<compile_context>
chip_gen: v7x
topology: tpu7x:2x2x1
jax: 0.10.0
libtpu: 0.0.40
codegen_flags: <defaults>
</compile_context>

<pallas_src>
import math
import functools
import numpy as np
import jax
import jax.numpy as jnp
from jax.experimental import pallas as pl
from jax.experimental.pallas import tpu as pltpu

LN_EPS = 1e-12      # ESM1bLayerNorm eps
PERF_EPS = 1e-4     # softmax_kernel eps
ATTN_VMEM = 64 * 1024 * 1024


def _row_tile(n, target=512):
    # <= target rows -> single full block (always legal); otherwise 512-row tiles (mult of 8).
    return n if n <= target else target


def _layernorm(x, w, b):
    mu = jnp.mean(x, axis=-1, keepdims=True)
    xc = x - mu
    var = jnp.mean(xc * xc, axis=-1, keepdims=True)
    return xc * jax.lax.rsqrt(var + LN_EPS) * w + b


def _gelu(x):
    # TODO(synk): tanh-approx GELU inside the kernel (exact erf GELU differs by ~1e-3).
    c = math.sqrt(2.0 / math.pi)
    return 0.5 * x * (1.0 + jnp.tanh(c * (x + 0.044715 * x * x * x)))


# --------------------------- embedding + LN_before ---------------------------

def _embed_kernel(x_ref, z_ref, w0_ref, b0_ref, w2_ref, b2_ref, wz_ref, bz_ref,
                  lnw_ref, lnb_ref, o_ref):
    x = x_ref[...]                                                    # (TN, 1)
    z = z_ref[...]
    h1 = jnp.maximum(x * w0_ref[...] + b0_ref[...], 0.0)             # (TN, E)
    left = jnp.dot(h1.astype(jnp.bfloat16), w2_ref[...],
                   preferred_element_type=jnp.float32) + b2_ref[...]  # (TN, E/2)
    right = z * wz_ref[...] + bz_ref[...]                             # (TN, E/2)
    h = jnp.concatenate([left, right], axis=-1)                       # (TN, E)
    o_ref[...] = _layernorm(h, lnw_ref[...], lnb_ref[...])


def embed_ln_pallas(x_col, z_col, p):
    N = x_col.shape[0]
    E = p["ln_before_w"].shape[-1]
    E2 = E // 2
    TN = _row_tile(N)
    row = lambda i: (i, 0)
    const = lambda i: (0, 0)
    return pl.pallas_call(
        _embed_kernel,
        grid=(pl.cdiv(N, TN),),
        in_specs=[pl.BlockSpec((TN, 1), row),
                  pl.BlockSpec((TN, 1), row),
                  pl.BlockSpec((1, E), const),
                  pl.BlockSpec((1, E), const),
                  pl.BlockSpec((E, E2), const),
                  pl.BlockSpec((1, E2), const),
                  pl.BlockSpec((1, E2), const),
                  pl.BlockSpec((1, E2), const),
                  pl.BlockSpec((1, E), const),
                  pl.BlockSpec((1, E), const)],
        out_specs=pl.BlockSpec((TN, E), row),
        out_shape=jax.ShapeDtypeStruct((N, E), jnp.float32),
        compiler_params=pltpu.CompilerParams(dimension_semantics=("parallel",)),
    )(x_col, z_col, p["embed0_w"], p["embed0_b"], p["embed2_wt"], p["embed2_b"],
      p["zeros_w"], p["zeros_b"], p["ln_before_w"], p["ln_before_b"])


# --------------------------- LN + fused QKV projection ------------------------

def _ln_qkv_kernel(x_ref, lnw_ref, lnb_ref, w_ref, b_ref, q_ref, k_ref, v_ref, *, H, hd):
    E = x_ref.shape[-1]
    h = _layernorm(x_ref[...], lnw_ref[...], lnb_ref[...])
    y = jnp.dot(h.astype(jnp.bfloat16), w_ref[...],
                preferred_element_type=jnp.float32) + b_ref[...]      # (TN, 3E)
    for hh in range(H):
        q_ref[hh] = y[:, hh * hd:(hh + 1) * hd]
        k_ref[hh] = y[:, E + hh * hd:E + (hh + 1) * hd]
    v_ref[...] = y[:, 2 * E:]


def ln_qkv_pallas(x2d, lnw, lnb, wqkv, bqkv, H, hd):
    N, E = x2d.shape
    TN = _row_tile(N)
    row = lambda i: (i, 0)
    const = lambda i: (0, 0)
    qk_spec = pl.BlockSpec((H, TN, hd), lambda i: (0, i, 0))
    return pl.pallas_call(
        functools.partial(_ln_qkv_kernel, H=H, hd=hd),
        grid=(pl.cdiv(N, TN),),
        in_specs=[pl.BlockSpec((TN, E), row),
                  pl.BlockSpec((1, E), const),
                  pl.BlockSpec((1, E), const),
                  pl.BlockSpec((E, 3 * E), const),
                  pl.BlockSpec((1, 3 * E), const)],
        out_specs=(qk_spec, qk_spec, pl.BlockSpec((TN, E), row)),
        out_shape=(jax.ShapeDtypeStruct((H, N, hd), jnp.float32),
                   jax.ShapeDtypeStruct((H, N, hd), jnp.float32),
                   jax.ShapeDtypeStruct((N, E), jnp.float32)),
        compiler_params=pltpu.CompilerParams(dimension_semantics=("parallel",)),
    )(x2d, lnw, lnb, wqkv, bqkv)


# --------------------------- performer context kernels ------------------------

def _perf_features(d, proj, dn, ratio, is_query):
    # softmax_kernel feature map for one (row/gene, head) slice.  d:(C,hd) f32, proj:(M,hd) bf16
    dd = jax.lax.dot_general((d * dn).astype(jnp.bfloat16), proj,
                             (((1,), (1,)), ((), ())),
                             preferred_element_type=jnp.float32)      # (C, M)
    diag = jnp.sum(d * d, axis=-1, keepdims=True) * (0.5 * dn * dn)
    if is_query:
        mx = jnp.max(dd, axis=-1, keepdims=True)
    else:
        mx = jnp.max(jnp.max(dd, axis=-1, keepdims=True), axis=-2, keepdims=True)
    return ratio * (jnp.exp(dd - diag - mx) + PERF_EPS)


def _gene_context_kernel(q_ref, k_ref, p_ref, a_ref, *, dn, ratio):
    r = pl.program_id(1)

    @pl.when(r == 0)
    def _():
        a_ref[...] = jnp.zeros_like(a_ref)

    qf = _perf_features(q_ref[0, 0], p_ref[...], dn, ratio, True)     # (C, M)
    kf = _perf_features(k_ref[0, 0], p_ref[...], dn, ratio, False)    # (C, M)
    a_ref[0] += jax.lax.dot_general(qf.astype(jnp.bfloat16), kf.astype(jnp.bfloat16),
                                    (((1,), (1,)), ((), ())),
                                    preferred_element_type=jnp.float32)   # (C, C)


def gene_context_pallas(q4, k4, proj, dn, ratio):
    H, R, C, hd = q4.shape
    M = proj.shape[0]
    return pl.pallas_call(
        functools.partial(_gene_context_kernel, dn=dn, ratio=ratio),
        grid=(H, R),
        in_specs=[pl.BlockSpec((1, 1, C, hd), lambda h, r: (h, r, 0, 0)),
                  pl.BlockSpec((1, 1, C, hd), lambda h, r: (h, r, 0, 0)),
                  pl.BlockSpec((M, hd), lambda h, r: (0, 0))],
        out_specs=pl.BlockSpec((1, C, C), lambda h, r: (h, 0, 0)),
        out_shape=jax.ShapeDtypeStruct((H, C, C), jnp.float32),
        compiler_params=pltpu.CompilerParams(
            dimension_semantics=("parallel", "arbitrary"),
            vmem_limit_bytes=ATTN_VMEM),
    )(q4, k4, proj)


def _cell_context_kernel(q_ref, k_ref, p_ref, a_ref, qs_ref, ks_ref, *, dn, ratio, inv_g2):
    g = pl.program_id(1)
    ng = pl.num_programs(1)

    @pl.when(g == 0)
    def _():
        qs_ref[...] = jnp.zeros_like(qs_ref)
        ks_ref[...] = jnp.zeros_like(ks_ref)

    qs_ref[...] += _perf_features(q_ref[0, 0], p_ref[...], dn, ratio, True)
    ks_ref[...] += _perf_features(k_ref[0, 0], p_ref[...], dn, ratio, False)

    @pl.when(g == ng - 1)
    def _():
        a_ref[0] = jax.lax.dot_general(
            qs_ref[...].astype(jnp.bfloat16), ks_ref[...].astype(jnp.bfloat16),
            (((1,), (1,)), ((), ())), preferred_element_type=jnp.float32) * inv_g2


def cell_context_pallas(q4, k4, proj, dn, ratio):
    H, G, Cc, hd = q4.shape
    M = proj.shape[0]
    return pl.pallas_call(
        functools.partial(_cell_context_kernel, dn=dn, ratio=ratio,
                          inv_g2=1.0 / float(G * G)),
        grid=(H, G),
        in_specs=[pl.BlockSpec((1, 1, Cc, hd), lambda h, g: (h, g, 0, 0)),
                  pl.BlockSpec((1, 1, Cc, hd), lambda h, g: (h, g, 0, 0)),
                  pl.BlockSpec((M, hd), lambda h, g: (0, 0))],
        out_specs=pl.BlockSpec((1, Cc, Cc), lambda h, g: (h, 0, 0)),
        out_shape=jax.ShapeDtypeStruct((H, Cc, Cc), jnp.float32),
        scratch_shapes=[pltpu.VMEM((Cc, M), jnp.float32),
                        pltpu.VMEM((Cc, M), jnp.float32)],
        compiler_params=pltpu.CompilerParams(
            dimension_semantics=("parallel", "arbitrary"),
            vmem_limit_bytes=ATTN_VMEM),
    )(q4, k4, proj)


# --------------------------- attention apply (shared) -------------------------

def _attn_apply_kernel(a_ref, v_ref, r_ref, o_ref, *, H, hd):
    # out[r, :, h*hd:(h+1)*hd] = (A[h] @ v[r,h]) / rowsum(A[h]); residual fused.
    vb = v_ref[0]                                                     # (C, E)
    outs = []
    for hh in range(H):
        ah = a_ref[hh]                                                # (C, C) f32
        d = jnp.sum(ah, axis=-1, keepdims=True)                       # (C, 1) > 0 by eps
        vh = vb[:, hh * hd:(hh + 1) * hd]
        oh = jnp.dot(ah.astype(jnp.bfloat16), vh.astype(jnp.bfloat16),
                     preferred_element_type=jnp.float32)              # (C, hd)
        outs.append(oh * pl.reciprocal(d, approx=True))
    o_ref[0] = r_ref[0] + jnp.concatenate(outs, axis=-1)


def attn_apply_pallas(A, v3, resid3, H, hd):
    # NOTE: A (H,C,C) is kept resident; for very large n_gene it would additionally be
    # tiled over heads / columns (accumulator pattern) to stay within v7x's 64 MiB VMEM.
    _, C, _ = A.shape
    R, _, E = v3.shape
    return pl.pallas_call(
        functools.partial(_attn_apply_kernel, H=H, hd=hd),
        grid=(R,),
        in_specs=[pl.BlockSpec((H, C, C), lambda r: (0, 0, 0)),
                  pl.BlockSpec((1, C, E), lambda r: (r, 0, 0)),
                  pl.BlockSpec((1, C, E), lambda r: (r, 0, 0))],
        out_specs=pl.BlockSpec((1, C, E), lambda r: (r, 0, 0)),
        out_shape=jax.ShapeDtypeStruct((R, C, E), jnp.float32),
        compiler_params=pltpu.CompilerParams(
            dimension_semantics=("parallel",),
            vmem_limit_bytes=ATTN_VMEM),
    )(A, v3, resid3)


# --------------------------- FFN kernels --------------------------------------

def _ln_linear_gelu_kernel(x_ref, lnw_ref, lnb_ref, w_ref, b_ref, o_ref):
    h = _layernorm(x_ref[...], lnw_ref[...], lnb_ref[...])
    y = jnp.dot(h.astype(jnp.bfloat16), w_ref[...],
                preferred_element_type=jnp.float32) + b_ref[...]
    o_ref[...] = _gelu(y)


def ln_linear_gelu_pallas(x2d, lnw, lnb, wt, b):
    N, Din = x2d.shape
    Dout = wt.shape[1]
    TN = _row_tile(N)
    row = lambda i: (i, 0)
    const = lambda i: (0, 0)
    return pl.pallas_call(
        _ln_linear_gelu_kernel,
        grid=(pl.cdiv(N, TN),),
        in_specs=[pl.BlockSpec((TN, Din), row),
                  pl.BlockSpec((1, Din), const),
                  pl.BlockSpec((1, Din), const),
                  pl.BlockSpec((Din, Dout), const),
                  pl.BlockSpec((1, Dout), const)],
        out_specs=pl.BlockSpec((TN, Dout), row),
        out_shape=jax.ShapeDtypeStruct((N, Dout), jnp.float32),
        compiler_params=pltpu.CompilerParams(dimension_semantics=("parallel",)),
    )(x2d, lnw, lnb, wt, b)


def _linear_residual_kernel(x_ref, w_ref, b_ref, r_ref, o_ref):
    y = jnp.dot(x_ref[...].astype(jnp.bfloat16), w_ref[...],
                preferred_element_type=jnp.float32) + b_ref[...]
    o_ref[...] = r_ref[...] + y


def linear_residual_pallas(x2d, wt, b, resid2d):
    N, Din = x2d.shape
    Dout = wt.shape[1]
    TN = _row_tile(N)
    row = lambda i: (i, 0)
    const = lambda i: (0, 0)
    return pl.pallas_call(
        _linear_residual_kernel,
        grid=(pl.cdiv(N, TN),),
        in_specs=[pl.BlockSpec((TN, Din), row),
                  pl.BlockSpec((Din, Dout), const),
                  pl.BlockSpec((1, Dout), const),
                  pl.BlockSpec((TN, Dout), row)],
        out_specs=pl.BlockSpec((TN, Dout), row),
        out_shape=jax.ShapeDtypeStruct((N, Dout), jnp.float32),
        compiler_params=pltpu.CompilerParams(dimension_semantics=("parallel",)),
    )(x2d, wt, b, resid2d)


# --------------------------- LN_after + lm_head --------------------------------

def _head_kernel(x_ref, lnw_ref, lnb_ref, wd_ref, bd_ref, wo_ref, bo_ref, o_ref):
    h = _layernorm(x_ref[...], lnw_ref[...], lnb_ref[...])
    y = jnp.dot(h.astype(jnp.bfloat16), wd_ref[...],
                preferred_element_type=jnp.float32) + bd_ref[...]
    y = _gelu(y)
    # final 1-wide projection as an MXU matvec (no per-row XLU reduce)
    o_ref[...] = jnp.dot(y.astype(jnp.bfloat16), wo_ref[...],
                         preferred_element_type=jnp.float32) + bo_ref[...]


def head_pallas(x2d, p):
    N, E = x2d.shape
    TN = _row_tile(N)
    row = lambda i: (i, 0)
    const = lambda i: (0, 0)
    return pl.pallas_call(
        _head_kernel,
        grid=(pl.cdiv(N, TN),),
        in_specs=[pl.BlockSpec((TN, E), row),
                  pl.BlockSpec((1, E), const),
                  pl.BlockSpec((1, E), const),
                  pl.BlockSpec((E, E), const),
                  pl.BlockSpec((1, E), const),
                  pl.BlockSpec((E, 1), const),
                  pl.BlockSpec((1, 1), const)],
        out_specs=pl.BlockSpec((TN, 1), row),
        out_shape=jax.ShapeDtypeStruct((N, 1), jnp.float32),
        compiler_params=pltpu.CompilerParams(dimension_semantics=("parallel",)),
    )(x2d, p["ln_after_w"], p["ln_after_b"], p["head_dense_wt"], p["head_dense_b"],
      p["head_out_wt"], p["head_out_b"])


# --------------------------- model glue (plain JAX) ----------------------------

def gene_attention_block(x, lp, H, hd):
    R, C, E = x.shape
    q, k, v = ln_qkv_pallas(x.reshape(R * C, E), lp["ln1_w"], lp["ln1_b"],
                            lp["row"]["wqkv"], lp["row"]["bqkv"], H, hd)
    dn = float(hd) ** -0.25
    ratio = float(lp["row"]["proj"].shape[0]) ** -0.5
    A = gene_context_pallas(q.reshape(H, R, C, hd), k.reshape(H, R, C, hd),
                            lp["row"]["proj"], dn, ratio)
    return attn_apply_pallas(A, v.reshape(R, C, E), x, H, hd)


def cell_attention_block(xt, lp, H, hd):
    G, Cc, E = xt.shape
    q, k, v = ln_qkv_pallas(xt.reshape(G * Cc, E), lp["ln2_w"], lp["ln2_b"],
                            lp["col"]["wqkv"], lp["col"]["bqkv"], H, hd)
    dn = float(hd) ** -0.25
    ratio = float(lp["col"]["proj"].shape[0]) ** -0.5
    A = cell_context_pallas(q.reshape(H, G, Cc, hd), k.reshape(H, G, Cc, hd),
                            lp["col"]["proj"], dn, ratio)
    return attn_apply_pallas(A, v.reshape(G, Cc, E), xt, H, hd)


def ffn_block(x, lp):
    R, C, E = x.shape
    x2 = x.reshape(R * C, E)
    mid = ln_linear_gelu_pallas(x2, lp["ln3_w"], lp["ln3_b"],
                                lp["ffn"]["w1t"], lp["ffn"]["b1"])
    out = linear_residual_pallas(mid, lp["ffn"]["w2t"], lp["ffn"]["b2"], x2)
    return out.reshape(R, C, E)


def model_forward(params, x, zero, network=None, return_attn=False, *, embed_dim, num_heads):
    del network  # unused in the reference forward
    x = x[0]
    zero = zero[0]
    n_cell, n_gene = x.shape
    E, H = embed_dim, num_heads
    hd = E // H
    N = n_cell * n_gene

    h = embed_ln_pallas(x.reshape(N, 1).astype(jnp.float32),
                        zero.reshape(N, 1).astype(jnp.float32), params)
    h = h.reshape(n_cell, n_gene, E)

    for lp in params["layers"]:
        h = gene_attention_block(h, lp, H, hd)
        ht = h.transpose(1, 0, 2)
        ht = cell_attention_block(ht, lp, H, hd)
        h = ht.transpose(1, 0, 2)
        h = ffn_block(h, lp)

    # TODO(synk): exact MLP lm_head definition is not provided; using LN->Linear(E,E)->GELU->Linear(E,1).
    y = head_pallas(h.reshape(N, E), params)
    logits = y.reshape(n_cell, n_gene, 1)[:, :n_gene]
    return {"logits": logits[None]}


# --------------------------- parameter construction ----------------------------

def init_linear(key, dout, din):
    k1, k2 = jax.random.split(key)
    bound = 1.0 / math.sqrt(din)
    w = jax.random.uniform(k1, (dout, din), jnp.float32, -bound, bound)
    b = jax.random.uniform(k2, (dout,), jnp.float32, -bound, bound)
    return w, b


def gaussian_orthogonal_random_matrix(key, nb_rows, nb_cols):
    # scaling=0, QR done host-side with numpy (setup glue, not the hot path)
    nb_full = nb_rows // nb_cols
    keys = jax.random.split(key, nb_full + 2)
    blocks = []
    for i in range(nb_full):
        a = np.asarray(jax.random.normal(keys[i], (nb_cols, nb_cols), jnp.float32))
        q, _ = np.linalg.qr(a)
        blocks.append(q.T)
    rem = nb_rows - nb_full * nb_cols
    if rem > 0:
        a = np.asarray(jax.random.normal(keys[nb_full], (nb_cols, nb_cols), jnp.float32))
        q, _ = np.linalg.qr(a)
        blocks.append(q.T[:rem])
    final = np.concatenate(blocks, axis=0)
    mult = np.linalg.norm(
        np.asarray(jax.random.normal(keys[-1], (nb_rows, nb_cols), jnp.float32)), axis=1)
    return jnp.asarray(mult[:, None] * final, jnp.float32)


def init_performer(key, E, H):
    hd = E // H
    ks = jax.random.split(key, 4)
    wq, bq = init_linear(ks[0], E, E)
    wk, bk = init_linear(ks[1], E, E)
    wv, bv = init_linear(ks[2], E, E)
    proj = gaussian_orthogonal_random_matrix(ks[3], E, hd)   # nb_features = embed_dim
    return {
        "wqkv": jnp.concatenate([wq.T, wk.T, wv.T], axis=-1).astype(jnp.bfloat16),  # (E, 3E)
        "bqkv": jnp.concatenate([bq, bk, bv]).reshape(1, 3 * E),
        "proj": proj.astype(jnp.bfloat16),                                          # (M, hd)
    }


def init_params(key, E, F, H, n_layers):
    params = {}
    ks = jax.random.split(key, 5 + n_layers)
    w0, b0 = init_linear(ks[0], E, 1)               # nn.Linear(1, E)
    params["embed0_w"] = w0.reshape(1, E)
    params["embed0_b"] = b0.reshape(1, E)
    w2, b2 = init_linear(ks[1], E // 2, E)          # nn.Linear(E, E//2)
    params["embed2_wt"] = jnp.asarray(w2.T, jnp.bfloat16)
    params["embed2_b"] = b2.reshape(1, E // 2)
    wz, bz = init_linear(ks[2], E // 2, 1)          # zeros_embed
    params["zeros_w"] = wz.reshape(1, E // 2)
    params["zeros_b"] = bz.reshape(1, E // 2)
    params["ln_before_w"] = jnp.ones((1, E), jnp.float32)
    params["ln_before_b"] = jnp.zeros((1, E), jnp.float32)
    params["ln_after_w"] = jnp.ones((1, E), jnp.float32)
    params["ln_after_b"] = jnp.zeros((1, E), jnp.float32)
    wd, bd = init_linear(ks[3], E, E)
    params["head_dense_wt"] = jnp.asarray(wd.T, jnp.bfloat16)
    params["head_dense_b"] = bd.reshape(1, E)
    wo, bo = init_linear(ks[4], 1, E)
    params["head_out_wt"] = jnp.asarray(wo.T, jnp.bfloat16)        # (E, 1)
    params["head_out_b"] = bo.reshape(1, 1)

    layers = []
    for li in range(n_layers):
        lk = jax.random.split(ks[5 + li] if (5 + li) < len(ks) else jax.random.fold_in(key, li), 4)
        w1, b1 = init_linear(lk[2], F, E)
        w2f, b2f = init_linear(lk[3], E, F)
        layers.append({
            "row": init_performer(lk[0], E, H),
            "col": init_performer(lk[1], E, H),
            "ln1_w": jnp.ones((1, E), jnp.float32), "ln1_b": jnp.zeros((1, E), jnp.float32),
            "ln2_w": jnp.ones((1, E), jnp.float32), "ln2_b": jnp.zeros((1, E), jnp.float32),
            "ln3_w": jnp.ones((1, E), jnp.float32), "ln3_b": jnp.zeros((1, E), jnp.float32),
            "ffn": {"w1t": jnp.asarray(w1.T, jnp.bfloat16), "b1": b1.reshape(1, F),
                    "w2t": jnp.asarray(w2f.T, jnp.bfloat16), "b2": b2f.reshape(1, E)},
        })
    params["layers"] = layers
    return params


# --------------------------------- main -----------------------------------------

if __name__ == "__main__":
    embed_dim, ffn_embed_dim, heads, n_layers = 32, 32, 4, 2
    n_cell, n_gene = 8, 16

    key = jax.random.PRNGKey(0)
    kp, kx, kz = jax.random.split(key, 3)
    params = init_params(kp, embed_dim, ffn_embed_dim, heads, n_layers)

    x = jax.random.normal(kx, (1, n_cell, n_gene), jnp.float32)
    zero = (jax.random.uniform(kz, (1, n_cell, n_gene)) > 0.5).astype(jnp.float32)

    fwd = jax.jit(functools.partial(model_forward, embed_dim=embed_dim, num_heads=heads))
    result = fwd(params, x, zero)
    logits = jax.block_until_ready(result["logits"])

    assert logits.shape == (1, n_cell, n_gene, 1), logits.shape
    assert bool(jnp.all(jnp.isfinite(logits)))
    print("KERNEL_OK")
</pallas_src>

<mosaic_0001>
module attributes {stable_mosaic.version = 11 : i64} {
  func.func @_ln_qkv_kernel(%arg0: i32, %arg1: memref<128x32xf32, #tpu.memory_space<vmem>>, %arg2: memref<1x32xf32, #tpu.memory_space<vmem>>, %arg3: memref<1x32xf32, #tpu.memory_space<vmem>>, %arg4: memref<32x96xbf16, #tpu.memory_space<vmem>>, %arg5: memref<1x96xf32, #tpu.memory_space<vmem>>, %arg6: memref<4x128x8xf32, #tpu.memory_space<vmem>>, %arg7: memref<4x128x8xf32, #tpu.memory_space<vmem>>, %arg8: memref<128x32xf32, #tpu.memory_space<vmem>>) attributes {dimension_semantics = [#tpu.dimension_semantics<parallel>], iteration_bounds = array<i64: 1>, scalar_prefetch = 0 : i64, scratch_operands = 0 : i64, tpu.core_type = #tpu.core_type<tc>, window_params = [{transform_indices = @transform_0, window_bounds = array<i64: 128, 32>}, {pipeline_mode = #tpu.pipeline_mode<synchronous>, transform_indices = @transform_1, window_bounds = array<i64: 1, 32>}, {pipeline_mode = #tpu.pipeline_mode<synchronous>, transform_indices = @transform_2, window_bounds = array<i64: 1, 32>}, {pipeline_mode = #tpu.pipeline_mode<synchronous>, transform_indices = @transform_3, window_bounds = array<i64: 32, 96>}, {pipeline_mode = #tpu.pipeline_mode<synchronous>, transform_indices = @transform_4, window_bounds = array<i64: 1, 96>}, {transform_indices = @transform_5, window_bounds = array<i64: 4, 128, 8>}, {transform_indices = @transform_6, window_bounds = array<i64: 4, 128, 8>}, {transform_indices = @transform_7, window_bounds = array<i64: 128, 32>}]} {
    %c0 = arith.constant 0 : index
    %c0_0 = arith.constant 0 : index
    %0 = vector.load %arg1[%c0, %c0_0] : memref<128x32xf32, #tpu.memory_space<vmem>>, vector<128x32xf32>
    %c0_1 = arith.constant 0 : index
    %c0_2 = arith.constant 0 : index
    %1 = vector.load %arg2[%c0_1, %c0_2] : memref<1x32xf32, #tpu.memory_space<vmem>>, vector<1x32xf32>
    %c0_3 = arith.constant 0 : index
    %c0_4 = arith.constant 0 : index
    %2 = vector.load %arg3[%c0_3, %c0_4] : memref<1x32xf32, #tpu.memory_space<vmem>>, vector<1x32xf32>
    %cst = arith.constant dense<0.000000e+00> : vector<128xf32>
    %3 = vector.multi_reduction <add>, %0, %cst [1] : vector<128x32xf32> to vector<128xf32>
    %4 = vector.shape_cast %3 : vector<128xf32> to vector<128x1xf32>
    %cst_5 = arith.constant 3.200000e+01 : f32
    %5 = vector.broadcast %cst_5 : f32 to vector<128x1xf32>
    %6 = arith.divf %4, %5 : vector<128x1xf32>
    %7 = vector.broadcast %6 : vector<128x1xf32> to vector<128x32xf32>
    %8 = arith.subf %0, %7 : vector<128x32xf32>
    %9 = arith.mulf %8, %8 : vector<128x32xf32>
    %cst_6 = arith.constant dense<0.000000e+00> : vector<128xf32>
    %10 = vector.multi_reduction <add>, %9, %cst_6 [1] : vector<128x32xf32> to vector<128xf32>
    %11 = vector.shape_cast %10 : vector<128xf32> to vector<128x1xf32>
    %cst_7 = arith.constant 3.200000e+01 : f32
    %12 = vector.broadcast %cst_7 : f32 to vector<128x1xf32>
    %13 = arith.divf %11, %12 : vector<128x1xf32>
    %cst_8 = arith.constant 9.99999996E-13 : f32
    %14 = vector.broadcast %cst_8 : f32 to vector<128x1xf32>
    %15 = arith.addf %13, %14 : vector<128x1xf32>
    %16 = math.rsqrt %15 : vector<128x1xf32>
    %17 = vector.broadcast %16 : vector<128x1xf32> to vector<128x32xf32>
    %18 = arith.mulf %8, %17 : vector<128x32xf32>
    %19 = vector.broadcast %1 : vector<1x32xf32> to vector<128x32xf32>
    %20 = arith.mulf %18, %19 : vector<128x32xf32>
    %21 = vector.broadcast %2 : vector<1x32xf32> to vector<128x32xf32>
    %22 = arith.addf %20, %21 : vector<128x32xf32>
    %23 = arith.truncf %22 : vector<128x32xf32> to vector<128x32xbf16>
    %c0_9 = arith.constant 0 : index
    %c0_10 = arith.constant 0 : index
    %24 = vector.load %arg4[%c0_9, %c0_10] : memref<32x96xbf16, #tpu.memory_space<vmem>>, vector<32x96xbf16>
    %cst_11 = arith.constant dense<0.000000e+00> : vector<128x96xf32>
    %25 = tpu.matmul %23, %24, %cst_11 {dimension_numbers = #tpu.dot_dimension_numbers<[1], [0], [0], [1], [0, 0, 1, 1], [], []>} : vector<128x32xbf16>, vector<32x96xbf16>, vector<128x96xf32> -> vector<128x96xf32>
    %c0_12 = arith.constant 0 : index
    %c0_13 = arith.constant 0 : index
    %26 = vector.load %arg5[%c0_12, %c0_13] : memref<1x96xf32, #tpu.memory_space<vmem>>, vector<1x96xf32>
    %27 = vector.broadcast %26 : vector<1x96xf32> to vector<128x96xf32>
    %28 = arith.addf %25, %27 : vector<128x96xf32>
    %29 = vector.extract_strided_slice %28 {offsets = [0, 0], sizes = [128, 8], strides = [1, 1]} : vector<128x96xf32> to vector<128x8xf32>
    %c0_14 = arith.constant 0 : index
    %c0_15 = arith.constant 0 : index
    %c0_16 = arith.constant 0 : index
    %30 = vector.load %arg6[%c0_14, %c0_15, %c0_16] : memref<4x128x8xf32, #tpu.memory_space<vmem>>, vector<1x128x8xf32>
    %31 = vector.shape_cast %30 : vector<1x128x8xf32> to vector<128x8xf32>
    %32 = vector.shape_cast %29 : vector<128x8xf32> to vector<1x128x8xf32>
    tpu.vector_store %arg6[%c0_14, %c0_15, %c0_16], %32 {strides = array<i32>} : memref<4x128x8xf32, #tpu.memory_space<vmem>>, vector<1x128x8xf32>,
    %33 = vector.extract_strided_slice %28 {offsets = [0, 32], sizes = [128, 8], strides = [1, 1]} : vector<128x96xf32> to vector<128x8xf32>
    %c0_17 = arith.constant 0 : index
    %c0_18 = arith.constant 0 : index
    %c0_19 = arith.constant 0 : index
    %34 = vector.load %arg7[%c0_17, %c0_18, %c0_19] : memref<4x128x8xf32, #tpu.memory_space<vmem>>, vector<1x128x8xf32>
    %35 = vector.shape_cast %34 : vector<1x128x8xf32> to vector<128x8xf32>
    %36 = vector.shape_cast %33 : vector<128x8xf32> to vector<1x128x8xf32>
    tpu.vector_store %arg7[%c0_17, %c0_18, %c0_19], %36 {strides = array<i32>} : memref<4x128x8xf32, #tpu.memory_space<vmem>>, vector<1x128x8xf32>,
    %37 = vector.extract_strided_slice %28 {offsets = [0, 8], sizes = [128, 8], strides = [1, 1]} : vector<128x96xf32> to vector<128x8xf32>
    %c1 = arith.constant 1 : index
    %c0_20 = arith.constant 0 : index
    %c0_21 = arith.constant 0 : index
    %38 = vector.load %arg6[%c1, %c0_20, %c0_21] : memref<4x128x8xf32, #tpu.memory_space<vmem>>, vector<1x128x8xf32>
    %39 = vector.shape_cast %38 : vector<1x128x8xf32> to vector<128x8xf32>
    %40 = vector.shape_cast %37 : vector<128x8xf32> to vector<1x128x8xf32>
    tpu.vector_store %arg6[%c1, %c0_20, %c0_21], %40 {strides = array<i32>} : memref<4x128x8xf32, #tpu.memory_space<vmem>>, vector<1x128x8xf32>,
    %41 = vector.extract_strided_slice %28 {offsets = [0, 40], sizes = [128, 8], strides = [1, 1]} : vector<128x96xf32> to vector<128x8xf32>
    %c1_22 = arith.constant 1 : index
    %c0_23 = arith.constant 0 : index
    %c0_24 = arith.constant 0 : index
    %42 = vector.load %arg7[%c1_22, %c0_23, %c0_24] : memref<4x128x8xf32, #tpu.memory_space<vmem>>, vector<1x128x8xf32>
    %43 = vector.shape_cast %42 : vector<1x128x8xf32> to vector<128x8xf32>
    %44 = vector.shape_cast %41 : vector<128x8xf32> to vector<1x128x8xf32>
    tpu.vector_store %arg7[%c1_22, %c0_23, %c0_24], %44 {strides = array<i32>} : memref<4x128x8xf32, #tpu.memory_space<vmem>>, vector<1x128x8xf32>,
    %45 = vector.extract_strided_slice %28 {offsets = [0, 16], sizes = [128, 8], strides = [1, 1]} : vector<128x96xf32> to vector<128x8xf32>
    %c2 = arith.constant 2 : index
    %c0_25 = arith.constant 0 : index
    %c0_26 = arith.constant 0 : index
    %46 = vector.load %arg6[%c2, %c0_25, %c0_26] : memref<4x128x8xf32, #tpu.memory_space<vmem>>, vector<1x128x8xf32>
    %47 = vector.shape_cast %46 : vector<1x128x8xf32> to vector<128x8xf32>
    %48 = vector.shape_cast %45 : vector<128x8xf32> to vector<1x128x8xf32>
    tpu.vector_store %arg6[%c2, %c0_25, %c0_26], %48 {strides = array<i32>} : memref<4x128x8xf32, #tpu.memory_space<vmem>>, vector<1x128x8xf32>,
    %49 = vector.extract_strided_slice %28 {offsets = [0, 48], sizes = [128, 8], strides = [1, 1]} : vector<128x96xf32> to vector<128x8xf32>
    %c2_27 = arith.constant 2 : index
    %c0_28 = arith.constant 0 : index
    %c0_29 = arith.constant 0 : index
    %50 = vector.load %arg7[%c2_27, %c0_28, %c0_29] : memref<4x128x8xf32, #tpu.memory_space<vmem>>, vector<1x128x8xf32>
    %51 = vector.shape_cast %50 : vector<1x128x8xf32> to vector<128x8xf32>
    %52 = vector.shape_cast %49 : vector<128x8xf32> to vector<1x128x8xf32>
    tpu.vector_store %arg7[%c2_27, %c0_28, %c0_29], %52 {strides = array<i32>} : memref<4x128x8xf32, #tpu.memory_space<vmem>>, vector<1x128x8xf32>,
    %53 = vector.extract_strided_slice %28 {offsets = [0, 24], sizes = [128, 8], strides = [1, 1]} : vector<128x96xf32> to vector<128x8xf32>
    %c3 = arith.constant 3 : index
    %c0_30 = arith.constant 0 : index
    %c0_31 = arith.constant 0 : index
    %54 = vector.load %arg6[%c3, %c0_30, %c0_31] : memref<4x128x8xf32, #tpu.memory_space<vmem>>, vector<1x128x8xf32>
    %55 = vector.shape_cast %54 : vector<1x128x8xf32> to vector<128x8xf32>
    %56 = vector.shape_cast %53 : vector<128x8xf32> to vector<1x128x8xf32>
    tpu.vector_store %arg6[%c3, %c0_30, %c0_31], %56 {strides = array<i32>} : memref<4x128x8xf32, #tpu.memory_space<vmem>>, vector<1x128x8xf32>,
    %57 = vector.extract_strided_slice %28 {offsets = [0, 56], sizes = [128, 8], strides = [1, 1]} : vector<128x96xf32> to vector<128x8xf32>
    %c3_32 = arith.constant 3 : index
    %c0_33 = arith.constant 0 : index
    %c0_34 = arith.constant 0 : index
    %58 = vector.load %arg7[%c3_32, %c0_33, %c0_34] : memref<4x128x8xf32, #tpu.memory_space<vmem>>, vector<1x128x8xf32>
    %59 = vector.shape_cast %58 : vector<1x128x8xf32> to vector<128x8xf32>
    %60 = vector.shape_cast %57 : vector<128x8xf32> to vector<1x128x8xf32>
    tpu.vector_store %arg7[%c3_32, %c0_33, %c0_34], %60 {strides = array<i32>} : memref<4x128x8xf32, #tpu.memory_space<vmem>>, vector<1x128x8xf32>,
    %61 = vector.extract_strided_slice %28 {offsets = [0, 64], sizes = [128, 32], strides = [1, 1]} : vector<128x96xf32> to vector<128x32xf32>
    %c0_35 = arith.constant 0 : index
    %c0_36 = arith.constant 0 : index
    %62 = vector.load %arg8[%c0_35, %c0_36] : memref<128x32xf32, #tpu.memory_space<vmem>>, vector<128x32xf32>
    tpu.vector_store %arg8[%c0_35, %c0_36], %61 {strides = array<i32>} : memref<128x32xf32, #tpu.memory_space<vmem>>, vector<128x32xf32>,
    return
  }
  func.func @transform_0(%arg0: i32) -> (i32, i32) {
    %c0_i32 = arith.constant 0 : i32
    %c0_i32_0 = arith.constant 0 : i32
    return %arg0, %c0_i32 : i32, i32
  }
  func.func @transform_1(%arg0: i32) -> (i32, i32) {
    %c0_i32 = arith.constant 0 : i32
    %c0_i32_0 = arith.constant 0 : i32
    %c0_i32_1 = arith.constant 0 : i32
    return %c0_i32, %c0_i32_0 : i32, i32
  }
  func.func @transform_2(%arg0: i32) -> (i32, i32) {
    %c0_i32 = arith.constant 0 : i32
    %c0_i32_0 = arith.constant 0 : i32
    %c0_i32_1 = arith.constant 0 : i32
    return %c0_i32, %c0_i32_0 : i32, i32
  }
  func.func @transform_3(%arg0: i32) -> (i32, i32) {
    %c0_i32 = arith.constant 0 : i32
    %c0_i32_0 = arith.constant 0 : i32
    %c0_i32_1 = arith.constant 0 : i32
    return %c0_i32, %c0_i32_0 : i32, i32
  }
  func.func @transform_4(%arg0: i32) -> (i32, i32) {
    %c0_i32 = arith.constant 0 : i32
    %c0_i32_0 = arith.constant 0 : i32
    %c0_i32_1 = arith.constant 0 : i32
    return %c0_i32, %c0_i32_0 : i32, i32
  }
  func.func @transform_5(%arg0: i32) -> (i32, i32, i32) {
    %c0_i32 = arith.constant 0 : i32
    %c0_i32_0 = arith.constant 0 : i32
    %c0_i32_1 = arith.constant 0 : i32
    return %c0_i32, %arg0, %c0_i32_0 : i32, i32, i32
  }
  func.func @transform_6(%arg0: i32) -> (i32, i32, i32) {
    %c0_i32 = arith.constant 0 : i32
    %c0_i32_0 = arith.constant 0 : i32
    %c0_i32_1 = arith.constant 0 : i32
    return %c0_i32, %arg0, %c0_i32_0 : i32, i32, i32
  }
  func.func @transform_7(%arg0: i32) -> (i32, i32) {
    %c0_i32 = arith.constant 0 : i32
    %c0_i32_0 = arith.constant 0 : i32
    return %arg0, %c0_i32 : i32, i32
  }
}

module attributes {stable_mosaic.version = 11 : i64} {
  func.func @_embed_kernel(%arg0: i32, %arg1: memref<128x1xf32, #tpu.memory_space<vmem>>, %arg2: memref<128x1xf32, #tpu.memory_space<vmem>>, %arg3: memref<1x32xf32, #tpu.memory_space<vmem>>, %arg4: memref<1x32xf32, #tpu.memory_space<vmem>>, %arg5: memref<32x16xbf16, #tpu.memory_space<vmem>>, %arg6: memref<1x16xf32, #tpu.memory_space<vmem>>, %arg7: memref<1x16xf32, #tpu.memory_space<vmem>>, %arg8: memref<1x16xf32, #tpu.memory_space<vmem>>, %arg9: memref<1x32xf32, #tpu.memory_space<vmem>>, %arg10: memref<1x32xf32, #tpu.memory_space<vmem>>, %arg11: memref<128x32xf32, #tpu.memory_space<vmem>>) attributes {dimension_semantics = [#tpu.dimension_semantics<parallel>], iteration_bounds = array<i64: 1>, scalar_prefetch = 0 : i64, scratch_operands = 0 : i64, tpu.core_type = #tpu.core_type<tc>, window_params = [{transform_indices = @transform_0, window_bounds = array<i64: 128, 1>}, {transform_indices = @transform_1, window_bounds = array<i64: 128, 1>}, {pipeline_mode = #tpu.pipeline_mode<synchronous>, transform_indices = @transform_2, window_bounds = array<i64: 1, 32>}, {pipeline_mode = #tpu.pipeline_mode<synchronous>, transform_indices = @transform_3, window_bounds = array<i64: 1, 32>}, {pipeline_mode = #tpu.pipeline_mode<synchronous>, transform_indices = @transform_4, window_bounds = array<i64: 32, 16>}, {pipeline_mode = #tpu.pipeline_mode<synchronous>, transform_indices = @transform_5, window_bounds = array<i64: 1, 16>}, {pipeline_mode = #tpu.pipeline_mode<synchronous>, transform_indices = @transform_6, window_bounds = array<i64: 1, 16>}, {pipeline_mode = #tpu.pipeline_mode<synchronous>, transform_indices = @transform_7, window_bounds = array<i64: 1, 16>}, {pipeline_mode = #tpu.pipeline_mode<synchronous>, transform_indices = @transform_8, window_bounds = array<i64: 1, 32>}, {pipeline_mode = #tpu.pipeline_mode<synchronous>, transform_indices = @transform_9, window_bounds = array<i64: 1, 32>}, {transform_indices = @transform_10, window_bounds = array<i64: 128, 32>}]} {
    %c0 = arith.constant 0 : index
    %c0_0 = arith.constant 0 : index
    %0 = vector.load %arg1[%c0, %c0_0] : memref<128x1xf32, #tpu.memory_space<vmem>>, vector<128x1xf32>
    %c0_1 = arith.constant 0 : index
    %c0_2 = arith.constant 0 : index
    %1 = vector.load %arg2[%c0_1, %c0_2] : memref<128x1xf32, #tpu.memory_space<vmem>>, vector<128x1xf32>
    %c0_3 = arith.constant 0 : index
    %c0_4 = arith.constant 0 : index
    %2 = vector.load %arg3[%c0_3, %c0_4] : memref<1x32xf32, #tpu.memory_space<vmem>>, vector<1x32xf32>
    %3 = vector.broadcast %0 : vector<128x1xf32> to vector<128x32xf32>
    %4 = vector.broadcast %2 : vector<1x32xf32> to vector<128x32xf32>
    %5 = arith.mulf %3, %4 : vector<128x32xf32>
    %c0_5 = arith.constant 0 : index
    %c0_6 = arith.constant 0 : index
    %6 = vector.load %arg4[%c0_5, %c0_6] : memref<1x32xf32, #tpu.memory_space<vmem>>, vector<1x32xf32>
    %7 = vector.broadcast %6 : vector<1x32xf32> to vector<128x32xf32>
    %8 = arith.addf %5, %7 : vector<128x32xf32>
    %cst = arith.constant 0.000000e+00 : f32
    %9 = vector.broadcast %cst : f32 to vector<128x32xf32>
    %10 = arith.maximumf %8, %9 : vector<128x32xf32>
    %11 = arith.truncf %10 : vector<128x32xf32> to vector<128x32xbf16>
    %c0_7 = arith.constant 0 : index
    %c0_8 = arith.constant 0 : index
    %12 = vector.load %arg5[%c0_7, %c0_8] : memref<32x16xbf16, #tpu.memory_space<vmem>>, vector<32x16xbf16>
    %cst_9 = arith.constant dense<0.000000e+00> : vector<128x16xf32>
    %13 = tpu.matmul %11, %12, %cst_9 {dimension_numbers = #tpu.dot_dimension_numbers<[1], [0], [0], [1], [0, 0, 1, 1], [], []>} : vector<128x32xbf16>, vector<32x16xbf16>, vector<128x16xf32> -> vector<128x16xf32>
    %c0_10 = arith.constant 0 : index
    %c0_11 = arith.constant 0 : index
    %14 = vector.load %arg6[%c0_10, %c0_11] : memref<1x16xf32, #tpu.memory_space<vmem>>, vector<1x16xf32>
    %15 = vector.broadcast %14 : vector<1x16xf32> to vector<128x16xf32>
    %16 = arith.addf %13, %15 : vector<128x16xf32>
    %c0_12 = arith.constant 0 : index
    %c0_13 = arith.constant 0 : index
    %17 = vector.load %arg7[%c0_12, %c0_13] : memref<1x16xf32, #tpu.memory_space<vmem>>, vector<1x16xf32>
    %18 = vector.broadcast %1 : vector<128x1xf32> to vector<128x16xf32>
    %19 = vector.broadcast %17 : vector<1x16xf32> to vector<128x16xf32>
    %20 = arith.mulf %18, %19 : vector<128x16xf32>
    %c0_14 = arith.constant 0 : index
    %c0_15 = arith.constant 0 : index
    %21 = vector.load %arg8[%c0_14, %c0_15] : memref<1x16xf32, #tpu.memory_space<vmem>>, vector<1x16xf32>
    %22 = vector.broadcast %21 : vector<1x16xf32> to vector<128x16xf32>
    %23 = arith.addf %20, %22 : vector<128x16xf32>
    %24 = tpu.concatenate %16, %23 in 1 : vector<128x16xf32>, vector<128x16xf32> -> vector<128x32xf32>
    %c0_16 = arith.constant 0 : index
    %c0_17 = arith.constant 0 : index
    %25 = vector.load %arg9[%c0_16, %c0_17] : memref<1x32xf32, #tpu.memory_space<vmem>>, vector<1x32xf32>
    %c0_18 = arith.constant 0 : index
    %c0_19 = arith.constant 0 : index
    %26 = vector.load %arg10[%c0_18, %c0_19] : memref<1x32xf32, #tpu.memory_space<vmem>>, vector<1x32xf32>
    %cst_20 = arith.constant dense<0.000000e+00> : vector<128xf32>
    %27 = vector.multi_reduction <add>, %24, %cst_20 [1] : vector<128x32xf32> to vector<128xf32>
    %28 = vector.shape_cast %27 : vector<128xf32> to vector<128x1xf32>
    %cst_21 = arith.constant 3.200000e+01 : f32
    %29 = vector.broadcast %cst_21 : f32 to vector<128x1xf32>
    %30 = arith.divf %28, %29 : vector<128x1xf32>
    %31 = vector.broadcast %30 : vector<128x1xf32> to vector<128x32xf32>
    %32 = arith.subf %24, %31 : vector<128x32xf32>
    %33 = arith.mulf %32, %32 : vector<128x32xf32>
    %cst_22 = arith.constant dense<0.000000e+00> : vector<128xf32>
    %34 = vector.multi_reduction <add>, %33, %cst_22 [1] : vector<128x32xf32> to vector<128xf32>
    %35 = vector.shape_cast %34 : vector<128xf32> to vector<128x1xf32>
    %cst_23 = arith.constant 3.200000e+01 : f32
    %36 = vector.broadcast %cst_23 : f32 to vector<128x1xf32>
    %37 = arith.divf %35, %36 : vector<128x1xf32>
    %cst_24 = arith.constant 9.99999996E-13 : f32
    %38 = vector.broadcast %cst_24 : f32 to vector<128x1xf32>
    %39 = arith.addf %37, %38 : vector<128x1xf32>
    %40 = math.rsqrt %39 : vector<128x1xf32>
    %41 = vector.broadcast %40 : vector<128x1xf32> to vector<128x32xf32>
    %42 = arith.mulf %32, %41 : vector<128x32xf32>
    %43 = vector.broadcast %25 : vector<1x32xf32> to vector<128x32xf32>
    %44 = arith.mulf %42, %43 : vector<128x32xf32>
    %45 = vector.broadcast %26 : vector<1x32xf32> to vector<128x32xf32>
    %46 = arith.addf %44, %45 : vector<128x32xf32>
    %c0_25 = arith.constant 0 : index
    %c0_26 = arith.constant 0 : index
    %47 = vector.load %arg11[%c0_25, %c0_26] : memref<128x32xf32, #tpu.memory_space<vmem>>, vector<128x32xf32>
    tpu.vector_store %arg11[%c0_25, %c0_26], %46 {strides = array<i32>} : memref<128x32xf32, #tpu.memory_space<vmem>>, vector<128x32xf32>,
    return
  }
  func.func @transform_0(%arg0: i32) -> (i32, i32) {
    %c0_i32 = arith.constant 0 : i32
    %c0_i32_0 = arith.constant 0 : i32
    return %arg0, %c0_i32 : i32, i32
  }
  func.func @transform_1(%arg0: i32) -> (i32, i32) {
    %c0_i32 = arith.constant 0 : i32
    %c0_i32_0 = arith.constant 0 : i32
    return %arg0, %c0_i32 : i32, i32
  }
  func.func @transform_2(%arg0: i32) -> (i32, i32) {
    %c0_i32 = arith.constant 0 : i32
    %c0_i32_0 = arith.constant 0 : i32
    %c0_i32_1 = arith.constant 0 : i32
    return %c0_i32, %c0_i32_0 : i32, i32
  }
  func.func @transform_3(%arg0: i32) -> (i32, i32) {
    %c0_i32 = arith.constant 0 : i32
    %c0_i32_0 = arith.constant 0 : i32
    %c0_i32_1 = arith.constant 0 : i32
    return %c0_i32, %c0_i32_0 : i32, i32
  }
  func.func @transform_4(%arg0: i32) -> (i32, i32) {
    %c0_i32 = arith.constant 0 : i32
    %c0_i32_0 = arith.constant 0 : i32
    %c0_i32_1 = arith.constant 0 : i32
    return %c0_i32, %c0_i32_0 : i32, i32
  }
  func.func @transform_5(%arg0: i32) -> (i32, i32) {
    %c0_i32 = arith.constant 0 : i32
    %c0_i32_0 = arith.constant 0 : i32
    %c0_i32_1 = arith.constant 0 : i32
    return %c0_i32, %c0_i32_0 : i32, i32
  }
  func.func @transform_6(%arg0: i32) -> (i32, i32) {
    %c0_i32 = arith.constant 0 : i32
    %c0_i32_0 = arith.constant 0 : i32
    %c0_i32_1 = arith.constant 0 : i32
    return %c0_i32, %c0_i32_0 : i32, i32
  }
  func.func @transform_7(%arg0: i32) -> (i32, i32) {
    %c0_i32 = arith.constant 0 : i32
    %c0_i32_0 = arith.constant 0 : i32
    %c0_i32_1 = arith.constant 0 : i32
    return %c0_i32, %c0_i32_0 : i32, i32
  }
  func.func @transform_8(%arg0: i32) -> (i32, i32) {
    %c0_i32 = arith.constant 0 : i32
    %c0_i32_0 = arith.constant 0 : i32
    %c0_i32_1 = arith.constant 0 : i32
    return %c0_i32, %c0_i32_0 : i32, i32
  }
  func.func @transform_9(%arg0: i32) -> (i32, i32) {
    %c0_i32 = arith.constant 0 : i32
    %c0_i32_0 = arith.constant 0 : i32
    %c0_i32_1 = arith.constant 0 : i32
    return %c0_i32, %c0_i32_0 : i32, i32
  }
  func.func @transform_10(%arg0: i32) -> (i32, i32) {
    %c0_i32 = arith.constant 0 : i32
    %c0_i32_0 = arith.constant 0 : i32
    return %arg0, %c0_i32 : i32, i32
  }
}

module attributes {stable_mosaic.version = 11 : i64} {
  func.func @_gene_context_kernel(%arg0: i32, %arg1: i32, %arg2: memref<1x1x16x8xf32, #tpu.memory_space<vmem>>, %arg3: memref<1x1x16x8xf32, #tpu.memory_space<vmem>>, %arg4: memref<32x8xbf16, #tpu.memory_space<vmem>>, %arg5: memref<1x16x16xf32, #tpu.memory_space<vmem>>) attributes {dimension_semantics = [#tpu.dimension_semantics<parallel>, #tpu.dimension_semantics<arbitrary>], iteration_bounds = array<i64: 4, 8>, scalar_prefetch = 0 : i64, scratch_operands = 0 : i64, tpu.core_type = #tpu.core_type<tc>, window_params = [{transform_indices = @transform_0, window_bounds = array<i64: 1, 1, 16, 8>}, {transform_indices = @transform_1, window_bounds = array<i64: 1, 1, 16, 8>}, {pipeline_mode = #tpu.pipeline_mode<synchronous>, transform_indices = @transform_2, window_bounds = array<i64: 32, 8>}, {transform_indices = @transform_3, window_bounds = array<i64: 1, 16, 16>}]} {
    %c0_i32 = arith.constant 0 : i32
    %0 = arith.cmpi eq, %arg1, %c0_i32 : i32
    %1 = arith.extui %0 : i1 to i32
    %c0_i32_0 = arith.constant 0 : i32
    %2 = arith.cmpi ne, %1, %c0_i32_0 : i32
    scf.if %2 {
      %cst_33 = arith.constant 0.000000e+00 : f32
      %60 = vector.broadcast %cst_33 : f32 to vector<1x16x16xf32>
      %c0_34 = arith.constant 0 : index
      %c0_35 = arith.constant 0 : index
      %c0_36 = arith.constant 0 : index
      %61 = vector.load %arg5[%c0_34, %c0_35, %c0_36] : memref<1x16x16xf32, #tpu.memory_space<vmem>>, vector<1x16x16xf32>
      tpu.vector_store %arg5[%c0_34, %c0_35, %c0_36], %60 {strides = array<i32>} : memref<1x16x16xf32, #tpu.memory_space<vmem>>, vector<1x16x16xf32>,
    } else {
    }
    %c0 = arith.constant 0 : index
    %c0_1 = arith.constant 0 : index
    %c0_2 = arith.constant 0 : index
    %c0_3 = arith.constant 0 : index
    %3 = vector.load %arg2[%c0, %c0_1, %c0_2, %c0_3] : memref<1x1x16x8xf32, #tpu.memory_space<vmem>>, vector<1x1x16x8xf32>
    %4 = vector.shape_cast %3 : vector<1x1x16x8xf32> to vector<16x8xf32>
    %c0_4 = arith.constant 0 : index
    %c0_5 = arith.constant 0 : index
    %5 = vector.load %arg4[%c0_4, %c0_5] : memref<32x8xbf16, #tpu.memory_space<vmem>>, vector<32x8xbf16>
    %cst = arith.constant 0.594603539 : f32
    %6 = vector.broadcast %cst : f32 to vector<16x8xf32>
    %7 = arith.mulf %4, %6 : vector<16x8xf32>
    %8 = arith.truncf %7 : vector<16x8xf32> to vector<16x8xbf16>
    %cst_6 = arith.constant dense<0.000000e+00> : vector<16x32xf32>
    %9 = tpu.matmul %8, %5, %cst_6 {dimension_numbers = #tpu.dot_dimension_numbers<[1], [1], [0], [0], [0, 0, 1, 0], [], []>} : vector<16x8xbf16>, vector<32x8xbf16>, vector<16x32xf32> -> vector<16x32xf32>
    %10 = arith.mulf %4, %4 : vector<16x8xf32>
    %cst_7 = arith.constant dense<0.000000e+00> : vector<16xf32>
    %11 = vector.multi_reduction <add>, %10, %cst_7 [1] : vector<16x8xf32> to vector<16xf32>
    %12 = vector.shape_cast %11 : vector<16xf32> to vector<16x1xf32>
    %cst_8 = arith.constant 0.176776692 : f32
    %13 = vector.broadcast %cst_8 : f32 to vector<16x1xf32>
    %14 = arith.mulf %12, %13 : vector<16x1xf32>
    %cst_9 = arith.constant dense<0xFF800000> : vector<16xf32>
    %15 = vector.multi_reduction <maximumf>, %9, %cst_9 [1] : vector<16x32xf32> to vector<16xf32>
    %16 = vector.shape_cast %15 : vector<16xf32> to vector<16x1xf32>
    %17 = vector.broadcast %14 : vector<16x1xf32> to vector<16x32xf32>
    %18 = arith.subf %9, %17 : vector<16x32xf32>
    %19 = vector.broadcast %16 : vector<16x1xf32> to vector<16x32xf32>
    %20 = arith.subf %18, %19 : vector<16x32xf32>
    %21 = math.exp %20 : vector<16x32xf32>
    %cst_10 = arith.constant 9.99999974E-5 : f32
    %22 = vector.broadcast %cst_10 : f32 to vector<16x32xf32>
    %23 = arith.addf %21, %22 : vector<16x32xf32>
    %cst_11 = arith.constant 0.176776692 : f32
    %24 = vector.broadcast %cst_11 : f32 to vector<16x32xf32>
    %25 = arith.mulf %24, %23 : vector<16x32xf32>
    %c0_12 = arith.constant 0 : index
    %c0_13 = arith.constant 0 : index
    %c0_14 = arith.constant 0 : index
    %c0_15 = arith.constant 0 : index
    %26 = vector.load %arg3[%c0_12, %c0_13, %c0_14, %c0_15] : memref<1x1x16x8xf32, #tpu.memory_space<vmem>>, vector<1x1x16x8xf32>
    %27 = vector.shape_cast %26 : vector<1x1x16x8xf32> to vector<16x8xf32>
    %c0_16 = arith.constant 0 : index
    %c0_17 = arith.constant 0 : index
    %28 = vector.load %arg4[%c0_16, %c0_17] : memref<32x8xbf16, #tpu.memory_space<vmem>>, vector<32x8xbf16>
    %cst_18 = arith.constant 0.594603539 : f32
    %29 = vector.broadcast %cst_18 : f32 to vector<16x8xf32>
    %30 = arith.mulf %27, %29 : vector<16x8xf32>
    %31 = arith.truncf %30 : vector<16x8xf32> to vector<16x8xbf16>
    %cst_19 = arith.constant dense<0.000000e+00> : vector<16x32xf32>
    %32 = tpu.matmul %31, %28, %cst_19 {dimension_numbers = #tpu.dot_dimension_numbers<[1], [1], [0], [0], [0, 0, 1, 0], [], []>} : vector<16x8xbf16>, vector<32x8xbf16>, vector<16x32xf32> -> vector<16x32xf32>
    %33 = arith.mulf %27, %27 : vector<16x8xf32>
    %cst_20 = arith.constant dense<0.000000e+00> : vector<16xf32>
    %34 = vector.multi_reduction <add>, %33, %cst_20 [1] : vector<16x8xf32> to vector<16xf32>
    %35 = vector.shape_cast %34 : vector<16xf32> to vector<16x1xf32>
    %cst_21 = arith.constant 0.176776692 : f32
    %36 = vector.broadcast %cst_21 : f32 to vector<16x1xf32>
    %37 = arith.mulf %35, %36 : vector<16x1xf32>
    %cst_22 = arith.constant dense<0xFF800000> : vector<16xf32>
    %38 = vector.multi_reduction <maximumf>, %32, %cst_22 [1] : vector<16x32xf32> to vector<16xf32>
    %39 = vector.shape_cast %38 : vector<16xf32> to vector<16x1xf32>
    %cst_23 = arith.constant dense<0xFF800000> : vector<1xf32>
    %40 = vector.multi_reduction <maximumf>, %39, %cst_23 [0] : vector<16x1xf32> to vector<1xf32>
    %41 = vector.shape_cast %40 : vector<1xf32> to vector<1x1xf32>
    %42 = vector.broadcast %37 : vector<16x1xf32> to vector<16x32xf32>
    %43 = arith.subf %32, %42 : vector<16x32xf32>
    %44 = vector.broadcast %41 : vector<1x1xf32> to vector<16x32xf32>
    %45 = arith.subf %43, %44 : vector<16x32xf32>
    %46 = math.exp %45 : vector<16x32xf32>
    %cst_24 = arith.constant 9.99999974E-5 : f32
    %47 = vector.broadcast %cst_24 : f32 to vector<16x32xf32>
    %48 = arith.addf %46, %47 : vector<16x32xf32>
    %cst_25 = arith.constant 0.176776692 : f32
    %49 = vector.broadcast %cst_25 : f32 to vector<16x32xf32>
    %50 = arith.mulf %49, %48 : vector<16x32xf32>
    %c0_26 = arith.constant 0 : index
    %c0_27 = arith.constant 0 : index
    %c0_28 = arith.constant 0 : index
    %51 = vector.load %arg5[%c0_26, %c0_27, %c0_28] : memref<1x16x16xf32, #tpu.memory_space<vmem>>, vector<1x16x16xf32>
    %52 = vector.shape_cast %51 : vector<1x16x16xf32> to vector<16x16xf32>
    %53 = arith.truncf %25 : vector<16x32xf32> to vector<16x32xbf16>
    %54 = arith.truncf %50 : vector<16x32xf32> to vector<16x32xbf16>
    %cst_29 = arith.constant dense<0.000000e+00> : vector<16x16xf32>
    %55 = tpu.matmul %53, %54, %cst_29 {dimension_numbers = #tpu.dot_dimension_numbers<[1], [1], [0], [0], [0, 0, 1, 0], [], []>} : vector<16x32xbf16>, vector<16x32xbf16>, vector<16x16xf32> -> vector<16x16xf32>
    %56 = arith.addf %52, %55 : vector<16x16xf32>
    %c0_30 = arith.constant 0 : index
    %c0_31 = arith.constant 0 : index
    %c0_32 = arith.constant 0 : index
    %57 = vector.load %arg5[%c0_30, %c0_31, %c0_32] : memref<1x16x16xf32, #tpu.memory_space<vmem>>, vector<1x16x16xf32>
    %58 = vector.shape_cast %57 : vector<1x16x16xf32> to vector<16x16xf32>
    %59 = vector.shape_cast %56 : vector<16x16xf32> to vector<1x16x16xf32>
    tpu.vector_store %arg5[%c0_30, %c0_31, %c0_32], %59 {strides = array<i32>} : memref<1x16x16xf32, #tpu.memory_space<vmem>>, vector<1x16x16xf32>,
    return
  }
  func.func @transform_0(%arg0: i32, %arg1: i32) -> (i32, i32, i32, i32) {
    %c0_i32 = arith.constant 0 : i32
    %c0_i32_0 = arith.constant 0 : i32
    %c0_i32_1 = arith.constant 0 : i32
    return %arg0, %arg1, %c0_i32, %c0_i32_0 : i32, i32, i32, i32
  }
  func.func @transform_1(%arg0: i32, %arg1: i32) -> (i32, i32, i32, i32) {
    %c0_i32 = arith.constant 0 : i32
    %c0_i32_0 = arith.constant 0 : i32
    %c0_i32_1 = arith.constant 0 : i32
    return %arg0, %arg1, %c0_i32, %c0_i32_0 : i32, i32, i32, i32
  }
  func.func @transform_2(%arg0: i32, %arg1: i32) -> (i32, i32) {
    %c0_i32 = arith.constant 0 : i32
    %c0_i32_0 = arith.constant 0 : i32
    %c0_i32_1 = arith.constant 0 : i32
    return %c0_i32, %c0_i32_0 : i32, i32
  }
  func.func @transform_3(%arg0: i32, %arg1: i32) -> (i32, i32, i32) {
    %c0_i32 = arith.constant 0 : i32
    %c0_i32_0 = arith.constant 0 : i32
    %c0_i32_1 = arith.constant 0 : i32
    return %arg0, %c0_i32, %c0_i32_0 : i32, i32, i32
  }
}

module attributes {stable_mosaic.version = 11 : i64} {
  func.func @_attn_apply_kernel(%arg0: i32, %arg1: memref<4x16x16xf32, #tpu.memory_space<vmem>>, %arg2: memref<1x16x32xf32, #tpu.memory_space<vmem>>, %arg3: memref<1x16x32xf32, #tpu.memory_space<vmem>>, %arg4: memref<1x16x32xf32, #tpu.memory_space<vmem>>) attributes {dimension_semantics = [#tpu.dimension_semantics<parallel>], iteration_bounds = array<i64: 8>, scalar_prefetch = 0 : i64, scratch_operands = 0 : i64, tpu.core_type = #tpu.core_type<tc>, window_params = [{pipeline_mode = #tpu.pipeline_mode<synchronous>, transform_indices = @transform_0, window_bounds = array<i64: 4, 16, 16>}, {transform_indices = @transform_1, window_bounds = array<i64: 1, 16, 32>}, {transform_indices = @transform_2, window_bounds = array<i64: 1, 16, 32>}, {transform_indices = @transform_3, window_bounds = array<i64: 1, 16, 32>}]} {
    %c0 = arith.constant 0 : index
    %c0_0 = arith.constant 0 : index
    %c0_1 = arith.constant 0 : index
    %0 = vector.load %arg2[%c0, %c0_0, %c0_1] : memref<1x16x32xf32, #tpu.memory_space<vmem>>, vector<1x16x32xf32>
    %1 = vector.shape_cast %0 : vector<1x16x32xf32> to vector<16x32xf32>
    %c0_2 = arith.constant 0 : index
    %c0_3 = arith.constant 0 : index
    %c0_4 = arith.constant 0 : index
    %2 = vector.load %arg1[%c0_2, %c0_3, %c0_4] : memref<4x16x16xf32, #tpu.memory_space<vmem>>, vector<1x16x16xf32>
    %3 = vector.shape_cast %2 : vector<1x16x16xf32> to vector<16x16xf32>
    %cst = arith.constant dense<0.000000e+00> : vector<16xf32>
    %4 = vector.multi_reduction <add>, %3, %cst [1] : vector<16x16xf32> to vector<16xf32>
    %5 = vector.shape_cast %4 : vector<16xf32> to vector<16x1xf32>
    %6 = vector.extract_strided_slice %1 {offsets = [0, 0], sizes = [16, 8], strides = [1, 1]} : vector<16x32xf32> to vector<16x8xf32>
    %7 = arith.truncf %3 : vector<16x16xf32> to vector<16x16xbf16>
    %8 = arith.truncf %6 : vector<16x8xf32> to vector<16x8xbf16>
    %cst_5 = arith.constant dense<0.000000e+00> : vector<16x8xf32>
    %9 = tpu.matmul %7, %8, %cst_5 {dimension_numbers = #tpu.dot_dimension_numbers<[1], [0], [0], [1], [0, 0, 1, 1], [], []>} : vector<16x16xbf16>, vector<16x8xbf16>, vector<16x8xf32> -> vector<16x8xf32>
    %10 = tpu.reciprocal %5 {approx = true} : vector<16x1xf32> -> vector<16x1xf32>
    %11 = vector.broadcast %10 : vector<16x1xf32> to vector<16x8xf32>
    %12 = arith.mulf %9, %11 : vector<16x8xf32>
    %c1 = arith.constant 1 : index
    %c0_6 = arith.constant 0 : index
    %c0_7 = arith.constant 0 : index
    %13 = vector.load %arg1[%c1, %c0_6, %c0_7] : memref<4x16x16xf32, #tpu.memory_space<vmem>>, vector<1x16x16xf32>
    %14 = vector.shape_cast %13 : vector<1x16x16xf32> to vector<16x16xf32>
    %cst_8 = arith.constant dense<0.000000e+00> : vector<16xf32>
    %15 = vector.multi_reduction <add>, %14, %cst_8 [1] : vector<16x16xf32> to vector<16xf32>
    %16 = vector.shape_cast %15 : vector<16xf32> to vector<16x1xf32>
    %17 = vector.extract_strided_slice %1 {offsets = [0, 8], sizes = [16, 8], strides = [1, 1]} : vector<16x32xf32> to vector<16x8xf32>
    %18 = arith.truncf %14 : vector<16x16xf32> to vector<16x16xbf16>
    %19 = arith.truncf %17 : vector<16x8xf32> to vector<16x8xbf16>
    %cst_9 = arith.constant dense<0.000000e+00> : vector<16x8xf32>
    %20 = tpu.matmul %18, %19, %cst_9 {dimension_numbers = #tpu.dot_dimension_numbers<[1], [0], [0], [1], [0, 0, 1, 1], [], []>} : vector<16x16xbf16>, vector<16x8xbf16>, vector<16x8xf32> -> vector<16x8xf32>
    %21 = tpu.reciprocal %16 {approx = true} : vector<16x1xf32> -> vector<16x1xf32>
    %22 = vector.broadcast %21 : vector<16x1xf32> to vector<16x8xf32>
    %23 = arith.mulf %20, %22 : vector<16x8xf32>
    %c2 = arith.constant 2 : index
    %c0_10 = arith.constant 0 : index
    %c0_11 = arith.constant 0 : index
    %24 = vector.load %arg1[%c2, %c0_10, %c0_11] : memref<4x16x16xf32, #tpu.memory_space<vmem>>, vector<1x16x16xf32>
    %25 = vector.shape_cast %24 : vector<1x16x16xf32> to vector<16x16xf32>
    %cst_12 = arith.constant dense<0.000000e+00> : vector<16xf32>
    %26 = vector.multi_reduction <add>, %25, %cst_12 [1] : vector<16x16xf32> to vector<16xf32>
    %27 = vector.shape_cast %26 : vector<16xf32> to vector<16x1xf32>
    %28 = vector.extract_strided_slice %1 {offsets = [0, 16], sizes = [16, 8], strides = [1, 1]} : vector<16x32xf32> to vector<16x8xf32>
    %29 = arith.truncf %25 : vector<16x16xf32> to vector<16x16xbf16>
    %30 = arith.truncf %28 : vector<16x8xf32> to vector<16x8xbf16>
    %cst_13 = arith.constant dense<0.000000e+00> : vector<16x8xf32>
    %31 = tpu.matmul %29, %30, %cst_13 {dimension_numbers = #tpu.dot_dimension_numbers<[1], [0], [0], [1], [0, 0, 1, 1], [], []>} : vector<16x16xbf16>, vector<16x8xbf16>, vector<16x8xf32> -> vector<16x8xf32>
    %32 = tpu.reciprocal %27 {approx = true} : vector<16x1xf32> -> vector<16x1xf32>
    %33 = vector.broadcast %32 : vector<16x1xf32> to vector<16x8xf32>
    %34 = arith.mulf %31, %33 : vector<16x8xf32>
    %c3 = arith.constant 3 : index
    %c0_14 = arith.constant 0 : index
    %c0_15 = arith.constant 0 : index
    %35 = vector.load %arg1[%c3, %c0_14, %c0_15] : memref<4x16x16xf32, #tpu.memory_space<vmem>>, vector<1x16x16xf32>
    %36 = vector.shape_cast %35 : vector<1x16x16xf32> to vector<16x16xf32>
    %cst_16 = arith.constant dense<0.000000e+00> : vector<16xf32>
    %37 = vector.multi_reduction <add>, %36, %cst_16 [1] : vector<16x16xf32> to vector<16xf32>
    %38 = vector.shape_cast %37 : vector<16xf32> to vector<16x1xf32>
    %39 = vector.extract_strided_slice %1 {offsets = [0, 24], sizes = [16, 8], strides = [1, 1]} : vector<16x32xf32> to vector<16x8xf32>
    %40 = arith.truncf %36 : vector<16x16xf32> to vector<16x16xbf16>
    %41 = arith.truncf %39 : vector<16x8xf32> to vector<16x8xbf16>
    %cst_17 = arith.constant dense<0.000000e+00> : vector<16x8xf32>
    %42 = tpu.matmul %40, %41, %cst_17 {dimension_numbers = #tpu.dot_dimension_numbers<[1], [0], [0], [1], [0, 0, 1, 1], [], []>} : vector<16x16xbf16>, vector<16x8xbf16>, vector<16x8xf32> -> vector<16x8xf32>
    %43 = tpu.reciprocal %38 {approx = true} : vector<16x1xf32> -> vector<16x1xf32>
    %44 = vector.broadcast %43 : vector<16x1xf32> to vector<16x8xf32>
    %45 = arith.mulf %42, %44 : vector<16x8xf32>
    %c0_18 = arith.constant 0 : index
    %c0_19 = arith.constant 0 : index
    %c0_20 = arith.constant 0 : index
    %46 = vector.load %arg3[%c0_18, %c0_19, %c0_20] : memref<1x16x32xf32, #tpu.memory_space<vmem>>, vector<1x16x32xf32>
    %47 = vector.shape_cast %46 : vector<1x16x32xf32> to vector<16x32xf32>
    %48 = tpu.concatenate %12, %23, %34, %45 in 1 : vector<16x8xf32>, vector<16x8xf32>, vector<16x8xf32>, vector<16x8xf32> -> vector<16x32xf32>
    %49 = arith.addf %47, %48 : vector<16x32xf32>
    %c0_21 = arith.constant 0 : index
    %c0_22 = arith.constant 0 : index
    %c0_23 = arith.constant 0 : index
    %50 = vector.load %arg4[%c0_21, %c0_22, %c0_23] : memref<1x16x32xf32, #tpu.memory_space<vmem>>, vector<1x16x32xf32>
    %51 = vector.shape_cast %50 : vector<1x16x32xf32> to vector<16x32xf32>
    %52 = vector.shape_cast %49 : vector<16x32xf32> to vector<1x16x32xf32>
    tpu.vector_store %arg4[%c0_21, %c0_22, %c0_23], %52 {strides = array<i32>} : memref<1x16x32xf32, #tpu.memory_space<vmem>>, vector<1x16x32xf32>,
    return
  }
  func.func @transform_0(%arg0: i32) -> (i32, i32, i32) {
    %c0_i32 = arith.constant 0 : i32
    %c0_i32_0 = arith.constant 0 : i32
    %c0_i32_1 = arith.constant 0 : i32
    %c0_i32_2 = arith.constant 0 : i32
    return %c0_i32, %c0_i32_0, %c0_i32_1 : i32, i32, i32
  }
  func.func @transform_1(%arg0: i32) -> (i32, i32, i32) {
    %c0_i32 = arith.constant 0 : i32
    %c0_i32_0 = arith.constant 0 : i32
    %c0_i32_1 = arith.constant 0 : i32
    return %arg0, %c0_i32, %c0_i32_0 : i32, i32, i32
  }
  func.func @transform_2(%arg0: i32) -> (i32, i32, i32) {
    %c0_i32 = arith.constant 0 : i32
    %c0_i32_0 = arith.constant 0 : i32
    %c0_i32_1 = arith.constant 0 : i32
    return %arg0, %c0_i32, %c0_i32_0 : i32, i32, i32
  }
  func.func @transform_3(%arg0: i32) -> (i32, i32, i32) {
    %c0_i32 = arith.constant 0 : i32
    %c0_i32_0 = arith.constant 0 : i32
    %c0_i32_1 = arith.constant 0 : i32
    return %arg0, %c0_i32, %c0_i32_0 : i32, i32, i32
  }
}

module attributes {stable_mosaic.version = 11 : i64} {
  func.func @_cell_context_kernel(%arg0: i32, %arg1: i32, %arg2: memref<1x1x8x8xf32, #tpu.memory_space<vmem>>, %arg3: memref<1x1x8x8xf32, #tpu.memory_space<vmem>>, %arg4: memref<32x8xbf16, #tpu.memory_space<vmem>>, %arg5: memref<1x8x8xf32, #tpu.memory_space<vmem>>, %arg6: memref<8x32xf32, #tpu.memory_space<vmem>>, %arg7: memref<8x32xf32, #tpu.memory_space<vmem>>) attributes {dimension_semantics = [#tpu.dimension_semantics<parallel>, #tpu.dimension_semantics<arbitrary>], iteration_bounds = array<i64: 4, 16>, scalar_prefetch = 0 : i64, scratch_operands = 2 : i64, tpu.core_type = #tpu.core_type<tc>, window_params = [{transform_indices = @transform_0, window_bounds = array<i64: 1, 1, 8, 8>}, {transform_indices = @transform_1, window_bounds = array<i64: 1, 1, 8, 8>}, {pipeline_mode = #tpu.pipeline_mode<synchronous>, transform_indices = @transform_2, window_bounds = array<i64: 32, 8>}, {transform_indices = @transform_3, window_bounds = array<i64: 1, 8, 8>}]} {
    %c0_i32 = arith.constant 0 : i32
    %0 = arith.cmpi eq, %arg1, %c0_i32 : i32
    %1 = arith.extui %0 : i1 to i32
    %c0_i32_0 = arith.constant 0 : i32
    %2 = arith.cmpi ne, %1, %c0_i32_0 : i32
    scf.if %2 {
      %cst_35 = arith.constant 0.000000e+00 : f32
      %60 = vector.broadcast %cst_35 : f32 to vector<8x32xf32>
      %c0_36 = arith.constant 0 : index
      %c0_37 = arith.constant 0 : index
      %61 = vector.load %arg6[%c0_36, %c0_37] : memref<8x32xf32, #tpu.memory_space<vmem>>, vector<8x32xf32>
      tpu.vector_store %arg6[%c0_36, %c0_37], %60 {strides = array<i32>} : memref<8x32xf32, #tpu.memory_space<vmem>>, vector<8x32xf32>,
      %cst_38 = arith.constant 0.000000e+00 : f32
      %62 = vector.broadcast %cst_38 : f32 to vector<8x32xf32>
      %c0_39 = arith.constant 0 : index
      %c0_40 = arith.constant 0 : index
      %63 = vector.load %arg7[%c0_39, %c0_40] : memref<8x32xf32, #tpu.memory_space<vmem>>, vector<8x32xf32>
      tpu.vector_store %arg7[%c0_39, %c0_40], %62 {strides = array<i32>} : memref<8x32xf32, #tpu.memory_space<vmem>>, vector<8x32xf32>,
    } else {
    }
    %c0 = arith.constant 0 : index
    %c0_1 = arith.constant 0 : index
    %3 = vector.load %arg6[%c0, %c0_1] : memref<8x32xf32, #tpu.memory_space<vmem>>, vector<8x32xf32>
    %c0_2 = arith.constant 0 : index
    %c0_3 = arith.constant 0 : index
    %c0_4 = arith.constant 0 : index
    %c0_5 = arith.constant 0 : index
    %4 = vector.load %arg2[%c0_2, %c0_3, %c0_4, %c0_5] : memref<1x1x8x8xf32, #tpu.memory_space<vmem>>, vector<1x1x8x8xf32>
    %5 = vector.shape_cast %4 : vector<1x1x8x8xf32> to vector<8x8xf32>
    %c0_6 = arith.constant 0 : index
    %c0_7 = arith.constant 0 : index
    %6 = vector.load %arg4[%c0_6, %c0_7] : memref<32x8xbf16, #tpu.memory_space<vmem>>, vector<32x8xbf16>
    %cst = arith.constant 0.594603539 : f32
    %7 = vector.broadcast %cst : f32 to vector<8x8xf32>
    %8 = arith.mulf %5, %7 : vector<8x8xf32>
    %9 = arith.truncf %8 : vector<8x8xf32> to vector<8x8xbf16>
    %cst_8 = arith.constant dense<0.000000e+00> : vector<8x32xf32>
    %10 = tpu.matmul %9, %6, %cst_8 {dimension_numbers = #tpu.dot_dimension_numbers<[1], [1], [0], [0], [0, 0, 1, 0], [], []>} : vector<8x8xbf16>, vector<32x8xbf16>, vector<8x32xf32> -> vector<8x32xf32>
    %11 = arith.mulf %5, %5 : vector<8x8xf32>
    %cst_9 = arith.constant dense<0.000000e+00> : vector<8xf32>
    %12 = vector.multi_reduction <add>, %11, %cst_9 [1] : vector<8x8xf32> to vector<8xf32>
    %13 = vector.shape_cast %12 : vector<8xf32> to vector<8x1xf32>
    %cst_10 = arith.constant 0.176776692 : f32
    %14 = vector.broadcast %cst_10 : f32 to vector<8x1xf32>
    %15 = arith.mulf %13, %14 : vector<8x1xf32>
    %cst_11 = arith.constant dense<0xFF800000> : vector<8xf32>
    %16 = vector.multi_reduction <maximumf>, %10, %cst_11 [1] : vector<8x32xf32> to vector<8xf32>
    %17 = vector.shape_cast %16 : vector<8xf32> to vector<8x1xf32>
    %18 = vector.broadcast %15 : vector<8x1xf32> to vector<8x32xf32>
    %19 = arith.subf %10, %18 : vector<8x32xf32>
    %20 = vector.broadcast %17 : vector<8x1xf32> to vector<8x32xf32>
    %21 = arith.subf %19, %20 : vector<8x32xf32>
    %22 = math.exp %21 : vector<8x32xf32>
    %cst_12 = arith.constant 9.99999974E-5 : f32
    %23 = vector.broadcast %cst_12 : f32 to vector<8x32xf32>
    %24 = arith.addf %22, %23 : vector<8x32xf32>
    %cst_13 = arith.constant 0.176776692 : f32
    %25 = vector.broadcast %cst_13 : f32 to vector<8x32xf32>
    %26 = arith.mulf %25, %24 : vector<8x32xf32>
    %27 = arith.addf %3, %26 : vector<8x32xf32>
    %c0_14 = arith.constant 0 : index
    %c0_15 = arith.constant 0 : index
    %28 = vector.load %arg6[%c0_14, %c0_15] : memref<8x32xf32, #tpu.memory_space<vmem>>, vector<8x32xf32>
    tpu.vector_store %arg6[%c0_14, %c0_15], %27 {strides = array<i32>} : memref<8x32xf32, #tpu.memory_space<vmem>>, vector<8x32xf32>,
    %c0_16 = arith.constant 0 : index
    %c0_17 = arith.constant 0 : index
    %29 = vector.load %arg7[%c0_16, %c0_17] : memref<8x32xf32, #tpu.memory_space<vmem>>, vector<8x32xf32>
    %c0_18 = arith.constant 0 : index
    %c0_19 = arith.constant 0 : index
    %c0_20 = arith.constant 0 : index
    %c0_21 = arith.constant 0 : index
    %30 = vector.load %arg3[%c0_18, %c0_19, %c0_20, %c0_21] : memref<1x1x8x8xf32, #tpu.memory_space<vmem>>, vector<1x1x8x8xf32>
    %31 = vector.shape_cast %30 : vector<1x1x8x8xf32> to vector<8x8xf32>
    %c0_22 = arith.constant 0 : index
    %c0_23 = arith.constant 0 : index
    %32 = vector.load %arg4[%c0_22, %c0_23] : memref<32x8xbf16, #tpu.memory_space<vmem>>, vector<32x8xbf16>
    %cst_24 = arith.constant 0.594603539 : f32
    %33 = vector.broadcast %cst_24 : f32 to vector<8x8xf32>
    %34 = arith.mulf %31, %33 : vector<8x8xf32>
    %35 = arith.truncf %34 : vector<8x8xf32> to vector<8x8xbf16>
    %cst_25 = arith.constant dense<0.000000e+00> : vector<8x32xf32>
    %36 = tpu.matmul %35, %32, %cst_25 {dimension_numbers = #tpu.dot_dimension_numbers<[1], [1], [0], [0], [0, 0, 1, 0], [], []>} : vector<8x8xbf16>, vector<32x8xbf16>, vector<8x32xf32> -> vector<8x32xf32>
    %37 = arith.mulf %31, %31 : vector<8x8xf32>
    %cst_26 = arith.constant dense<0.000000e+00> : vector<8xf32>
    %38 = vector.multi_reduction <add>, %37, %cst_26 [1] : vector<8x8xf32> to vector<8xf32>
    %39 = vector.shape_cast %38 : vector<8xf32> to vector<8x1xf32>
    %cst_27 = arith.constant 0.176776692 : f32
    %40 = vector.broadcast %cst_27 : f32 to vector<8x1xf32>
    %41 = arith.mulf %39, %40 : vector<8x1xf32>
    %cst_28 = arith.constant dense<0xFF800000> : vector<8xf32>
    %42 = vector.multi_reduction <maximumf>, %36, %cst_28 [1] : vector<8x32xf32> to vector<8xf32>
    %43 = vector.shape_cast %42 : vector<8xf32> to vector<8x1xf32>
    %cst_29 = arith.constant dense<0xFF800000> : vector<1xf32>
    %44 = vector.multi_reduction <maximumf>, %43, %cst_29 [0] : vector<8x1xf32> to vector<1xf32>
    %45 = vector.shape_cast %44 : vector<1xf32> to vector<1x1xf32>
    %46 = vector.broadcast %41 : vector<8x1xf32> to vector<8x32xf32>
    %47 = arith.subf %36, %46 : vector<8x32xf32>
    %48 = vector.broadcast %45 : vector<1x1xf32> to vector<8x32xf32>
    %49 = arith.subf %47, %48 : vector<8x32xf32>
    %50 = math.exp %49 : vector<8x32xf32>
    %cst_30 = arith.constant 9.99999974E-5 : f32
    %51 = vector.broadcast %cst_30 : f32 to vector<8x32xf32>
    %52 = arith.addf %50, %51 : vector<8x32xf32>
    %cst_31 = arith.constant 0.176776692 : f32
    %53 = vector.broadcast %cst_31 : f32 to vector<8x32xf32>
    %54 = arith.mulf %53, %52 : vector<8x32xf32>
    %55 = arith.addf %29, %54 : vector<8x32xf32>
    %c0_32 = arith.constant 0 : index
    %c0_33 = arith.constant 0 : index
    %56 = vector.load %arg7[%c0_32, %c0_33] : memref<8x32xf32, #tpu.memory_space<vmem>>, vector<8x32xf32>
    tpu.vector_store %arg7[%c0_32, %c0_33], %55 {strides = array<i32>} : memref<8x32xf32, #tpu.memory_space<vmem>>, vector<8x32xf32>,
    %c15_i32 = arith.constant 15 : i32
    %57 = arith.cmpi eq, %arg1, %c15_i32 : i32
    %58 = arith.extui %57 : i1 to i32
    %c0_i32_34 = arith.constant 0 : i32
    %59 = arith.cmpi ne, %58, %c0_i32_34 : i32
    scf.if %59 {
      %c0_35 = arith.constant 0 : index
      %c0_36 = arith.constant 0 : index
      %60 = vector.load %arg6[%c0_35, %c0_36] : memref<8x32xf32, #tpu.memory_space<vmem>>, vector<8x32xf32>
      %61 = arith.truncf %60 : vector<8x32xf32> to vector<8x32xbf16>
      %c0_37 = arith.constant 0 : index
      %c0_38 = arith.constant 0 : index
      %62 = vector.load %arg7[%c0_37, %c0_38] : memref<8x32xf32, #tpu.memory_space<vmem>>, vector<8x32xf32>
      %63 = arith.truncf %62 : vector<8x32xf32> to vector<8x32xbf16>
      %cst_39 = arith.constant dense<0.000000e+00> : vector<8x8xf32>
      %64 = tpu.matmul %61, %63, %cst_39 {dimension_numbers = #tpu.dot_dimension_numbers<[1], [1], [0], [0], [0, 0, 1, 0], [], []>} : vector<8x32xbf16>, vector<8x32xbf16>, vector<8x8xf32> -> vector<8x8xf32>
      %cst_40 = arith.constant 3.906250e-03 : f32
      %65 = vector.broadcast %cst_40 : f32 to vector<8x8xf32>
      %66 = arith.mulf %64, %65 : vector<8x8xf32>
      %c0_41 = arith.constant 0 : index
      %c0_42 = arith.constant 0 : index
      %c0_43 = arith.constant 0 : index
      %67 = vector.load %arg5[%c0_41, %c0_42, %c0_43] : memref<1x8x8xf32, #tpu.memory_space<vmem>>, vector<1x8x8xf32>
      %68 = vector.shape_cast %67 : vector<1x8x8xf32> to vector<8x8xf32>
      %69 = vector.shape_cast %66 : vector<8x8xf32> to vector<1x8x8xf32>
      tpu.vector_store %arg5[%c0_41, %c0_42, %c0_43], %69 {strides = array<i32>} : memref<1x8x8xf32, #tpu.memory_space<vmem>>, vector<1x8x8xf32>,
    } else {
    }
    return
  }
  func.func @transform_0(%arg0: i32, %arg1: i32) -> (i32, i32, i32, i32) {
    %c0_i32 = arith.constant 0 : i32
    %c0_i32_0 = arith.constant 0 : i32
    %c0_i32_1 = arith.constant 0 : i32
    return %arg0, %arg1, %c0_i32, %c0_i32_0 : i32, i32, i32, i32
  }
  func.func @transform_1(%arg0: i32, %arg1: i32) -> (i32, i32, i32, i32) {
    %c0_i32 = arith.constant 0 : i32
    %c0_i32_0 = arith.constant 0 : i32
    %c0_i32_1 = arith.constant 0 : i32
    return %arg0, %arg1, %c0_i32, %c0_i32_0 : i32, i32, i32, i32
  }
  func.func @transform_2(%arg0: i32, %arg1: i32) -> (i32, i32) {
    %c0_i32 = arith.constant 0 : i32
    %c0_i32_0 = arith.constant 0 : i32
    %c0_i32_1 = arith.constant 0 : i32
    return %c0_i32, %c0_i32_0 : i32, i32
  }
  func.func @transform_3(%arg0: i32, %arg1: i32) -> (i32, i32, i32) {
    %c0_i32 = arith.constant 0 : i32
    %c0_i32_0 = arith.constant 0 : i32
    %c0_i32_1 = arith.constant 0 : i32
    return %arg0, %c0_i32, %c0_i32_0 : i32, i32, i32
  }
}

module attributes {stable_mosaic.version = 11 : i64} {
  func.func @_attn_apply_kernel(%arg0: i32, %arg1: memref<4x8x8xf32, #tpu.memory_space<vmem>>, %arg2: memref<1x8x32xf32, #tpu.memory_space<vmem>>, %arg3: memref<1x8x32xf32, #tpu.memory_space<vmem>>, %arg4: memref<1x8x32xf32, #tpu.memory_space<vmem>>) attributes {dimension_semantics = [#tpu.dimension_semantics<parallel>], iteration_bounds = array<i64: 16>, scalar_prefetch = 0 : i64, scratch_operands = 0 : i64, tpu.core_type = #tpu.core_type<tc>, window_params = [{pipeline_mode = #tpu.pipeline_mode<synchronous>, transform_indices = @transform_0, window_bounds = array<i64: 4, 8, 8>}, {transform_indices = @transform_1, window_bounds = array<i64: 1, 8, 32>}, {transform_indices = @transform_2, window_bounds = array<i64: 1, 8, 32>}, {transform_indices = @transform_3, window_bounds = array<i64: 1, 8, 32>}]} {
    %c0 = arith.constant 0 : index
    %c0_0 = arith.constant 0 : index
    %c0_1 = arith.constant 0 : index
    %0 = vector.load %arg2[%c0, %c0_0, %c0_1] : memref<1x8x32xf32, #tpu.memory_space<vmem>>, vector<1x8x32xf32>
    %1 = vector.shape_cast %0 : vector<1x8x32xf32> to vector<8x32xf32>
    %c0_2 = arith.constant 0 : index
    %c0_3 = arith.constant 0 : index
    %c0_4 = arith.constant 0 : index
    %2 = vector.load %arg1[%c0_2, %c0_3, %c0_4] : memref<4x8x8xf32, #tpu.memory_space<vmem>>, vector<1x8x8xf32>
    %3 = vector.shape_cast %2 : vector<1x8x8xf32> to vector<8x8xf32>
    %cst = arith.constant dense<0.000000e+00> : vector<8xf32>
    %4 = vector.multi_reduction <add>, %3, %cst [1] : vector<8x8xf32> to vector<8xf32>
    %5 = vector.shape_cast %4 : vector<8xf32> to vector<8x1xf32>
    %6 = vector.extract_strided_slice %1 {offsets = [0, 0], sizes = [8, 8], strides = [1, 1]} : vector<8x32xf32> to vector<8x8xf32>
    %7 = arith.truncf %3 : vector<8x8xf32> to vector<8x8xbf16>
    %8 = arith.truncf %6 : vector<8x8xf32> to vector<8x8xbf16>
    %cst_5 = arith.constant dense<0.000000e+00> : vector<8x8xf32>
    %9 = tpu.matmul %7, %8, %cst_5 {dimension_numbers = #tpu.dot_dimension_numbers<[1], [0], [0], [1], [0, 0, 1, 1], [], []>} : vector<8x8xbf16>, vector<8x8xbf16>, vector<8x8xf32> -> vector<8x8xf32>
    %10 = tpu.reciprocal %5 {approx = true} : vector<8x1xf32> -> vector<8x1xf32>
    %11 = vector.broadcast %10 : vector<8x1xf32> to vector<8x8xf32>
    %12 = arith.mulf %9, %11 : vector<8x8xf32>
    %c1 = arith.constant 1 : index
    %c0_6 = arith.constant 0 : index
    %c0_7 = arith.constant 0 : index
    %13 = vector.load %arg1[%c1, %c0_6, %c0_7] : memref<4x8x8xf32, #tpu.memory_space<vmem>>, vector<1x8x8xf32>
    %14 = vector.shape_cast %13 : vector<1x8x8xf32> to vector<8x8xf32>
    %cst_8 = arith.constant dense<0.000000e+00> : vector<8xf32>
    %15 = vector.multi_reduction <add>, %14, %cst_8 [1] : vector<8x8xf32> to vector<8xf32>
    %16 = vector.shape_cast %15 : vector<8xf32> to vector<8x1xf32>
    %17 = vector.extract_strided_slice %1 {offsets = [0, 8], sizes = [8, 8], strides = [1, 1]} : vector<8x32xf32> to vector<8x8xf32>
    %18 = arith.truncf %14 : vector<8x8xf32> to vector<8x8xbf16>
    %19 = arith.truncf %17 : vector<8x8xf32> to vector<8x8xbf16>
    %cst_9 = arith.constant dense<0.000000e+00> : vector<8x8xf32>
    %20 = tpu.matmul %18, %19, %cst_9 {dimension_numbers = #tpu.dot_dimension_numbers<[1], [0], [0], [1], [0, 0, 1, 1], [], []>} : vector<8x8xbf16>, vector<8x8xbf16>, vector<8x8xf32> -> vector<8x8xf32>
    %21 = tpu.reciprocal %16 {approx = true} : vector<8x1xf32> -> vector<8x1xf32>
    %22 = vector.broadcast %21 : vector<8x1xf32> to vector<8x8xf32>
    %23 = arith.mulf %20, %22 : vector<8x8xf32>
    %c2 = arith.constant 2 : index
    %c0_10 = arith.constant 0 : index
    %c0_11 = arith.constant 0 : index
    %24 = vector.load %arg1[%c2, %c0_10, %c0_11] : memref<4x8x8xf32, #tpu.memory_space<vmem>>, vector<1x8x8xf32>
    %25 = vector.shape_cast %24 : vector<1x8x8xf32> to vector<8x8xf32>
    %cst_12 = arith.constant dense<0.000000e+00> : vector<8xf32>
    %26 = vector.multi_reduction <add>, %25, %cst_12 [1] : vector<8x8xf32> to vector<8xf32>
    %27 = vector.shape_cast %26 : vector<8xf32> to vector<8x1xf32>
    %28 = vector.extract_strided_slice %1 {offsets = [0, 16], sizes = [8, 8], strides = [1, 1]} : vector<8x32xf32> to vector<8x8xf32>
    %29 = arith.truncf %25 : vector<8x8xf32> to vector<8x8xbf16>
    %30 = arith.truncf %28 : vector<8x8xf32> to vector<8x8xbf16>
    %cst_13 = arith.constant dense<0.000000e+00> : vector<8x8xf32>
    %31 = tpu.matmul %29, %30, %cst_13 {dimension_numbers = #tpu.dot_dimension_numbers<[1], [0], [0], [1], [0, 0, 1, 1], [], []>} : vector<8x8xbf16>, vector<8x8xbf16>, vector<8x8xf32> -> vector<8x8xf32>
    %32 = tpu.reciprocal %27 {approx = true} : vector<8x1xf32> -> vector<8x1xf32>
    %33 = vector.broadcast %32 : vector<8x1xf32> to vector<8x8xf32>
    %34 = arith.mulf %31, %33 : vector<8x8xf32>
    %c3 = arith.constant 3 : index
    %c0_14 = arith.constant 0 : index
    %c0_15 = arith.constant 0 : index
    %35 = vector.load %arg1[%c3, %c0_14, %c0_15] : memref<4x8x8xf32, #tpu.memory_space<vmem>>, vector<1x8x8xf32>
    %36 = vector.shape_cast %35 : vector<1x8x8xf32> to vector<8x8xf32>
    %cst_16 = arith.constant dense<0.000000e+00> : vector<8xf32>
    %37 = vector.multi_reduction <add>, %36, %cst_16 [1] : vector<8x8xf32> to vector<8xf32>
    %38 = vector.shape_cast %37 : vector<8xf32> to vector<8x1xf32>
    %39 = vector.extract_strided_slice %1 {offsets = [0, 24], sizes = [8, 8], strides = [1, 1]} : vector<8x32xf32> to vector<8x8xf32>
    %40 = arith.truncf %36 : vector<8x8xf32> to vector<8x8xbf16>
    %41 = arith.truncf %39 : vector<8x8xf32> to vector<8x8xbf16>
    %cst_17 = arith.constant dense<0.000000e+00> : vector<8x8xf32>
    %42 = tpu.matmul %40, %41, %cst_17 {dimension_numbers = #tpu.dot_dimension_numbers<[1], [0], [0], [1], [0, 0, 1, 1], [], []>} : vector<8x8xbf16>, vector<8x8xbf16>, vector<8x8xf32> -> vector<8x8xf32>
    %43 = tpu.reciprocal %38 {approx = true} : vector<8x1xf32> -> vector<8x1xf32>
    %44 = vector.broadcast %43 : vector<8x1xf32> to vector<8x8xf32>
    %45 = arith.mulf %42, %44 : vector<8x8xf32>
    %c0_18 = arith.constant 0 : index
    %c0_19 = arith.constant 0 : index
    %c0_20 = arith.constant 0 : index
    %46 = vector.load %arg3[%c0_18, %c0_19, %c0_20] : memref<1x8x32xf32, #tpu.memory_space<vmem>>, vector<1x8x32xf32>
    %47 = vector.shape_cast %46 : vector<1x8x32xf32> to vector<8x32xf32>
    %48 = tpu.concatenate %12, %23, %34, %45 in 1 : vector<8x8xf32>, vector<8x8xf32>, vector<8x8xf32>, vector<8x8xf32> -> vector<8x32xf32>
    %49 = arith.addf %47, %48 : vector<8x32xf32>
    %c0_21 = arith.constant 0 : index
    %c0_22 = arith.constant 0 : index
    %c0_23 = arith.constant 0 : index
    %50 = vector.load %arg4[%c0_21, %c0_22, %c0_23] : memref<1x8x32xf32, #tpu.memory_space<vmem>>, vector<1x8x32xf32>
    %51 = vector.shape_cast %50 : vector<1x8x32xf32> to vector<8x32xf32>
    %52 = vector.shape_cast %49 : vector<8x32xf32> to vector<1x8x32xf32>
    tpu.vector_store %arg4[%c0_21, %c0_22, %c0_23], %52 {strides = array<i32>} : memref<1x8x32xf32, #tpu.memory_space<vmem>>, vector<1x8x32xf32>,
    return
  }
  func.func @transform_0(%arg0: i32) -> (i32, i32, i32) {
    %c0_i32 = arith.constant 0 : i32
    %c0_i32_0 = arith.constant 0 : i32
    %c0_i32_1 = arith.constant 0 : i32
    %c0_i32_2 = arith.constant 0 : i32
    return %c0_i32, %c0_i32_0, %c0_i32_1 : i32, i32, i32
  }
  func.func @transform_1(%arg0: i32) -> (i32, i32, i32) {
    %c0_i32 = arith.constant 0 : i32
    %c0_i32_0 = arith.constant 0 : i32
    %c0_i32_1 = arith.constant 0 : i32
    return %arg0, %c0_i32, %c0_i32_0 : i32, i32, i32
  }
  func.func @transform_2(%arg0: i32) -> (i32, i32, i32) {
    %c0_i32 = arith.constant 0 : i32
    %c0_i32_0 = arith.constant 0 : i32
    %c0_i32_1 = arith.constant 0 : i32
    return %arg0, %c0_i32, %c0_i32_0 : i32, i32, i32
  }
  func.func @transform_3(%arg0: i32) -> (i32, i32, i32) {
    %c0_i32 = arith.constant 0 : i32
    %c0_i32_0 = arith.constant 0 : i32
    %c0_i32_1 = arith.constant 0 : i32
    return %arg0, %c0_i32, %c0_i32_0 : i32, i32, i32
  }
}

module attributes {stable_mosaic.version = 11 : i64} {
  func.func @_linear_residual_kernel(%arg0: i32, %arg1: memref<128x32xf32, #tpu.memory_space<vmem>>, %arg2: memref<32x32xbf16, #tpu.memory_space<vmem>>, %arg3: memref<1x32xf32, #tpu.memory_space<vmem>>, %arg4: memref<128x32xf32, #tpu.memory_space<vmem>>, %arg5: memref<128x32xf32, #tpu.memory_space<vmem>>) attributes {dimension_semantics = [#tpu.dimension_semantics<parallel>], iteration_bounds = array<i64: 1>, scalar_prefetch = 0 : i64, scratch_operands = 0 : i64, tpu.core_type = #tpu.core_type<tc>, window_params = [{transform_indices = @transform_0, window_bounds = array<i64: 128, 32>}, {pipeline_mode = #tpu.pipeline_mode<synchronous>, transform_indices = @transform_1, window_bounds = array<i64: 32, 32>}, {pipeline_mode = #tpu.pipeline_mode<synchronous>, transform_indices = @transform_2, window_bounds = array<i64: 1, 32>}, {transform_indices = @transform_3, window_bounds = array<i64: 128, 32>}, {transform_indices = @transform_4, window_bounds = array<i64: 128, 32>}]} {
    %c0 = arith.constant 0 : index
    %c0_0 = arith.constant 0 : index
    %0 = vector.load %arg1[%c0, %c0_0] : memref<128x32xf32, #tpu.memory_space<vmem>>, vector<128x32xf32>
    %1 = arith.truncf %0 : vector<128x32xf32> to vector<128x32xbf16>
    %c0_1 = arith.constant 0 : index
    %c0_2 = arith.constant 0 : index
    %2 = vector.load %arg2[%c0_1, %c0_2] : memref<32x32xbf16, #tpu.memory_space<vmem>>, vector<32x32xbf16>
    %cst = arith.constant dense<0.000000e+00> : vector<128x32xf32>
    %3 = tpu.matmul %1, %2, %cst {dimension_numbers = #tpu.dot_dimension_numbers<[1], [0], [0], [1], [0, 0, 1, 1], [], []>} : vector<128x32xbf16>, vector<32x32xbf16>, vector<128x32xf32> -> vector<128x32xf32>
    %c0_3 = arith.constant 0 : index
    %c0_4 = arith.constant 0 : index
    %4 = vector.load %arg3[%c0_3, %c0_4] : memref<1x32xf32, #tpu.memory_space<vmem>>, vector<1x32xf32>
    %5 = vector.broadcast %4 : vector<1x32xf32> to vector<128x32xf32>
    %6 = arith.addf %3, %5 : vector<128x32xf32>
    %c0_5 = arith.constant 0 : index
    %c0_6 = arith.constant 0 : index
    %7 = vector.load %arg4[%c0_5, %c0_6] : memref<128x32xf32, #tpu.memory_space<vmem>>, vector<128x32xf32>
    %8 = arith.addf %7, %6 : vector<128x32xf32>
    %c0_7 = arith.constant 0 : index
    %c0_8 = arith.constant 0 : index
    %9 = vector.load %arg5[%c0_7, %c0_8] : memref<128x32xf32, #tpu.memory_space<vmem>>, vector<128x32xf32>
    tpu.vector_store %arg5[%c0_7, %c0_8], %8 {strides = array<i32>} : memref<128x32xf32, #tpu.memory_space<vmem>>, vector<128x32xf32>,
    return
  }
  func.func @transform_0(%arg0: i32) -> (i32, i32) {
    %c0_i32 = arith.constant 0 : i32
    %c0_i32_0 = arith.constant 0 : i32
    return %arg0, %c0_i32 : i32, i32
  }
  func.func @transform_1(%arg0: i32) -> (i32, i32) {
    %c0_i32 = arith.constant 0 : i32
    %c0_i32_0 = arith.constant 0 : i32
    %c0_i32_1 = arith.constant 0 : i32
    return %c0_i32, %c0_i32_0 : i32, i32
  }
  func.func @transform_2(%arg0: i32) -> (i32, i32) {
    %c0_i32 = arith.constant 0 : i32
    %c0_i32_0 = arith.constant 0 : i32
    %c0_i32_1 = arith.constant 0 : i32
    return %c0_i32, %c0_i32_0 : i32, i32
  }
  func.func @transform_3(%arg0: i32) -> (i32, i32) {
    %c0_i32 = arith.constant 0 : i32
    %c0_i32_0 = arith.constant 0 : i32
    return %arg0, %c0_i32 : i32, i32
  }
  func.func @transform_4(%arg0: i32) -> (i32, i32) {
    %c0_i32 = arith.constant 0 : i32
    %c0_i32_0 = arith.constant 0 : i32
    return %arg0, %c0_i32 : i32, i32
  }
}

module attributes {stable_mosaic.version = 11 : i64} {
  func.func @_ln_linear_gelu_kernel(%arg0: i32, %arg1: memref<128x32xf32, #tpu.memory_space<vmem>>, %arg2: memref<1x32xf32, #tpu.memory_space<vmem>>, %arg3: memref<1x32xf32, #tpu.memory_space<vmem>>, %arg4: memref<32x32xbf16, #tpu.memory_space<vmem>>, %arg5: memref<1x32xf32, #tpu.memory_space<vmem>>, %arg6: memref<128x32xf32, #tpu.memory_space<vmem>>) attributes {dimension_semantics = [#tpu.dimension_semantics<parallel>], iteration_bounds = array<i64: 1>, scalar_prefetch = 0 : i64, scratch_operands = 0 : i64, tpu.core_type = #tpu.core_type<tc>, window_params = [{transform_indices = @transform_0, window_bounds = array<i64: 128, 32>}, {pipeline_mode = #tpu.pipeline_mode<synchronous>, transform_indices = @transform_1, window_bounds = array<i64: 1, 32>}, {pipeline_mode = #tpu.pipeline_mode<synchronous>, transform_indices = @transform_2, window_bounds = array<i64: 1, 32>}, {pipeline_mode = #tpu.pipeline_mode<synchronous>, transform_indices = @transform_3, window_bounds = array<i64: 32, 32>}, {pipeline_mode = #tpu.pipeline_mode<synchronous>, transform_indices = @transform_4, window_bounds = array<i64: 1, 32>}, {transform_indices = @transform_5, window_bounds = array<i64: 128, 32>}]} {
    %c0 = arith.constant 0 : index
    %c0_0 = arith.constant 0 : index
    %0 = vector.load %arg1[%c0, %c0_0] : memref<128x32xf32, #tpu.memory_space<vmem>>, vector<128x32xf32>
    %c0_1 = arith.constant 0 : index
    %c0_2 = arith.constant 0 : index
    %1 = vector.load %arg2[%c0_1, %c0_2] : memref<1x32xf32, #tpu.memory_space<vmem>>, vector<1x32xf32>
    %c0_3 = arith.constant 0 : index
    %c0_4 = arith.constant 0 : index
    %2 = vector.load %arg3[%c0_3, %c0_4] : memref<1x32xf32, #tpu.memory_space<vmem>>, vector<1x32xf32>
    %cst = arith.constant dense<0.000000e+00> : vector<128xf32>
    %3 = vector.multi_reduction <add>, %0, %cst [1] : vector<128x32xf32> to vector<128xf32>
    %4 = vector.shape_cast %3 : vector<128xf32> to vector<128x1xf32>
    %cst_5 = arith.constant 3.200000e+01 : f32
    %5 = vector.broadcast %cst_5 : f32 to vector<128x1xf32>
    %6 = arith.divf %4, %5 : vector<128x1xf32>
    %7 = vector.broadcast %6 : vector<128x1xf32> to vector<128x32xf32>
    %8 = arith.subf %0, %7 : vector<128x32xf32>
    %9 = arith.mulf %8, %8 : vector<128x32xf32>
    %cst_6 = arith.constant dense<0.000000e+00> : vector<128xf32>
    %10 = vector.multi_reduction <add>, %9, %cst_6 [1] : vector<128x32xf32> to vector<128xf32>
    %11 = vector.shape_cast %10 : vector<128xf32> to vector<128x1xf32>
    %cst_7 = arith.constant 3.200000e+01 : f32
    %12 = vector.broadcast %cst_7 : f32 to vector<128x1xf32>
    %13 = arith.divf %11, %12 : vector<128x1xf32>
    %cst_8 = arith.constant 9.99999996E-13 : f32
    %14 = vector.broadcast %cst_8 : f32 to vector<128x1xf32>
    %15 = arith.addf %13, %14 : vector<128x1xf32>
    %16 = math.rsqrt %15 : vector<128x1xf32>
    %17 = vector.broadcast %16 : vector<128x1xf32> to vector<128x32xf32>
    %18 = arith.mulf %8, %17 : vector<128x32xf32>
    %19 = vector.broadcast %1 : vector<1x32xf32> to vector<128x32xf32>
    %20 = arith.mulf %18, %19 : vector<128x32xf32>
    %21 = vector.broadcast %2 : vector<1x32xf32> to vector<128x32xf32>
    %22 = arith.addf %20, %21 : vector<128x32xf32>
    %23 = arith.truncf %22 : vector<128x32xf32> to vector<128x32xbf16>
    %c0_9 = arith.constant 0 : index
    %c0_10 = arith.constant 0 : index
    %24 = vector.load %arg4[%c0_9, %c0_10] : memref<32x32xbf16, #tpu.memory_space<vmem>>, vector<32x32xbf16>
    %cst_11 = arith.constant dense<0.000000e+00> : vector<128x32xf32>
    %25 = tpu.matmul %23, %24, %cst_11 {dimension_numbers = #tpu.dot_dimension_numbers<[1], [0], [0], [1], [0, 0, 1, 1], [], []>} : vector<128x32xbf16>, vector<32x32xbf16>, vector<128x32xf32> -> vector<128x32xf32>
    %c0_12 = arith.constant 0 : index
    %c0_13 = arith.constant 0 : index
    %26 = vector.load %arg5[%c0_12, %c0_13] : memref<1x32xf32, #tpu.memory_space<vmem>>, vector<1x32xf32>
    %27 = vector.broadcast %26 : vector<1x32xf32> to vector<128x32xf32>
    %28 = arith.addf %25, %27 : vector<128x32xf32>
    %cst_14 = arith.constant 5.000000e-01 : f32
    %29 = vector.broadcast %cst_14 : f32 to vector<128x32xf32>
    %30 = arith.mulf %29, %28 : vector<128x32xf32>
    %cst_15 = arith.constant 4.471500e-02 : f32
    %31 = vector.broadcast %cst_15 : f32 to vector<128x32xf32>
    %32 = arith.mulf %31, %28 : vector<128x32xf32>
    %33 = arith.mulf %32, %28 : vector<128x32xf32>
    %34 = arith.mulf %33, %28 : vector<128x32xf32>
    %35 = arith.addf %28, %34 : vector<128x32xf32>
    %cst_16 = arith.constant 0.797884583 : f32
    %36 = vector.broadcast %cst_16 : f32 to vector<128x32xf32>
    %37 = arith.mulf %36, %35 : vector<128x32xf32>
    %38 = math.tanh %37 : vector<128x32xf32>
    %cst_17 = arith.constant 1.000000e+00 : f32
    %39 = vector.broadcast %cst_17 : f32 to vector<128x32xf32>
    %40 = arith.addf %39, %38 : vector<128x32xf32>
    %41 = arith.mulf %30, %40 : vector<128x32xf32>
    %c0_18 = arith.constant 0 : index
    %c0_19 = arith.constant 0 : index
    %42 = vector.load %arg6[%c0_18, %c0_19] : memref<128x32xf32, #tpu.memory_space<vmem>>, vector<128x32xf32>
    tpu.vector_store %arg6[%c0_18, %c0_19], %41 {strides = array<i32>} : memref<128x32xf32, #tpu.memory_space<vmem>>, vector<128x32xf32>,
    return
  }
  func.func @transform_0(%arg0: i32) -> (i32, i32) {
    %c0_i32 = arith.constant 0 : i32
    %c0_i32_0 = arith.constant 0 : i32
    return %arg0, %c0_i32 : i32, i32
  }
  func.func @transform_1(%arg0: i32) -> (i32, i32) {
    %c0_i32 = arith.constant 0 : i32
    %c0_i32_0 = arith.constant 0 : i32
    %c0_i32_1 = arith.constant 0 : i32
    return %c0_i32, %c0_i32_0 : i32, i32
  }
  func.func @transform_2(%arg0: i32) -> (i32, i32) {
    %c0_i32 = arith.constant 0 : i32
    %c0_i32_0 = arith.constant 0 : i32
    %c0_i32_1 = arith.constant 0 : i32
    return %c0_i32, %c0_i32_0 : i32, i32
  }
  func.func @transform_3(%arg0: i32) -> (i32, i32) {
    %c0_i32 = arith.constant 0 : i32
    %c0_i32_0 = arith.constant 0 : i32
    %c0_i32_1 = arith.constant 0 : i32
    return %c0_i32, %c0_i32_0 : i32, i32
  }
  func.func @transform_4(%arg0: i32) -> (i32, i32) {
    %c0_i32 = arith.constant 0 : i32
    %c0_i32_0 = arith.constant 0 : i32
    %c0_i32_1 = arith.constant 0 : i32
    return %c0_i32, %c0_i32_0 : i32, i32
  }
  func.func @transform_5(%arg0: i32) -> (i32, i32) {
    %c0_i32 = arith.constant 0 : i32
    %c0_i32_0 = arith.constant 0 : i32
    return %arg0, %c0_i32 : i32, i32
  }
}

module attributes {stable_mosaic.version = 11 : i64} {
  func.func @_head_kernel(%arg0: i32, %arg1: memref<128x32xf32, #tpu.memory_space<vmem>>, %arg2: memref<1x32xf32, #tpu.memory_space<vmem>>, %arg3: memref<1x32xf32, #tpu.memory_space<vmem>>, %arg4: memref<32x32xbf16, #tpu.memory_space<vmem>>, %arg5: memref<1x32xf32, #tpu.memory_space<vmem>>, %arg6: memref<32x1xbf16, #tpu.memory_space<vmem>>, %arg7: memref<1x1xf32, #tpu.memory_space<vmem>>, %arg8: memref<128x1xf32, #tpu.memory_space<vmem>>) attributes {dimension_semantics = [#tpu.dimension_semantics<parallel>], iteration_bounds = array<i64: 1>, scalar_prefetch = 0 : i64, scratch_operands = 0 : i64, tpu.core_type = #tpu.core_type<tc>, window_params = [{transform_indices = @transform_0, window_bounds = array<i64: 128, 32>}, {pipeline_mode = #tpu.pipeline_mode<synchronous>, transform_indices = @transform_1, window_bounds = array<i64: 1, 32>}, {pipeline_mode = #tpu.pipeline_mode<synchronous>, transform_indices = @transform_2, window_bounds = array<i64: 1, 32>}, {pipeline_mode = #tpu.pipeline_mode<synchronous>, transform_indices = @transform_3, window_bounds = array<i64: 32, 32>}, {pipeline_mode = #tpu.pipeline_mode<synchronous>, transform_indices = @transform_4, window_bounds = array<i64: 1, 32>}, {pipeline_mode = #tpu.pipeline_mode<synchronous>, transform_indices = @transform_5, window_bounds = array<i64: 32, 1>}, {pipeline_mode = #tpu.pipeline_mode<synchronous>, transform_indices = @transform_6, window_bounds = array<i64: 1, 1>}, {transform_indices = @transform_7, window_bounds = array<i64: 128, 1>}]} {
    %c0 = arith.constant 0 : index
    %c0_0 = arith.constant 0 : index
    %0 = vector.load %arg1[%c0, %c0_0] : memref<128x32xf32, #tpu.memory_space<vmem>>, vector<128x32xf32>
    %c0_1 = arith.constant 0 : index
    %c0_2 = arith.constant 0 : index
    %1 = vector.load %arg2[%c0_1, %c0_2] : memref<1x32xf32, #tpu.memory_space<vmem>>, vector<1x32xf32>
    %c0_3 = arith.constant 0 : index
    %c0_4 = arith.constant 0 : index
    %2 = vector.load %arg3[%c0_3, %c0_4] : memref<1x32xf32, #tpu.memory_space<vmem>>, vector<1x32xf32>
    %cst = arith.constant dense<0.000000e+00> : vector<128xf32>
    %3 = vector.multi_reduction <add>, %0, %cst [1] : vector<128x32xf32> to vector<128xf32>
    %4 = vector.shape_cast %3 : vector<128xf32> to vector<128x1xf32>
    %cst_5 = arith.constant 3.200000e+01 : f32
    %5 = vector.broadcast %cst_5 : f32 to vector<128x1xf32>
    %6 = arith.divf %4, %5 : vector<128x1xf32>
    %7 = vector.broadcast %6 : vector<128x1xf32> to vector<128x32xf32>
    %8 = arith.subf %0, %7 : vector<128x32xf32>
    %9 = arith.mulf %8, %8 : vector<128x32xf32>
    %cst_6 = arith.constant dense<0.000000e+00> : vector<128xf32>
    %10 = vector.multi_reduction <add>, %9, %cst_6 [1] : vector<128x32xf32> to vector<128xf32>
    %11 = vector.shape_cast %10 : vector<128xf32> to vector<128x1xf32>
    %cst_7 = arith.constant 3.200000e+01 : f32
    %12 = vector.broadcast %cst_7 : f32 to vector<128x1xf32>
    %13 = arith.divf %11, %12 : vector<128x1xf32>
    %cst_8 = arith.constant 9.99999996E-13 : f32
    %14 = vector.broadcast %cst_8 : f32 to vector<128x1xf32>
    %15 = arith.addf %13, %14 : vector<128x1xf32>
    %16 = math.rsqrt %15 : vector<128x1xf32>
    %17 = vector.broadcast %16 : vector<128x1xf32> to vector<128x32xf32>
    %18 = arith.mulf %8, %17 : vector<128x32xf32>
    %19 = vector.broadcast %1 : vector<1x32xf32> to vector<128x32xf32>
    %20 = arith.mulf %18, %19 : vector<128x32xf32>
    %21 = vector.broadcast %2 : vector<1x32xf32> to vector<128x32xf32>
    %22 = arith.addf %20, %21 : vector<128x32xf32>
    %23 = arith.truncf %22 : vector<128x32xf32> to vector<128x32xbf16>
    %c0_9 = arith.constant 0 : index
    %c0_10 = arith.constant 0 : index
    %24 = vector.load %arg4[%c0_9, %c0_10] : memref<32x32xbf16, #tpu.memory_space<vmem>>, vector<32x32xbf16>
    %cst_11 = arith.constant dense<0.000000e+00> : vector<128x32xf32>
    %25 = tpu.matmul %23, %24, %cst_11 {dimension_numbers = #tpu.dot_dimension_numbers<[1], [0], [0], [1], [0, 0, 1, 1], [], []>} : vector<128x32xbf16>, vector<32x32xbf16>, vector<128x32xf32> -> vector<128x32xf32>
    %c0_12 = arith.constant 0 : index
    %c0_13 = arith.constant 0 : index
    %26 = vector.load %arg5[%c0_12, %c0_13] : memref<1x32xf32, #tpu.memory_space<vmem>>, vector<1x32xf32>
    %27 = vector.broadcast %26 : vector<1x32xf32> to vector<128x32xf32>
    %28 = arith.addf %25, %27 : vector<128x32xf32>
    %cst_14 = arith.constant 5.000000e-01 : f32
    %29 = vector.broadcast %cst_14 : f32 to vector<128x32xf32>
    %30 = arith.mulf %29, %28 : vector<128x32xf32>
    %cst_15 = arith.constant 4.471500e-02 : f32
    %31 = vector.broadcast %cst_15 : f32 to vector<128x32xf32>
    %32 = arith.mulf %31, %28 : vector<128x32xf32>
    %33 = arith.mulf %32, %28 : vector<128x32xf32>
    %34 = arith.mulf %33, %28 : vector<128x32xf32>
    %35 = arith.addf %28, %34 : vector<128x32xf32>
    %cst_16 = arith.constant 0.797884583 : f32
    %36 = vector.broadcast %cst_16 : f32 to vector<128x32xf32>
    %37 = arith.mulf %36, %35 : vector<128x32xf32>
    %38 = math.tanh %37 : vector<128x32xf32>
    %cst_17 = arith.constant 1.000000e+00 : f32
    %39 = vector.broadcast %cst_17 : f32 to vector<128x32xf32>
    %40 = arith.addf %39, %38 : vector<128x32xf32>
    %41 = arith.mulf %30, %40 : vector<128x32xf32>
    %42 = arith.truncf %41 : vector<128x32xf32> to vector<128x32xbf16>
    %c0_18 = arith.constant 0 : index
    %c0_19 = arith.constant 0 : index
    %43 = vector.load %arg6[%c0_18, %c0_19] : memref<32x1xbf16, #tpu.memory_space<vmem>>, vector<32x1xbf16>
    %cst_20 = arith.constant dense<0.000000e+00> : vector<128x1xf32>
    %44 = tpu.matmul %42, %43, %cst_20 {dimension_numbers = #tpu.dot_dimension_numbers<[1], [0], [0], [1], [0, 0, 1, 1], [], []>} : vector<128x32xbf16>, vector<32x1xbf16>, vector<128x1xf32> -> vector<128x1xf32>
    %c0_21 = arith.constant 0 : index
    %c0_22 = arith.constant 0 : index
    %45 = vector.load %arg7[%c0_21, %c0_22] : memref<1x1xf32, #tpu.memory_space<vmem>>, vector<1x1xf32>
    %46 = vector.broadcast %45 : vector<1x1xf32> to vector<128x1xf32>
    %47 = arith.addf %44, %46 : vector<128x1xf32>
    %c0_23 = arith.constant 0 : index
    %c0_24 = arith.constant 0 : index
    %48 = vector.load %arg8[%c0_23, %c0_24] : memref<128x1xf32, #tpu.memory_space<vmem>>, vector<128x1xf32>
    tpu.vector_store %arg8[%c0_23, %c0_24], %47 {strides = array<i32>} : memref<128x1xf32, #tpu.memory_space<vmem>>, vector<128x1xf32>,
    return
  }
  func.func @transform_0(%arg0: i32) -> (i32, i32) {
    %c0_i32 = arith.constant 0 : i32
    %c0_i32_0 = arith.constant 0 : i32
    return %arg0, %c0_i32 : i32, i32
  }
  func.func @transform_1(%arg0: i32) -> (i32, i32) {
    %c0_i32 = arith.constant 0 : i32
    %c0_i32_0 = arith.constant 0 : i32
    %c0_i32_1 = arith.constant 0 : i32
    return %c0_i32, %c0_i32_0 : i32, i32
  }
  func.func @transform_2(%arg0: i32) -> (i32, i32) {
    %c0_i32 = arith.constant 0 : i32
    %c0_i32_0 = arith.constant 0 : i32
    %c0_i32_1 = arith.constant 0 : i32
    return %c0_i32, %c0_i32_0 : i32, i32
  }
  func.func @transform_3(%arg0: i32) -> (i32, i32) {
    %c0_i32 = arith.constant 0 : i32
    %c0_i32_0 = arith.constant 0 : i32
    %c0_i32_1 = arith.constant 0 : i32
    return %c0_i32, %c0_i32_0 : i32, i32
  }
  func.func @transform_4(%arg0: i32) -> (i32, i32) {
    %c0_i32 = arith.constant 0 : i32
    %c0_i32_0 = arith.constant 0 : i32
    %c0_i32_1 = arith.constant 0 : i32
    return %c0_i32, %c0_i32_0 : i32, i32
  }
  func.func @transform_5(%arg0: i32) -> (i32, i32) {
    %c0_i32 = arith.constant 0 : i32
    %c0_i32_0 = arith.constant 0 : i32
    %c0_i32_1 = arith.constant 0 : i32
    return %c0_i32, %c0_i32_0 : i32, i32
  }
  func.func @transform_6(%arg0: i32) -> (i32, i32) {
    %c0_i32 = arith.constant 0 : i32
    %c0_i32_0 = arith.constant 0 : i32
    %c0_i32_1 = arith.constant 0 : i32
    return %c0_i32, %c0_i32_0 : i32, i32
  }
  func.func @transform_7(%arg0: i32) -> (i32, i32) {
    %c0_i32 = arith.constant 0 : i32
    %c0_i32_0 = arith.constant 0 : i32
    return %arg0, %c0_i32 : i32, i32
  }
}

</mosaic_0001>

<bundles_post_ra>
// kernel: squeeze.0
= control target key start
LH: loop header
LB: loop body
LE: loop exit
PB: predicated region body
PF: predicated region fallthrough
CT: control target
= control target key end

     0   :  { %vm3_vm0 = vcmask 7168   ;;  %s264_s8 = smov 125   ;;  %s265_s17 = smov 126   ;;  %s547_s0 = inlined_call_operand.vmem [shape: f32[1,8,16], index: 0, kind: input, shape index: {}]   ;;  %s548_s1 = inlined_call_operand.vmem [shape: f32[128,1], index: 1, kind: output, shape index: {}]  }
   0x1   :  { %v8_v0 = vld [vmem:[%s547_s0] sm:$0xff]   ;;  %s263_s0 = smov 127   ;;  %s266_s18 = smov 124  }
   0x2   :  { %9 = vrot.lane.b32.xlu0 %v8_v0, %s263_s0  ;;  %33 = vrot.lane.b32.xlu1 %v8_v0, %s264_s8  ;;  %4 = vst.msk [vmem:[%s548_s1] ss:$16 sm:$0x3] %vm3_vm0, %v8_v0   ;;  %5 = vst.msk [vmem:[%s548_s1] ss:$16 sm:$0xc] %vm3_vm0, %v8_v0  }
   0x3   :  { %6 = vst.msk [vmem:[%s548_s1] ss:$16 sm:$0x30] %vm3_vm0, %v8_v0   ;;  %7 = vst.msk [vmem:[%s548_s1] ss:$16 sm:$0xc0] %vm3_vm0, %v8_v0  }
   0x4   :  { %s267_s19 = smov 123   ;;  %s268_s20 = smov 122  }
   0x5   :  { %s269_s21 = smov 121   ;;  %s270_s22 = smov 120  }
   0x6   :  { %21 = vrot.lane.b32.xlu0 %v8_v0, %s265_s17  ;;  %45 = vrot.lane.b32.xlu1 %v8_v0, %s266_s18  ;;  %s271_s23 = smov 119   ;;  %s272_s24 = smov 118  }
   0x7   :  { %s273_s25 = smov 117   ;;  %s274_s26 = smov 116  }
   0x8   :  { %s275_s27 = smov 115   ;;  %s276_s28 = smov 114  }
   0x9   :  { %s277_s29 = smov 113  }
   0xa   :  { %57 = vrot.lane.b32.xlu0 %v8_v0, %s267_s19  ;;  %69 = vrot.lane.b32.xlu1 %v8_v0, %s268_s20 }
   0xe   :  { %81 = vrot.lane.b32.xlu0 %v8_v0, %s269_s21  ;;  %93 = vrot.lane.b32.xlu1 %v8_v0, %s270_s22 }
  0x12   :  { %105 = vrot.lane.b32.xlu0 %v8_v0, %s271_s23  ;;  %117 = vrot.lane.b32.xlu1 %v8_v0, %s272_s24 }
  0x16   :  { %129 = vrot.lane.b32.xlu0 %v8_v0, %s273_s25  ;;  %141 = vrot.lane.b32.xlu1 %v8_v0, %s274_s26 }
  0x1a   :  { %153 = vrot.lane.b32.xlu0 %v8_v0, %s275_s27  ;;  %165 = vrot.lane.b32.xlu1 %v8_v0, %s276_s28 }
  0x1e   :  { %177 = vrot.lane.b32.xlu0 %v8_v0, %s277_s29 }
  0x74   :  { %v10_v1 = vpop.permute.xlu0 %9   ;;  %v34_v2 = vpop.permute.xlu1 %33  }
  0x75   :  { %188 = vst.msk [vmem:[%s548_s1 + $0x1] ss:$16 sm:$0x3] %vm3_vm0, %v10_v1   ;;  %189 = vst.msk [vmem:[%s548_s1 + $0x1] ss:$16 sm:$0xc] %vm3_vm0, %v10_v1  }
  0x76   :  { %190 = vst.msk [vmem:[%s548_s1 + $0x1] ss:$16 sm:$0x30] %vm3_vm0, %v10_v1   ;;  %191 = vst.msk [vmem:[%s548_s1 + $0x1] ss:$16 sm:$0xc0] %vm3_vm0, %v10_v1  }
  0x77   :  { %196 = vst.msk [vmem:[%s548_s1 + $0x3] ss:$16 sm:$0x3] %vm3_vm0, %v34_v2   ;;  %197 = vst.msk [vmem:[%s548_s1 + $0x3] ss:$16 sm:$0xc] %vm3_vm0, %v34_v2  }
  0x78   :  { %198 = vst.msk [vmem:[%s548_s1 + $0x3] ss:$16 sm:$0x30] %vm3_vm0, %v34_v2   ;;  %199 = vst.msk [vmem:[%s548_s1 + $0x3] ss:$16 sm:$0xc0] %vm3_vm0, %v34_v2   ;;  %v22_v3 = vpop.permute.xlu0 %21   ;;  %v46_v4 = vpop.permute.xlu1 %45  }
  0x79   :  { %192 = vst.msk [vmem:[%s548_s1 + $0x2] ss:$16 sm:$0x3] %vm3_vm0, %v22_v3   ;;  %193 = vst.msk [vmem:[%s548_s1 + $0x2] ss:$16 sm:$0xc] %vm3_vm0, %v22_v3  }
  0x7a   :  { %194 = vst.msk [vmem:[%s548_s1 + $0x2] ss:$16 sm:$0x30] %vm3_vm0, %v22_v3   ;;  %195 = vst.msk [vmem:[%s548_s1 + $0x2] ss:$16 sm:$0xc0] %vm3_vm0, %v22_v3  }
  0x7b   :  { %200 = vst.msk [vmem:[%s548_s1 + $0x4] ss:$16 sm:$0x3] %vm3_vm0, %v46_v4   ;;  %201 = vst.msk [vmem:[%s548_s1 + $0x4] ss:$16 sm:$0xc] %vm3_vm0, %v46_v4  }
  0x7c   :  { %202 = vst.msk [vmem:[%s548_s1 + $0x4] ss:$16 sm:$0x30] %vm3_vm0, %v46_v4   ;;  %203 = vst.msk [vmem:[%s548_s1 + $0x4] ss:$16 sm:$0xc0] %vm3_vm0, %v46_v4   ;;  %v58_v5 = vpop.permute.xlu0 %57   ;;  %v70_v6 = vpop.permute.xlu1 %69  }
  0x7d   :  { %204 = vst.msk [vmem:[%s548_s1 + $0x5] ss:$16 sm:$0x3] %vm3_vm0, %v58_v5   ;;  %205 = vst.msk [vmem:[%s548_s1 + $0x5] ss:$16 sm:$0xc] %vm3_vm0, %v58_v5  }
  0x7e   :  { %206 = vst.msk [vmem:[%s548_s1 + $0x5] ss:$16 sm:$0x30] %vm3_vm0, %v58_v5   ;;  %207 = vst.msk [vmem:[%s548_s1 + $0x5] ss:$16 sm:$0xc0] %vm3_vm0, %v58_v5  }
  0x7f   :  { %208 = vst.msk [vmem:[%s548_s1 + $0x6] ss:$16 sm:$0x3] %vm3_vm0, %v70_v6   ;;  %209 = vst.msk [vmem:[%s548_s1 + $0x6] ss:$16 sm:$0xc] %vm3_vm0, %v70_v6  }
  0x80   :  { %210 = vst.msk [vmem:[%s548_s1 + $0x6] ss:$16 sm:$0x30] %vm3_vm0, %v70_v6   ;;  %211 = vst.msk [vmem:[%s548_s1 + $0x6] ss:$16 sm:$0xc0] %vm3_vm0, %v70_v6   ;;  %v82_v7 = vpop.permute.xlu0 %81   ;;  %v94_v8 = vpop.permute.xlu1 %93  }
  0x81   :  { %212 = vst.msk [vmem:[%s548_s1 + $0x7] ss:$16 sm:$0x3] %vm3_vm0, %v82_v7   ;;  %213 = vst.msk [vmem:[%s548_s1 + $0x7] ss:$16 sm:$0xc] %vm3_vm0, %v82_v7  }
  0x82   :  { %214 = vst.msk [vmem:[%s548_s1 + $0x7] ss:$16 sm:$0x30] %vm3_vm0, %v82_v7   ;;  %215 = vst.msk [vmem:[%s548_s1 + $0x7] ss:$16 sm:$0xc0] %vm3_vm0, %v82_v7  }
  0x83   :  { %216 = vst.msk [vmem:[%s548_s1 + $0x8] ss:$16 sm:$0x3] %vm3_vm0, %v94_v8   ;;  %217 = vst.msk [vmem:[%s548_s1 + $0x8] ss:$16 sm:$0xc] %vm3_vm0, %v94_v8  }
  0x84   :  { %218 = vst.msk [vmem:[%s548_s1 + $0x8] ss:$16 sm:$0x30] %vm3_vm0, %v94_v8   ;;  %219 = vst.msk [vmem:[%s548_s1 + $0x8] ss:$16 sm:$0xc0] %vm3_vm0, %v94_v8   ;;  %v106_v9 = vpop.permute.xlu0 %105   ;;  %v118_v10 = vpop.permute.xlu1 %117  }
  0x85   :  { %220 = vst.msk [vmem:[%s548_s1 + $0x9] ss:$16 sm:$0x3] %vm3_vm0, %v106_v9   ;;  %221 = vst.msk [vmem:[%s548_s1 + $0x9] ss:$16 sm:$0xc] %vm3_vm0, %v106_v9  }
  0x86   :  { %222 = vst.msk [vmem:[%s548_s1 + $0x9] ss:$16 sm:$0x30] %vm3_vm0, %v106_v9   ;;  %223 = vst.msk [vmem:[%s548_s1 + $0x9] ss:$16 sm:$0xc0] %vm3_vm0, %v106_v9  }
  0x87   :  { %224 = vst.msk [vmem:[%s548_s1 + $0xa] ss:$16 sm:$0x3] %vm3_vm0, %v118_v10   ;;  %225 = vst.msk [vmem:[%s548_s1 + $0xa] ss:$16 sm:$0xc] %vm3_vm0, %v118_v10  }
  0x88   :  { %226 = vst.msk [vmem:[%s548_s1 + $0xa] ss:$16 sm:$0x30] %vm3_vm0, %v118_v10   ;;  %227 = vst.msk [vmem:[%s548_s1 + $0xa] ss:$16 sm:$0xc0] %vm3_vm0, %v118_v10   ;;  %v130_v11 = vpop.permute.xlu0 %129   ;;  %v142_v12 = vpop.permute.xlu1 %141  }
  0x89   :  { %228 = vst.msk [vmem:[%s548_s1 + $0xb] ss:$16 sm:$0x3] %vm3_vm0, %v130_v11   ;;  %229 = vst.msk [vmem:[%s548_s1 + $0xb] ss:$16 sm:$0xc] %vm3_vm0, %v130_v11  }
  0x8a   :  { %230 = vst.msk [vmem:[%s548_s1 + $0xb] ss:$16 sm:$0x30] %vm3_vm0, %v130_v11   ;;  %231 = vst.msk [vmem:[%s548_s1 + $0xb] ss:$16 sm:$0xc0] %vm3_vm0, %v130_v11  }
  0x8b   :  { %232 = vst.msk [vmem:[%s548_s1 + $0xc] ss:$16 sm:$0x3] %vm3_vm0, %v142_v12   ;;  %233 = vst.msk [vmem:[%s548_s1 + $0xc] ss:$16 sm:$0xc] %vm3_vm0, %v142_v12  }
  0x8c   :  { %234 = vst.msk [vmem:[%s548_s1 + $0xc] ss:$16 sm:$0x30] %vm3_vm0, %v142_v12   ;;  %235 = vst.msk [vmem:[%s548_s1 + $0xc] ss:$16 sm:$0xc0] %vm3_vm0, %v142_v12   ;;  %v154_v13 = vpop.permute.xlu0 %153   ;;  %v166_v14 = vpop.permute.xlu1 %165  }
  0x8d   :  { %236 = vst.msk [vmem:[%s548_s1 + $0xd] ss:$16 sm:$0x3] %vm3_vm0, %v154_v13   ;;  %237 = vst.msk [vmem:[%s548_s1 + $0xd] ss:$16 sm:$0xc] %vm3_vm0, %v154_v13  }
  0x8e   :  { %238 = vst.msk [vmem:[%s548_s1 + $0xd] ss:$16 sm:$0x30] %vm3_vm0, %v154_v13   ;;  %239 = vst.msk [vmem:[%s548_s1 + $0xd] ss:$16 sm:$0xc0] %vm3_vm0, %v154_v13  }
  0x8f   :  { %240 = vst.msk [vmem:[%s548_s1 + $0xe] ss:$16 sm:$0x3] %vm3_vm0, %v166_v14   ;;  %241 = vst.msk [vmem:[%s548_s1 + $0xe] ss:$16 sm:$0xc] %vm3_vm0, %v166_v14  }
  0x90   :  { %242 = vst.msk [vmem:[%s548_s1 + $0xe] ss:$16 sm:$0x30] %vm3_vm0, %v166_v14   ;;  %243 = vst.msk [vmem:[%s548_s1 + $0xe] ss:$16 sm:$0xc0] %vm3_vm0, %v166_v14   ;;  %v178_v15 = vpop.permute.xlu0 %177  }
  0x91   :  { %244 = vst.msk [vmem:[%s548_s1 + $0xf] ss:$16 sm:$0x3] %vm3_vm0, %v178_v15   ;;  %245 = vst.msk [vmem:[%s548_s1 + $0xf] ss:$16 sm:$0xc] %vm3_vm0, %v178_v15  }
  0x92   :  { %246 = vst.msk [vmem:[%s548_s1 + $0xf] ss:$16 sm:$0x30] %vm3_vm0, %v178_v15   ;;  %247 = vst.msk [vmem:[%s548_s1 + $0xf] ss:$16 sm:$0xc0] %vm3_vm0, %v178_v15  }

// kernel: model_forward.19
= control target key start
LH: loop header
LB: loop body
LE: loop exit
PB: predicated region body
PF: predicated region fallthrough
CT: control target
= control target key end

     0   :  { %13 = vsyncpa [#allocation3], 0  ;;  %vm44_vm0 = vcmask 261120   ;;  %s2017_s0 = inlined_call_operand.vmem [shape: f32[128,32], index: 0, kind: input, shape index: {}]   ;;  %s2018_s1 = inlined_call_operand.vmem [shape: f32[1,32], index: 1, kind: input, shape index: {}]   ;;  %s2019_s2 = inlined_call_operand.vmem [shape: f32[1,32], index: 2, kind: input, shape index: {}]   ;;  %s2020_s3 = inlined_call_operand.vmem [shape: bf16[32,96], index: 3, kind: input, shape index: {}]   ;;  %s2021_s4 = inlined_call_operand.vmem [shape: f32[1,96], index: 4, kind: input, shape index: {}]   ;;  %s2022_s5 = inlined_call_operand.hbm [shape: f32[4,128,8], index: 5, kind: output, shape index: {0}]   ;;  %s2023_s6 = inlined_call_operand.hbm [shape: f32[4,128,8], index: 6, kind: output, shape index: {1}]   ;;  %s2024_s7 = inlined_call_operand.hbm [shape: f32[128,32], index: 7, kind: output, shape index: {2}]  }
   0x1   :  { %v26_v0 = vld [vmem:[%s2017_s0] sm:$0xff]  ;;  %v27_v2 = vld [vmem:[%s2017_s0 + $0x8] sm:$0xff]  ;;  %v28_v8 = vld [vmem:[%s2017_s0 + $0x10] sm:$0xff] }
   0x2   :  { %v34_v1 = vld [vmem:[%s2017_s0 + $0x40] sm:$0xff]  ;;  %v45_v3 = vsel %vm44_vm0, %v26_v0, 0.0  ;;  %v35_v5 = vld [vmem:[%s2017_s0 + $0x48] sm:$0xff]  ;;  %v48_v6 = vsel %vm44_vm0, %v27_v2, 0.0  ;;  %v29_v9 = vld [vmem:[%s2017_s0 + $0x18] sm:$0xff]  ;;  %v51_v10 = vsel %vm44_vm0, %v28_v8, 0.0 }
   0x3   :  { %v69_v4 = vsel %vm44_vm0, %v34_v1, 0.0  ;;  %46 = vadd.xlane.f32.xlu0 %v45_v3  ;;  %v72_v7 = vsel %vm44_vm0, %v35_v5, 0.0  ;;  %v54_v11 = vsel %vm44_vm0, %v29_v9, 0.0 }
   0x4   :  { %70 = vadd.xlane.f32.xlu1 %v69_v4 }
   0x7   :  { %49 = vadd.xlane.f32.xlu0 %v48_v6 }
   0x8   :  { %73 = vadd.xlane.f32.xlu1 %v72_v7 }
   0x9   :  { %14 = vsyncpa [#allocation5], 0  ;;  %v1292_v12 = vld [vmem:[%s2017_s0 + $0x50] sm:$0xff]  ;;  %v1297_v13 = vld [vmem:[%s2017_s0 + $0x58] sm:$0xff]  ;;  %vm450_vm1 = vcmask 64512   ;;  %s1212_s16 = smov 96  }
   0xa   :  { %v75_v14 = vsel %vm44_vm0, %v1292_v12, 0.0  ;;  %v78_v15 = vsel %vm44_vm0, %v1297_v13, 0.0  ;;  %v1306_v16 = vld [vmem:[%s2017_s0 + $0x20] sm:$0xff]  ;;  %v1311_v17 = vld [vmem:[%s2017_s0 + $0x28] sm:$0xff]  ;;  %v1334_v24 = vld [vmem:[%s2017_s0 + $0x30] sm:$0xff]  ;;  %s1214_s17 = smov 88  }
   0xb   :  { %52 = vadd.xlane.f32.xlu0 %v51_v10  ;;  %v57_v18 = vsel %vm44_vm0, %v1306_v16, 0.0  ;;  %v60_v19 = vsel %vm44_vm0, %v1311_v17, 0.0  ;;  %v1320_v20 = vld [vmem:[%s2017_s0 + $0x60] sm:$0xff]  ;;  %v1325_v21 = vld [vmem:[%s2017_s0 + $0x68] sm:$0xff]  ;;  %v1339_v25 = vld [vmem:[%s2017_s0 + $0x38] sm:$0xff]  ;;  %v63_v26 = vsel %vm44_vm0, %v1334_v24, 0.0 }
   0xc   :  { %55 = vadd.xlane.f32.xlu1 %v54_v11  ;;  %v81_v22 = vsel %vm44_vm0, %v1320_v20, 0.0  ;;  %v84_v23 = vsel %vm44_vm0, %v1325_v21, 0.0  ;;  %v66_v27 = vsel %vm44_vm0, %v1339_v25, 0.0  ;;  %v1348_v28 = vld [vmem:[%s2017_s0 + $0x70] sm:$0xff]  ;;  %v1353_v29 = vld [vmem:[%s2017_s0 + $0x78] sm:$0xff]  ;;  %s1215_s18 = smov 112  }
   0xd   :  { %v87_v30 = vsel %vm44_vm0, %v1348_v28, 0.0  ;;  %v90_v31 = vsel %vm44_vm0, %v1353_v29, 0.0  ;;  %s1216_s19 = smov 80   ;;  %s1217_s20 = smov 104  }
   0xe   :  { %s1218_s21 = smov 72   ;;  %s1219_s22 = smov 64  }
   0xf   :  { %76 = vadd.xlane.f32.xlu0 %v75_v14  ;;  %s1220_s23 = smov [#allocation2]  }
  0x10   :  { %79 = vadd.xlane.f32.xlu1 %v78_v15  ;;  %s1006_s24 = sshll.u32 %s1220_s23, 4  ;;  %s1007_s24 = int_to_ptr.vmem [resolvable:$true] %s1006_s24 }
  0x11   :  { %s1142_s25 = scalar_lea.vmem %s1007_s24, 8192  ;;  %p1147_p1 = scmp.lt.s32.totalorder %s1007_s24, %s1007_s24 }
  0x12   :  { %p1143_p0 = scmp.ne.s32.totalorder %s1007_s24, %s1142_s25  ;;  %p1148_p2 = scmp.lt.s32.totalorder %s1142_s25, %s1142_s25 }
  0x13   :  { %58 = vadd.xlane.f32.xlu0 %v57_v18 }
  0x14   :  { %61 = vadd.xlane.f32.xlu1 %v60_v19  ;;  %p1149_p3 = por %p1148_p2, %p1147_p1 }
  0x16   :  { %p1150_p4 = pnand %p1149_p3, %p1143_p0 }
  0x17   :  { %82 = vadd.xlane.f32.xlu0 %v81_v22 }
  0x18   :  { %85 = vadd.xlane.f32.xlu1 %v84_v23 }
  0x1b   :  { %64 = vadd.xlane.f32.xlu0 %v63_v26 }
  0x1c   :  { %67 = vadd.xlane.f32.xlu1 %v66_v27 }
  0x1f   :  { %88 = vadd.xlane.f32.xlu0 %v87_v30 }
  0x20   :  { %91 = vadd.xlane.f32.xlu1 %v90_v31 }
  0x90   :  { %v47_v32 = vpop.xlane.xlu0 %46 }
  0x91   :  { %v71_v33 = vpop.xlane.xlu1 %70  ;;  %v94_v34 = vmul.f32 0.03125, %v47_v32 }
  0x92   :  { %v102_v35 = vmul.f32 0.03125, %v71_v33 }
  0x93   :  { %v1359_v36 = vsub.f32 %v26_v0, %v94_v34 }
  0x94   :  { %v1361_v37 = vsub.f32 %v34_v1, %v102_v35  ;;  %v50_v38 = vpop.xlane.xlu0 %49 }
  0x95   :  { %v74_v39 = vpop.xlane.xlu1 %73  ;;  %v95_v40 = vmul.f32 0.03125, %v50_v38  ;;  %v126_v42 = vmul.f32 %v1359_v36, %v1359_v36 }
  0x96   :  { %v103_v41 = vmul.f32 0.03125, %v74_v39  ;;  %v134_v43 = vmul.f32 %v1361_v37, %v1361_v37 }
  0x97   :  { %v1367_v44 = vsub.f32 %v27_v2, %v95_v40  ;;  %v142_v46 = vsel %vm44_vm0, %v126_v42, 0.0 }
  0x98   :  { %v1369_v45 = vsub.f32 %v35_v5, %v103_v41  ;;  %143 = vadd.xlane.f32.xlu0 %v142_v46  ;;  %v53_v47 = vpop.xlane.xlu0 %52  ;;  %v166_v49 = vsel %vm44_vm0, %v134_v43, 0.0 }
  0x99   :  { %v56_v48 = vpop.xlane.xlu1 %55  ;;  %v96_v50 = vmul.f32 0.03125, %v53_v47  ;;  %v127_v52 = vmul.f32 %v1367_v44, %v1367_v44 }
  0x9a   :  { %v97_v51 = vmul.f32 0.03125, %v56_v48  ;;  %v135_v53 = vmul.f32 %v1369_v45, %v1369_v45 }
  0x9b   :  { %v1377_v54 = vsub.f32 %v28_v8, %v96_v50  ;;  %v145_v56 = vsel %vm44_vm0, %v127_v52, 0.0 }
  0x9c   :  { %v1379_v55 = vsub.f32 %v29_v9, %v97_v51  ;;  %167 = vadd.xlane.f32.xlu0 %v166_v49  ;;  %146 = vadd.xlane.f32.xlu1 %v145_v56  ;;  %v77_v57 = vpop.xlane.xlu0 %76  ;;  %v169_v59 = vsel %vm44_vm0, %v135_v53, 0.0  ;;  %v1109_v53 = vld [vmem:[%s2020_s3 + $0x8] sm:$0xff]  }
  0x9d   :  { %v80_v58 = vpop.xlane.xlu1 %79  ;;  %v104_v60 = vmul.f32 0.03125, %v77_v57  ;;  %v128_v62 = vmul.f32 %v1377_v54, %v1377_v54 }
  0x9e   :  { %v105_v61 = vmul.f32 0.03125, %v80_v58  ;;  %v129_v63 = vmul.f32 %v1379_v55, %v1379_v55 }
  0x9f   :  { %v1388_v0 = vsub.f32 %v1292_v12, %v104_v60  ;;  %v148_v2 = vsel %vm44_vm0, %v128_v62, 0.0 }
  0xa0   :  { %v1391_v1 = vsub.f32 %v1297_v13, %v105_v61  ;;  %170 = vadd.xlane.f32.xlu1 %v169_v59  ;;  %149 = vadd.xlane.f32.xlu0 %v148_v2  ;;  %v59_v3 = vpop.xlane.xlu0 %58  ;;  %v151_v5 = vsel %vm44_vm0, %v129_v63, 0.0 }
  0xa1   :  { %v62_v4 = vpop.xlane.xlu1 %61  ;;  %v98_v6 = vmul.f32 0.03125, %v59_v3  ;;  %v136_v8 = vmul.f32 %v1388_v0, %v1388_v0 }
  0xa2   :  { %v99_v7 = vmul.f32 0.03125, %v62_v4  ;;  %v137_v9 = vmul.f32 %v1391_v1, %v1391_v1 }
  0xa3   :  { %v1400_v10 = vsub.f32 %v1306_v16, %v98_v6  ;;  %v172_v12 = vsel %vm44_vm0, %v136_v8, 0.0 }
  0xa4   :  { %v1403_v11 = vsub.f32 %v1311_v17, %v99_v7  ;;  %152 = vadd.xlane.f32.xlu1 %v151_v5  ;;  %173 = vadd.xlane.f32.xlu0 %v172_v12  ;;  %v83_v13 = vpop.xlane.xlu0 %82  ;;  %v175_v15 = vsel %vm44_vm0, %v137_v9, 0.0 }
  0xa5   :  { %v86_v14 = vpop.xlane.xlu1 %85  ;;  %v106_v18 = vmul.f32 0.03125, %v83_v13  ;;  %v130_v22 = vmul.f32 %v1400_v10, %v1400_v10 }
  0xa6   :  { %v107_v19 = vmul.f32 0.03125, %v86_v14  ;;  %v131_v16 = vmul.f32 %v1403_v11, %v1403_v11 }
  0xa7   :  { %v1412_v23 = vsub.f32 %v1320_v20, %v106_v18  ;;  %v154_v26 = vsel %vm44_vm0, %v130_v22, 0.0 }
  0xa8   :  { %v1415_v17 = vsub.f32 %v1325_v21, %v107_v19  ;;  %176 = vadd.xlane.f32.xlu1 %v175_v15  ;;  %155 = vadd.xlane.f32.xlu0 %v154_v26  ;;  %v65_v27 = vpop.xlane.xlu0 %64  ;;  %v157_v31 = vsel %vm44_vm0, %v131_v16, 0.0 }
  0xa9   :  { %v68_v30 = vpop.xlane.xlu1 %67  ;;  %v100_v32 = vmul.f32 0.03125, %v65_v27  ;;  %v138_v34 = vmul.f32 %v1412_v23, %v1412_v23 }
  0xaa   :  { %v101_v33 = vmul.f32 0.03125, %v68_v30  ;;  %v139_v20 = vmul.f32 %v1415_v17, %v1415_v17 }
  0xab   :  { %v1424_v35 = vsub.f32 %v1334_v24, %v100_v32  ;;  %v178_v38 = vsel %vm44_vm0, %v138_v34, 0.0 }
  0xac   :  { %v1427_v21 = vsub.f32 %v1339_v25, %v101_v33  ;;  %158 = vadd.xlane.f32.xlu1 %v157_v31  ;;  %179 = vadd.xlane.f32.xlu0 %v178_v38  ;;  %v89_v39 = vpop.xlane.xlu0 %88  ;;  %v181_v41 = vsel %vm44_vm0, %v139_v20, 0.0  ;;  %v1459_v31 = vld [vmem:[%s2018_s1] ss:$0 sm:$0xff] }
  0xad   :  { %v92_v40 = vpop.xlane.xlu1 %91  ;;  %v108_v42 = vmul.f32 0.03125, %v89_v39  ;;  %v132_v46 = vmul.f32 %v1424_v35, %v1424_v35 }
  0xae   :  { %v109_v43 = vmul.f32 0.03125, %v92_v40  ;;  %v133_v24 = vmul.f32 %v1427_v21, %v1427_v21 }
  0xaf   :  { %v1436_v47 = vsub.f32 %v1348_v28, %v108_v42  ;;  %v160_v48 = vsel %vm44_vm0, %v132_v46, 0.0 }
  0xb0   :  { %v1439_v25 = vsub.f32 %v1353_v29, %v109_v43  ;;  %182 = vadd.xlane.f32.xlu1 %v181_v41  ;;  %161 = vadd.xlane.f32.xlu0 %v160_v48  ;;  %v163_v49 = vsel %vm44_vm0, %v133_v24, 0.0  ;;  %v1108_v29 = vld [vmem:[%s2020_s3] sm:$0xff]  }
  0xb1   :  { %v140_v50 = vmul.f32 %v1436_v47, %v1436_v47  ;;  %1071 = vmatprep.subr.bf16.mxu0 %v1108_v29  ;;  %1091 = vmatprep.subr.bf16.mxu1 %v1108_v29  ;;  %v1466_v43 = vld [vmem:[%s2019_s2] ss:$0 sm:$0xff] }
  0xb2   :  { %v141_v51 = vmul.f32 %v1439_v25, %v1439_v25  ;;  %1072 = vmatpush3.bf16.msra.mxu0 %v1108_v29  ;;  %1093 = vmatpush3.bf16.msra.mxu1 %v1108_v29 }
  0xb3   :  { %v184_v52 = vsel %vm44_vm0, %v140_v50, 0.0  ;;  %1073 = vmatprep.subr.bf16.mxu0 %v1109_v53  ;;  %1092 = vmatprep.subr.bf16.mxu1 %v1109_v53 }
  0xb4   :  { %164 = vadd.xlane.f32.xlu1 %v163_v49  ;;  %185 = vadd.xlane.f32.xlu0 %v184_v52  ;;  %v187_v28 = vsel %vm44_vm0, %v141_v51, 0.0 }
  0xb6   :  { %1074 = vmatpush3.bf16.msra.mxu0 %v1109_v53  ;;  %1094 = vmatpush3.bf16.msra.mxu1 %v1109_v53 }
  0xb8   :  { %188 = vadd.xlane.f32.xlu1 %v187_v28 }
 0x125   :  { %v144_v56 = vpop.xlane.xlu0 %143 }
 0x126   :  { %v190_v57 = vmul.f32 0.03125, %v144_v56 }
 0x128   :  { %v206_v58 = vadd.f32 1e-12, %v190_v57 }
 0x129   :  { %v147_v59 = vpop.xlane.xlu1 %146  ;;  %v168_v60 = vpop.xlane.xlu0 %167 }
 0x12a   :  { %1110 = vrsqrt.f32 %v206_v58  ;;  %v191_v61 = vmul.f32 0.03125, %v147_v59  ;;  %v198_v62 = vmul.f32 0.03125, %v168_v60 }
 0x12c   :  { %v207_v63 = vadd.f32 1e-12, %v191_v61  ;;  %v214_v2 = vadd.f32 1e-12, %v198_v62 }
 0x12d   :  { %v171_v3 = vpop.xlane.xlu1 %170  ;;  %v150_v4 = vpop.xlane.xlu0 %149 }
 0x12e   :  { %1112 = vrsqrt.f32 %v207_v63  ;;  %v199_v5 = vmul.f32 0.03125, %v171_v3  ;;  %v192_v6 = vmul.f32 0.03125, %v150_v4 }
 0x12f   :  { %1114 = vrsqrt.f32 %v214_v2 }
 0x130   :  { %v215_v7 = vadd.f32 1e-12, %v199_v5  ;;  %v208_v8 = vadd.f32 1e-12, %v192_v6 }
 0x131   :  { %v153_v9 = vpop.xlane.xlu1 %152  ;;  %v174_v12 = vpop.xlane.xlu0 %173 }
 0x132   :  { %1116 = vrsqrt.f32 %v215_v7  ;;  %v193_v13 = vmul.f32 0.03125, %v153_v9  ;;  %v200_v14 = vmul.f32 0.03125, %v174_v12 }
 0x133   :  { %1118 = vrsqrt.f32 %v208_v8 }
 0x134   :  { %v1111_v15 = vpop.eup %1110  ;;  %v209_v18 = vadd.f32 1e-12, %v193_v13  ;;  %v216_v19 = vadd.f32 1e-12, %v200_v14 }
 0x135   :  { %v177_v22 = vpop.xlane.xlu1 %176  ;;  %v156_v16 = vpop.xlane.xlu0 %155  ;;  %v238_v26 = vmul.f32 %v1111_v15, %v1359_v36 }
 0x136   :  { %1120 = vrsqrt.f32 %v209_v18  ;;  %v201_v27 = vmul.f32 0.03125, %v177_v22  ;;  %v194_v30 = vmul.f32 0.03125, %v156_v16 }
 0x137   :  { %1122 = vrsqrt.f32 %v216_v19  ;;  %v260_v41 = vmul.f32 %v1459_v31, %v238_v26 }
 0x138   :  { %v1113_v32 = vpop.eup %1112  ;;  %v217_v33 = vadd.f32 1e-12, %v201_v27  ;;  %v210_v34 = vadd.f32 1e-12, %v194_v30 }
 0x139   :  { %v1115_v20 = vpop.eup %1114  ;;  %v159_v38 = vpop.xlane.xlu1 %158  ;;  %v239_v40 = vmul.f32 %v1113_v32, %v1367_v44  ;;  %v282_v28 = vadd.f32 %v1466_v43, %v260_v41 }
 0x13a   :  { %v180_v39 = vpop.xlane.xlu0 %179  ;;  %1124 = vrsqrt.f32 %v217_v33  ;;  %v195_v36 = vmul.f32 0.03125, %v159_v38  ;;  %v246_v46 = vmul.f32 %v1115_v20, %v1361_v37 }
 0x13b   :  { %v202_v42 = vmul.f32 0.03125, %v180_v39  ;;  %1126 = vrsqrt.f32 %v210_v34  ;;  %v261_v24 = vmul.f32 %v1459_v31, %v239_v40 }
 0x13c   :  { %v1117_v48 = vpop.eup %1116  ;;  %v211_v49 = vadd.f32 1e-12, %v195_v36  ;;  %v268_v56 = vmul.f32 %v1459_v31, %v246_v46 }
 0x13d   :  { %v218_v50 = vadd.f32 1e-12, %v202_v42  ;;  %v1119_v51 = vpop.eup %1118  ;;  %v183_v44 = vpop.xlane.xlu1 %182  ;;  %v283_v29 = vadd.f32 %v1466_v43, %v261_v24  ;;  %v247_v53 = vmul.f32 %v1117_v48, %v1369_v45 }
 0x13e   :  { %v162_v52 = vpop.xlane.xlu0 %161  ;;  %1128 = vrsqrt.f32 %v211_v49  ;;  %v203_v57 = vmul.f32 0.03125, %v183_v44  ;;  %v240_v60 = vmul.f32 %v1119_v51, %v1377_v54  ;;  %v290_v45 = vadd.f32 %v1466_v43, %v268_v56 }
 0x13f   :  { %v196_v37 = vmul.f32 0.03125, %v162_v52  ;;  %1130 = vrsqrt.f32 %v218_v50  ;;  %v298_v58 = vpack.c.bf16 %v283_v29, %v282_v28  ;;  %v269_v59 = vmul.f32 %v1459_v31, %v247_v53 }
 0x140   :  { %v1121_v61 = vpop.eup %1120  ;;  %v219_v62 = vadd.f32 1e-12, %v203_v57  ;;  %v262_v7 = vmul.f32 %v1459_v31, %v240_v60 }
 0x141   :  { %v212_v63 = vadd.f32 1e-12, %v196_v37  ;;  %v1123_v2 = vpop.eup %1122  ;;  %v165_v3 = vpop.xlane.xlu1 %164  ;;  %1075 = vmatprep.mubr.msk.bf16.mxu0 %vm44_vm0, %v298_v58  ;;  %v291_v5 = vadd.f32 %v1466_v43, %v269_v59  ;;  %v241_v6 = vmul.f32 %v1121_v61, %v1379_v55 }
 0x142   :  { %v186_v4 = vpop.xlane.xlu0 %185  ;;  %1132 = vrsqrt.f32 %v219_v62  ;;  %v197_v8 = vmul.f32 0.03125, %v165_v3  ;;  %v248_v54 = vmul.f32 %v1123_v2, %v1388_v0  ;;  %v284_v55 = vadd.f32 %v1466_v43, %v262_v7 }
 0x143   :  { %v204_v9 = vmul.f32 0.03125, %v186_v4  ;;  %1134 = vrsqrt.f32 %v212_v63  ;;  %v302_v12 = vpack.c.bf16 %v291_v5, %v290_v45  ;;  %v263_v13 = vmul.f32 %v1459_v31, %v241_v6  ;;  %v1050_v4 = vld [vmem:[%s2021_s4] ss:$0 sm:$0xff]  ;;  %s1213_s4 = smov 120  }
 0x144   :  { %v1125_v14 = vpop.eup %1124  ;;  %v213_v15 = vadd.f32 1e-12, %v197_v8  ;;  %v270_v27 = vmul.f32 %v1459_v31, %v248_v54 }
 0x145   :  { %v220_v18 = vadd.f32 1e-12, %v204_v9  ;;  %v1127_v19 = vpop.eup %1126  ;;  %v189_v22 = vpop.xlane.xlu1 %188  ;;  %1083 = vmatprep.mubr.msk.bf16.mxu1 %vm44_vm0, %v302_v12  ;;  %v285_v16 = vadd.f32 %v1466_v43, %v263_v13  ;;  %v249_v26 = vmul.f32 %v1125_v14, %v1391_v1 }
 0x146   :  { %1136 = vrsqrt.f32 %v213_v15  ;;  %v205_v0 = vmul.f32 0.03125, %v189_v22  ;;  %v242_v30 = vmul.f32 %v1127_v19, %v1400_v10  ;;  %v292_v39 = vadd.f32 %v1466_v43, %v270_v27 }
 0x147   :  { %1138 = vrsqrt.f32 %v220_v18  ;;  %v299_v32 = vpack.c.bf16 %v285_v16, %v284_v55  ;;  %v271_v33 = vmul.f32 %v1459_v31, %v249_v26 }
 0x148   :  { %v1129_v34 = vpop.eup %1128  ;;  %v221_v20 = vadd.f32 1e-12, %v205_v0  ;;  %v264_v41 = vmul.f32 %v1459_v31, %v242_v30 }
 0x149   :  { %v1131_v38 = vpop.eup %1130  ;;  %1076 = vmatmul.mubr.msk.bf16.vlgmr.msra.gmra.mrb[0].mxu0 %vm44_vm0, %v299_v32  ;;  %v293_v40 = vadd.f32 %v1466_v43, %v271_v33  ;;  %v243_v1 = vmul.f32 %v1129_v34, %v1403_v11 }
 0x14a   :  { %1140 = vrsqrt.f32 %v221_v20  ;;  %v250_v10 = vmul.f32 %v1131_v38, %v1412_v23  ;;  %v286_v48 = vadd.f32 %v1466_v43, %v264_v41 }
 0x14b   :  { %v303_v36 = vpack.c.bf16 %v293_v40, %v292_v39  ;;  %v265_v42 = vmul.f32 %v1459_v31, %v243_v1 }
 0x14c   :  { %v1133_v46 = vpop.eup %1132  ;;  %v272_v11 = vmul.f32 %v1459_v31, %v250_v10 }
 0x14d   :  { %v1135_v24 = vpop.eup %1134  ;;  %1084 = vmatmul.mubr.msk.bf16.vlgmr.msra.gmra.mrb[0].mxu1 %vm44_vm0, %v303_v36  ;;  %v287_v49 = vadd.f32 %v1466_v43, %v265_v42  ;;  %v251_v50 = vmul.f32 %v1133_v46, %v1415_v17 }
 0x14e   :  { %v244_v51 = vmul.f32 %v1135_v24, %v1424_v35  ;;  %v294_v29 = vadd.f32 %v1466_v43, %v272_v11 }
 0x14f   :  { %v300_v44 = vpack.c.bf16 %v287_v49, %v286_v48  ;;  %v273_v23 = vmul.f32 %v1459_v31, %v251_v50 }
 0x150   :  { %v1137_v52 = vpop.eup %1136  ;;  %v266_v57 = vmul.f32 %v1459_v31, %v244_v51 }
 0x151   :  { %v1139_v28 = vpop.eup %1138  ;;  %1079 = vmatprep.mubr.msk.bf16.mxu0 %vm44_vm0, %v300_v44  ;;  %v295_v53 = vadd.f32 %v1466_v43, %v273_v23  ;;  %v245_v56 = vmul.f32 %v1137_v52, %v1427_v21 }
 0x152   :  { %v252_v17 = vmul.f32 %v1139_v28, %v1436_v47  ;;  %v288_v59 = vadd.f32 %v1466_v43, %v266_v57 }
 0x153   :  { %v304_v37 = vpack.c.bf16 %v295_v53, %v294_v29  ;;  %v267_v35 = vmul.f32 %v1459_v31, %v245_v56 }
 0x154   :  { %v1141_v58 = vpop.eup %1140  ;;  %v274_v62 = vmul.f32 %v1459_v31, %v252_v17 }
 0x155   :  { %1087 = vmatprep.mubr.msk.bf16.mxu1 %vm44_vm0, %v304_v37  ;;  %v289_v60 = vadd.f32 %v1466_v43, %v267_v35  ;;  %v253_v61 = vmul.f32 %v1141_v58, %v1439_v25 }
 0x156   :  { %v296_v47 = vadd.f32 %v1466_v43, %v274_v62 }
 0x157   :  { %v301_v63 = vpack.c.bf16 %v289_v60, %v288_v59  ;;  %v275_v21 = vmul.f32 %v1459_v31, %v253_v61 }
 0x159   :  { %1080 = vmatmul.mubr.msk.bf16.gmra.mrb[4].mxu0 %vm44_vm0, %v301_v63  ;;  %v297_v2 = vadd.f32 %v1466_v43, %v275_v21 }
 0x15b   :  { %v305_v3 = vpack.c.bf16 %v297_v2, %v296_v47 }
 0x15d   :  { %1088 = vmatmul.mubr.msk.bf16.gmra.mrb[4].mxu1 %vm44_vm0, %v305_v3 }
 0x21c   :  { %v1077_v45 = vpop.f32.mrb[0].mxu0 }
 0x21d   :  { %v1524_v25 = vadd.f32 %v1077_v45, %v1050_v4  ;;  %v387_v5 = vpop.f32.mrb[1].mxu0 }
 0x21e   :  { %v1526_v6 = vadd.f32 %v1050_v4, %v387_v5  ;;  %v1078_v31 = vpop.f32.mrb[2].mxu0 }
 0x21f   :  { %453 = vst.msk [vmem:[#allocation2 + $0x10] sm:$0xff] %vm450_vm1, %v1524_v25  ;;  %v1530_v7 = vadd.f32 %v1078_v31, %v1050_v4  ;;  %487 = vrot.lane.b32.xlu1 %v1524_v25, %s1212_s16  ;;  %v390_v43 = vpop.f32.mrb[3].mxu0 }
 0x220   :  { %451 = vst.msk [vmem:[#allocation2] sm:$0xff] %vm450_vm1, %v1526_v6  ;;  %v1536_v8 = vadd.f32 %v1050_v4, %v390_v43  ;;  %v1085_v9 = vpop.f32.mrb[0].mxu1 }
 0x221   :  { %454 = vst.msk [vmem:[#allocation2 + $0x18] sm:$0xff] %vm450_vm1, %v1530_v7  ;;  %v1540_v54 = vadd.f32 %v1085_v9, %v1050_v4  ;;  %v419_v12 = vpop.f32.mrb[1].mxu1 }
 0x222   :  { %452 = vst.msk [vmem:[#allocation2 + $0x8] sm:$0xff] %vm450_vm1, %v1536_v8  ;;  %v1544_v13 = vadd.f32 %v1050_v4, %v419_v12  ;;  %v1086_v14 = vpop.f32.mrb[2].mxu1 }
 0x223   :  { %461 = vst.msk [vmem:[#allocation2 + $0x50] sm:$0xff] %vm450_vm1, %v1540_v54  ;;  %v1548_v15 = vadd.f32 %v1086_v14, %v1050_v4  ;;  %489 = vrot.lane.b32.xlu1 %v1530_v7, %s1212_s16  ;;  %503 = vrot.lane.b32.xlu0 %v1540_v54, %s1212_s16  ;;  %v422_v18 = vpop.f32.mrb[3].mxu1 }
 0x224   :  { %459 = vst.msk [vmem:[#allocation2 + $0x40] sm:$0xff] %vm450_vm1, %v1544_v13  ;;  %v1556_v19 = vadd.f32 %v1050_v4, %v422_v18 }
 0x225   :  { %462 = vst.msk [vmem:[#allocation2 + $0x58] sm:$0xff] %vm450_vm1, %v1548_v15 }
 0x226   :  { %460 = vst.msk [vmem:[#allocation2 + $0x48] sm:$0xff] %vm450_vm1, %v1556_v19 }
 0x227   :  { %551 = vrot.lane.b32.xlu0 %v1524_v25, %s1213_s4  ;;  %505 = vrot.lane.b32.xlu1 %v1548_v15, %s1212_s16 }
 0x22b   :  { %567 = vrot.lane.b32.xlu0 %v1540_v54, %s1213_s4  ;;  %553 = vrot.lane.b32.xlu1 %v1530_v7, %s1213_s4 }
 0x22c   :  { %v1081_v22 = vpop.f32.mrb[4].mxu0 }
 0x22d   :  { %v1570_v55 = vadd.f32 %v1081_v22, %v1050_v4  ;;  %v403_v16 = vpop.f32.mrb[5].mxu0 }
 0x22e   :  { %v1572_v26 = vadd.f32 %v1050_v4, %v403_v16  ;;  %v1082_v27 = vpop.f32.mrb[6].mxu0 }
 0x22f   :  { %457 = vst.msk [vmem:[#allocation2 + $0x30] sm:$0xff] %vm450_vm1, %v1570_v55  ;;  %v1576_v0 = vadd.f32 %v1082_v27, %v1050_v4  ;;  %616 = vrot.lane.b32.xlu0 %v1524_v25, %s1214_s17  ;;  %569 = vrot.lane.b32.xlu1 %v1548_v15, %s1213_s4  ;;  %v406_v30 = vpop.f32.mrb[7].mxu0 }
 0x230   :  { %455 = vst.msk [vmem:[#allocation2 + $0x20] sm:$0xff] %vm450_vm1, %v1572_v26  ;;  %v1584_v32 = vadd.f32 %v1050_v4, %v406_v30  ;;  %v1089_v33 = vpop.f32.mrb[4].mxu1 }
 0x231   :  { %458 = vst.msk [vmem:[#allocation2 + $0x38] sm:$0xff] %vm450_vm1, %v1576_v0  ;;  %v1588_v34 = vadd.f32 %v1089_v33, %v1050_v4  ;;  %v435_v20 = vpop.f32.mrb[5].mxu1 }
 0x232   :  { %456 = vst.msk [vmem:[#allocation2 + $0x28] sm:$0xff] %vm450_vm1, %v1584_v32  ;;  %v1592_v38 = vadd.f32 %v1050_v4, %v435_v20  ;;  %v1090_v39 = vpop.f32.mrb[6].mxu1 }
 0x233   :  { %465 = vst.msk [vmem:[#allocation2 + $0x70] sm:$0xff] %vm450_vm1, %v1588_v34  ;;  %v1596_v40 = vadd.f32 %v1090_v39, %v1050_v4  ;;  %632 = vrot.lane.b32.xlu0 %v1540_v54, %s1214_s17  ;;  %618 = vrot.lane.b32.xlu1 %v1530_v7, %s1214_s17  ;;  %v438_v1 = vpop.f32.mrb[7].mxu1 }
 0x234   :  { %463 = vst.msk [vmem:[#allocation2 + $0x60] sm:$0xff] %vm450_vm1, %v1592_v38  ;;  %v1604_v41 = vadd.f32 %v1050_v4, %v438_v1 }
 0x235   :  { %466 = vst.msk [vmem:[#allocation2 + $0x78] sm:$0xff] %vm450_vm1, %v1596_v40 }
 0x236   :  { %464 = vst.msk [vmem:[#allocation2 + $0x68] sm:$0xff] %vm450_vm1, %v1604_v41 }
 0x237   :  { %681 = vrot.lane.b32.xlu0 %v1524_v25, %s1215_s18  ;;  %634 = vrot.lane.b32.xlu1 %v1548_v15, %s1214_s17 }
 0x23b   :  { %697 = vrot.lane.b32.xlu0 %v1540_v54, %s1215_s18  ;;  %683 = vrot.lane.b32.xlu1 %v1530_v7, %s1215_s18 }
 0x23f   :  { %746 = vrot.lane.b32.xlu0 %v1524_v25, %s1216_s19  ;;  %699 = vrot.lane.b32.xlu1 %v1548_v15, %s1215_s18 }
 0x243   :  { %762 = vrot.lane.b32.xlu0 %v1540_v54, %s1216_s19  ;;  %748 = vrot.lane.b32.xlu1 %v1530_v7, %s1216_s19 }
 0x247   :  { %811 = vrot.lane.b32.xlu0 %v1524_v25, %s1217_s20  ;;  %764 = vrot.lane.b32.xlu1 %v1548_v15, %s1216_s19 }
 0x24b   :  { %827 = vrot.lane.b32.xlu0 %v1540_v54, %s1217_s20  ;;  %813 = vrot.lane.b32.xlu1 %v1530_v7, %s1217_s20 }
 0x24f   :  { %876 = vrot.lane.b32.xlu0 %v1524_v25, %s1218_s21  ;;  %829 = vrot.lane.b32.xlu1 %v1548_v15, %s1217_s20 }
 0x253   :  { %892 = vrot.lane.b32.xlu0 %v1540_v54, %s1218_s21  ;;  %878 = vrot.lane.b32.xlu1 %v1530_v7, %s1218_s21 }
 0x257   :  { %941 = vrot.lane.b32.xlu0 %v1524_v25, %s1219_s22  ;;  %894 = vrot.lane.b32.xlu1 %v1548_v15, %s1218_s21 }
 0x25b   :  { %957 = vrot.lane.b32.xlu0 %v1540_v54, %s1219_s22  ;;  %943 = vrot.lane.b32.xlu1 %v1530_v7, %s1219_s22 }
 0x25f   :  { %483 = vrot.lane.b32.xlu0 %v1526_v6, %s1212_s16  ;;  %959 = vrot.lane.b32.xlu1 %v1548_v15, %s1219_s22 }
 0x263   :  { %485 = vrot.lane.b32.xlu1 %v1536_v8, %s1212_s16  ;;  %499 = vrot.lane.b32.xlu0 %v1544_v13, %s1212_s16 }
 0x267   :  { %501 = vrot.lane.b32.xlu1 %v1556_v19, %s1212_s16  ;;  %547 = vrot.lane.b32.xlu0 %v1526_v6, %s1213_s4 }
 0x26b   :  { %549 = vrot.lane.b32.xlu1 %v1536_v8, %s1213_s4  ;;  %563 = vrot.lane.b32.xlu0 %v1544_v13, %s1213_s4 }
 0x26f   :  { %565 = vrot.lane.b32.xlu1 %v1556_v19, %s1213_s4  ;;  %612 = vrot.lane.b32.xlu0 %v1526_v6, %s1214_s17 }
 0x273   :  { %614 = vrot.lane.b32.xlu1 %v1536_v8, %s1214_s17  ;;  %628 = vrot.lane.b32.xlu0 %v1544_v13, %s1214_s17 }
 0x277   :  { %630 = vrot.lane.b32.xlu1 %v1556_v19, %s1214_s17  ;;  %677 = vrot.lane.b32.xlu0 %v1526_v6, %s1215_s18 }
 0x27b   :  { %679 = vrot.lane.b32.xlu1 %v1536_v8, %s1215_s18  ;;  %693 = vrot.lane.b32.xlu0 %v1544_v13, %s1215_s18 }
 0x27f   :  { %695 = vrot.lane.b32.xlu1 %v1556_v19, %s1215_s18  ;;  %742 = vrot.lane.b32.xlu0 %v1526_v6, %s1216_s19 }
 0x283   :  { %744 = vrot.lane.b32.xlu1 %v1536_v8, %s1216_s19  ;;  %758 = vrot.lane.b32.xlu0 %v1544_v13, %s1216_s19 }
 0x287   :  { %760 = vrot.lane.b32.xlu1 %v1556_v19, %s1216_s19  ;;  %807 = vrot.lane.b32.xlu0 %v1526_v6, %s1217_s20 }
 0x28b   :  { %809 = vrot.lane.b32.xlu1 %v1536_v8, %s1217_s20  ;;  %823 = vrot.lane.b32.xlu0 %v1544_v13, %s1217_s20 }
 0x28f   :  { %825 = vrot.lane.b32.xlu1 %v1556_v19, %s1217_s20  ;;  %872 = vrot.lane.b32.xlu0 %v1526_v6, %s1218_s21 }
 0x291   :  { %v488_v10 = vpop.permute.xlu1 %487 }
 0x292   :  { %533 = vst.msk [vmem:[#allocation4 + $0x10] sm:$0xff] %vm450_vm1, %v488_v10 }
 0x293   :  { %874 = vrot.lane.b32.xlu1 %v1536_v8, %s1218_s21  ;;  %888 = vrot.lane.b32.xlu0 %v1544_v13, %s1218_s21 }
 0x295   :  { %v490_v36 = vpop.permute.xlu1 %489  ;;  %v504_v42 = vpop.permute.xlu0 %503 }
 0x296   :  { %534 = vst.msk [vmem:[#allocation4 + $0x18] sm:$0xff] %vm450_vm1, %v490_v36  ;;  %541 = vst.msk [vmem:[#allocation4 + $0x50] sm:$0xff] %vm450_vm1, %v504_v42 }
 0x297   :  { %890 = vrot.lane.b32.xlu1 %v1556_v19, %s1218_s21  ;;  %937 = vrot.lane.b32.xlu0 %v1526_v6, %s1219_s22 }
 0x299   :  { %v506_v46 = vpop.permute.xlu1 %505  ;;  %v552_v24 = vpop.permute.xlu0 %551 }
 0x29a   :  { %542 = vst.msk [vmem:[#allocation4 + $0x58] sm:$0xff] %vm450_vm1, %v506_v46  ;;  %598 = vst.msk [vmem:[#allocation2 + $0x90] sm:$0xff] %vm450_vm1, %v552_v24 }
 0x29b   :  { %939 = vrot.lane.b32.xlu1 %v1536_v8, %s1219_s22  ;;  %953 = vrot.lane.b32.xlu0 %v1544_v13, %s1219_s22 }
 0x29d   :  { %v554_v48 = vpop.permute.xlu1 %553  ;;  %v568_v49 = vpop.permute.xlu0 %567 }
 0x29e   :  { %599 = vst.msk [vmem:[#allocation2 + $0x98] sm:$0xff] %vm450_vm1, %v554_v48  ;;  %606 = vst.msk [vmem:[#allocation2 + $0xd0] sm:$0xff] %vm450_vm1, %v568_v49 }
 0x29f   :  { %955 = vrot.lane.b32.xlu1 %v1556_v19, %s1219_s22  ;;  %495 = vrot.lane.b32.xlu0 %v1570_v55, %s1212_s16 }
 0x2a1   :  { %v570_v50 = vpop.permute.xlu1 %569  ;;  %v617_v11 = vpop.permute.xlu0 %616 }
 0x2a2   :  { %607 = vst.msk [vmem:[#allocation2 + $0xd8] sm:$0xff] %vm450_vm1, %v570_v50  ;;  %663 = vst.msk [vmem:[#allocation4 + $0x90] sm:$0xff] %vm450_vm1, %v617_v11 }
 0x2a3   :  { %497 = vrot.lane.b32.xlu1 %v1576_v0, %s1212_s16  ;;  %511 = vrot.lane.b32.xlu0 %v1588_v34, %s1212_s16 }
 0x2a5   :  { %v619_v51 = vpop.permute.xlu1 %618  ;;  %v633_v44 = vpop.permute.xlu0 %632 }
 0x2a6   :  { %664 = vst.msk [vmem:[#allocation4 + $0x98] sm:$0xff] %vm450_vm1, %v619_v51  ;;  %671 = vst.msk [vmem:[#allocation4 + $0xd0] sm:$0xff] %vm450_vm1, %v633_v44 }
 0x2a7   :  { %559 = vrot.lane.b32.xlu0 %v1570_v55, %s1213_s4  ;;  %513 = vrot.lane.b32.xlu1 %v1596_v40, %s1212_s16 }
 0x2a9   :  { %v635_v23 = vpop.permute.xlu1 %634  ;;  %v682_v52 = vpop.permute.xlu0 %681 }
 0x2aa   :  { %672 = vst.msk [vmem:[#allocation4 + $0xd8] sm:$0xff] %vm450_vm1, %v635_v23  ;;  %728 = vst.msk [vmem:[#allocation2 + $0x110] sm:$0xff] %vm450_vm1, %v682_v52 }
 0x2ab   :  { %575 = vrot.lane.b32.xlu0 %v1588_v34, %s1213_s4  ;;  %561 = vrot.lane.b32.xlu1 %v1576_v0, %s1213_s4 }
 0x2ad   :  { %v684_v28 = vpop.permute.xlu1 %683  ;;  %v698_v29 = vpop.permute.xlu0 %697 }
 0x2ae   :  { %729 = vst.msk [vmem:[#allocation2 + $0x118] sm:$0xff] %vm450_vm1, %v684_v28  ;;  %736 = vst.msk [vmem:[#allocation2 + $0x150] sm:$0xff] %vm450_vm1, %v698_v29 }
 0x2af   :  { %624 = vrot.lane.b32.xlu0 %v1570_v55, %s1214_s17  ;;  %577 = vrot.lane.b32.xlu1 %v1596_v40, %s1213_s4 }
 0x2b1   :  { %v700_v53 = vpop.permute.xlu1 %699  ;;  %v747_v56 = vpop.permute.xlu0 %746 }
 0x2b2   :  { %737 = vst.msk [vmem:[#allocation2 + $0x158] sm:$0xff] %vm450_vm1, %v700_v53  ;;  %793 = vst.msk [vmem:[#allocation4 + $0x110] sm:$0xff] %vm450_vm1, %v747_v56 }
 0x2b3   :  { %640 = vrot.lane.b32.xlu0 %v1588_v34, %s1214_s17  ;;  %626 = vrot.lane.b32.xlu1 %v1576_v0, %s1214_s17 }
 0x2b5   :  { %v749_v57 = vpop.permute.xlu1 %748  ;;  %v763_v17 = vpop.permute.xlu0 %762 }
 0x2b6   :  { %794 = vst.msk [vmem:[#allocation4 + $0x118] sm:$0xff] %vm450_vm1, %v749_v57  ;;  %801 = vst.msk [vmem:[#allocation4 + $0x150] sm:$0xff] %vm450_vm1, %v763_v17 }
 0x2b7   :  { %689 = vrot.lane.b32.xlu0 %v1570_v55, %s1215_s18  ;;  %642 = vrot.lane.b32.xlu1 %v1596_v40, %s1214_s17 }
 0x2b9   :  { %v765_v37 = vpop.permute.xlu1 %764  ;;  %v812_v35 = vpop.permute.xlu0 %811 }
 0x2ba   :  { %802 = vst.msk [vmem:[#allocation4 + $0x158] sm:$0xff] %vm450_vm1, %v765_v37  ;;  %858 = vst.msk [vmem:[#allocation2 + $0x190] sm:$0xff] %vm450_vm1, %v812_v35 }
 0x2bb   :  { %705 = vrot.lane.b32.xlu0 %v1588_v34, %s1215_s18  ;;  %691 = vrot.lane.b32.xlu1 %v1576_v0, %s1215_s18 }
 0x2bd   :  { %v814_v58 = vpop.permute.xlu1 %813  ;;  %v828_v59 = vpop.permute.xlu0 %827 }
 0x2be   :  { %859 = vst.msk [vmem:[#allocation2 + $0x198] sm:$0xff] %vm450_vm1, %v814_v58  ;;  %866 = vst.msk [vmem:[#allocation2 + $0x1d0] sm:$0xff] %vm450_vm1, %v828_v59 }
 0x2bf   :  { %754 = vrot.lane.b32.xlu0 %v1570_v55, %s1216_s19  ;;  %707 = vrot.lane.b32.xlu1 %v1596_v40, %s1215_s18 }
 0x2c1   :  { %v830_v60 = vpop.permute.xlu1 %829  ;;  %v877_v61 = vpop.permute.xlu0 %876 }
 0x2c2   :  { %867 = vst.msk [vmem:[#allocation2 + $0x1d8] sm:$0xff] %vm450_vm1, %v830_v60  ;;  %923 = vst.msk [vmem:[#allocation4 + $0x190] sm:$0xff] %vm450_vm1, %v877_v61 }
 0x2c3   :  { %770 = vrot.lane.b32.xlu0 %v1588_v34, %s1216_s19  ;;  %756 = vrot.lane.b32.xlu1 %v1576_v0, %s1216_s19 }
 0x2c5   :  { %v879_v62 = vpop.permute.xlu1 %878  ;;  %v893_v63 = vpop.permute.xlu0 %892 }
 0x2c6   :  { %924 = vst.msk [vmem:[#allocation4 + $0x198] sm:$0xff] %vm450_vm1, %v879_v62  ;;  %931 = vst.msk [vmem:[#allocation4 + $0x1d0] sm:$0xff] %vm450_vm1, %v893_v63 }
 0x2c7   :  { %819 = vrot.lane.b32.xlu0 %v1570_v55, %s1217_s20  ;;  %772 = vrot.lane.b32.xlu1 %v1596_v40, %s1216_s19 }
 0x2c9   :  { %v895_v21 = vpop.permute.xlu1 %894  ;;  %v942_v47 = vpop.permute.xlu0 %941 }
 0x2ca   :  { %932 = vst.msk [vmem:[#allocation4 + $0x1d8] sm:$0xff] %vm450_vm1, %v895_v21 }
 0x2cb   :  { %987 = vst.msk [vmem:[#allocation6 + $0x10] sm:$0xff] %vm44_vm0, %v942_v47  ;;  %835 = vrot.lane.b32.xlu0 %v1588_v34, %s1217_s20  ;;  %821 = vrot.lane.b32.xlu1 %v1576_v0, %s1217_s20 }
 0x2cd   :  { %v944_v2 = vpop.permute.xlu1 %943  ;;  %v958_v3 = vpop.permute.xlu0 %957 }
 0x2ce   :  { %988 = vst.msk [vmem:[#allocation6 + $0x18] sm:$0xff] %vm44_vm0, %v944_v2  ;;  %995 = vst.msk [vmem:[#allocation6 + $0x50] sm:$0xff] %vm44_vm0, %v958_v3 }
 0x2cf   :  { %884 = vrot.lane.b32.xlu0 %v1570_v55, %s1218_s21  ;;  %837 = vrot.lane.b32.xlu1 %v1596_v40, %s1217_s20 }
 0x2d1   :  { %v960_v4 = vpop.permute.xlu1 %959  ;;  %v484_v45 = vpop.permute.xlu0 %483 }
 0x2d2   :  { %996 = vst.msk [vmem:[#allocation6 + $0x58] sm:$0xff] %vm44_vm0, %v960_v4 }
 0x2d3   :  { %531 = vst.msk [vmem:[#allocation4] sm:$0xff] %vm450_vm1, %v484_v45  ;;  %900 = vrot.lane.b32.xlu0 %v1588_v34, %s1218_s21  ;;  %886 = vrot.lane.b32.xlu1 %v1576_v0, %s1218_s21 }
 0x2d5   :  { %v486_v25 = vpop.permute.xlu1 %485  ;;  %v500_v5 = vpop.permute.xlu0 %499 }
 0x2d6   :  { %532 = vst.msk [vmem:[#allocation4 + $0x8] sm:$0xff] %vm450_vm1, %v486_v25  ;;  %539 = vst.msk [vmem:[#allocation4 + $0x40] sm:$0xff] %vm450_vm1, %v500_v5 }
 0x2d7   :  { %949 = vrot.lane.b32.xlu0 %v1570_v55, %s1219_s22  ;;  %902 = vrot.lane.b32.xlu1 %v1596_v40, %s1218_s21 }
 0x2d9   :  { %v502_v6 = vpop.permute.xlu1 %501  ;;  %v548_v31 = vpop.permute.xlu0 %547 }
 0x2da   :  { %540 = vst.msk [vmem:[#allocation4 + $0x48] sm:$0xff] %vm450_vm1, %v502_v6  ;;  %596 = vst.msk [vmem:[#allocation2 + $0x80] sm:$0xff] %vm450_vm1, %v548_v31 }
 0x2db   :  { %491 = vrot.lane.b32.xlu0 %v1572_v26, %s1212_s16  ;;  %951 = vrot.lane.b32.xlu1 %v1576_v0, %s1219_s22 }
 0x2dd   :  { %v550_v7 = vpop.permute.xlu1 %549  ;;  %v564_v43 = vpop.permute.xlu0 %563 }
 0x2de   :  { %597 = vst.msk [vmem:[#allocation2 + $0x88] sm:$0xff] %vm450_vm1, %v550_v7  ;;  %604 = vst.msk [vmem:[#allocation2 + $0xc0] sm:$0xff] %vm450_vm1, %v564_v43 }
 0x2df   :  { %493 = vrot.lane.b32.xlu1 %v1584_v32, %s1212_s16  ;;  %507 = vrot.lane.b32.xlu0 %v1592_v38, %s1212_s16 }
 0x2e1   :  { %v566_v8 = vpop.permute.xlu1 %565  ;;  %v613_v9 = vpop.permute.xlu0 %612 }
 0x2e2   :  { %605 = vst.msk [vmem:[#allocation2 + $0xc8] sm:$0xff] %vm450_vm1, %v566_v8  ;;  %661 = vst.msk [vmem:[#allocation4 + $0x80] sm:$0xff] %vm450_vm1, %v613_v9 }
 0x2e3   :  { %509 = vrot.lane.b32.xlu1 %v1604_v41, %s1212_s16  ;;  %555 = vrot.lane.b32.xlu0 %v1572_v26, %s1213_s4 }
 0x2e5   :  { %v615_v54 = vpop.permute.xlu1 %614  ;;  %v629_v12 = vpop.permute.xlu0 %628 }
 0x2e6   :  { %662 = vst.msk [vmem:[#allocation4 + $0x88] sm:$0xff] %vm450_vm1, %v615_v54  ;;  %669 = vst.msk [vmem:[#allocation4 + $0xc0] sm:$0xff] %vm450_vm1, %v629_v12 }
 0x2e7   :  { %557 = vrot.lane.b32.xlu1 %v1584_v32, %s1213_s4  ;;  %571 = vrot.lane.b32.xlu0 %v1592_v38, %s1213_s4 }
 0x2e9   :  { %v631_v13 = vpop.permute.xlu1 %630  ;;  %v678_v14 = vpop.permute.xlu0 %677 }
 0x2ea   :  { %670 = vst.msk [vmem:[#allocation4 + $0xc8] sm:$0xff] %vm450_vm1, %v631_v13  ;;  %726 = vst.msk [vmem:[#allocation2 + $0x100] sm:$0xff] %vm450_vm1, %v678_v14 }
 0x2eb   :  { %573 = vrot.lane.b32.xlu1 %v1604_v41, %s1213_s4  ;;  %620 = vrot.lane.b32.xlu0 %v1572_v26, %s1214_s17 }
 0x2ed   :  { %v680_v15 = vpop.permute.xlu1 %679  ;;  %v694_v18 = vpop.permute.xlu0 %693 }
 0x2ee   :  { %727 = vst.msk [vmem:[#allocation2 + $0x108] sm:$0xff] %vm450_vm1, %v680_v15  ;;  %734 = vst.msk [vmem:[#allocation2 + $0x140] sm:$0xff] %vm450_vm1, %v694_v18 }
 0x2ef   :  { %622 = vrot.lane.b32.xlu1 %v1584_v32, %s1214_s17  ;;  %636 = vrot.lane.b32.xlu0 %v1592_v38, %s1214_s17 }
 0x2f1   :  { %v696_v19 = vpop.permute.xlu1 %695  ;;  %v743_v22 = vpop.permute.xlu0 %742 }
 0x2f2   :  { %735 = vst.msk [vmem:[#allocation2 + $0x148] sm:$0xff] %vm450_vm1, %v696_v19  ;;  %791 = vst.msk [vmem:[#allocation4 + $0x100] sm:$0xff] %vm450_vm1, %v743_v22 }
 0x2f3   :  { %638 = vrot.lane.b32.xlu1 %v1604_v41, %s1214_s17  ;;  %685 = vrot.lane.b32.xlu0 %v1572_v26, %s1215_s18 }
 0x2f5   :  { %v745_v55 = vpop.permute.xlu1 %744  ;;  %v759_v16 = vpop.permute.xlu0 %758 }
 0x2f6   :  { %792 = vst.msk [vmem:[#allocation4 + $0x108] sm:$0xff] %vm450_vm1, %v745_v55  ;;  %799 = vst.msk [vmem:[#allocation4 + $0x140] sm:$0xff] %vm450_vm1, %v759_v16 }
 0x2f7   :  { %687 = vrot.lane.b32.xlu1 %v1584_v32, %s1215_s18  ;;  %701 = vrot.lane.b32.xlu0 %v1592_v38, %s1215_s18 }
 0x2f9   :  { %v761_v27 = vpop.permute.xlu1 %760  ;;  %v808_v0 = vpop.permute.xlu0 %807 }
 0x2fa   :  { %800 = vst.msk [vmem:[#allocation4 + $0x148] sm:$0xff] %vm450_vm1, %v761_v27  ;;  %856 = vst.msk [vmem:[#allocation2 + $0x180] sm:$0xff] %vm450_vm1, %v808_v0 }
 0x2fb   :  { %703 = vrot.lane.b32.xlu1 %v1604_v41, %s1215_s18  ;;  %750 = vrot.lane.b32.xlu0 %v1572_v26, %s1216_s19 }
 0x2fd   :  { %v810_v30 = vpop.permute.xlu1 %809  ;;  %v824_v33 = vpop.permute.xlu0 %823 }
 0x2fe   :  { %857 = vst.msk [vmem:[#allocation2 + $0x188] sm:$0xff] %vm450_vm1, %v810_v30  ;;  %864 = vst.msk [vmem:[#allocation2 + $0x1c0] sm:$0xff] %vm450_vm1, %v824_v33 }
 0x2ff   :  { %752 = vrot.lane.b32.xlu1 %v1584_v32, %s1216_s19  ;;  %766 = vrot.lane.b32.xlu0 %v1592_v38, %s1216_s19 }
 0x301   :  { %v826_v20 = vpop.permute.xlu1 %825  ;;  %v873_v39 = vpop.permute.xlu0 %872 }
 0x302   :  { %865 = vst.msk [vmem:[#allocation2 + $0x1c8] sm:$0xff] %vm450_vm1, %v826_v20  ;;  %921 = vst.msk [vmem:[#allocation4 + $0x180] sm:$0xff] %vm450_vm1, %v873_v39 }
 0x303   :  { %768 = vrot.lane.b32.xlu1 %v1604_v41, %s1216_s19  ;;  %815 = vrot.lane.b32.xlu0 %v1572_v26, %s1217_s20 }
 0x305   :  { %v875_v1 = vpop.permute.xlu1 %874  ;;  %v889_v10 = vpop.permute.xlu0 %888 }
 0x306   :  { %922 = vst.msk [vmem:[#allocation4 + $0x188] sm:$0xff] %vm450_vm1, %v875_v1  ;;  %929 = vst.msk [vmem:[#allocation4 + $0x1c0] sm:$0xff] %vm450_vm1, %v889_v10 }
 0x307   :  { %817 = vrot.lane.b32.xlu1 %v1584_v32, %s1217_s20  ;;  %831 = vrot.lane.b32.xlu0 %v1592_v38, %s1217_s20 }
 0x309   :  { %v891_v36 = vpop.permute.xlu1 %890  ;;  %v938_v42 = vpop.permute.xlu0 %937 }
 0x30a   :  { %930 = vst.msk [vmem:[#allocation4 + $0x1c8] sm:$0xff] %vm450_vm1, %v891_v36 }
 0x30b   :  { %985 = vst.msk [vmem:[#allocation6] sm:$0xff] %vm44_vm0, %v938_v42  ;;  %833 = vrot.lane.b32.xlu1 %v1604_v41, %s1217_s20  ;;  %880 = vrot.lane.b32.xlu0 %v1572_v26, %s1218_s21 }
 0x30d   :  { %v940_v46 = vpop.permute.xlu1 %939  ;;  %v954_v24 = vpop.permute.xlu0 %953 }
 0x30e   :  { %986 = vst.msk [vmem:[#allocation6 + $0x8] sm:$0xff] %vm44_vm0, %v940_v46  ;;  %993 = vst.msk [vmem:[#allocation6 + $0x40] sm:$0xff] %vm44_vm0, %v954_v24 }
 0x30f   :  { %882 = vrot.lane.b32.xlu1 %v1584_v32, %s1218_s21  ;;  %896 = vrot.lane.b32.xlu0 %v1592_v38, %s1218_s21 }
 0x311   :  { %v956_v48 = vpop.permute.xlu1 %955  ;;  %v496_v49 = vpop.permute.xlu0 %495 }
 0x312   :  { %994 = vst.msk [vmem:[#allocation6 + $0x48] sm:$0xff] %vm44_vm0, %v956_v48 }
 0x313   :  { %537 = vst.msk [vmem:[#allocation4 + $0x30] sm:$0xff] %vm450_vm1, %v496_v49  ;;  %898 = vrot.lane.b32.xlu1 %v1604_v41, %s1218_s21  ;;  %945 = vrot.lane.b32.xlu0 %v1572_v26, %s1219_s22 }
 0x315   :  { %v498_v50 = vpop.permute.xlu1 %497  ;;  %v512_v11 = vpop.permute.xlu0 %511 }
 0x316   :  { %538 = vst.msk [vmem:[#allocation4 + $0x38] sm:$0xff] %vm450_vm1, %v498_v50  ;;  %545 = vst.msk [vmem:[#allocation4 + $0x70] sm:$0xff] %vm450_vm1, %v512_v11 }
 0x317   :  { %947 = vrot.lane.b32.xlu1 %v1584_v32, %s1219_s22  ;;  %961 = vrot.lane.b32.xlu0 %v1592_v38, %s1219_s22 }
 0x319   :  { %v514_v51 = vpop.permute.xlu1 %513  ;;  %v560_v44 = vpop.permute.xlu0 %559 }
 0x31a   :  { %546 = vst.msk [vmem:[#allocation4 + $0x78] sm:$0xff] %vm450_vm1, %v514_v51  ;;  %602 = vst.msk [vmem:[#allocation2 + $0xb0] sm:$0xff] %vm450_vm1, %v560_v44 }
 0x31b   :  { %963 = vrot.lane.b32.xlu1 %v1604_v41, %s1219_s22  ;;  %965 = vrot.lane.b32.xlu0 %v1588_v34, %s1219_s22 }
 0x31d   :  { %v562_v26 = vpop.permute.xlu1 %561  ;;  %v576_v23 = vpop.permute.xlu0 %575 }
 0x31e   :  { %603 = vst.msk [vmem:[#allocation2 + $0xb8] sm:$0xff] %vm450_vm1, %v562_v26  ;;  %610 = vst.msk [vmem:[#allocation2 + $0xf0] sm:$0xff] %vm450_vm1, %v576_v23 }
 0x31f   :  { %967 = vrot.lane.b32.xlu1 %v1596_v40, %s1219_s22 }
 0x321   :  { %v578_v32 = vpop.permute.xlu1 %577  ;;  %v625_v38 = vpop.permute.xlu0 %624 }
 0x322   :  { %611 = vst.msk [vmem:[#allocation2 + $0xf8] sm:$0xff] %vm450_vm1, %v578_v32  ;;  %667 = vst.msk [vmem:[#allocation4 + $0xb0] sm:$0xff] %vm450_vm1, %v625_v38 }
 0x325   :  { %v627_v52 = vpop.permute.xlu1 %626  ;;  %v641_v41 = vpop.permute.xlu0 %640 }
 0x326   :  { %668 = vst.msk [vmem:[#allocation4 + $0xb8] sm:$0xff] %vm450_vm1, %v627_v52  ;;  %675 = vst.msk [vmem:[#allocation4 + $0xf0] sm:$0xff] %vm450_vm1, %v641_v41 }
 0x329   :  { %v643_v34 = vpop.permute.xlu1 %642  ;;  %v690_v28 = vpop.permute.xlu0 %689 }
 0x32a   :  { %676 = vst.msk [vmem:[#allocation4 + $0xf8] sm:$0xff] %vm450_vm1, %v643_v34  ;;  %732 = vst.msk [vmem:[#allocation2 + $0x130] sm:$0xff] %vm450_vm1, %v690_v28 }
 0x32d   :  { %v692_v29 = vpop.permute.xlu1 %691  ;;  %v706_v40 = vpop.permute.xlu0 %705 }
 0x32e   :  { %733 = vst.msk [vmem:[#allocation2 + $0x138] sm:$0xff] %vm450_vm1, %v692_v29  ;;  %740 = vst.msk [vmem:[#allocation2 + $0x170] sm:$0xff] %vm450_vm1, %v706_v40 }
 0x331   :  { %v708_v53 = vpop.permute.xlu1 %707  ;;  %v755_v56 = vpop.permute.xlu0 %754 }
 0x332   :  { %741 = vst.msk [vmem:[#allocation2 + $0x178] sm:$0xff] %vm450_vm1, %v708_v53  ;;  %797 = vst.msk [vmem:[#allocation4 + $0x130] sm:$0xff] %vm450_vm1, %v755_v56 }
 0x335   :  { %v757_v57 = vpop.permute.xlu1 %756  ;;  %v771_v17 = vpop.permute.xlu0 %770 }
 0x336   :  { %798 = vst.msk [vmem:[#allocation4 + $0x138] sm:$0xff] %vm450_vm1, %v757_v57  ;;  %805 = vst.msk [vmem:[#allocation4 + $0x170] sm:$0xff] %vm450_vm1, %v771_v17 }
 0x339   :  { %v773_v37 = vpop.permute.xlu1 %772  ;;  %v820_v35 = vpop.permute.xlu0 %819 }
 0x33a   :  { %806 = vst.msk [vmem:[#allocation4 + $0x178] sm:$0xff] %vm450_vm1, %v773_v37  ;;  %862 = vst.msk [vmem:[#allocation2 + $0x1b0] sm:$0xff] %vm450_vm1, %v820_v35 }
 0x33d   :  { %v822_v58 = vpop.permute.xlu1 %821  ;;  %v836_v59 = vpop.permute.xlu0 %835 }
 0x33e   :  { %863 = vst.msk [vmem:[#allocation2 + $0x1b8] sm:$0xff] %vm450_vm1, %v822_v58  ;;  %870 = vst.msk [vmem:[#allocation2 + $0x1f0] sm:$0xff] %vm450_vm1, %v836_v59 }
 0x341   :  { %v838_v60 = vpop.permute.xlu1 %837  ;;  %v885_v61 = vpop.permute.xlu0 %884 }
 0x342   :  { %871 = vst.msk [vmem:[#allocation2 + $0x1f8] sm:$0xff] %vm450_vm1, %v838_v60  ;;  %927 = vst.msk [vmem:[#allocation4 + $0x1b0] sm:$0xff] %vm450_vm1, %v885_v61 }
 0x345   :  { %v887_v62 = vpop.permute.xlu1 %886  ;;  %v901_v63 = vpop.permute.xlu0 %900 }
 0x346   :  { %928 = vst.msk [vmem:[#allocation4 + $0x1b8] sm:$0xff] %vm450_vm1, %v887_v62  ;;  %935 = vst.msk [vmem:[#allocation4 + $0x1f0] sm:$0xff] %vm450_vm1, %v901_v63 }
 0x349   :  { %v903_v21 = vpop.permute.xlu1 %902  ;;  %v950_v47 = vpop.permute.xlu0 %949 }
 0x34a   :  { %936 = vst.msk [vmem:[#allocation4 + $0x1f8] sm:$0xff] %vm450_vm1, %v903_v21 }
 0x34b   :  { %991 = vst.msk [vmem:[#allocation6 + $0x30] sm:$0xff] %vm44_vm0, %v950_v47 }
 0x34d   :  { %v952_v2 = vpop.permute.xlu1 %951  ;;  %v492_v3 = vpop.permute.xlu0 %491 }
 0x34e   :  { %992 = vst.msk [vmem:[#allocation6 + $0x38] sm:$0xff] %vm44_vm0, %v952_v2 }
 0x34f   :  { %535 = vst.msk [vmem:[#allocation4 + $0x20] sm:$0xff] %vm450_vm1, %v492_v3 }
 0x351   :  { %v494_v4 = vpop.permute.xlu1 %493  ;;  %v508_v45 = vpop.permute.xlu0 %507 }
 0x352   :  { %536 = vst.msk [vmem:[#allocation4 + $0x28] sm:$0xff] %vm450_vm1, %v494_v4  ;;  %543 = vst.msk [vmem:[#allocation4 + $0x60] sm:$0xff] %vm450_vm1, %v508_v45 }
 0x355   :  { %v510_v25 = vpop.permute.xlu1 %509  ;;  %v556_v5 = vpop.permute.xlu0 %555 }
 0x356   :  { %544 = vst.msk [vmem:[#allocation4 + $0x68] sm:$0xff] %vm450_vm1, %v510_v25  ;;  %600 = vst.msk [vmem:[#allocation2 + $0xa0] sm:$0xff] %vm450_vm1, %v556_v5 }
 0x359   :  { %v558_v6 = vpop.permute.xlu1 %557  ;;  %v572_v31 = vpop.permute.xlu0 %571 }
 0x35a   :  { %601 = vst.msk [vmem:[#allocation2 + $0xa8] sm:$0xff] %vm450_vm1, %v558_v6  ;;  %608 = vst.msk [vmem:[#allocation2 + $0xe0] sm:$0xff] %vm450_vm1, %v572_v31 }
 0x35d   :  { %v574_v7 = vpop.permute.xlu1 %573  ;;  %v621_v43 = vpop.permute.xlu0 %620 }
 0x35e   :  { %609 = vst.msk [vmem:[#allocation2 + $0xe8] sm:$0xff] %vm450_vm1, %v574_v7  ;;  %665 = vst.msk [vmem:[#allocation4 + $0xa0] sm:$0xff] %vm450_vm1, %v621_v43 }
 0x361   :  { %v623_v8 = vpop.permute.xlu1 %622  ;;  %v637_v9 = vpop.permute.xlu0 %636 }
 0x362   :  { %666 = vst.msk [vmem:[#allocation4 + $0xa8] sm:$0xff] %vm450_vm1, %v623_v8  ;;  %673 = vst.msk [vmem:[#allocation4 + $0xe0] sm:$0xff] %vm450_vm1, %v637_v9 }
 0x365   :  { %v639_v54 = vpop.permute.xlu1 %638  ;;  %v686_v12 = vpop.permute.xlu0 %685 }
 0x366   :  { %674 = vst.msk [vmem:[#allocation4 + $0xe8] sm:$0xff] %vm450_vm1, %v639_v54  ;;  %730 = vst.msk [vmem:[#allocation2 + $0x120] sm:$0xff] %vm450_vm1, %v686_v12 }
 0x369   :  { %v688_v13 = vpop.permute.xlu1 %687  ;;  %v702_v14 = vpop.permute.xlu0 %701 }
 0x36a   :  { %731 = vst.msk [vmem:[#allocation2 + $0x128] sm:$0xff] %vm450_vm1, %v688_v13  ;;  %738 = vst.msk [vmem:[#allocation2 + $0x160] sm:$0xff] %vm450_vm1, %v702_v14 }
 0x36d   :  { %v704_v15 = vpop.permute.xlu1 %703  ;;  %v751_v18 = vpop.permute.xlu0 %750 }
 0x36e   :  { %739 = vst.msk [vmem:[#allocation2 + $0x168] sm:$0xff] %vm450_vm1, %v704_v15  ;;  %795 = vst.msk [vmem:[#allocation4 + $0x120] sm:$0xff] %vm450_vm1, %v751_v18 }
 0x371   :  { %v753_v19 = vpop.permute.xlu1 %752  ;;  %v767_v22 = vpop.permute.xlu0 %766 }
 0x372   :  { %796 = vst.msk [vmem:[#allocation4 + $0x128] sm:$0xff] %vm450_vm1, %v753_v19  ;;  %803 = vst.msk [vmem:[#allocation4 + $0x160] sm:$0xff] %vm450_vm1, %v767_v22 }
 0x375   :  { %v769_v55 = vpop.permute.xlu1 %768  ;;  %v816_v16 = vpop.permute.xlu0 %815 }
 0x376   :  { %804 = vst.msk [vmem:[#allocation4 + $0x168] sm:$0xff] %vm450_vm1, %v769_v55  ;;  %860 = vst.msk [vmem:[#allocation2 + $0x1a0] sm:$0xff] %vm450_vm1, %v816_v16 }
 0x379   :  { %v818_v27 = vpop.permute.xlu1 %817  ;;  %v832_v0 = vpop.permute.xlu0 %831 }
 0x37a   :  { %861 = vst.msk [vmem:[#allocation2 + $0x1a8] sm:$0xff] %vm450_vm1, %v818_v27  ;;  %868 = vst.msk [vmem:[#allocation2 + $0x1e0] sm:$0xff] %vm450_vm1, %v832_v0 }
 0x37d   :  { %v834_v30 = vpop.permute.xlu1 %833  ;;  %v881_v33 = vpop.permute.xlu0 %880 }
 0x37e   :  { %869 = vst.msk [vmem:[#allocation2 + $0x1e8] sm:$0xff] %vm450_vm1, %v834_v30  ;;  %925 = vst.msk [vmem:[#allocation4 + $0x1a0] sm:$0xff] %vm450_vm1, %v881_v33 }
 0x37f   :  { %1153 = shalt.err (!%p1150_p4)
}
 0x380   :  { %s1154_s28 = scalar_lea.hbm %s2022_s5, 8192 }
 0x381   :  { %p1155_p5 = scmp.ne.s32.totalorder %s2022_s5, %s1154_s28  ;;  %p1158_p6 = scmp.lt.u32.totalorder %s1154_s28, %s2022_s5 }
 0x383   :  { %p1160_p7 = pnand %p1158_p6, %p1155_p5 }
 0x385   :  { %1163 = shalt.err (!%p1160_p7)
}
 0x386   :  { %s1221_s0 = smov 128   ;;  %s1222_s10 = smov 8   ;;  %v883_v20 = vpop.permute.xlu1 %882  ;;  %v897_v39 = vpop.permute.xlu0 %896 }
 0x387   :  { %1012 = dma.vmem_to_hbm [thread:$0]  %s1007_s24, 8192, %s2022_s5, [#allocation3], %s1221_s0, %s1221_s0, %s1222_s10   ;;  %926 = vst.msk [vmem:[#allocation4 + $0x1a8] sm:$0xff] %vm450_vm1, %v883_v20  ;;  %933 = vst.msk [vmem:[#allocation4 + $0x1e0] sm:$0xff] %vm450_vm1, %v897_v39 }
 0x388   :  { %s1223_s3 = smov [#allocation4]  }
 0x389   :  { %s1018_s13 = sshll.u32 %s1223_s3, 4  ;;  %s1019_s13 = int_to_ptr.vmem [resolvable:$true] %s1018_s13 }
 0x38a   :  { %v899_v1 = vpop.permute.xlu1 %898  ;;  %v946_v10 = vpop.permute.xlu0 %945  ;;  %s1164_s14 = scalar_lea.vmem %s1019_s13, 8192  ;;  %p1169_p9 = scmp.lt.s32.totalorder %s1019_s13, %s1019_s13 }
 0x38b   :  { %934 = vst.msk [vmem:[#allocation4 + $0x1e8] sm:$0xff] %vm450_vm1, %v899_v1  ;;  %p1165_p8 = scmp.ne.s32.totalorder %s1019_s13, %s1164_s14  ;;  %p1170_p10 = scmp.lt.s32.totalorder %s1164_s14, %s1164_s14 }
 0x38c   :  { %989 = vst.msk [vmem:[#allocation6 + $0x20] sm:$0xff] %vm44_vm0, %v946_v10 }
 0x38d   :  { %p1171_p11 = por %p1170_p10, %p1169_p9 }
 0x38f   :  { %p1172_p12 = pnand %p1171_p11, %p1165_p8 }
 0x391   :  { %1175 = shalt.err (!%p1172_p12)
}
 0x392   :  { %s1176_s1 = scalar_lea.hbm %s2023_s6, 8192 }
 0x393   :  { %p1177_p13 = scmp.ne.s32.totalorder %s2023_s6, %s1176_s1  ;;  %p1180_p0 = scmp.lt.u32.totalorder %s1176_s1, %s2023_s6 }
 0x395   :  { %p1182_p1 = pnand %p1180_p0, %p1177_p13 }
 0x397   :  { %1185 = shalt.err (!%p1182_p1)
}
 0x398   :  { %1024 = dma.vmem_to_hbm [thread:$0]  %s1019_s13, 8192, %s2023_s6, [#allocation5], %s1221_s0, %s1221_s0, %s1222_s10   ;;  %v948_v36 = vpop.permute.xlu1 %947  ;;  %v962_v42 = vpop.permute.xlu0 %961 }
 0x399   :  { %990 = vst.msk [vmem:[#allocation6 + $0x28] sm:$0xff] %vm44_vm0, %v948_v36  ;;  %997 = vst.msk [vmem:[#allocation6 + $0x60] sm:$0xff] %vm44_vm0, %v962_v42  ;;  %s1224_s20 = smov [#allocation6]  }
 0x39a   :  { %s1030_s21 = sshll.u32 %s1224_s20, 4  ;;  %s1031_s21 = int_to_ptr.vmem [resolvable:$true] %s1030_s21 }
 0x39b   :  { %s1186_s22 = scalar_lea.vmem %s1031_s21, 2048  ;;  %p1191_p3 = scmp.lt.s32.totalorder %s1031_s21, %s1031_s21 }
 0x39c   :  { %v964_v46 = vpop.permute.xlu1 %963  ;;  %v966_v24 = vpop.permute.xlu0 %965  ;;  %p1187_p2 = scmp.ne.s32.totalorder %s1031_s21, %s1186_s22  ;;  %p1192_p4 = scmp.lt.s32.totalorder %s1186_s22, %s1186_s22 }
 0x39d   :  { %998 = vst.msk [vmem:[#allocation6 + $0x68] sm:$0xff] %vm44_vm0, %v964_v46  ;;  %999 = vst.msk [vmem:[#allocation6 + $0x70] sm:$0xff] %vm44_vm0, %v966_v24 }
 0x39e   :  { %p1193_p5 = por %p1192_p4, %p1191_p3 }
 0x3a0   :  { %v968_v48 = vpop.permute.xlu1 %967  ;;  %p1194_p6 = pnand %p1193_p5, %p1187_p2 }
 0x3a1   :  { %1000 = vst.msk [vmem:[#allocation6 + $0x78] sm:$0xff] %vm44_vm0, %v968_v48 }
 0x3a2   :  { %1197 = shalt.err (!%p1194_p6)
}
 0x3a3   :  { %s1198_s24 = scalar_lea.hbm %s2024_s7, 2048 }
 0x3a4   :  { %p1199_p7 = scmp.ne.s32.totalorder %s2024_s7, %s1198_s24  ;;  %p1202_p8 = scmp.lt.u32.totalorder %s1198_s24, %s2024_s7 }
 0x3a6   :  { %p1204_p9 = pnand %p1202_p8, %p1199_p7 }
 0x3a8   :  { %1207 = shalt.err (!%p1204_p9)
}
 0x3a9   :  { %1036 = dma.vmem_to_hbm [thread:$0]  %s1031_s21, 2048, %s2024_s7, [#allocation5], %s1221_s0, %s1221_s0, %s1222_s10  }
 0x3aa   :  { %1208 = dma.done.wait [#allocation3], 8192  }
 0x3ab   :  { %1209 = vsyncadd [#allocation3], 4294959104 }
 0x3ac   :  { %1210 = dma.done.wait [#allocation5], 10240  }
 0x3ad   :  { %1211 = vsyncadd [#allocation5], 4294957056 }
 0x3ae   :  { %1046 = vsyncpa [#allocation3], 1 }
 0x3af   :  { %1047 = vsyncpa [#allocation5], 1 }

// kernel: model_forward.20
= control target key start
LH: loop header
LB: loop body
LE: loop exit
PB: predicated region body
PF: predicated region fallthrough
CT: control target
= control target key end

     0   :  { %s1455_s0 = inlined_call_operand.hbm [shape: f32[4,8,16,8], index: 0, kind: input, shape index: {}]   ;;  %s1456_s1 = inlined_call_operand.hbm [shape: f32[4,8,16,8], index: 1, kind: input, shape index: {}]   ;;  %s1457_s2 = inlined_call_operand.hbm [shape: bf16[32,8], index: 2, kind: input, shape index: {}]   ;;  %s1458_s3 = inlined_call_operand.hbm [shape: f32[4,16,16], index: 3, kind: output, shape index: {}]  }
   0x1   :  { %1471 = sst [smem:[#allocation19_spill]] %s1455_s0 }
   0x2   :  { %1472 = sst [smem:[#allocation20_spill]] %s1457_s2 }
   0x3   :  { %1473 = sst [smem:[#allocation21_spill]] %s1458_s3 }
   0x4   :  { %8 = vsyncpa [#allocation3], 0 }
   0x5   :  { %10 = vsyncpa [#allocation3 + $0x1], 0 }
   0x6   :  { %11 = vsyncpa [#allocation6], 0 }
   0x7   :  { %13 = vsyncpa [#allocation6 + $0x1], 0 }
   0x8   :  { %14 = vsyncpa [#allocation4], 0 }
   0x9   :  { %16 = vsyncpa [#allocation4 + $0x1], 0  ;;  %s1096_s12 = smov 0   ;;  %s1098_s13 = smov 0  }
   0xa   :  { %s1100_s14 = smov 0   ;;  %s1102_s15 = smov 0  }
   0xb   :  { %s1104_s16 = smov 0   ;;  %s1106_s17 = smov 0  }
   0xc   :  { %s1108_s18 = smov 0   ;;  %s1110_s19 = smov 0  }
   0xd   :  { %s1112_s20 = smov 0   ;;  %s1114_s21 = smov 0  }
   0xe   :  { %s1116_s22 = smov 0  }
   0xf LB: > { %1474 = sst [smem:[#allocation13_spill]] %s1021_s12  ;;  %s1150_s23 = sadd.s32 4294967295, %s1061_s22   ;;  %s1061_s22 = sphi %s1116_s22, %s22_s22   ;;  %s1057_s21 = sphi %s1114_s21, %s1501_s21   ;;  %s1053_s20 = sphi %s1112_s20, %s1509_s20   ;;  %s1049_s19 = sphi %s1110_s19, %s1499_s19   ;;  %s1045_s18 = sphi %s1108_s18, %s1508_s18   ;;  %s1041_s17 = sphi %s1106_s17, %s1507_s17   ;;  %s1037_s16 = sphi %s1104_s16, %s1506_s16   ;;  %s1033_s15 = sphi %s1102_s15, %s1505_s15   ;;  %s1029_s14 = sphi %s1100_s14, %s1504_s14   ;;  %s1025_s13 = sphi %s1098_s13, %s1503_s13   ;;  %s1021_s12 = sphi %s1096_s12, %s1502_s12  }
  0x10   : > { %1475 = sst [smem:[#allocation14_spill]] %s1057_s21  ;;  %s647_s24 = sadd.s32 4294967294, %s1061_s22  }
  0x11   : > { %p56_p0 = scmp.ne.s32.totalorder %s1037_s16, %s1033_s15  ;;  %p1459_p1 = scmp.eq.s32.totalorder %s1150_s23, 0 }
  0x12   : > { %s118_s25 = sadd.s32 1, %s1029_s14  ;;  %p128_p2 = scmp.ne.s32.totalorder %s1029_s14, %s1025_s13 }
  0x13   : > { %p1160_p3 = por %p1459_p1, %p56_p0  ;;  %p129_p4 = scmp.eq.s32.totalorder %s1150_s23, 31 }
  0x14   : > { %p134_p5 = scmp.ne.s32.totalorder %s1025_s13, %s1021_s12  ;;  %p135_p6 = scmp.eq.s32.totalorder %s647_s24, 31 }
  0x15   : > { %s1476_s26 = scalar_select %p1160_p3, 1, 0 }
  0x16   : > { %p1167_p7 = por %p129_p4, %p128_p2  ;;  %p648_p8 = scmp.ge.s32.totalorder %s1061_s22, 1 }
  0x17   : > { %p1172_p9 = por %p135_p6, %p134_p5  ;;  %p142_p10 = scmp.lt.s32.totalorder %s1061_s22, 33 }
  0x18   : > { %s1477_s27 = scalar_select %p1167_p7, 1, 0 }
  0x19   : > { %s1479_s28 = scalar_select %p1172_p9, 1, 0 }
  0x1a   : > { %1478 = sst [smem:[#allocation15_spill]] %s1477_s27  ;;  %p1177_p11 = pnand %p648_p8, %p142_p10 }
  0x1b   : > { %1480 = sst [smem:[#allocation16_spill]] %s1479_s28  ;;  %s1063_s30 = smov [#allocation7]  }
  0x1c   : > { %s1481_s29 = scalar_select %p1177_p11, 1, 0 }
  0x1d   : > { %s154_s4 = sshll.u32 %s1063_s30, 4  ;;  %p716_p12 = pneg %p1177_p11  ;;  %s155_s4 = int_to_ptr.vmem [resolvable:$true] %s154_s4 }
  0x1e   : > { %s1483_s2 = sld [smem:[#allocation20_spill]] }
  0x1f   : > { %p1185_p13 = pnand %p716_p12, %p1459_p1 }
  0x21   : > { %p845_p2 = pneg %p1185_p13 }
  0x24   : > { %s843_s8 = scalar_lea.hbm %s1483_s2, 256 }
  0x25   : > { %p844_p0 = scmp.ne.s32.totalorder %s1483_s2, %s843_s8  ;;  %p850_p6 = scmp.lt.u32.totalorder %s843_s8, %s1483_s2 }
  0x27   : > { %p846_p4 = pnand %p845_p2, %p844_p0 }
  0x29   : > { %p847_p5 = pneg %p846_p4 }
  0x2b   : > { %p852_p8 = pnand %p850_p6, %p847_p5 }
  0x2d   : > { %855 = shalt.err (!%p852_p8)
}
  0x2e   : > { %s856_s24 = scalar_lea.vmem %s155_s4, 256  ;;  %p864_p9 = scmp.lt.s32.totalorder %s155_s4, %s155_s4 }
  0x2f   : > { %p857_p10 = scmp.ne.s32.totalorder %s155_s4, %s856_s24  ;;  %p865_p7 = scmp.lt.s32.totalorder %s856_s24, %s856_s24 }
  0x31   : > { %p859_p12 = pnand %p857_p10, %p845_p2  ;;  %p866_p3 = por %p865_p7, %p864_p9 }
  0x33   : > { %p860_p1 = pneg %p859_p12 }
  0x35   : > { %p867_p11 = pnand %p866_p3, %p860_p1 }
  0x37   : > { %870 = shalt.err (!%p867_p11)
}
  0x38   : > { %s1064_s30 = smov 64   ;;  %s1065_s6 = smov 4  }
  0x39   : > { %719 = dma.hbm_to_vmem [thread:$0]  (!%p1185_p13), %s1483_s2, 256, %s155_s4, [#allocation6], %s1064_s30, %s1064_s30, %s1065_s6  }
  0x3a   : > { %s31_s9 = sadd.s32 1, %s1053_s20  ;;  %s34_s10 = sadd.s32 1, %s1057_s21 }
  0x3b   : > { %p32_p1 = scmp.ge.s32.totalorder %s31_s9, 8  ;;  %s43_s11 = sadd.s32 1, %s1041_s17 }
  0x3c   : > { %p50_p3 = scmp.ne.s32.totalorder %s1041_s17, %s1037_s16  ;;  %p51_p7 = scmp.eq.s32.totalorder %s1061_s22, 0 }
  0x3d   : > { %s1511_s9 = smov (%p32_p1, %s31_s9), 0  ;;  %s1513_s10 = smov (!%p32_p1, %s34_s10), %s1057_s21 }
  0x3e   : > { %1484 = sst [smem:[#allocation17_spill]] %s1511_s9  ;;  %s39_s5 = ssub.s32 %s1053_s20, %s1511_s9 }
  0x3f   : > { %p36_p9 = scmp.ge.s32.totalorder %s1513_s10, 4  ;;  %p732_p11 = scmp.lt.s32.totalorder %s1061_s22, 32 }
  0x40   : > { %p1217_p13 = por %p51_p7, %p50_p3  ;;  %s168_s15 = sand.u32 1, %s1041_s17  }
  0x41   : > { %s1515_s10 = smov (%p36_p9, %s1513_s10), 0  ;;  %s1224_s24 = sshll.u32 %s168_s15, 4 }
  0x42   : > { %1486 = sst [smem:[#allocation18_spill]] %s1515_s10  ;;  %s38_s30 = ssub.s32 %s1057_s21, %s1515_s10 }
  0x43   : > { %s40_s6 = sor.u32 %s39_s5, %s38_s30  ;;  %p116_p0 = scmp.eq.s32.totalorder %s38_s30, 0 }
  0x44   : > { %p41_p2 = scmp.eq.s32.totalorder %s40_s6, 0  ;;  %s652_s7 = sshll.u32 %s1053_s20, 1 }
  0x45   : > { %s1232_s8 = scalar_select %p116_p0, %s1029_s14, %s118_s25  }
  0x46   : > { %s1235_s2 = scalar_select %p41_p2, %s1041_s17, %s43_s11  }
  0x47   : > { %s653_s9 = sshll.u32 %s1057_s21, 4  ;;  %s172_s28 = scalar_lea.vmem [#allocation2], %s1224_s24 }
  0x48   : > { %s181_s12 = sshll.u32 %s172_s28, 4  ;;  %s1239_s3 = sadd.s32 %s653_s9, %s652_s7  ;;  %s1241_s12 = int_to_ptr.vmem [resolvable:$true] %s181_s12 }
  0x49   : > { %s654_s27 = sshll.u32 %s1239_s3, 7  ;;  %p1248_p4 = pnand %p732_p11, %p1217_p13 }
  0x4a   : > { %s1488_s0 = sld [smem:[#allocation19_spill]]  ;;  %s1259_s9 = scalar_lea.sflag [#allocation3], %s168_s15 }
  0x4b   : > { %p873_p6 = pneg %p1248_p4 }
  0x50   : > { %s1257_s28 = scalar_lea.hbm %s1488_s0, %s654_s27  ;;  %s876_s7 = scalar_lea.hbm %s1488_s0, 8192 }
  0x51   : > { %s871_s4 = scalar_lea.hbm %s1257_s28, 256  ;;  %p877_p12 = scmp.lt.u32.totalorder %s1257_s28, %s1488_s0 }
  0x52   : > { %p872_p5 = scmp.ne.s32.totalorder %s1257_s28, %s871_s4  ;;  %p878_p1 = scmp.lt.u32.totalorder %s876_s7, %s871_s4 }
  0x53   : > { %p880_p7 = scmp.lt.u32.totalorder %s871_s4, %s1257_s28 }
  0x54   : > { %p874_p8 = pnand %p873_p6, %p872_p5  ;;  %p879_p3 = por %p878_p1, %p877_p12 }
  0x56   : > { %p875_p10 = pneg %p874_p8  ;;  %p881_p9 = por %p880_p7, %p879_p3 }
  0x58   : > { %p882_p11 = pnand %p881_p9, %p875_p10 }
  0x5a   : > { %885 = shalt.err (!%p882_p11)
}
  0x5b   : > { %s886_s15 = scalar_lea.vmem %s1241_s12, 256  ;;  %s1066_s30 = smov [#allocation2]  }
  0x5c   : > { %p887_p13 = scmp.ne.s32.totalorder %s1241_s12, %s886_s15  ;;  %s891_s6 = sshll.u32 %s1066_s30, 4  ;;  %s892_s6 = int_to_ptr.vmem [resolvable:$false] %s891_s6 }
  0x5d   : > { %s893_s25 = scalar_lea.vmem %s892_s6, 512  ;;  %p894_p5 = scmp.lt.s32.totalorder %s1241_s12, %s892_s6 }
  0x5e   : > { %p889_p0 = pnand %p887_p13, %p873_p6  ;;  %p895_p8 = scmp.lt.s32.totalorder %s893_s25, %s886_s15 }
  0x60   : > { %p890_p2 = pneg %p889_p0  ;;  %p896_p12 = por %p895_p8, %p894_p5 }
  0x62   : > { %p897_p1 = pnand %p896_p12, %p890_p2 }
  0x64   : > { %900 = shalt.err (!%p897_p1)
}
  0x65   : > { %s1067_s4 = smov 128   ;;  %s1068_s7 = smov 8  }
  0x66   : > { %723 = dma.hbm_to_vmem [thread:$0]  (!%p1248_p4), %s1257_s28, 256, %s1241_s12, %s1259_s9, %s1067_s4, %s1067_s4, %s1068_s7  }
  0x67   : > { %s1295_s30 = scalar_lea.hbm %s1456_s1, %s654_s27  ;;  %s195_s6 = scalar_lea.vmem [#allocation5], %s1224_s24 }
  0x68   : > { %s204_s25 = sshll.u32 %s195_s6, 4  ;;  %s191_s0 = sand.u32 1, %s1061_s22   ;;  %s1299_s25 = int_to_ptr.vmem [resolvable:$true] %s204_s25 }
  0x69   : > { %s1301_s10 = scalar_lea.sflag [#allocation6], %s191_s0  ;;  %s901_s21 = scalar_lea.hbm %s1295_s30, 256 }
  0x6a   : > { %p902_p10 = scmp.ne.s32.totalorder %s1295_s30, %s901_s21  ;;  %s906_s27 = scalar_lea.hbm %s1456_s1, 8192 }
  0x6b   : > { %p907_p9 = scmp.lt.u32.totalorder %s1295_s30, %s1456_s1  ;;  %p908_p11 = scmp.lt.u32.totalorder %s906_s27, %s901_s21 }
  0x6c   : > { %p904_p3 = pnand %p902_p10, %p873_p6  ;;  %p910_p0 = scmp.lt.u32.totalorder %s901_s21, %s1295_s30 }
  0x6d   : > { %p909_p13 = por %p908_p11, %p907_p9 }
  0x6e   : > { %p905_p7 = pneg %p904_p3 }
  0x6f   : > { %p911_p2 = por %p910_p0, %p909_p13 }
  0x71   : > { %p912_p5 = pnand %p911_p2, %p905_p7 }
  0x73   : > { %915 = shalt.err (!%p912_p5)
}
  0x74   : > { %s916_s0 = scalar_lea.vmem %s1299_s25, 256  ;;  %s1069_s24 = smov [#allocation5]  }
  0x75   : > { %p917_p8 = scmp.ne.s32.totalorder %s1299_s25, %s916_s0  ;;  %s921_s11 = sshll.u32 %s1069_s24, 4  ;;  %s922_s11 = int_to_ptr.vmem [resolvable:$false] %s921_s11 }
  0x76   : > { %s923_s15 = scalar_lea.vmem %s922_s11, 512  ;;  %p924_p10 = scmp.lt.s32.totalorder %s1299_s25, %s922_s11 }
  0x77   : > { %p919_p12 = pnand %p917_p8, %p873_p6  ;;  %p925_p3 = scmp.lt.s32.totalorder %s923_s15, %s916_s0 }
  0x79   : > { %p920_p1 = pneg %p919_p12  ;;  %p926_p9 = por %p925_p3, %p924_p10 }
  0x7b   : > { %p927_p11 = pnand %p926_p9, %p920_p1 }
  0x7d   : > { %930 = shalt.err (!%p927_p11)
}
  0x7e   : > { %726 = dma.hbm_to_vmem [thread:$0]  (!%p1248_p4), %s1295_s30, 256, %s1299_s25, %s1301_s10, %s1067_s4, %s1067_s4, %s1068_s7  }
  0x7f   : > { %p1489_p6 = scmp.ne.s32.totalorder %s1481_s29, 0 }
  0x80   : > { %s218_s21 = sand.u32 (!%p1489_p6), 1, %s1037_s16   ;;  %p1490_p7 = scmp.ne.s32.totalorder (!%p1489_p6), %s1476_s26, 0 }
  0x81   : > { %216 = sbr.rel (%p1489_p6) target bundleno = 803 (0x323), region = 32  ;;  %s1333_s6 = sshll.u32 (!%p1489_p6), %s218_s21, 4 }
  0x82   : > { %s219_s3 = scalar_lea.sflag (!%p1489_p6), [#allocation3], %s218_s21  ;;  %s222_s12 = scalar_lea.vmem (!%p1489_p6), [#allocation2], %s1333_s6 }
  0x88   : > { %1004 = dma.done.wait (%p1490_p7), %s219_s3, 256  }
  0x89   : > { %1006 = vsyncadd (%p1490_p7), %s219_s3, 4294967040  ;;  %s227_s10 = sand.u32 1, %s1150_s23   ;;  %s231_s29 = scalar_lea.vmem [#allocation5], %s1333_s6 }
  0x8a   : > { %s228_s5 = scalar_lea.sflag [#allocation6], %s227_s10 }
  0x8b   : > { %1008 = dma.done.wait (%p1490_p7), %s228_s5, 256  }
  0x8c   : > { %1010 = vsyncadd (%p1490_p7), %s228_s5, 4294967040  ;;  %p1491_p4 = scmp.eq.s32.totalorder %s1150_s23, 0 }
  0x8e   : > { %1012 = dma.done.wait (%p1491_p4), [#allocation6], 256   ;;  %p1492_p13 = pmov %p1491_p4 }
  0x8f   : > { %s260_s4 = sand.u32 1, %s1025_s13   ;;  %p664_p0 = scmp.ne.s32.totalorder %s1045_s18, 0 }
  0x90   : > { %1014 = vsyncadd (%p1492_p13), [#allocation6], 4294967040  ;;  %s663_s7 = sshll.u32 %s260_s4, 4  ;;  %vm268_vm0 = vcmask (!%p664_p0), 130048   ;;  %v1070_v0 = vmov (!%p664_p0), 0.0  }
  0x91   : > { %s1353_s30 = scalar_lea.vmem [#allocation8], %s663_s7  ;;  %267 = sbr.rel (%p664_p0) target bundleno = 152 (0x98), region = 48 }
  0x92   : > { %269 = vst.msk [vmem:[%s1353_s30] sm:$0xff] (!%p664_p0), %vm268_vm0, %v1070_v0  ;;  %270 = vst.msk [vmem:[%s1353_s30 + $0x8] sm:$0xff] (!%p664_p0), %vm268_vm0, %v1070_v0 }
  0x98 PF: > { %v833_v1 = vld [vmem:[#allocation7] sm:$0xff]   ;;  %v1071_v2 = vmov 0.0   ;;  %vm290_vm1 = vcmask 64512   ;;  %v371_v5 = vld [vmem:[%s231_s29 + $0x8] sm:$0xff]  ;;  %vm1072_vm2 = vmmov 0   ;;  %vm351_vm3 = vcmask 261120  }
  0x99   : > { %684 = vmatprep.subr.bf16.mxu0 %v1071_v2  ;;  %692 = vmatprep.subr.bf16.mxu1 %v1071_v2  ;;  %v295_v3 = vsel %vm290_vm1, %v833_v1, 0  ;;  %v370_v4 = vld [vmem:[%s231_s29] sm:$0xff]  ;;  %v834_v7 = vld [vmem:[#allocation7 + $0x8] sm:$0xff]   ;;  %v420_v8 = vmul.f32 %v371_v5, %v371_v5  ;;  %v373_v18 = vmul.f32 0.59460354, %v371_v5  ;;  %s675_s18 = sshll.u32 %s1049_s19, 8 }
  0x9a   : > { %685 = vmatpush3.bf16.xpose.msra.mxu0 %v295_v3  ;;  %693 = vmatpush3.bf16.xpose.msra.mxu1 %v295_v3  ;;  %v419_v6 = vmul.f32 %v370_v4, %v370_v4  ;;  %v271_v10 = vld [vmem:[%s222_s12] sm:$0xff]  ;;  %v272_v11 = vld [vmem:[%s222_s12 + $0x8] sm:$0xff]  ;;  %v298_v14 = vsel %vm290_vm1, %v834_v7, 0  ;;  %v372_v17 = vmul.f32 0.59460354, %v370_v4  ;;  %s524_s23 = sshll.u32 %s1353_s30, 4  ;;  %s1388_s23 = int_to_ptr.vmem [resolvable:$true] %s524_s23 }
  0x9b   : > { %686 = vmatprep.subr.bf16.mxu0 %v1071_v2  ;;  %694 = vmatprep.subr.bf16.mxu1 %v1071_v2  ;;  %v424_v12 = vsel %vm290_vm1, %v420_v8, 0.0  ;;  %v342_v13 = vmul.f32 %v272_v11, %v272_v11  ;;  %v277_v15 = vmul.f32 0.59460354, %v271_v10  ;;  %v278_v16 = vmul.f32 0.59460354, %v272_v11  ;;  %s1493_s26 = sld [smem:[#allocation15_spill]] }
  0x9c   : > { %688 = vmatprep.mubr.msk.bf16.mxu0 %vm1072_vm2, %v1071_v2  ;;  %696 = vmatprep.mubr.msk.bf16.mxu1 %vm1072_vm2, %v1071_v2  ;;  %v421_v9 = vsel %vm290_vm1, %v419_v6, 0.0  ;;  %v374_v21 = vpack.c.bf16 %v373_v18, %v372_v17  ;;  %v341_v31 = vmul.f32 %v271_v10, %v271_v10  ;;  %v454_v18 = vld [vmem:[%s1353_s30] sm:$0xff]  ;;  %vm507_vm4 = vcmask 130048   ;;  %s1494_s28 = sld [smem:[#allocation21_spill]]  ;;  %s1394_s19 = scalar_lea.sflag [#allocation4], %s260_s4 }
  0x9d   : > { %422 = vadd.xlane.f32.xlu1 %v421_v9  ;;  %v346_v19 = vsel %vm290_vm1, %v342_v13, 0.0  ;;  %v279_v20 = vpack.c.bf16 %v278_v16, %v277_v15  ;;  %s931_s0 = scalar_lea.vmem %s1388_s23, 256  ;;  %s1073_s24 = smov [#allocation8]  }
  0x9e   : > { %v343_v34 = vsel %vm290_vm1, %v341_v31, 0.0  ;;  %p932_p2 = scmp.ne.s32.totalorder %s1388_s23, %s931_s0  ;;  %s935_s11 = sshll.u32 %s1073_s24, 4  ;;  %s936_s11 = int_to_ptr.vmem [resolvable:$false] %s935_s11 }
  0x9f   : > { %s937_s15 = scalar_lea.vmem %s936_s11, 512  ;;  %p938_p1 = scmp.lt.s32.totalorder %s1388_s23, %s936_s11 }
  0xa0   : > { %p939_p10 = scmp.lt.s32.totalorder %s937_s15, %s931_s0 }
  0xa1   : > { %425 = vadd.xlane.f32.xlu1 %v424_v12  ;;  %p1495_p5 = scmp.ne.s32.totalorder %s1493_s26, 0 }
  0xa2   : > { %687 = vmatpush3.bf16.xpose.msra.mxu0 %v298_v14  ;;  %695 = vmatpush3.bf16.xpose.msra.mxu1 %v298_v14  ;;  %s1386_s9 = scalar_lea.hbm %s1494_s28, %s675_s18  ;;  %p940_p3 = por %p939_p10, %p938_p1 }
  0xa3   : > { %700 = vmatprep.subr.bf16.mxu0 %v1071_v2  ;;  %p933_p8 = pnand %p932_p2, %p1495_p5 }
  0xa5   : > { %347 = vadd.xlane.f32.xlu1 %v346_v19  ;;  %p934_p12 = pneg %p933_p8 }
  0xa7   : > { %p941_p9 = pnand %p940_p3, %p934_p12 }
  0xa9   : > { %689 = vmatmul.mubr.msk.bf16.vlgmr.msra.gmra.mrb[0].mxu0 %vm290_vm1, %v279_v20  ;;  %697 = vmatmul.mubr.msk.bf16.vlgmr.msra.gmra.mrb[0].mxu1 %vm290_vm1, %v374_v21  ;;  %v455_v20 = vld [vmem:[%s1353_s30 + $0x8] sm:$0xff] }
  0xaa   : > { %702 = vmatprep.mubr.msk.bf16.mxu0 %vm1072_vm2, %v1071_v2 }
 0x12a   : > { %v423_v36 = vpop.xlane.xlu1 %422 }
 0x12b   : > { %v427_v53 = vmul.f32 0.17677669, %v423_v36 }
 0x12e   : > { %v426_v37 = vpop.xlane.xlu1 %425 }
 0x12f   : > { %v428_v55 = vmul.f32 0.17677669, %v426_v37 }
 0x132   : > { %v348_v38 = vpop.xlane.xlu1 %347 }
 0x133   : > { %v350_v39 = vmul.f32 0.17677669, %v348_v38 }
 0x17c   : > { %v334_v22 = vpop.f32.mrb[0].mxu0  ;;  %v412_v23 = vpop.f32.mrb[0].mxu1 }
 0x17d   : > { %v690_v24 = vpop.f32.mrb[1].mxu0  ;;  %v698_v25 = vpop.f32.mrb[1].mxu1  ;;  %v429_v26 = vsel %vm351_vm3, %v412_v23, -inf  ;;  %v352_v35 = vsel %vm351_vm3, %v334_v22, -inf  ;;  %v442_v60 = vsub.f32 %v412_v23, %v427_v53 }
 0x17e   : > { %430 = vmax.xlane.f32.xlu0 %v429_v26  ;;  %v337_v27 = vpop.f32.mrb[2].mxu0  ;;  %v415_v28 = vpop.f32.mrb[2].mxu1 }
 0x17f   : > { %v699_v29 = vpop.f32.mrb[3].mxu1  ;;  %v355_v30 = vsel %vm351_vm3, %v337_v27, -inf  ;;  %v691_v32 = vpop.f32.mrb[3].mxu0  ;;  %v432_v33 = vsel %vm351_vm3, %v415_v28, -inf  ;;  %v359_v42 = vsub.f32 %v337_v27, %v350_v39  ;;  %v443_v61 = vsub.f32 %v415_v28, %v428_v55 }
 0x180   : > { %356 = vmax.xlane.f32.xlu1 %v355_v30 }
 0x182   : > { %433 = vmax.xlane.f32.xlu0 %v432_v33 }
 0x186   : > { %344 = vadd.xlane.f32.xlu0 %v343_v34 }
 0x18a   : > { %353 = vmax.xlane.f32.xlu0 %v352_v35 }
 0x20b   : > { %v431_v40 = vpop.xlane.xlu0 %430 }
 0x20d   : > { %v357_v41 = vpop.xlane.xlu1 %356 }
 0x20e   : > { %v361_v44 = vsub.f32 %v359_v42, %v357_v41 }
 0x20f   : > { %v434_v43 = vpop.xlane.xlu0 %433 }
 0x210   : > { %v435_v45 = vmax.f32 %v431_v40, %v434_v43  ;;  %v364_v48 = vmul.f32 1.442695, %v361_v44 }
 0x212   : > { %v436_v46 = vrot.slane %v435_v45, 4  ;;  %835 = vpow2.f32 %v364_v48 }
 0x213   : > { %v345_v47 = vpop.xlane.xlu0 %344 }
 0x214   : > { %v437_v49 = vmax.f32 %v435_v45, %v436_v46  ;;  %v349_v50 = vmul.f32 0.17677669, %v345_v47 }
 0x216   : > { %v438_v51 = vrot.slane %v437_v49, 2  ;;  %v358_v52 = vsub.f32 %v334_v22, %v349_v50 }
 0x217   : > { %v354_v54 = vpop.xlane.xlu0 %353 }
 0x218   : > { %v439_v56 = vmax.f32 %v437_v49, %v438_v51  ;;  %v360_v57 = vsub.f32 %v358_v52, %v354_v54 }
 0x21a   : > { %v440_v58 = vrot.slane %v439_v56, 1  ;;  %v362_v59 = vmul.f32 1.442695, %v360_v57 }
 0x21c   : > { %v441_v62 = vmax.f32 %v439_v56, %v440_v58  ;;  %837 = vpow2.f32 %v362_v59  ;;  %v836_v3 = vpop.eup %835 }
 0x21d   : > { %v367_v4 = vadd.f32 0.0001, %v836_v3 }
 0x21e   : > { %v444_v63 = vsub.f32 %v442_v60, %v441_v62  ;;  %v445_v0 = vsub.f32 %v443_v61, %v441_v62 }
 0x21f   : > { %v369_v7 = vmul.f32 0.17677669, %v367_v4 }
 0x220   : > { %v446_v1 = vmul.f32 1.442695, %v444_v63  ;;  %v448_v2 = vmul.f32 1.442695, %v445_v0 }
 0x222   : > { %839 = vpow2.f32 %v446_v1 }
 0x223   : > { %841 = vpow2.f32 %v448_v2 }
 0x226   : > { %v838_v5 = vpop.eup %837 }
 0x227   : > { %v366_v6 = vadd.f32 0.0001, %v838_v5 }
 0x229   : > { %v368_v8 = vmul.f32 0.17677669, %v366_v6 }
 0x22b   : > { %v456_v9 = vpack.c.bf16 %v369_v7, %v368_v8 }
 0x22c   : > { %v840_v10 = vpop.eup %839 }
 0x22d   : > { %v842_v11 = vpop.eup %841  ;;  %v450_v12 = vadd.f32 0.0001, %v840_v10 }
 0x22e   : > { %v451_v13 = vadd.f32 0.0001, %v842_v11 }
 0x22f   : > { %v452_v14 = vmul.f32 0.17677669, %v450_v12 }
 0x230   : > { %v453_v15 = vmul.f32 0.17677669, %v451_v13 }
 0x232   : > { %v457_v16 = vpack.c.bf16 %v453_v15, %v452_v14 }
 0x234   : > { %v462_v17 = vsel %vm351_vm3, %v457_v16, 0 }
 0x235   : > { %701 = vmatpush3.bf16.xpose.msra.mxu0 %v462_v17 }
 0x23c   : > { %703 = vmatmul.mubr.msk.bf16.vlgmr.msra.gmra.mrb[4].mxu0 %vm351_vm3, %v456_v9 }
 0x30f   : > { %v498_v19 = vpop.f32.mrb[4].mxu0 }
 0x310   : > { %v505_v21 = vadd.f32 %v498_v19, %v454_v18  ;;  %v704_v22 = vpop.f32.mrb[5].mxu0 }
 0x311   : > { %v501_v23 = vpop.f32.mrb[6].mxu0 }
 0x312   : > { %508 = vst.msk [vmem:[%s1353_s30] sm:$0xff] %vm507_vm4, %v505_v21  ;;  %v506_v24 = vadd.f32 %v501_v23, %v455_v20  ;;  %v705_v25 = vpop.f32.mrb[7].mxu0 }
 0x314   : > { %509 = vst.msk [vmem:[%s1353_s30 + $0x8] sm:$0xff] %vm507_vm4, %v506_v24 }
 0x315   : > { %944 = shalt.err (!%p941_p9)
}
 0x316   : > { %s945_s21 = scalar_lea.hbm %s1386_s9, 256  ;;  %s949_s12 = scalar_lea.hbm %s1494_s28, 1024 }
 0x317   : > { %p946_p11 = scmp.ne.s32.totalorder %s1386_s9, %s945_s21  ;;  %p950_p4 = scmp.lt.u32.totalorder %s1386_s9, %s1494_s28 }
 0x318   : > { %p951_p13 = scmp.lt.u32.totalorder %s949_s12, %s945_s21  ;;  %p953_p2 = scmp.lt.u32.totalorder %s945_s21, %s1386_s9 }
 0x319   : > { %p947_p6 = pnand %p946_p11, %p1495_p5 }
 0x31a   : > { %p952_p0 = por %p951_p13, %p950_p4 }
 0x31b   : > { %p948_p7 = pneg %p947_p6 }
 0x31c   : > { %p954_p8 = por %p953_p2, %p952_p0 }
 0x31e   : > { %p955_p12 = pnand %p954_p8, %p948_p7 }
 0x320   : > { %958 = shalt.err (!%p955_p12)
}
 0x321   : > { %s1074_s29 = smov 128   ;;  %s1075_s4 = smov 8  }
 0x322   : > { %714 = dma.vmem_to_hbm [thread:$0]  (%p1495_p5), %s1388_s23, 256, %s1386_s9, %s1394_s19, %s1074_s29, %s1074_s29, %s1075_s4  }
 0x323 PF: > { %s1496_s7 = sld [smem:[#allocation13_spill]]  ;;  %s1497_s30 = sld [smem:[#allocation16_spill]] }
 0x324   : > { %p734_p1 = scmp.ge.s32.totalorder %s1061_s22, 2 }
 0x329   : > { %s539_s18 = sand.u32 1, %s1496_s7   ;;  %p1498_p10 = scmp.ne.s32.totalorder %s1497_s30, 0 }
 0x32a   : > { %s540_s25 = scalar_lea.sflag [#allocation4], %s539_s18 }
 0x32b   : > { %p728_p3 = pnand %p734_p1, %p1498_p10 }
 0x32d   : > { %1016 = dma.done.wait (!%p728_p3), %s540_s25, 256  }
 0x32e   : > { %1018 = vsyncadd (!%p728_p3), %s540_s25, 4294967040  ;;  %s22_s22 = sadd.s32 1, %s1061_s22   ;;  %s1499_s19 = sld [smem:[#allocation14_spill]] }
 0x32f   : > { %p19_p9 = scmp.ge.s32.totalorder %s22_s22, 34   ;;  %s1500_s23 = sld [smem:[#allocation17_spill]] }
 0x330   : > { %s1501_s21 = sld [smem:[#allocation18_spill]]  ;;  %s1502_s12 = smov %s1025_s13 }
 0x331   : > { %s1503_s13 = smov %s1029_s14  ;;  %s1504_s14 = smov %s1232_s8 }
 0x332   : > { %s1505_s15 = smov %s1037_s16  ;;  %s1506_s16 = smov %s1041_s17 }
 0x333   : > { %s1507_s17 = smov %s1235_s2  ;;  %s1508_s18 = smov %s1053_s20 }
 0x334   :  { %21 = sbr.rel (!%p19_p9) target bundleno = 15 (0xf), region = 98 }
 0x335   : > { %s1509_s20 = smov %s1500_s23 }
 0x33b   :  { %545 = vsyncpa [#allocation3], 1 }
 0x33c   :  { %547 = vsyncpa [#allocation3 + $0x1], 1 }
 0x33d   :  { %548 = vsyncpa [#allocation6], 1 }
 0x33e   :  { %550 = vsyncpa [#allocation6 + $0x1], 1 }
 0x33f   :  { %551 = vsyncpa [#allocation4], 1 }
 0x340   :  { %553 = vsyncpa [#allocation4 + $0x1], 1 }

// kernel: model_forward.18
= control target key start
LH: loop header
LB: loop body
LE: loop exit
PB: predicated region body
PF: predicated region fallthrough
CT: control target
= control target key end

     0   :  { %v934_v0 = vmov 0   ;;  %vm241_vm0 = vcmask 261120   ;;  %vm553_vm1 = vcmask 130048   ;;  %s1526_s0 = inlined_call_operand.vmem [shape: f32[128,1], index: 0, kind: input, shape index: {}]   ;;  %s1527_s4 = inlined_call_operand.vmem [shape: bf16[32,16], index: 4, kind: input, shape index: {}]   ;;  %s1528_s1 = inlined_call_operand.vmem [shape: f32[128,1], index: 1, kind: input, shape index: {}]   ;;  %s1529_s2 = inlined_call_operand.vmem [shape: f32[1,32], index: 2, kind: input, shape index: {}]   ;;  %s1530_s3 = inlined_call_operand.vmem [shape: f32[1,32], index: 3, kind: input, shape index: {}]   ;;  %s1531_s6 = inlined_call_operand.vmem [shape: f32[1,16], index: 6, kind: input, shape index: {}]   ;;  %s1532_s7 = inlined_call_operand.vmem [shape: f32[1,16], index: 7, kind: input, shape index: {}]   ;;  %s1533_s5 = inlined_call_operand.vmem [shape: f32[1,16], index: 5, kind: input, shape index: {}]   ;;  %s1534_s8 = inlined_call_operand.vmem [shape: f32[1,32], index: 8, kind: input, shape index: {}]   ;;  %s1535_s9 = inlined_call_operand.vmem [shape: f32[1,32], index: 9, kind: input, shape index: {}]   ;;  %s1536_s10 = inlined_call_operand.vmem [shape: f32[128,32], index: 10, kind: output, shape index: {}]  }
   0x1   :  { %899 = vset.pattern.permute.xlu1 %v934_v0  ;;  %898 = vset.pattern.permute.xlu0 %v934_v0  ;;  %v44_v1 = vld [vmem:[%s1526_s0 + $0x40] sm:$0xff]  ;;  %v45_v3 = vld [vmem:[%s1526_s0 + $0x48] sm:$0xff]  ;;  %v39_v5 = vld [vmem:[%s1526_s0 + $0x18] sm:$0xff] }
   0x2   :  { %v36_v2 = vld [vmem:[%s1526_s0] sm:$0xff]  ;;  %111 = vperm.xlu1 %899, %v44_v1   ;;  %v37_v4 = vld [vmem:[%s1526_s0 + $0x8] sm:$0xff]  ;;  %v38_v6 = vld [vmem:[%s1526_s0 + $0x10] sm:$0xff] }
   0x3   :  { %71 = vperm.xlu0 %898, %v36_v2   ;;  %v47_v7 = vld [vmem:[%s1526_s0 + $0x58] sm:$0xff]  ;;  %v46_v8 = vld [vmem:[%s1526_s0 + $0x50] sm:$0xff]  ;;  %v900_v9 = vld [vmem:[%s1527_s4] sm:$0xff]  }
   0x4   :  { %v901_v10 = vld [vmem:[%s1527_s4 + $0x8] sm:$0xff]   ;;  %v40_v12 = vld [vmem:[%s1526_s0 + $0x20] sm:$0xff]  ;;  %872 = vmatprep.subr.bf16.mxu0 %v900_v9  ;;  %892 = vmatprep.subr.bf16.mxu1 %v900_v9  ;;  %v43_v15 = vld [vmem:[%s1526_s0 + $0x38] sm:$0xff] }
   0x5   :  { %v41_v11 = vld [vmem:[%s1526_s0 + $0x28] sm:$0xff]  ;;  %873 = vmatpush3.bf16.msra.mxu0 %v900_v9  ;;  %894 = vmatpush3.bf16.msra.mxu1 %v900_v9  ;;  %v48_v14 = vld [vmem:[%s1526_s0 + $0x60] sm:$0xff]  ;;  %v42_v16 = vld [vmem:[%s1526_s0 + $0x30] sm:$0xff] }
   0x6   :  { %116 = vperm.xlu1 %899, %v45_v3   ;;  %874 = vmatprep.subr.bf16.mxu0 %v901_v10  ;;  %v49_v13 = vld [vmem:[%s1526_s0 + $0x68] sm:$0xff]  ;;  %v51_v17 = vld [vmem:[%s1526_s0 + $0x78] sm:$0xff]  ;;  %v50_v18 = vld [vmem:[%s1526_s0 + $0x70] sm:$0xff] }
   0x7   :  { %76 = vperm.xlu0 %898, %v37_v4   ;;  %893 = vmatprep.subr.bf16.mxu1 %v901_v10  ;;  %v53_v19 = vld [vmem:[%s1528_s1 + $0x8] sm:$0xff]  ;;  %v52_v20 = vld [vmem:[%s1528_s1] sm:$0xff]  ;;  %v55_v21 = vld [vmem:[%s1528_s1 + $0x18] sm:$0xff] }
   0x8   :  { %v54_v22 = vld [vmem:[%s1528_s1 + $0x10] sm:$0xff]  ;;  %v57_v23 = vld [vmem:[%s1528_s1 + $0x28] sm:$0xff]  ;;  %v56_v24 = vld [vmem:[%s1528_s1 + $0x20] sm:$0xff] }
   0x9   :  { %875 = vmatpush3.bf16.msra.mxu0 %v901_v10  ;;  %895 = vmatpush3.bf16.msra.mxu1 %v901_v10  ;;  %v59_v25 = vld [vmem:[%s1528_s1 + $0x38] sm:$0xff]  ;;  %v58_v26 = vld [vmem:[%s1528_s1 + $0x30] sm:$0xff]  ;;  %v61_v27 = vld [vmem:[%s1528_s1 + $0x48] sm:$0xff] }
   0xa   :  { %86 = vperm.xlu1 %899, %v39_v5   ;;  %v60_v28 = vld [vmem:[%s1528_s1 + $0x40] sm:$0xff]  ;;  %v63_v29 = vld [vmem:[%s1528_s1 + $0x58] sm:$0xff]  ;;  %v62_v30 = vld [vmem:[%s1528_s1 + $0x50] sm:$0xff] }
   0xb   :  { %81 = vperm.xlu0 %898, %v38_v6   ;;  %v65_v31 = vld [vmem:[%s1528_s1 + $0x68] sm:$0xff]  ;;  %v64_v32 = vld [vmem:[%s1528_s1 + $0x60] sm:$0xff]  ;;  %v67_v33 = vld [vmem:[%s1528_s1 + $0x78] sm:$0xff] }
   0xc   :  { %v66_v34 = vld [vmem:[%s1528_s1 + $0x70] sm:$0xff]  ;;  %v1096_v35 = vld [vmem:[%s1529_s2] ss:$0 sm:$0xff] }
   0xd   :  { %v1101_v38 = vld [vmem:[%s1530_s3] ss:$0 sm:$0xff] }
   0xe   :  { %126 = vperm.xlu1 %899, %v47_v7  }
   0xf   :  { %121 = vperm.xlu0 %898, %v46_v8  }
  0x12   :  { %96 = vperm.xlu1 %899, %v41_v11  }
  0x13   :  { %91 = vperm.xlu0 %898, %v40_v12  }
  0x16   :  { %136 = vperm.xlu1 %899, %v49_v13  }
  0x17   :  { %131 = vperm.xlu0 %898, %v48_v14  }
  0x1a   :  { %106 = vperm.xlu1 %899, %v43_v15  }
  0x1b   :  { %101 = vperm.xlu0 %898, %v42_v16  }
  0x1e   :  { %146 = vperm.xlu1 %899, %v51_v17  }
  0x1f   :  { %141 = vperm.xlu0 %898, %v50_v18  }
  0x22   :  { %371 = vperm.xlu1 %899, %v53_v19  }
  0x23   :  { %366 = vperm.xlu0 %898, %v52_v20  }
  0x26   :  { %381 = vperm.xlu1 %899, %v55_v21  }
  0x27   :  { %376 = vperm.xlu0 %898, %v54_v22  }
  0x2a   :  { %391 = vperm.xlu1 %899, %v57_v23  }
  0x2b   :  { %386 = vperm.xlu0 %898, %v56_v24  }
  0x2e   :  { %401 = vperm.xlu1 %899, %v59_v25  }
  0x2f   :  { %396 = vperm.xlu0 %898, %v58_v26  }
  0x32   :  { %411 = vperm.xlu1 %899, %v61_v27  }
  0x33   :  { %406 = vperm.xlu0 %898, %v60_v28  }
  0x36   :  { %421 = vperm.xlu1 %899, %v63_v29  }
  0x37   :  { %416 = vperm.xlu0 %898, %v62_v30  }
  0x3a   :  { %431 = vperm.xlu1 %899, %v65_v31  }
  0x3b   :  { %426 = vperm.xlu0 %898, %v64_v32  }
  0x3e   :  { %441 = vperm.xlu1 %899, %v67_v33  }
  0x3f   :  { %436 = vperm.xlu0 %898, %v66_v34  }
  0x81   :  { %v112_v36 = vpop.permute.xlu1 %111 }
  0x82   :  { %v72_v37 = vpop.permute.xlu0 %71  ;;  %v163_v39 = vmul.f32 %v1096_v35, %v112_v36 }
  0x83   :  { %v155_v40 = vmul.f32 %v1096_v35, %v72_v37 }
  0x84   :  { %v186_v41 = vadd.f32 %v1101_v38, %v163_v39 }
  0x85   :  { %v178_v42 = vadd.f32 %v1101_v38, %v155_v40  ;;  %v117_v43 = vpop.permute.xlu1 %116 }
  0x86   :  { %v77_v44 = vpop.permute.xlu0 %76  ;;  %v164_v45 = vmul.f32 %v1096_v35, %v117_v43  ;;  %v202_v49 = vmax.f32 %v186_v41, 0.0  ;;  %v1142_v41 = vld [vmem:[%s1531_s6] ss:$0 sm:$0xff]  ;;  %s935_s6 = smov 16  }
  0x87   :  { %v156_v46 = vmul.f32 %v1096_v35, %v77_v44  ;;  %v194_v50 = vmax.f32 %v178_v42, 0.0 }
  0x88   :  { %v187_v47 = vadd.f32 %v1101_v38, %v164_v45  ;;  %v1149_v45 = vld [vmem:[%s1532_s7] ss:$0 sm:$0xff] }
  0x89   :  { %v179_v48 = vadd.f32 %v1101_v38, %v156_v46  ;;  %v87_v51 = vpop.permute.xlu1 %86 }
  0x8a   :  { %v82_v52 = vpop.permute.xlu0 %81  ;;  %v203_v53 = vmax.f32 %v187_v47, 0.0  ;;  %v158_v55 = vmul.f32 %v1096_v35, %v87_v51 }
  0x8b   :  { %v195_v54 = vmax.f32 %v179_v48, 0.0  ;;  %v157_v56 = vmul.f32 %v1096_v35, %v82_v52 }
  0x8c   :  { %v181_v57 = vadd.f32 %v1101_v38, %v158_v55  ;;  %v214_v60 = vpack.c.bf16 %v203_v53, %v202_v49 }
  0x8d   :  { %v180_v58 = vadd.f32 %v1101_v38, %v157_v56  ;;  %v210_v59 = vpack.c.bf16 %v195_v54, %v194_v50  ;;  %v127_v61 = vpop.permute.xlu1 %126 }
  0x8e   :  { %v122_v62 = vpop.permute.xlu0 %121  ;;  %v197_v63 = vmax.f32 %v181_v57, 0.0  ;;  %v166_v1 = vmul.f32 %v1096_v35, %v127_v61  ;;  %884 = vmatprep.mubr.msk.bf16.mxu1 %vm241_vm0, %v214_v60 }
  0x8f   :  { %v196_v0 = vmax.f32 %v180_v58, 0.0  ;;  %v165_v2 = vmul.f32 %v1096_v35, %v122_v62  ;;  %876 = vmatprep.mubr.msk.bf16.mxu0 %vm241_vm0, %v210_v59 }
  0x90   :  { %v189_v4 = vadd.f32 %v1101_v38, %v166_v1 }
  0x91   :  { %v211_v3 = vpack.c.bf16 %v197_v63, %v196_v0  ;;  %v188_v5 = vadd.f32 %v1101_v38, %v165_v2  ;;  %v97_v6 = vpop.permute.xlu1 %96 }
  0x92   :  { %v92_v7 = vpop.permute.xlu0 %91  ;;  %v205_v8 = vmax.f32 %v189_v4, 0.0  ;;  %v160_v10 = vmul.f32 %v1096_v35, %v97_v6 }
  0x93   :  { %v204_v9 = vmax.f32 %v188_v5, 0.0  ;;  %v159_v11 = vmul.f32 %v1096_v35, %v92_v7  ;;  %877 = vmatmul.mubr.msk.bf16.vlgmr.msra.gmra.mrb[0].mxu0 %vm241_vm0, %v211_v3 }
  0x94   :  { %v183_v13 = vadd.f32 %v1101_v38, %v160_v10 }
  0x95   :  { %v215_v12 = vpack.c.bf16 %v205_v8, %v204_v9  ;;  %v182_v14 = vadd.f32 %v1101_v38, %v159_v11  ;;  %v137_v15 = vpop.permute.xlu1 %136 }
  0x96   :  { %v132_v16 = vpop.permute.xlu0 %131  ;;  %v199_v17 = vmax.f32 %v183_v13, 0.0  ;;  %v168_v19 = vmul.f32 %v1096_v35, %v137_v15 }
  0x97   :  { %v198_v18 = vmax.f32 %v182_v14, 0.0  ;;  %v167_v20 = vmul.f32 %v1096_v35, %v132_v16  ;;  %885 = vmatmul.mubr.msk.bf16.vlgmr.msra.gmra.mrb[0].mxu1 %vm241_vm0, %v215_v12 }
  0x98   :  { %v191_v22 = vadd.f32 %v1101_v38, %v168_v19 }
  0x99   :  { %v212_v21 = vpack.c.bf16 %v199_v17, %v198_v18  ;;  %v190_v23 = vadd.f32 %v1101_v38, %v167_v20  ;;  %v107_v24 = vpop.permute.xlu1 %106 }
  0x9a   :  { %v102_v25 = vpop.permute.xlu0 %101  ;;  %v207_v26 = vmax.f32 %v191_v22, 0.0  ;;  %v162_v28 = vmul.f32 %v1096_v35, %v107_v24 }
  0x9b   :  { %v206_v27 = vmax.f32 %v190_v23, 0.0  ;;  %v161_v29 = vmul.f32 %v1096_v35, %v102_v25  ;;  %880 = vmatprep.mubr.msk.bf16.mxu0 %vm241_vm0, %v212_v21 }
  0x9c   :  { %v185_v31 = vadd.f32 %v1101_v38, %v162_v28 }
  0x9d   :  { %v216_v30 = vpack.c.bf16 %v207_v26, %v206_v27  ;;  %v184_v32 = vadd.f32 %v1101_v38, %v161_v29  ;;  %v147_v33 = vpop.permute.xlu1 %146 }
  0x9e   :  { %v142_v34 = vpop.permute.xlu0 %141  ;;  %v201_v36 = vmax.f32 %v185_v31, 0.0  ;;  %v170_v39 = vmul.f32 %v1096_v35, %v147_v33 }
  0x9f   :  { %v200_v37 = vmax.f32 %v184_v32, 0.0  ;;  %v169_v40 = vmul.f32 %v1096_v35, %v142_v34  ;;  %888 = vmatprep.mubr.msk.bf16.mxu1 %vm241_vm0, %v216_v30 }
  0xa0   :  { %v193_v43 = vadd.f32 %v1101_v38, %v170_v39 }
  0xa1   :  { %v213_v42 = vpack.c.bf16 %v201_v36, %v200_v37  ;;  %v192_v44 = vadd.f32 %v1101_v38, %v169_v40  ;;  %v372_v46 = vpop.permute.xlu1 %371  ;;  %v1208_v40 = vld [vmem:[%s1533_s5] ss:$0 sm:$0xff] }
  0xa2   :  { %v367_v47 = vpop.permute.xlu0 %366  ;;  %v209_v35 = vmax.f32 %v193_v43, 0.0  ;;  %v451_v49 = vmul.f32 %v1142_v41, %v372_v46 }
  0xa3   :  { %v208_v48 = vmax.f32 %v192_v44, 0.0  ;;  %v450_v50 = vmul.f32 %v1142_v41, %v367_v47  ;;  %881 = vmatmul.mubr.msk.bf16.gmra.mrb[4].mxu0 %vm241_vm0, %v213_v42 }
  0xa4   :  { %v474_v52 = vadd.f32 %v1149_v45, %v451_v49 }
  0xa5   :  { %v217_v51 = vpack.c.bf16 %v209_v35, %v208_v48  ;;  %v473_v38 = vadd.f32 %v1149_v45, %v450_v50  ;;  %v382_v53 = vpop.permute.xlu1 %381 }
  0xa6   :  { %v377_v54 = vpop.permute.xlu0 %376  ;;  %v453_v55 = vmul.f32 %v1142_v41, %v382_v53  ;;  %507 = vrot.lane.b32.xlu1 %v474_v52, %s935_s6 }
  0xa7   :  { %v452_v56 = vmul.f32 %v1142_v41, %v377_v54  ;;  %889 = vmatmul.mubr.msk.bf16.gmra.mrb[4].mxu1 %vm241_vm0, %v217_v51  ;;  %505 = vrot.lane.b32.xlu0 %v473_v38, %s935_s6 }
  0xa8   :  { %v476_v57 = vadd.f32 %v1149_v45, %v453_v55 }
  0xa9   :  { %v475_v58 = vadd.f32 %v1149_v45, %v452_v56  ;;  %v392_v59 = vpop.permute.xlu1 %391 }
  0xaa   :  { %v387_v60 = vpop.permute.xlu0 %386  ;;  %v455_v61 = vmul.f32 %v1142_v41, %v392_v59  ;;  %511 = vrot.lane.b32.xlu1 %v476_v57, %s935_s6 }
  0xab   :  { %v454_v62 = vmul.f32 %v1142_v41, %v387_v60  ;;  %509 = vrot.lane.b32.xlu0 %v475_v58, %s935_s6 }
  0xac   :  { %v478_v63 = vadd.f32 %v1149_v45, %v455_v61 }
  0xad   :  { %v477_v0 = vadd.f32 %v1149_v45, %v454_v62  ;;  %v402_v1 = vpop.permute.xlu1 %401 }
  0xae   :  { %v397_v2 = vpop.permute.xlu0 %396  ;;  %v457_v3 = vmul.f32 %v1142_v41, %v402_v1  ;;  %515 = vrot.lane.b32.xlu1 %v478_v63, %s935_s6 }
  0xaf   :  { %v456_v4 = vmul.f32 %v1142_v41, %v397_v2  ;;  %513 = vrot.lane.b32.xlu0 %v477_v0, %s935_s6 }
  0xb0   :  { %v480_v5 = vadd.f32 %v1149_v45, %v457_v3 }
  0xb1   :  { %v479_v6 = vadd.f32 %v1149_v45, %v456_v4  ;;  %v412_v7 = vpop.permute.xlu1 %411 }
  0xb2   :  { %v407_v8 = vpop.permute.xlu0 %406  ;;  %v459_v9 = vmul.f32 %v1142_v41, %v412_v7  ;;  %519 = vrot.lane.b32.xlu1 %v480_v5, %s935_s6 }
  0xb3   :  { %v458_v10 = vmul.f32 %v1142_v41, %v407_v8  ;;  %517 = vrot.lane.b32.xlu0 %v479_v6, %s935_s6 }
  0xb4   :  { %v482_v11 = vadd.f32 %v1149_v45, %v459_v9 }
  0xb5   :  { %v481_v12 = vadd.f32 %v1149_v45, %v458_v10  ;;  %v422_v13 = vpop.permute.xlu1 %421 }
  0xb6   :  { %v417_v14 = vpop.permute.xlu0 %416  ;;  %v461_v15 = vmul.f32 %v1142_v41, %v422_v13  ;;  %523 = vrot.lane.b32.xlu1 %v482_v11, %s935_s6 }
  0xb7   :  { %v460_v16 = vmul.f32 %v1142_v41, %v417_v14  ;;  %521 = vrot.lane.b32.xlu0 %v481_v12, %s935_s6 }
  0xb8   :  { %v484_v17 = vadd.f32 %v1149_v45, %v461_v15 }
  0xb9   :  { %v483_v18 = vadd.f32 %v1149_v45, %v460_v16  ;;  %v432_v19 = vpop.permute.xlu1 %431 }
  0xba   :  { %v427_v20 = vpop.permute.xlu0 %426  ;;  %v463_v21 = vmul.f32 %v1142_v41, %v432_v19  ;;  %527 = vrot.lane.b32.xlu1 %v484_v17, %s935_s6 }
  0xbb   :  { %v462_v22 = vmul.f32 %v1142_v41, %v427_v20  ;;  %525 = vrot.lane.b32.xlu0 %v483_v18, %s935_s6 }
  0xbc   :  { %v486_v23 = vadd.f32 %v1149_v45, %v463_v21 }
  0xbd   :  { %v485_v24 = vadd.f32 %v1149_v45, %v462_v22  ;;  %v442_v25 = vpop.permute.xlu1 %441 }
  0xbe   :  { %v437_v26 = vpop.permute.xlu0 %436  ;;  %v465_v27 = vmul.f32 %v1142_v41, %v442_v25  ;;  %531 = vrot.lane.b32.xlu1 %v486_v23, %s935_s6 }
  0xbf   :  { %v464_v28 = vmul.f32 %v1142_v41, %v437_v26  ;;  %529 = vrot.lane.b32.xlu0 %v485_v24, %s935_s6 }
  0xc0   :  { %v488_v29 = vadd.f32 %v1149_v45, %v465_v27 }
  0xc1   :  { %v487_v30 = vadd.f32 %v1149_v45, %v464_v28 }
  0xc2   :  { %535 = vrot.lane.b32.xlu1 %v488_v29, %s935_s6 }
  0xc3   :  { %533 = vrot.lane.b32.xlu0 %v487_v30, %s935_s6 }
 0x118   :  { %v508_v32 = vpop.permute.xlu1 %507 }
 0x119   :  { %v506_v31 = vpop.permute.xlu0 %505 }
 0x11c   :  { %v512_v34 = vpop.permute.xlu1 %511 }
 0x11d   :  { %v510_v33 = vpop.permute.xlu0 %509 }
 0x120   :  { %v1203_v37 = vpop.permute.xlu1 %515 }
 0x121   :  { %v1201_v36 = vpop.permute.xlu0 %513 }
 0x124   :  { %v520_v41 = vpop.permute.xlu1 %519 }
 0x125   :  { %v518_v39 = vpop.permute.xlu0 %517 }
 0x128   :  { %v524_v51 = vpop.permute.xlu1 %523 }
 0x129   :  { %v522_v42 = vpop.permute.xlu0 %521 }
 0x12c   :  { %v528_v2 = vpop.permute.xlu1 %527 }
 0x12d   :  { %v526_v55 = vpop.permute.xlu0 %525 }
 0x131   :  { %v530_v26 = vpop.permute.xlu0 %529 }
 0x166   :  { %v878_v43 = vpop.f32.mrb[0].mxu0 }
 0x167   :  { %v309_v44 = vadd.f32 %v878_v43, %v1208_v40  ;;  %v300_v45 = vpop.f32.mrb[1].mxu0 }
 0x168   :  { %v301_v46 = vadd.f32 %v1208_v40, %v300_v45  ;;  %v879_v47 = vpop.f32.mrb[2].mxu0 }
 0x169   :  { %v303_v35 = vpop.f32.mrb[3].mxu0  ;;  %v1213_v48 = vsel %vm553_vm1, %v309_v44, %v510_v33  ;;  %v312_v52 = vadd.f32 %v879_v47, %v1208_v40 }
 0x16a   :  { %v886_v49 = vpop.f32.mrb[0].mxu1  ;;  %v578_v50 = vsel %vm241_vm0, %v1213_v48, 0.0  ;;  %v1220_v54 = vsel %vm553_vm1, %v301_v46, %v506_v31  ;;  %v304_v60 = vadd.f32 %v1208_v40, %v303_v35 }
 0x16b   :  { %v341_v38 = vadd.f32 %v886_v49, %v1208_v40  ;;  %v332_v53 = vpop.f32.mrb[1].mxu1  ;;  %579 = vadd.xlane.f32.xlu0 %v578_v50  ;;  %v572_v61 = vsel %vm241_vm0, %v1220_v54, 0.0  ;;  %v1233_v0 = vsel %vm553_vm1, %v312_v52, %v512_v34 }
 0x16c   :  { %v333_v56 = vadd.f32 %v1208_v40, %v332_v53  ;;  %v887_v57 = vpop.f32.mrb[2].mxu1  ;;  %v581_v3 = vsel %vm241_vm0, %v1233_v0, 0.0  ;;  %v1247_v7 = vsel %vm553_vm1, %v304_v60, %v508_v32 }
 0x16d   :  { %v335_v58 = vpop.f32.mrb[3].mxu1  ;;  %v1224_v59 = vsel %vm553_vm1, %v341_v38, %v526_v55  ;;  %v344_v63 = vadd.f32 %v887_v57, %v1208_v40  ;;  %v575_v10 = vsel %vm241_vm0, %v1247_v7, 0.0 }
 0x16e   :  { %v602_v62 = vsel %vm241_vm0, %v1224_v59, 0.0  ;;  %v1236_v1 = vsel %vm553_vm1, %v333_v56, %v522_v42  ;;  %v336_v5 = vadd.f32 %v1208_v40, %v335_v58 }
 0x16f   :  { %573 = vadd.xlane.f32.xlu0 %v572_v61  ;;  %603 = vadd.xlane.f32.xlu1 %v602_v62  ;;  %v596_v4 = vsel %vm241_vm0, %v1236_v1, 0.0  ;;  %v1244_v6 = vsel %vm553_vm1, %v344_v63, %v528_v2 }
 0x170   :  { %v605_v9 = vsel %vm241_vm0, %v1244_v6, 0.0  ;;  %v1255_v13 = vsel %vm553_vm1, %v336_v5, %v524_v51 }
 0x171   :  { %v599_v20 = vsel %vm241_vm0, %v1255_v13, 0.0 }
 0x173   :  { %582 = vadd.xlane.f32.xlu0 %v581_v3  ;;  %597 = vadd.xlane.f32.xlu1 %v596_v4 }
 0x176   :  { %v882_v8 = vpop.f32.mrb[4].mxu0 }
 0x177   :  { %v325_v11 = vadd.f32 %v882_v8, %v1208_v40  ;;  %v316_v12 = vpop.f32.mrb[5].mxu0  ;;  %606 = vadd.xlane.f32.xlu0 %v605_v9  ;;  %576 = vadd.xlane.f32.xlu1 %v575_v10 }
 0x178   :  { %v317_v14 = vadd.f32 %v1208_v40, %v316_v12  ;;  %v883_v15 = vpop.f32.mrb[6].mxu0 }
 0x179   :  { %v328_v16 = vadd.f32 %v883_v15, %v1208_v40  ;;  %v319_v17 = vpop.f32.mrb[7].mxu0  ;;  %v1260_v18 = vsel %vm553_vm1, %v325_v11, %v518_v39  ;;  %v532_v39 = vpop.permute.xlu1 %531 }
 0x17a   :  { %v890_v19 = vpop.f32.mrb[4].mxu1  ;;  %v590_v21 = vsel %vm241_vm0, %v1260_v18, 0.0  ;;  %v320_v22 = vadd.f32 %v1208_v40, %v319_v17  ;;  %v1272_v25 = vsel %vm553_vm1, %v317_v14, %v1201_v36 }
 0x17b   :  { %v348_v23 = vpop.f32.mrb[5].mxu1  ;;  %600 = vadd.xlane.f32.xlu0 %v599_v20  ;;  %591 = vadd.xlane.f32.xlu1 %v590_v21  ;;  %v1268_v24 = vsel %vm553_vm1, %v328_v16, %v520_v41  ;;  %v357_v30 = vadd.f32 %v890_v19, %v1208_v40  ;;  %v584_v32 = vsel %vm241_vm0, %v1272_v25, 0.0  ;;  %v534_v41 = vpop.permute.xlu0 %533 }
 0x17c   :  { %v349_v27 = vadd.f32 %v1208_v40, %v348_v23  ;;  %v891_v28 = vpop.f32.mrb[6].mxu1  ;;  %v593_v31 = vsel %vm241_vm0, %v1268_v24, 0.0  ;;  %v1283_v34 = vsel %vm553_vm1, %v320_v22, %v1203_v37 }
 0x17d   :  { %v351_v29 = vpop.f32.mrb[7].mxu1  ;;  %v587_v42 = vsel %vm241_vm0, %v1283_v34, 0.0  ;;  %v360_v44 = vadd.f32 %v891_v28, %v1208_v40  ;;  %v1297_v37 = vsel %vm553_vm1, %v357_v30, %v534_v41  ;;  %v536_v46 = vpop.permute.xlu1 %535 }
 0x17e   :  { %v352_v33 = vadd.f32 %v1208_v40, %v351_v29  ;;  %v1286_v36 = vsel %vm553_vm1, %v349_v27, %v530_v26  ;;  %v614_v35 = vsel %vm241_vm0, %v1297_v37, 0.0 }
 0x17f   :  { %594 = vadd.xlane.f32.xlu0 %v593_v31  ;;  %585 = vadd.xlane.f32.xlu1 %v584_v32  ;;  %v608_v43 = vsel %vm241_vm0, %v1286_v36, 0.0  ;;  %v1304_v49 = vsel %vm553_vm1, %v360_v44, %v536_v46 }
 0x180   :  { %v1294_v45 = vsel %vm553_vm1, %v352_v33, %v532_v39  ;;  %v617_v40 = vsel %vm241_vm0, %v1304_v49, 0.0 }
 0x181   :  { %v611_v47 = vsel %vm241_vm0, %v1294_v45, 0.0 }
 0x183   :  { %588 = vadd.xlane.f32.xlu0 %v587_v42  ;;  %609 = vadd.xlane.f32.xlu1 %v608_v43 }
 0x187   :  { %612 = vadd.xlane.f32.xlu0 %v611_v47  ;;  %615 = vadd.xlane.f32.xlu1 %v614_v35 }
 0x18b   :  { %618 = vadd.xlane.f32.xlu0 %v617_v40 }
 0x1f8   :  { %v580_v50 = vpop.xlane.xlu0 %579 }
 0x1f9   :  { %v623_v51 = vmul.f32 0.03125, %v580_v50 }
 0x1fb   :  { %v1309_v52 = vsub.f32 %v1213_v48, %v623_v51 }
 0x1fc   :  { %v604_v38 = vpop.xlane.xlu1 %603  ;;  %v574_v53 = vpop.xlane.xlu0 %573 }
 0x1fd   :  { %v631_v55 = vmul.f32 0.03125, %v604_v38  ;;  %v621_v56 = vmul.f32 0.03125, %v574_v53  ;;  %v655_v57 = vmul.f32 %v1309_v52, %v1309_v52 }
 0x1ff   :  { %v1314_v58 = vsub.f32 %v1224_v59, %v631_v55  ;;  %v1317_v60 = vsub.f32 %v1220_v54, %v621_v56  ;;  %v675_v61 = vsel %vm241_vm0, %v655_v57, 0.0 }
 0x200   :  { %v598_v62 = vpop.xlane.xlu1 %597  ;;  %676 = vadd.xlane.f32.xlu1 %v675_v61  ;;  %v583_v63 = vpop.xlane.xlu0 %582 }
 0x201   :  { %v629_v48 = vmul.f32 0.03125, %v598_v62  ;;  %v624_v2 = vmul.f32 0.03125, %v583_v63  ;;  %v663_v3 = vmul.f32 %v1314_v58, %v1314_v58  ;;  %v653_v4 = vmul.f32 %v1317_v60, %v1317_v60 }
 0x203   :  { %v1325_v5 = vsub.f32 %v1236_v1, %v629_v48  ;;  %v1328_v59 = vsub.f32 %v1233_v0, %v624_v2  ;;  %v699_v54 = vsel %vm241_vm0, %v663_v3, 0.0  ;;  %v669_v14 = vsel %vm241_vm0, %v653_v4, 0.0 }
 0x204   :  { %v577_v8 = vpop.xlane.xlu1 %576  ;;  %700 = vadd.xlane.f32.xlu1 %v699_v54  ;;  %v607_v9 = vpop.xlane.xlu0 %606 }
 0x205   :  { %v622_v10 = vmul.f32 0.03125, %v577_v8  ;;  %v632_v11 = vmul.f32 0.03125, %v607_v9  ;;  %v656_v12 = vmul.f32 %v1328_v59, %v1328_v59  ;;  %v661_v16 = vmul.f32 %v1325_v5, %v1325_v5 }
 0x207   :  { %v1335_v15 = vsub.f32 %v1247_v7, %v622_v10  ;;  %v1338_v1 = vsub.f32 %v1244_v6, %v632_v11  ;;  %v678_v0 = vsel %vm241_vm0, %v656_v12, 0.0  ;;  %v693_v26 = vsel %vm241_vm0, %v661_v16, 0.0 }
 0x208   :  { %v592_v17 = vpop.xlane.xlu1 %591  ;;  %670 = vadd.xlane.f32.xlu1 %v669_v14  ;;  %679 = vadd.xlane.f32.xlu0 %v678_v0  ;;  %v601_v19 = vpop.xlane.xlu0 %600 }
 0x209   :  { %v627_v20 = vmul.f32 0.03125, %v592_v17  ;;  %v630_v21 = vmul.f32 0.03125, %v601_v19  ;;  %v664_v22 = vmul.f32 %v1338_v1, %v1338_v1  ;;  %v654_v7 = vmul.f32 %v1335_v15, %v1335_v15 }
 0x20b   :  { %v1348_v6 = vsub.f32 %v1260_v18, %v627_v20  ;;  %v1351_v23 = vsub.f32 %v1255_v13, %v630_v21  ;;  %v702_v27 = vsel %vm241_vm0, %v664_v22, 0.0  ;;  %v672_v33 = vsel %vm241_vm0, %v654_v7, 0.0 }
 0x20c   :  { %v586_v28 = vpop.xlane.xlu1 %585  ;;  %694 = vadd.xlane.f32.xlu1 %v693_v26  ;;  %703 = vadd.xlane.f32.xlu0 %v702_v27  ;;  %v595_v29 = vpop.xlane.xlu0 %594 }
 0x20d   :  { %v625_v30 = vmul.f32 0.03125, %v586_v28  ;;  %v628_v31 = vmul.f32 0.03125, %v595_v29  ;;  %v659_v32 = vmul.f32 %v1348_v6, %v1348_v6  ;;  %v662_v41 = vmul.f32 %v1351_v23, %v1351_v23 }
 0x20f   :  { %v1359_v18 = vsub.f32 %v1272_v25, %v625_v30  ;;  %v1362_v13 = vsub.f32 %v1268_v24, %v628_v31  ;;  %v687_v39 = vsel %vm241_vm0, %v659_v32, 0.0  ;;  %v696_v50 = vsel %vm241_vm0, %v662_v41, 0.0  ;;  %v1407_v30 = vld [vmem:[%s1534_s8] ss:$0 sm:$0xff] }
 0x210   :  { %v610_v42 = vpop.xlane.xlu1 %609  ;;  %688 = vadd.xlane.f32.xlu1 %v687_v39  ;;  %673 = vadd.xlane.f32.xlu0 %v672_v33  ;;  %v589_v43 = vpop.xlane.xlu0 %588 }
 0x211   :  { %v633_v44 = vmul.f32 0.03125, %v610_v42  ;;  %v626_v46 = vmul.f32 0.03125, %v589_v43  ;;  %v657_v47 = vmul.f32 %v1359_v18, %v1359_v18  ;;  %v660_v25 = vmul.f32 %v1362_v13, %v1362_v13  ;;  %v1413_v42 = vld [vmem:[%s1535_s9] ss:$0 sm:$0xff] }
 0x213   :  { %v1372_v24 = vsub.f32 %v1286_v36, %v633_v44  ;;  %v1375_v35 = vsub.f32 %v1283_v34, %v626_v46  ;;  %v681_v40 = vsel %vm241_vm0, %v657_v47, 0.0  ;;  %v690_v57 = vsel %vm241_vm0, %v660_v25, 0.0 }
 0x214   :  { %v616_v51 = vpop.xlane.xlu1 %615  ;;  %682 = vadd.xlane.f32.xlu1 %v681_v40  ;;  %697 = vadd.xlane.f32.xlu0 %v696_v50  ;;  %v613_v38 = vpop.xlane.xlu0 %612 }
 0x215   :  { %v635_v53 = vmul.f32 0.03125, %v616_v51  ;;  %v634_v55 = vmul.f32 0.03125, %v613_v38  ;;  %v665_v56 = vmul.f32 %v1372_v24, %v1372_v24  ;;  %v658_v62 = vmul.f32 %v1375_v35, %v1375_v35 }
 0x217   :  { %v1383_v36 = vsub.f32 %v1297_v37, %v635_v53  ;;  %v1386_v34 = vsub.f32 %v1294_v45, %v634_v55  ;;  %v705_v61 = vsel %vm241_vm0, %v665_v56, 0.0  ;;  %v684_v45 = vsel %vm241_vm0, %v658_v62, 0.0 }
 0x218   :  { %706 = vadd.xlane.f32.xlu1 %v705_v61  ;;  %691 = vadd.xlane.f32.xlu0 %v690_v57  ;;  %v619_v63 = vpop.xlane.xlu0 %618 }
 0x219   :  { %v636_v48 = vmul.f32 0.03125, %v619_v63  ;;  %v667_v2 = vmul.f32 %v1383_v36, %v1383_v36  ;;  %v666_v4 = vmul.f32 %v1386_v34, %v1386_v34 }
 0x21b   :  { %v1394_v3 = vsub.f32 %v1304_v49, %v636_v48  ;;  %v711_v37 = vsel %vm241_vm0, %v667_v2, 0.0  ;;  %v708_v54 = vsel %vm241_vm0, %v666_v4, 0.0 }
 0x21c   :  { %712 = vadd.xlane.f32.xlu1 %v711_v37  ;;  %685 = vadd.xlane.f32.xlu0 %v684_v45 }
 0x21d   :  { %v668_v8 = vmul.f32 %v1394_v3, %v1394_v3 }
 0x21f   :  { %v714_v9 = vsel %vm241_vm0, %v668_v8, 0.0 }
 0x220   :  { %709 = vadd.xlane.f32.xlu0 %v708_v54 }
 0x224   :  { %715 = vadd.xlane.f32.xlu0 %v714_v9 }
 0x28d   :  { %v677_v49 = vpop.xlane.xlu1 %676 }
 0x28e   :  { %v719_v10 = vmul.f32 0.03125, %v677_v49 }
 0x290   :  { %v735_v11 = vadd.f32 1e-12, %v719_v10 }
 0x291   :  { %v701_v12 = vpop.xlane.xlu1 %700 }
 0x292   :  { %902 = vrsqrt.f32 %v735_v11  ;;  %v727_v14 = vmul.f32 0.03125, %v701_v12 }
 0x294   :  { %v743_v0 = vadd.f32 1e-12, %v727_v14 }
 0x295   :  { %v671_v16 = vpop.xlane.xlu1 %670  ;;  %v680_v17 = vpop.xlane.xlu0 %679 }
 0x296   :  { %904 = vrsqrt.f32 %v743_v0  ;;  %v717_v19 = vmul.f32 0.03125, %v671_v16  ;;  %v720_v20 = vmul.f32 0.03125, %v680_v17 }
 0x298   :  { %v733_v21 = vadd.f32 1e-12, %v717_v19  ;;  %v736_v22 = vadd.f32 1e-12, %v720_v20 }
 0x299   :  { %v695_v7 = vpop.xlane.xlu1 %694  ;;  %v704_v26 = vpop.xlane.xlu0 %703 }
 0x29a   :  { %906 = vrsqrt.f32 %v733_v21  ;;  %v725_v27 = vmul.f32 0.03125, %v695_v7  ;;  %v728_v28 = vmul.f32 0.03125, %v704_v26 }
 0x29b   :  { %908 = vrsqrt.f32 %v736_v22 }
 0x29c   :  { %v903_v29 = vpop.eup %902  ;;  %v741_v31 = vadd.f32 1e-12, %v725_v27  ;;  %v744_v32 = vadd.f32 1e-12, %v728_v28 }
 0x29d   :  { %v767_v33 = vmul.f32 %v903_v29, %v1309_v52  ;;  %v689_v39 = vpop.xlane.xlu1 %688  ;;  %v674_v41 = vpop.xlane.xlu0 %673 }
 0x29e   :  { %910 = vrsqrt.f32 %v741_v31  ;;  %v723_v43 = vmul.f32 0.03125, %v689_v39  ;;  %v718_v44 = vmul.f32 0.03125, %v674_v41 }
 0x29f   :  { %v789_v46 = vmul.f32 %v1407_v30, %v767_v33  ;;  %912 = vrsqrt.f32 %v744_v32 }
 0x2a0   :  { %v905_v47 = vpop.eup %904  ;;  %v739_v25 = vadd.f32 1e-12, %v723_v43  ;;  %v734_v40 = vadd.f32 1e-12, %v718_v44 }
 0x2a1   :  { %v811_v50 = vadd.f32 %v1413_v42, %v789_v46  ;;  %v775_v52 = vmul.f32 %v905_v47, %v1314_v58  ;;  %v683_v51 = vpop.xlane.xlu1 %682  ;;  %v698_v38 = vpop.xlane.xlu0 %697 }
 0x2a2   :  { %914 = vrsqrt.f32 %v739_v25  ;;  %v721_v53 = vmul.f32 0.03125, %v683_v51  ;;  %v726_v55 = vmul.f32 0.03125, %v698_v38 }
 0x2a3   :  { %827 = vst.msk [vmem:[%s1536_s10 + $0x10] sm:$0xff] %vm241_vm0, %v811_v50  ;;  %v797_v56 = vmul.f32 %v1407_v30, %v775_v52  ;;  %916 = vrsqrt.f32 %v734_v40 }
 0x2a4   :  { %v907_v57 = vpop.eup %906  ;;  %v737_v61 = vadd.f32 1e-12, %v721_v53  ;;  %v742_v62 = vadd.f32 1e-12, %v726_v55 }
 0x2a5   :  { %v909_v63 = vpop.eup %908  ;;  %v819_v48 = vadd.f32 %v1413_v42, %v797_v56  ;;  %v765_v58 = vmul.f32 %v907_v57, %v1317_v60  ;;  %v707_v2 = vpop.xlane.xlu1 %706 }
 0x2a6   :  { %v692_v37 = vpop.xlane.xlu0 %691  ;;  %v768_v45 = vmul.f32 %v909_v63, %v1328_v59  ;;  %918 = vrsqrt.f32 %v737_v61  ;;  %v729_v4 = vmul.f32 0.03125, %v707_v2 }
 0x2a7   :  { %v724_v54 = vmul.f32 0.03125, %v692_v37  ;;  %835 = vst.msk [vmem:[%s1536_s10 + $0x50] sm:$0xff] %vm241_vm0, %v819_v48  ;;  %v787_v8 = vmul.f32 %v1407_v30, %v765_v58  ;;  %920 = vrsqrt.f32 %v742_v62 }
 0x2a8   :  { %v911_v9 = vpop.eup %910  ;;  %v790_v49 = vmul.f32 %v1407_v30, %v768_v45  ;;  %v745_v10 = vadd.f32 1e-12, %v729_v4 }
 0x2a9   :  { %v740_v60 = vadd.f32 1e-12, %v724_v54  ;;  %v913_v11 = vpop.eup %912  ;;  %v809_v12 = vadd.f32 %v1413_v42, %v787_v8  ;;  %v773_v59 = vmul.f32 %v911_v9, %v1325_v5  ;;  %v713_v14 = vpop.xlane.xlu1 %712 }
 0x2aa   :  { %v686_v0 = vpop.xlane.xlu0 %685  ;;  %v812_v16 = vadd.f32 %v1413_v42, %v790_v49  ;;  %v776_v17 = vmul.f32 %v913_v11, %v1338_v1  ;;  %922 = vrsqrt.f32 %v745_v10  ;;  %v731_v19 = vmul.f32 0.03125, %v713_v14 }
 0x2ab   :  { %825 = vst.msk [vmem:[%s1536_s10] sm:$0xff] %vm241_vm0, %v809_v12  ;;  %v795_v20 = vmul.f32 %v1407_v30, %v773_v59  ;;  %924 = vrsqrt.f32 %v740_v60  ;;  %v722_v21 = vmul.f32 0.03125, %v686_v0 }
 0x2ac   :  { %v915_v22 = vpop.eup %914  ;;  %828 = vst.msk [vmem:[%s1536_s10 + $0x18] sm:$0xff] %vm241_vm0, %v812_v16  ;;  %v798_v5 = vmul.f32 %v1407_v30, %v776_v17  ;;  %v747_v1 = vadd.f32 1e-12, %v731_v19 }
 0x2ad   :  { %v917_v7 = vpop.eup %916  ;;  %v817_v26 = vadd.f32 %v1413_v42, %v795_v20  ;;  %v771_v27 = vmul.f32 %v915_v22, %v1348_v6  ;;  %v738_v28 = vadd.f32 1e-12, %v722_v21 }
 0x2ae   :  { %v710_v29 = vpop.xlane.xlu0 %709  ;;  %v820_v31 = vadd.f32 %v1413_v42, %v798_v5  ;;  %v766_v32 = vmul.f32 %v917_v7, %v1335_v15  ;;  %926 = vrsqrt.f32 %v747_v1 }
 0x2af   :  { %v730_v33 = vmul.f32 0.03125, %v710_v29  ;;  %833 = vst.msk [vmem:[%s1536_s10 + $0x40] sm:$0xff] %vm241_vm0, %v817_v26  ;;  %v793_v39 = vmul.f32 %v1407_v30, %v771_v27  ;;  %928 = vrsqrt.f32 %v738_v28 }
 0x2b0   :  { %v919_v41 = vpop.eup %918  ;;  %836 = vst.msk [vmem:[%s1536_s10 + $0x58] sm:$0xff] %vm241_vm0, %v820_v31  ;;  %v788_v6 = vmul.f32 %v1407_v30, %v766_v32 }
 0x2b1   :  { %v746_v43 = vadd.f32 1e-12, %v730_v33  ;;  %v921_v15 = vpop.eup %920  ;;  %v815_v44 = vadd.f32 %v1413_v42, %v793_v39  ;;  %v769_v46 = vmul.f32 %v919_v41, %v1359_v18 }
 0x2b2   :  { %v716_v47 = vpop.xlane.xlu0 %715  ;;  %v810_v25 = vadd.f32 %v1413_v42, %v788_v6  ;;  %v774_v40 = vmul.f32 %v921_v15, %v1351_v23 }
 0x2b3   :  { %930 = vrsqrt.f32 %v746_v43  ;;  %v732_v50 = vmul.f32 0.03125, %v716_v47  ;;  %831 = vst.msk [vmem:[%s1536_s10 + $0x30] sm:$0xff] %vm241_vm0, %v815_v44  ;;  %v791_v52 = vmul.f32 %v1407_v30, %v769_v46 }
 0x2b4   :  { %v923_v51 = vpop.eup %922  ;;  %826 = vst.msk [vmem:[%s1536_s10 + $0x8] sm:$0xff] %vm241_vm0, %v810_v25  ;;  %v796_v18 = vmul.f32 %v1407_v30, %v774_v40 }
 0x2b5   :  { %v748_v38 = vadd.f32 1e-12, %v732_v50  ;;  %v925_v53 = vpop.eup %924  ;;  %v813_v23 = vadd.f32 %v1413_v42, %v791_v52  ;;  %v777_v55 = vmul.f32 %v923_v51, %v1372_v24 }
 0x2b6   :  { %v818_v56 = vadd.f32 %v1413_v42, %v796_v18  ;;  %v772_v57 = vmul.f32 %v925_v53, %v1362_v13 }
 0x2b7   :  { %932 = vrsqrt.f32 %v748_v38  ;;  %829 = vst.msk [vmem:[%s1536_s10 + $0x20] sm:$0xff] %vm241_vm0, %v813_v23  ;;  %v799_v61 = vmul.f32 %v1407_v30, %v777_v55 }
 0x2b8   :  { %v927_v62 = vpop.eup %926  ;;  %834 = vst.msk [vmem:[%s1536_s10 + $0x48] sm:$0xff] %vm241_vm0, %v818_v56  ;;  %v794_v24 = vmul.f32 %v1407_v30, %v772_v57 }
 0x2b9   :  { %v929_v63 = vpop.eup %928  ;;  %v821_v48 = vadd.f32 %v1413_v42, %v799_v61  ;;  %v779_v13 = vmul.f32 %v927_v62, %v1383_v36 }
 0x2ba   :  { %v816_v58 = vadd.f32 %v1413_v42, %v794_v24  ;;  %v770_v2 = vmul.f32 %v929_v63, %v1375_v35 }
 0x2bb   :  { %837 = vst.msk [vmem:[%s1536_s10 + $0x60] sm:$0xff] %vm241_vm0, %v821_v48  ;;  %v801_v37 = vmul.f32 %v1407_v30, %v779_v13 }
 0x2bc   :  { %832 = vst.msk [vmem:[%s1536_s10 + $0x38] sm:$0xff] %vm241_vm0, %v816_v58  ;;  %v792_v4 = vmul.f32 %v1407_v30, %v770_v2 }
 0x2bd   :  { %v931_v45 = vpop.eup %930  ;;  %v823_v36 = vadd.f32 %v1413_v42, %v801_v37 }
 0x2be   :  { %v778_v54 = vmul.f32 %v931_v45, %v1386_v34  ;;  %v814_v35 = vadd.f32 %v1413_v42, %v792_v4 }
 0x2bf   :  { %839 = vst.msk [vmem:[%s1536_s10 + $0x70] sm:$0xff] %vm241_vm0, %v823_v36 }
 0x2c0   :  { %v800_v8 = vmul.f32 %v1407_v30, %v778_v54  ;;  %830 = vst.msk [vmem:[%s1536_s10 + $0x28] sm:$0xff] %vm241_vm0, %v814_v35 }
 0x2c1   :  { %v933_v9 = vpop.eup %932 }
 0x2c2   :  { %v822_v49 = vadd.f32 %v1413_v42, %v800_v8  ;;  %v780_v10 = vmul.f32 %v933_v9, %v1394_v3 }
 0x2c4   :  { %838 = vst.msk [vmem:[%s1536_s10 + $0x68] sm:$0xff] %vm241_vm0, %v822_v49  ;;  %v802_v34 = vmul.f32 %v1407_v30, %v780_v10 }
 0x2c6   :  { %v824_v60 = vadd.f32 %v1413_v42, %v802_v34 }
 0x2c8   :  { %840 = vst.msk [vmem:[%s1536_s10 + $0x78] sm:$0xff] %vm241_vm0, %v824_v60 }

// kernel: model_forward.21
= control target key start
LH: loop header
LB: loop body
LE: loop exit
PB: predicated region body
PF: predicated region fallthrough
CT: control target
= control target key end

     0   :  { %8 = vsyncpa [#allocation3], 0  ;;  %s1268_s0 = inlined_call_operand.hbm [shape: f32[4,16,16], index: 0, kind: input, shape index: {}]   ;;  %s1269_s1 = inlined_call_operand.hbm [shape: f32[8,16,32], index: 1, kind: input, shape index: {}]   ;;  %s1270_s2 = inlined_call_operand.hbm [shape: f32[8,16,32], index: 2, kind: input, shape index: {}]   ;;  %s1271_s3 = inlined_call_operand.hbm [shape: f32[8,16,32], index: 3, kind: output, shape index: {}]  }
   0x1   :  { %9 = vsyncpa [#allocation6], 0 }
   0x2   :  { %11 = vsyncpa [#allocation6 + $0x1], 0 }
   0x3   :  { %12 = vsyncpa [#allocation4], 0 }
   0x4   :  { %14 = vsyncpa [#allocation4 + $0x1], 0  ;;  %s988_s12 = smov 0   ;;  %s990_s13 = smov 0  }
   0x5   :  { %s992_s14 = smov 0   ;;  %s994_s15 = smov 0  }
   0x6 LB: > { %s1009_s16 = sadd.s32 1, %s951_s15   ;;  %s48_s17 = sadd.s32 1, %s947_s14  ;;  %s951_s15 = sphi %s994_s15, %s1293_s15   ;;  %s947_s14 = sphi %s992_s14, %s1292_s14   ;;  %s943_s13 = sphi %s990_s13, %s1291_s13   ;;  %s939_s12 = sphi %s988_s12, %s1290_s12  }
   0x7   : > { %s45_s18 = ssub.s32 %s951_s15, %s1009_s16  ;;  %p55_p0 = scmp.ne.s32.totalorder %s947_s14, %s943_s13 }
   0x8   : > { %p46_p1 = scmp.eq.s32.totalorder %s45_s18, 0  ;;  %p56_p2 = scmp.eq.s32.totalorder %s951_s15, 0 }
   0x9   : > { %p730_p4 = scmp.lt.s32.totalorder %s951_s15, 8  ;;  %s150_s20 = sand.u32 1, %s951_s15  }
   0xa   : > { %s1018_s19 = scalar_select %p46_p1, %s947_s14, %s48_s17  }
   0xb   : > { %p57_p3 = por %p56_p2, %p55_p0  ;;  %s152_s21 = sand.u32 1, %s947_s14  }
   0xc   : > { %s1026_s22 = sshll.u32 %s152_s21, 4  ;;  %s669_s23 = sshll.u32 %s951_s15, 8 }
   0xd   : > { %s1034_s26 = scalar_lea.hbm %s1269_s1, %s669_s23  ;;  %s154_s27 = scalar_lea.vmem [#allocation5], %s1026_s22 }
   0xe   : > { %s161_s28 = sshll.u32 %s154_s27, 4  ;;  %p1037_p5 = pnand %p730_p4, %p57_p3  ;;  %s1041_s28 = int_to_ptr.vmem [resolvable:$true] %s161_s28 }
   0xf   : > { %s1043_s30 = scalar_lea.sflag [#allocation6], %s150_s20  ;;  %s793_s4 = scalar_lea.hbm %s1034_s26, 256 }
  0x10   : > { %p794_p6 = scmp.ne.s32.totalorder %s1034_s26, %s793_s4  ;;  %p795_p7 = pneg %p1037_p5 }
  0x11   : > { %s798_s7 = scalar_lea.hbm %s1269_s1, 2048  ;;  %p799_p10 = scmp.lt.u32.totalorder %s1034_s26, %s1269_s1 }
  0x12   : > { %p796_p8 = pnand %p795_p7, %p794_p6  ;;  %p800_p11 = scmp.lt.u32.totalorder %s798_s7, %s793_s4 }
  0x13   : > { %p802_p13 = scmp.lt.u32.totalorder %s793_s4, %s1034_s26 }
  0x14   : > { %p797_p9 = pneg %p796_p8  ;;  %p801_p12 = por %p800_p11, %p799_p10 }
  0x16   : > { %p803_p1 = por %p802_p13, %p801_p12 }
  0x18   : > { %p804_p2 = pnand %p803_p1, %p797_p9 }
  0x1a   : > { %807 = shalt.err (!%p804_p2)
}
  0x1b   : > { %s808_s10 = scalar_lea.vmem %s1041_s28, 256  ;;  %s953_s11 = smov [#allocation5]  }
  0x1c   : > { %p809_p3 = scmp.ne.s32.totalorder %s1041_s28, %s808_s10  ;;  %s813_s17 = sshll.u32 %s953_s11, 4  ;;  %s814_s17 = int_to_ptr.vmem [resolvable:$false] %s813_s17 }
  0x1d   : > { %s815_s18 = scalar_lea.vmem %s814_s17, 512  ;;  %p816_p8 = scmp.lt.s32.totalorder %s1041_s28, %s814_s17 }
  0x1e   : > { %p811_p4 = pnand %p809_p3, %p795_p7  ;;  %p817_p10 = scmp.lt.s32.totalorder %s815_s18, %s808_s10 }
  0x20   : > { %p812_p6 = pneg %p811_p4  ;;  %p818_p11 = por %p817_p10, %p816_p8 }
  0x22   : > { %p819_p12 = pnand %p818_p11, %p812_p6 }
  0x24   : > { %822 = shalt.err (!%p819_p12)
}
  0x25   : > { %s954_s20 = smov 128   ;;  %s955_s21 = smov 8  }
  0x26   : > { %721 = dma.hbm_to_vmem [thread:$0]  (!%p1037_p5), %s1034_s26, 256, %s1041_s28, %s1043_s30, %s954_s20, %s954_s20, %s955_s21  }
  0x27   : > { %s175_s24 = scalar_lea.vmem [#allocation7], %s1026_s22  ;;  %s1076_s27 = sadd.s32 4294967295, %s951_s15  }
  0x28   : > { %s182_s25 = sshll.u32 %s175_s24, 4  ;;  %s645_s4 = sadd.s32 4294967294, %s951_s15   ;;  %s1109_s25 = int_to_ptr.vmem [resolvable:$true] %s182_s25 }
  0x29   : > { %p61_p9 = scmp.ne.s32.totalorder %s943_s13, %s939_s12  ;;  %p1272_p13 = scmp.eq.s32.totalorder %s1076_s27, 0 }
  0x2a   : > { %p111_p1 = scmp.eq.s32.totalorder %s1076_s27, 7  ;;  %p117_p2 = scmp.eq.s32.totalorder %s645_s4, 7 }
  0x2b   : > { %p1085_p3 = por %p1272_p13, %p61_p9  ;;  %p646_p4 = scmp.ge.s32.totalorder %s951_s15, 1 }
  0x2c   : > { %p1093_p6 = por %p111_p1, %p55_p0  ;;  %p1097_p8 = por %p117_p2, %p61_p9 }
  0x2d   : > { %s1277_s5 = scalar_select %p1085_p3, 1, 0 }
  0x2e   : > { %s1278_s22 = scalar_select %p1093_p6, 1, 0 }
  0x2f   : > { %s1279_s26 = scalar_select %p1097_p8, 1, 0 }
  0x30   : > { %p124_p10 = scmp.lt.s32.totalorder %s951_s15, 9  ;;  %s1107_s7 = scalar_lea.hbm %s1270_s2, %s669_s23 }
  0x31   : > { %s956_s9 = smov [#allocation2]   ;;  %s823_s11 = scalar_lea.hbm %s1107_s7, 256 }
  0x32   : > { %p1111_p0 = pnand %p646_p4, %p124_p10  ;;  %s1115_s10 = sshll.u32 %s956_s9, 4  ;;  %s137_s10 = int_to_ptr.vmem [resolvable:$true] %s1115_s10 }
  0x33   : > { %p824_p12 = scmp.ne.s32.totalorder %s1107_s7, %s823_s11  ;;  %s828_s18 = scalar_lea.hbm %s1270_s2, 2048 }
  0x34   : > { %s1280_s8 = scalar_select %p1111_p0, 1, 0 }
  0x35   : > { %p826_p9 = pnand %p824_p12, %p795_p7  ;;  %p829_p2 = scmp.lt.u32.totalorder %s1107_s7, %s1270_s2 }
  0x36   : > { %p830_p4 = scmp.lt.u32.totalorder %s828_s18, %s823_s11  ;;  %p832_p13 = scmp.lt.u32.totalorder %s823_s11, %s1107_s7 }
  0x37   : > { %p827_p1 = pneg %p826_p9 }
  0x38   : > { %p831_p10 = por %p830_p4, %p829_p2 }
  0x3a   : > { %p833_p8 = por %p832_p13, %p831_p10 }
  0x3c   : > { %p834_p6 = pnand %p833_p8, %p827_p1 }
  0x3e   : > { %837 = shalt.err (!%p834_p6)
}
  0x3f   : > { %s838_s28 = scalar_lea.vmem %s1109_s25, 256  ;;  %s957_s6 = smov [#allocation7]  }
  0x40   : > { %p839_p12 = scmp.ne.s32.totalorder %s1109_s25, %s838_s28  ;;  %s843_s9 = sshll.u32 %s957_s6, 4  ;;  %s844_s9 = int_to_ptr.vmem [resolvable:$false] %s843_s9 }
  0x41   : > { %s845_s23 = scalar_lea.vmem %s844_s9, 512  ;;  %p846_p3 = scmp.lt.s32.totalorder %s1109_s25, %s844_s9 }
  0x42   : > { %p841_p9 = pnand %p839_p12, %p795_p7  ;;  %p847_p2 = scmp.lt.s32.totalorder %s845_s23, %s838_s28 }
  0x44   : > { %p842_p11 = pneg %p841_p9  ;;  %p848_p4 = por %p847_p2, %p846_p3 }
  0x46   : > { %p849_p13 = pnand %p848_p4, %p842_p11 }
  0x48   : > { %852 = shalt.err (!%p849_p13)
}
  0x49   : > { %724 = dma.hbm_to_vmem [thread:$0]  (!%p1037_p5), %s1107_s7, 256, %s1109_s25, %s1043_s30, %s954_s20, %s954_s20, %s955_s21  }
  0x4a   : > { %p1281_p7 = scmp.eq.s32.totalorder %s1076_s27, 0  ;;  %p1282_p6 = pneg %p1111_p0 }
  0x4b   : > { %s853_s18 = scalar_lea.hbm %s1268_s0, 1024 }
  0x4c   : > { %p1152_p8 = pnand %p1282_p6, %p1281_p7  ;;  %p854_p3 = scmp.ne.s32.totalorder %s1268_s0, %s853_s18 }
  0x4d   : > { %p860_p10 = scmp.lt.u32.totalorder %s853_s18, %s1268_s0 }
  0x4e   : > { %p855_p11 = pneg %p1152_p8 }
  0x50   : > { %p856_p5 = pnand %p855_p11, %p854_p3 }
  0x52   : > { %p857_p1 = pneg %p856_p5 }
  0x54   : > { %p862_p12 = pnand %p860_p10, %p857_p1 }
  0x56   : > { %865 = shalt.err (!%p862_p12)
}
  0x57   : > { %s866_s7 = scalar_lea.vmem %s137_s10, 1024  ;;  %p874_p13 = scmp.lt.s32.totalorder %s137_s10, %s137_s10 }
  0x58   : > { %p867_p9 = scmp.ne.s32.totalorder %s137_s10, %s866_s7  ;;  %p875_p7 = scmp.lt.s32.totalorder %s866_s7, %s866_s7 }
  0x5a   : > { %p869_p2 = pnand %p867_p9, %p855_p11  ;;  %p876_p6 = por %p875_p7, %p874_p13 }
  0x5c   : > { %p870_p4 = pneg %p869_p2 }
  0x5e   : > { %p877_p0 = pnand %p876_p6, %p870_p4 }
  0x60   : > { %880 = shalt.err (!%p877_p0)
}
  0x61   : > { %717 = dma.hbm_to_vmem [thread:$0]  (!%p1152_p8), %s1268_s0, 1024, %s137_s10, [#allocation3], %s954_s20, %s954_s20, %s955_s21  }
  0x62   : > { %p1284_p3 = scmp.ne.s32.totalorder %s1280_s8, 0 }
  0x63   : > { %p1285_p11 = scmp.eq.s32.totalorder (!%p1284_p3), %s1076_s27, 0 }
  0x64   : > { %194 = sbr.rel (%p1284_p3) target bundleno = 593 (0x251), region = 32 }
  0x6b   : > { %926 = dma.done.wait (%p1285_p11), [#allocation3], 1024   ;;  %p1286_p5 = pmov %p1285_p11 }
  0x6c   : > { %s200_s9 = sand.u32 1, %s1076_s27   ;;  %s202_s23 = sand.u32 1, %s943_s13  }
  0x6d   : > { %928 = vsyncadd (%p1286_p5), [#allocation3], 4294966272  ;;  %s1185_s11 = sshll.u32 %s202_s23, 4  ;;  %s201_s20 = scalar_lea.sflag [#allocation6], %s200_s9 }
  0x6e   : > { %s204_s21 = scalar_lea.vmem [#allocation5], %s1185_s11  ;;  %p1287_p0 = scmp.ne.s32.totalorder %s1277_s5, 0 }
  0x70   : > { %930 = dma.done.wait (%p1287_p0), %s201_s20, 512  }
  0x71   : > { %932 = vsyncadd (%p1287_p0), %s201_s20, 4294966784  ;;  %v958_v0 = vmov 0.0   ;;  %vm959_vm0 = vmmov 0   ;;  %v242_v1 = vld [vmem:[%s204_s21] sm:$0xff]  ;;  %v243_v2 = vld [vmem:[%s204_s21 + $0x8] sm:$0xff]  ;;  %s960_s5 = smov 120  }
  0x72   : > { %680 = vmatprep.subr.bf16.mxu0 %v958_v0  ;;  %682 = vmatprep.mubr.msk.bf16.mxu0 %vm959_vm0, %v958_v0  ;;  %v244_v3 = vld [vmem:[#allocation2] sm:$0xff]  ;;  %v254_v4 = vpack.c.bf16 %v243_v2, %v242_v1  ;;  %v245_v5 = vld [vmem:[#allocation2 + $0x8] sm:$0xff]  ;;  %v304_v6 = vld [vmem:[#allocation2 + $0x10] sm:$0xff]  ;;  %s961_s8 = smov 104   ;;  %vm246_vm1 = vcmask 130048   ;;  %s962_s10 = smov 112  }
  0x73   : > { %686 = vmatprep.subr.bf16.mxu1 %v958_v0  ;;  %688 = vmatprep.mubr.msk.bf16.mxu1 %vm959_vm0, %v958_v0  ;;  %v305_v7 = vld [vmem:[#allocation2 + $0x18] sm:$0xff]  ;;  %v366_v9 = vld [vmem:[#allocation2 + $0x20] sm:$0xff]  ;;  %v367_v10 = vld [vmem:[#allocation2 + $0x28] sm:$0xff]  ;;  %v253_v12 = vpack.c.bf16 %v245_v5, %v244_v3  ;;  %v306_v17 = vsel %vm246_vm1, %v304_v6, 0.0  ;;  %v247_v22 = vsel %vm246_vm1, %v244_v3, 0.0  ;;  %v250_v23 = vsel %vm246_vm1, %v245_v5, 0.0 }
  0x74   : > { %v312_v8 = vpack.c.bf16 %v305_v7, %v304_v6  ;;  %v427_v11 = vld [vmem:[#allocation2 + $0x30] sm:$0xff]  ;;  %314 = vrot.lane.b32.xlu0 %v254_v4, %s960_s5  ;;  %436 = vrot.lane.b32.xlu1 %v254_v4, %s961_s8  ;;  %v374_v13 = vpack.c.bf16 %v367_v10, %v366_v9  ;;  %v428_v14 = vld [vmem:[#allocation2 + $0x38] sm:$0xff]  ;;  %v309_v16 = vsel %vm246_vm1, %v305_v7, 0.0  ;;  %v368_v18 = vsel %vm246_vm1, %v366_v9, 0.0  ;;  %s963_s17 = smov 8   ;;  %s964_s29 = smov 16  }
  0x75   : > { %681 = vmatpush3.bf16.msra.mxu0 %v254_v4  ;;  %v435_v15 = vpack.c.bf16 %v428_v14, %v427_v11  ;;  %v371_v19 = vsel %vm246_vm1, %v367_v10, 0.0  ;;  %v429_v20 = vsel %vm246_vm1, %v427_v11, 0.0  ;;  %v432_v21 = vsel %vm246_vm1, %v428_v14, 0.0  ;;  %s965_s18 = smov 24   ;;  %s213_s24 = scalar_lea.vmem [#allocation7], %s1185_s11 }
  0x76   : > { %692 = vmatprep.subr.bf16.mxu0 %v958_v0  ;;  %vm513_vm2 = vcmask 64512   ;;  %vm518_vm3 = vcmask 195584   ;;  %s671_s4 = sshll.u32 %s1076_s27, 8  ;;  %vm523_vm4 = vcmask 261120   ;;  %s240_s30 = scalar_lea.vmem [#allocation8], %s1185_s11 }
  0x77   : > { %s540_s25 = sshll.u32 %s240_s30, 4  ;;  %s1220_s6 = scalar_lea.hbm %s1271_s3, %s671_s4  ;;  %s1222_s25 = int_to_ptr.vmem [resolvable:$true] %s540_s25 }
  0x78   : > { %375 = vrot.lane.b32.xlu0 %v254_v4, %s962_s10  ;;  %683 = vmatmul.mubr.msk.bf16.vlgmr.msra.gmra.mrb[0].mxu0 %vm246_vm1, %v253_v12  ;;  %s1226_s27 = scalar_lea.sflag [#allocation4], %s202_s23  ;;  %s881_s9 = scalar_lea.vmem %s1222_s25, 256 }
  0x79   : > { %694 = vmatprep.mubr.msk.bf16.mxu0 %vm959_vm0, %v958_v0  ;;  %p882_p8 = scmp.ne.s32.totalorder %s1222_s25, %s881_s9  ;;  %p1288_p1 = scmp.ne.s32.totalorder %s1278_s22, 0 }
  0x7a   : > { %s966_s11 = smov [#allocation8]  }
  0x7b   : > { %p883_p10 = pnand %p882_p8, %p1288_p1  ;;  %s885_s20 = sshll.u32 %s966_s11, 4  ;;  %s886_s20 = int_to_ptr.vmem [resolvable:$false] %s885_s20 }
  0x7c   : > { %s887_s21 = scalar_lea.vmem %s886_s20, 512  ;;  %p888_p9 = scmp.lt.s32.totalorder %s1222_s25, %s886_s20 }
  0x7d   : > { %p884_p12 = pneg %p883_p10  ;;  %p889_p2 = scmp.lt.s32.totalorder %s887_s21, %s881_s9 }
  0x7f   : > { %p890_p4 = por %p889_p2, %p888_p9 }
  0x81   : > { %p891_p13 = pnand %p890_p4, %p884_p12 }
  0x97   : > { %310 = vadd.xlane.f32.xlu0 %v309_v16 }
  0x98   : > { %307 = vadd.xlane.f32.xlu1 %v306_v17 }
  0x9b   : > { %369 = vadd.xlane.f32.xlu0 %v368_v18 }
  0x9c   : > { %372 = vadd.xlane.f32.xlu1 %v371_v19 }
  0x9f   : > { %430 = vadd.xlane.f32.xlu0 %v429_v20 }
  0xa0   : > { %433 = vadd.xlane.f32.xlu1 %v432_v21 }
  0xa3   : > { %248 = vadd.xlane.f32.xlu0 %v247_v22 }
  0xa4   : > { %251 = vadd.xlane.f32.xlu1 %v250_v23 }
  0xe6   : > { %v315_v24 = vpop.permute.xlu0 %314  ;;  %v437_v25 = vpop.permute.xlu1 %436 }
  0xe7   : > { %687 = vmatpush3.bf16.msra.mxu1 %v315_v24 }
  0xe8   : > { %698 = vmatprep.subr.bf16.mxu1 %v958_v0 }
  0xea   : > { %689 = vmatmul.mubr.msk.bf16.vlgmr.msra.gmra.mrb[0].mxu1 %vm246_vm1, %v312_v8  ;;  %v376_v26 = vpop.permute.xlu0 %375  ;;  %v488_v8 = vld [vmem:[%s213_s24 + $0x8] sm:$0xff] }
  0xeb   : > { %693 = vmatpush3.bf16.msra.mxu0 %v376_v26  ;;  %699 = vmatpush3.bf16.msra.mxu1 %v437_v25 }
  0xec   : > { %700 = vmatprep.mubr.msk.bf16.mxu1 %vm959_vm0, %v958_v0 }
  0xee   : > { %695 = vmatmul.mubr.msk.bf16.vlgmr.msra.gmra.mrb[4].mxu0 %vm246_vm1, %v374_v13  ;;  %v487_v13 = vld [vmem:[%s213_s24] sm:$0xff] }
  0xf2   : > { %701 = vmatmul.mubr.msk.bf16.vlgmr.msra.gmra.mrb[4].mxu1 %vm246_vm1, %v435_v15 }
 0x124   : > { %v311_v32 = vpop.xlane.xlu0 %310 }
 0x125   : > { %v308_v31 = vpop.xlane.xlu1 %307 }
 0x126   : > { %777 = vrcp.f32 %v308_v31 }
 0x128   : > { %v370_v34 = vpop.xlane.xlu0 %369 }
 0x129   : > { %v373_v33 = vpop.xlane.xlu1 %372  ;;  %779 = vrcp.f32 %v370_v34 }
 0x12a   : > { %781 = vrcp.f32 %v373_v33 }
 0x12b   : > { %783 = vrcp.f32 %v311_v32 }
 0x12c   : > { %v431_v37 = vpop.xlane.xlu0 %430 }
 0x12d   : > { %v434_v35 = vpop.xlane.xlu1 %433 }
 0x12e   : > { %785 = vrcp.f32 %v434_v35 }
 0x12f   : > { %787 = vrcp.f32 %v431_v37 }
 0x130   : > { %v778_v36 = vpop.eup %777  ;;  %v249_v62 = vpop.xlane.xlu0 %248 }
 0x131   : > { %v252_v61 = vpop.xlane.xlu1 %251 }
 0x132   : > { %789 = vrcp.f32 %v252_v61 }
 0x133   : > { %v780_v41 = vpop.eup %779  ;;  %791 = vrcp.f32 %v249_v62 }
 0x134   : > { %v782_v44 = vpop.eup %781 }
 0x135   : > { %v784_v49 = vpop.eup %783 }
 0x138   : > { %v786_v52 = vpop.eup %785 }
 0x139   : > { %v788_v56 = vpop.eup %787 }
 0x13c   : > { %v790_v0 = vpop.eup %789 }
 0x13d   : > { %v792_v2 = vpop.eup %791 }
 0x14b   : > { %v292_v27 = vpop.f32.mrb[0].mxu0 }
 0x14c   : > { %v684_v28 = vpop.f32.mrb[1].mxu0  ;;  %v301_v6 = vmul.f32 %v792_v2, %v292_v27 }
 0x14d   : > { %v295_v29 = vpop.f32.mrb[2].mxu0 }
 0x14e   : > { %v685_v30 = vpop.f32.mrb[3].mxu0  ;;  %v302_v4 = vmul.f32 %v790_v0, %v295_v29 }
 0x1bd   : > { %v354_v38 = vpop.f32.mrb[0].mxu1 }
 0x1be   : > { %v363_v39 = vmul.f32 %v778_v36, %v354_v38  ;;  %v690_v40 = vpop.f32.mrb[1].mxu1 }
 0x1bf   : > { %v357_v42 = vpop.f32.mrb[2].mxu1 }
 0x1c0   : > { %491 = vrot.lane.b32.xlu0 %v363_v39, %s963_s17  ;;  %v691_v43 = vpop.f32.mrb[3].mxu1  ;;  %v364_v54 = vmul.f32 %v784_v49, %v357_v42 }
 0x1c1   : > { %v415_v45 = vpop.f32.mrb[4].mxu0 }
 0x1c2   : > { %v424_v46 = vmul.f32 %v780_v41, %v415_v45  ;;  %v696_v47 = vpop.f32.mrb[5].mxu0 }
 0x1c3   : > { %v418_v48 = vpop.f32.mrb[6].mxu0 }
 0x1c4   : > { %v425_v50 = vmul.f32 %v782_v44, %v418_v48  ;;  %499 = vrot.lane.b32.xlu1 %v424_v46, %s964_s29  ;;  %v697_v51 = vpop.f32.mrb[7].mxu0 }
 0x1c5   : > { %v476_v53 = vpop.f32.mrb[4].mxu1 }
 0x1c6   : > { %v702_v55 = vpop.f32.mrb[5].mxu1  ;;  %501 = vrot.lane.b32.xlu0 %v425_v50, %s964_s29  ;;  %v485_v60 = vmul.f32 %v788_v56, %v476_v53 }
 0x1c7   : > { %v479_v57 = vpop.f32.mrb[6].mxu1 }
 0x1c8   : > { %v486_v58 = vmul.f32 %v786_v52, %v479_v57  ;;  %493 = vrot.lane.b32.xlu1 %v364_v54, %s963_s17  ;;  %v703_v59 = vpop.f32.mrb[7].mxu1 }
 0x1ca   : > { %509 = vrot.lane.b32.xlu0 %v486_v58, %s965_s18 }
 0x1cc   : > { %507 = vrot.lane.b32.xlu1 %v485_v60, %s965_s18 }
 0x232   : > { %v492_v63 = vpop.permute.xlu0 %491 }
 0x233   : > { %v514_v11 = vsel %vm513_vm2, %v301_v6, %v492_v63 }
 0x236   : > { %v500_v1 = vpop.permute.xlu1 %499 }
 0x237   : > { %v516_v14 = vsel %vm246_vm1, %v514_v11, %v500_v1 }
 0x238   : > { %v502_v3 = vpop.permute.xlu0 %501 }
 0x23a   : > { %v494_v5 = vpop.permute.xlu1 %493 }
 0x23b   : > { %v515_v7 = vsel %vm513_vm2, %v302_v4, %v494_v5 }
 0x23c   : > { %v517_v9 = vsel %vm246_vm1, %v515_v7, %v502_v3  ;;  %v510_v10 = vpop.permute.xlu0 %509 }
 0x23d   : > { %v520_v12 = vsel %vm518_vm3, %v517_v9, %v510_v10 }
 0x23e   : > { %v522_v15 = vadd.f32 %v520_v12, %v488_v8  ;;  %v508_v16 = vpop.permute.xlu1 %507 }
 0x23f   : > { %v519_v17 = vsel %vm518_vm3, %v516_v14, %v508_v16 }
 0x240   : > { %525 = vst.msk [vmem:[%s240_s30 + $0x8] sm:$0xff] %vm523_vm4, %v522_v15  ;;  %v521_v18 = vadd.f32 %v519_v17, %v487_v13 }
 0x242   : > { %524 = vst.msk [vmem:[%s240_s30] sm:$0xff] %vm523_vm4, %v521_v18 }
 0x243   : > { %894 = shalt.err (!%p891_p13)
}
 0x244   : > { %s895_s23 = scalar_lea.hbm %s1220_s6, 256  ;;  %s899_s10 = scalar_lea.hbm %s1271_s3, 2048 }
 0x245   : > { %p896_p7 = scmp.ne.s32.totalorder %s1220_s6, %s895_s23  ;;  %p900_p11 = scmp.lt.u32.totalorder %s1220_s6, %s1271_s3 }
 0x246   : > { %p901_p5 = scmp.lt.u32.totalorder %s899_s10, %s895_s23  ;;  %p903_p8 = scmp.lt.u32.totalorder %s895_s23, %s1220_s6 }
 0x247   : > { %p897_p6 = pnand %p896_p7, %p1288_p1 }
 0x248   : > { %p902_p0 = por %p901_p5, %p900_p11 }
 0x249   : > { %p898_p3 = pneg %p897_p6 }
 0x24a   : > { %p904_p10 = por %p903_p8, %p902_p0 }
 0x24c   : > { %p905_p12 = pnand %p904_p10, %p898_p3 }
 0x24e   : > { %908 = shalt.err (!%p905_p12)
}
 0x24f   : > { %s967_s24 = smov 128  }
 0x250   : > { %712 = dma.vmem_to_hbm [thread:$0]  (%p1288_p1), %s1222_s25, 256, %s1220_s6, %s1226_s27, %s967_s24, %s967_s24, %s963_s17  }
 0x251 PF: > { %p732_p9 = scmp.ge.s32.totalorder %s951_s15, 2  ;;  %s555_s4 = sand.u32 1, %s939_s12  }
 0x252   : > { %p1289_p2 = scmp.ne.s32.totalorder %s1279_s26, 0  ;;  %s556_s30 = scalar_lea.sflag [#allocation4], %s555_s4 }
 0x254   : > { %p726_p4 = pnand %p732_p9, %p1289_p2 }
 0x256   : > { %934 = dma.done.wait (!%p726_p4), %s556_s30, 256  }
 0x257   : > { %936 = vsyncadd (!%p726_p4), %s556_s30, 4294967040  ;;  %p17_p13 = scmp.ge.s32.totalorder %s1009_s16, 10   ;;  %s1290_s12 = smov %s943_s13 }
 0x258   : > { %s1291_s13 = smov %s947_s14  ;;  %s1292_s14 = smov %s1018_s19 }
 0x259   : > { %s1293_s15 = smov %s1009_s16  ;;  %19 = sbr.rel (!%p17_p13) target bundleno = 6 (0x6), region = 96 }
 0x260   :  { %561 = vsyncpa [#allocation3], 1 }
 0x261   :  { %563 = vsyncpa [#allocation3 + $0x1], 1 }
 0x262   :  { %564 = vsyncpa [#allocation6], 1 }
 0x263   :  { %566 = vsyncpa [#allocation6 + $0x1], 1 }
 0x264   :  { %567 = vsyncpa [#allocation4], 1 }
 0x265   :  { %569 = vsyncpa [#allocation4 + $0x1], 1 }

// kernel: model_forward.26
= control target key start
LH: loop header
LB: loop body
LE: loop exit
PB: predicated region body
PF: predicated region fallthrough
CT: control target
= control target key end

     0   :  { %vm65_vm0 = vcmask 261120   ;;  %s506_s1 = inlined_call_operand.vmem [shape: bf16[32,32], index: 1, kind: input, shape index: {}]   ;;  %s507_s0 = inlined_call_operand.vmem [shape: f32[128,32], index: 0, kind: input, shape index: {}]   ;;  %s508_s2 = inlined_call_operand.vmem [shape: f32[1,32], index: 2, kind: input, shape index: {}]   ;;  %s509_s3 = inlined_call_operand.vmem [shape: f32[128,32], index: 3, kind: input, shape index: {}]   ;;  %s510_s4 = inlined_call_operand.vmem [shape: f32[128,32], index: 4, kind: output, shape index: {}]  }
   0x1   :  { %v284_v0 = vld [vmem:[%s506_s1] sm:$0xff]   ;;  %v285_v1 = vld [vmem:[%s506_s1 + $0x8] sm:$0xff]   ;;  %v20_v7 = vld [vmem:[%s507_s0 + $0x10] sm:$0xff] }
   0x2   :  { %260 = vmatprep.subr.bf16.mxu0 %v284_v0  ;;  %280 = vmatprep.subr.bf16.mxu1 %v284_v0  ;;  %v18_v2 = vld [vmem:[%s507_s0] sm:$0xff]  ;;  %v19_v3 = vld [vmem:[%s507_s0 + $0x8] sm:$0xff]  ;;  %v21_v8 = vld [vmem:[%s507_s0 + $0x18] sm:$0xff] }
   0x3   :  { %v26_v4 = vld [vmem:[%s507_s0 + $0x40] sm:$0xff]  ;;  %261 = vmatpush3.bf16.msra.mxu0 %v284_v0  ;;  %282 = vmatpush3.bf16.msra.mxu1 %v284_v0  ;;  %v34_v5 = vpack.c.bf16 %v19_v3, %v18_v2  ;;  %v27_v6 = vld [vmem:[%s507_s0 + $0x48] sm:$0xff]  ;;  %v28_v10 = vld [vmem:[%s507_s0 + $0x50] sm:$0xff]  ;;  %v35_v16 = vpack.c.bf16 %v21_v8, %v20_v7 }
   0x4   :  { %262 = vmatprep.subr.bf16.mxu0 %v285_v1  ;;  %281 = vmatprep.subr.bf16.mxu1 %v285_v1  ;;  %v38_v9 = vpack.c.bf16 %v27_v6, %v26_v4  ;;  %v29_v11 = vld [vmem:[%s507_s0 + $0x58] sm:$0xff]  ;;  %v22_v12 = vld [vmem:[%s507_s0 + $0x20] sm:$0xff]  ;;  %v23_v13 = vld [vmem:[%s507_s0 + $0x28] sm:$0xff] }
   0x5   :  { %264 = vmatprep.mubr.msk.bf16.mxu0 %vm65_vm0, %v34_v5  ;;  %v30_v14 = vld [vmem:[%s507_s0 + $0x60] sm:$0xff]  ;;  %v31_v15 = vld [vmem:[%s507_s0 + $0x68] sm:$0xff]  ;;  %v39_v17 = vpack.c.bf16 %v29_v11, %v28_v10  ;;  %v36_v18 = vpack.c.bf16 %v23_v13, %v22_v12  ;;  %v24_v20 = vld [vmem:[%s507_s0 + $0x30] sm:$0xff] }
   0x6   :  { %272 = vmatprep.mubr.msk.bf16.mxu1 %vm65_vm0, %v38_v9  ;;  %v40_v19 = vpack.c.bf16 %v31_v15, %v30_v14  ;;  %v25_v21 = vld [vmem:[%s507_s0 + $0x38] sm:$0xff]  ;;  %v32_v22 = vld [vmem:[%s507_s0 + $0x70] sm:$0xff]  ;;  %v376_v26 = vld [vmem:[%s508_s2] ss:$0 sm:$0xff] }
   0x7   :  { %263 = vmatpush3.bf16.msra.mxu0 %v285_v1  ;;  %283 = vmatpush3.bf16.msra.mxu1 %v285_v1  ;;  %v33_v23 = vld [vmem:[%s507_s0 + $0x78] sm:$0xff]  ;;  %v37_v24 = vpack.c.bf16 %v25_v21, %v24_v20  ;;  %v189_v28 = vld [vmem:[%s509_s3 + $0x10] sm:$0xff]  ;;  %v187_v34 = vld [vmem:[%s509_s3] sm:$0xff] }
   0x8   :  { %v41_v25 = vpack.c.bf16 %v33_v23, %v32_v22  ;;  %v197_v30 = vld [vmem:[%s509_s3 + $0x50] sm:$0xff]  ;;  %v195_v36 = vld [vmem:[%s509_s3 + $0x40] sm:$0xff]  ;;  %v190_v40 = vld [vmem:[%s509_s3 + $0x18] sm:$0xff] }
   0x9   :  { %v198_v42 = vld [vmem:[%s509_s3 + $0x58] sm:$0xff]  ;;  %v188_v48 = vld [vmem:[%s509_s3 + $0x8] sm:$0xff]  ;;  %v193_v60 = vld [vmem:[%s509_s3 + $0x30] sm:$0xff] }
   0xa   :  { %265 = vmatmul.mubr.msk.bf16.vlgmr.msra.gmra.mrb[0].mxu0 %vm65_vm0, %v35_v16  ;;  %273 = vmatmul.mubr.msk.bf16.vlgmr.msra.gmra.mrb[0].mxu1 %vm65_vm0, %v39_v17  ;;  %v196_v50 = vld [vmem:[%s509_s3 + $0x48] sm:$0xff]  ;;  %v201_v62 = vld [vmem:[%s509_s3 + $0x70] sm:$0xff]  ;;  %v191_v2 = vld [vmem:[%s509_s3 + $0x20] sm:$0xff] }
   0xb   :  { %268 = vmatprep.mubr.msk.bf16.mxu0 %vm65_vm0, %v36_v18  ;;  %276 = vmatprep.mubr.msk.bf16.mxu1 %vm65_vm0, %v40_v19  ;;  %v199_v4 = vld [vmem:[%s509_s3 + $0x60] sm:$0xff]  ;;  %v194_v8 = vld [vmem:[%s509_s3 + $0x38] sm:$0xff]  ;;  %v192_v16 = vld [vmem:[%s509_s3 + $0x28] sm:$0xff] }
   0xc   :  { %v202_v10 = vld [vmem:[%s509_s3 + $0x78] sm:$0xff]  ;;  %v200_v18 = vld [vmem:[%s509_s3 + $0x68] sm:$0xff] }
  0x12   :  { %269 = vmatmul.mubr.msk.bf16.gmra.mrb[4].mxu0 %vm65_vm0, %v37_v24  ;;  %277 = vmatmul.mubr.msk.bf16.gmra.mrb[4].mxu1 %vm65_vm0, %v41_v25 }
  0xdd   :  { %v266_v27 = vpop.f32.mrb[0].mxu0  ;;  %v274_v29 = vpop.f32.mrb[0].mxu1 }
  0xde   :  { %v133_v31 = vadd.f32 %v266_v27, %v376_v26  ;;  %v165_v32 = vadd.f32 %v274_v29, %v376_v26  ;;  %v124_v33 = vpop.f32.mrb[1].mxu0  ;;  %v156_v35 = vpop.f32.mrb[1].mxu1 }
  0xdf   :  { %v125_v37 = vadd.f32 %v376_v26, %v124_v33  ;;  %v157_v38 = vadd.f32 %v376_v26, %v156_v35  ;;  %v267_v39 = vpop.f32.mrb[2].mxu0  ;;  %v275_v41 = vpop.f32.mrb[2].mxu1 }
  0xe0   :  { %v205_v43 = vadd.f32 %v189_v28, %v133_v31  ;;  %v213_v44 = vadd.f32 %v197_v30, %v165_v32  ;;  %v136_v45 = vadd.f32 %v267_v39, %v376_v26  ;;  %v168_v46 = vadd.f32 %v275_v41, %v376_v26  ;;  %v127_v47 = vpop.f32.mrb[3].mxu0  ;;  %v159_v49 = vpop.f32.mrb[3].mxu1 }
  0xe1   :  { %v203_v51 = vadd.f32 %v187_v34, %v125_v37  ;;  %v211_v52 = vadd.f32 %v195_v36, %v157_v38  ;;  %v128_v53 = vadd.f32 %v376_v26, %v127_v47  ;;  %v160_v54 = vadd.f32 %v376_v26, %v159_v49 }
  0xe2   :  { %221 = vst.msk [vmem:[%s510_s4 + $0x10] sm:$0xff] %vm65_vm0, %v205_v43  ;;  %229 = vst.msk [vmem:[%s510_s4 + $0x50] sm:$0xff] %vm65_vm0, %v213_v44  ;;  %v206_v55 = vadd.f32 %v190_v40, %v136_v45  ;;  %v214_v56 = vadd.f32 %v198_v42, %v168_v46 }
  0xe3   :  { %219 = vst.msk [vmem:[%s510_s4] sm:$0xff] %vm65_vm0, %v203_v51  ;;  %227 = vst.msk [vmem:[%s510_s4 + $0x40] sm:$0xff] %vm65_vm0, %v211_v52  ;;  %v204_v57 = vadd.f32 %v188_v48, %v128_v53  ;;  %v212_v58 = vadd.f32 %v196_v50, %v160_v54 }
  0xe4   :  { %222 = vst.msk [vmem:[%s510_s4 + $0x18] sm:$0xff] %vm65_vm0, %v206_v55  ;;  %230 = vst.msk [vmem:[%s510_s4 + $0x58] sm:$0xff] %vm65_vm0, %v214_v56 }
  0xe5   :  { %220 = vst.msk [vmem:[%s510_s4 + $0x8] sm:$0xff] %vm65_vm0, %v204_v57  ;;  %228 = vst.msk [vmem:[%s510_s4 + $0x48] sm:$0xff] %vm65_vm0, %v212_v58  ;;  %v270_v59 = vpop.f32.mrb[4].mxu0  ;;  %v278_v61 = vpop.f32.mrb[4].mxu1 }
  0xe6   :  { %v149_v63 = vadd.f32 %v270_v59, %v376_v26  ;;  %v181_v0 = vadd.f32 %v278_v61, %v376_v26  ;;  %v140_v1 = vpop.f32.mrb[5].mxu0  ;;  %v172_v3 = vpop.f32.mrb[5].mxu1 }
  0xe7   :  { %v141_v5 = vadd.f32 %v376_v26, %v140_v1  ;;  %v173_v6 = vadd.f32 %v376_v26, %v172_v3  ;;  %v271_v7 = vpop.f32.mrb[6].mxu0  ;;  %v279_v9 = vpop.f32.mrb[6].mxu1 }
  0xe8   :  { %v209_v11 = vadd.f32 %v193_v60, %v149_v63  ;;  %v217_v12 = vadd.f32 %v201_v62, %v181_v0  ;;  %v152_v13 = vadd.f32 %v271_v7, %v376_v26  ;;  %v184_v14 = vadd.f32 %v279_v9, %v376_v26  ;;  %v143_v15 = vpop.f32.mrb[7].mxu0  ;;  %v175_v17 = vpop.f32.mrb[7].mxu1 }
  0xe9   :  { %v207_v19 = vadd.f32 %v191_v2, %v141_v5  ;;  %v215_v20 = vadd.f32 %v199_v4, %v173_v6  ;;  %v144_v21 = vadd.f32 %v376_v26, %v143_v15  ;;  %v176_v22 = vadd.f32 %v376_v26, %v175_v17 }
  0xea   :  { %225 = vst.msk [vmem:[%s510_s4 + $0x30] sm:$0xff] %vm65_vm0, %v209_v11  ;;  %233 = vst.msk [vmem:[%s510_s4 + $0x70] sm:$0xff] %vm65_vm0, %v217_v12  ;;  %v210_v23 = vadd.f32 %v194_v8, %v152_v13  ;;  %v218_v24 = vadd.f32 %v202_v10, %v184_v14 }
  0xeb   :  { %223 = vst.msk [vmem:[%s510_s4 + $0x20] sm:$0xff] %vm65_vm0, %v207_v19  ;;  %231 = vst.msk [vmem:[%s510_s4 + $0x60] sm:$0xff] %vm65_vm0, %v215_v20  ;;  %v208_v25 = vadd.f32 %v192_v16, %v144_v21  ;;  %v216_v26 = vadd.f32 %v200_v18, %v176_v22 }
  0xec   :  { %226 = vst.msk [vmem:[%s510_s4 + $0x38] sm:$0xff] %vm65_vm0, %v210_v23  ;;  %234 = vst.msk [vmem:[%s510_s4 + $0x78] sm:$0xff] %vm65_vm0, %v218_v24 }
  0xed   :  { %224 = vst.msk [vmem:[%s510_s4 + $0x28] sm:$0xff] %vm65_vm0, %v208_v25  ;;  %232 = vst.msk [vmem:[%s510_s4 + $0x68] sm:$0xff] %vm65_vm0, %v216_v26 }

// kernel: model_forward.24
= control target key start
LH: loop header
LB: loop body
LE: loop exit
PB: predicated region body
PF: predicated region fallthrough
CT: control target
= control target key end

     0   :  { %8 = vsyncpa [#allocation3], 0  ;;  %s1183_s0 = inlined_call_operand.hbm [shape: f32[4,8,8], index: 0, kind: input, shape index: {}]   ;;  %s1184_s1 = inlined_call_operand.hbm [shape: f32[16,8,32], index: 1, kind: input, shape index: {}]   ;;  %s1185_s2 = inlined_call_operand.hbm [shape: f32[16,8,32], index: 2, kind: input, shape index: {}]   ;;  %s1186_s3 = inlined_call_operand.hbm [shape: f32[16,8,32], index: 3, kind: output, shape index: {}]  }
   0x1   :  { %9 = vsyncpa [#allocation6], 0 }
   0x2   :  { %11 = vsyncpa [#allocation6 + $0x1], 0 }
   0x3   :  { %12 = vsyncpa [#allocation4], 0 }
   0x4   :  { %14 = vsyncpa [#allocation4 + $0x1], 0  ;;  %s926_s12 = smov 0   ;;  %s928_s13 = smov 0  }
   0x5   :  { %s930_s14 = smov 0   ;;  %s932_s15 = smov 0  }
   0x6 LB: > { %s947_s16 = sadd.s32 1, %s890_s15   ;;  %s48_s17 = sadd.s32 1, %s886_s14  ;;  %s890_s15 = sphi %s932_s15, %s1208_s15   ;;  %s886_s14 = sphi %s930_s14, %s1207_s14   ;;  %s882_s13 = sphi %s928_s13, %s1206_s13   ;;  %s878_s12 = sphi %s926_s12, %s1205_s12  }
   0x7   : > { %s45_s18 = ssub.s32 %s890_s15, %s947_s16  ;;  %p55_p0 = scmp.ne.s32.totalorder %s886_s14, %s882_s13 }
   0x8   : > { %p46_p1 = scmp.eq.s32.totalorder %s45_s18, 0  ;;  %p56_p2 = scmp.eq.s32.totalorder %s890_s15, 0 }
   0x9   : > { %p678_p3 = scmp.lt.s32.totalorder %s890_s15, 16  ;;  %s150_s20 = sand.u32 1, %s890_s15  }
   0xa   : > { %s957_s19 = scalar_select %p46_p1, %s886_s14, %s48_s17  }
   0xb   : > { %p57_p4 = por %p56_p2, %p55_p0  ;;  %s152_s21 = sand.u32 1, %s886_s14  }
   0xc   : > { %s964_s22 = sshll.u32 %s152_s21, 3  ;;  %s604_s23 = sshll.u32 %s890_s15, 7 }
   0xd   : > { %s972_s26 = scalar_lea.hbm %s1184_s1, %s604_s23  ;;  %s154_s27 = scalar_lea.vmem [#allocation5], %s964_s22 }
   0xe   : > { %s161_s28 = sshll.u32 %s154_s27, 4  ;;  %p975_p5 = pnand %p678_p3, %p57_p4  ;;  %s979_s28 = int_to_ptr.vmem [resolvable:$true] %s161_s28 }
   0xf   : > { %s981_s30 = scalar_lea.sflag [#allocation6], %s150_s20  ;;  %s732_s4 = scalar_lea.hbm %s972_s26, 128 }
  0x10   : > { %p733_p6 = scmp.ne.s32.totalorder %s972_s26, %s732_s4  ;;  %p734_p7 = pneg %p975_p5 }
  0x11   : > { %s737_s7 = scalar_lea.hbm %s1184_s1, 2048  ;;  %p738_p10 = scmp.lt.u32.totalorder %s972_s26, %s1184_s1 }
  0x12   : > { %p735_p8 = pnand %p734_p7, %p733_p6  ;;  %p739_p11 = scmp.lt.u32.totalorder %s737_s7, %s732_s4 }
  0x13   : > { %p741_p13 = scmp.lt.u32.totalorder %s732_s4, %s972_s26 }
  0x14   : > { %p736_p9 = pneg %p735_p8  ;;  %p740_p12 = por %p739_p11, %p738_p10 }
  0x16   : > { %p742_p1 = por %p741_p13, %p740_p12 }
  0x18   : > { %p743_p2 = pnand %p742_p1, %p736_p9 }
  0x1a   : > { %746 = shalt.err (!%p743_p2)
}
  0x1b   : > { %s747_s10 = scalar_lea.vmem %s979_s28, 128  ;;  %s892_s11 = smov [#allocation5]  }
  0x1c   : > { %p748_p3 = scmp.ne.s32.totalorder %s979_s28, %s747_s10  ;;  %s752_s17 = sshll.u32 %s892_s11, 4  ;;  %s753_s17 = int_to_ptr.vmem [resolvable:$false] %s752_s17 }
  0x1d   : > { %s754_s18 = scalar_lea.vmem %s753_s17, 256  ;;  %p755_p8 = scmp.lt.s32.totalorder %s979_s28, %s753_s17 }
  0x1e   : > { %p750_p4 = pnand %p748_p3, %p734_p7  ;;  %p756_p10 = scmp.lt.s32.totalorder %s754_s18, %s747_s10 }
  0x20   : > { %p751_p6 = pneg %p750_p4  ;;  %p757_p11 = por %p756_p10, %p755_p8 }
  0x22   : > { %p758_p12 = pnand %p757_p11, %p751_p6 }
  0x24   : > { %761 = shalt.err (!%p758_p12)
}
  0x25   : > { %669 = dma.hbm_to_vmem [thread:$0]  (!%p975_p5), %s972_s26, 128, %s979_s28, %s981_s30  }
  0x26   : > { %s1010_s20 = sadd.s32 4294967295, %s890_s15   ;;  %s599_s21 = sadd.s32 4294967294, %s890_s15  }
  0x27   : > { %p61_p9 = scmp.ne.s32.totalorder %s882_s13, %s878_s12  ;;  %p1187_p13 = scmp.eq.s32.totalorder %s1010_s20, 0 }
  0x28   : > { %p111_p1 = scmp.eq.s32.totalorder %s1010_s20, 15  ;;  %p117_p2 = scmp.eq.s32.totalorder %s599_s21, 15 }
  0x29   : > { %p1019_p3 = por %p1187_p13, %p61_p9  ;;  %p600_p4 = scmp.ge.s32.totalorder %s890_s15, 1 }
  0x2a   : > { %p1027_p6 = por %p111_p1, %p55_p0  ;;  %p1031_p8 = por %p117_p2, %p61_p9 }
  0x2b   : > { %s1193_s24 = scalar_select %p1019_p3, 1, 0 }
  0x2c   : > { %s1194_s25 = scalar_select %p1027_p6, 1, 0 }
  0x2d   : > { %s1195_s26 = scalar_select %p1031_p8, 1, 0 }
  0x2e   : > { %p124_p10 = scmp.lt.s32.totalorder %s890_s15, 17  ;;  %s893_s28 = smov [#allocation2]  }
  0x2f   : > { %s136_s4 = sshll.u32 %s893_s28, 4  ;;  %s1045_s7 = scalar_lea.hbm %s1185_s2, %s604_s23  ;;  %s1050_s4 = int_to_ptr.vmem [resolvable:$true] %s136_s4 }
  0x30   : > { %p1036_p11 = pnand %p600_p4, %p124_p10  ;;  %s172_s8 = scalar_lea.vmem [#allocation7], %s964_s22 }
  0x31   : > { %s179_s9 = sshll.u32 %s172_s8, 4  ;;  %s762_s11 = scalar_lea.hbm %s1045_s7, 128  ;;  %s180_s9 = int_to_ptr.vmem [resolvable:$true] %s179_s9 }
  0x32   : > { %s1196_s27 = scalar_select %p1036_p11, 1, 0 }
  0x33   : > { %p662_p0 = pneg %p1036_p11  ;;  %p763_p9 = scmp.ne.s32.totalorder %s1045_s7, %s762_s11 }
  0x34   : > { %s767_s18 = scalar_lea.hbm %s1185_s2, 2048  ;;  %p768_p4 = scmp.lt.u32.totalorder %s1045_s7, %s1185_s2 }
  0x35   : > { %p1054_p12 = pnand %p662_p0, %p1187_p13  ;;  %p765_p1 = pnand %p763_p9, %p734_p7 }
  0x36   : > { %p769_p10 = scmp.lt.u32.totalorder %s767_s18, %s762_s11  ;;  %p771_p0 = scmp.lt.u32.totalorder %s762_s11, %s1045_s7 }
  0x37   : > { %s1197_s10 = scalar_select %p1054_p12, 1, 0 }
  0x38   : > { %p766_p2 = pneg %p765_p1  ;;  %p770_p8 = por %p769_p10, %p768_p4 }
  0x3a   : > { %p772_p13 = por %p771_p0, %p770_p8 }
  0x3c   : > { %p773_p6 = pnand %p772_p13, %p766_p2 }
  0x3e   : > { %776 = shalt.err (!%p773_p6)
}
  0x3f   : > { %s777_s28 = scalar_lea.vmem %s180_s9, 128  ;;  %s894_s5 = smov [#allocation7]  }
  0x40   : > { %p778_p3 = scmp.ne.s32.totalorder %s180_s9, %s777_s28  ;;  %s782_s6 = sshll.u32 %s894_s5, 4  ;;  %s783_s6 = int_to_ptr.vmem [resolvable:$false] %s782_s6 }
  0x41   : > { %s784_s8 = scalar_lea.vmem %s783_s6, 256  ;;  %p785_p11 = scmp.lt.s32.totalorder %s180_s9, %s783_s6 }
  0x42   : > { %p780_p9 = pnand %p778_p3, %p734_p7  ;;  %p786_p12 = scmp.lt.s32.totalorder %s784_s8, %s777_s28 }
  0x44   : > { %p781_p1 = pneg %p780_p9  ;;  %p787_p4 = por %p786_p12, %p785_p11 }
  0x46   : > { %p788_p10 = pnand %p787_p4, %p781_p1 }
  0x48   : > { %791 = shalt.err (!%p788_p10)
}
  0x49   : > { %672 = dma.hbm_to_vmem [thread:$0]  (!%p975_p5), %s1045_s7, 128, %s180_s9, %s981_s30  }
  0x4a   : > { %s792_s17 = scalar_lea.hbm %s1183_s0, 512  ;;  %p1198_p13 = scmp.ne.s32.totalorder %s1197_s10, 0 }
  0x4b   : > { %p793_p7 = scmp.ne.s32.totalorder %s1183_s0, %s792_s17  ;;  %p799_p11 = scmp.lt.u32.totalorder %s792_s17, %s1183_s0 }
  0x4c   : > { %p794_p3 = pneg %p1198_p13 }
  0x4e   : > { %p795_p6 = pnand %p794_p3, %p793_p7 }
  0x50   : > { %p796_p8 = pneg %p795_p6 }
  0x52   : > { %p801_p12 = pnand %p799_p11, %p796_p8 }
  0x54   : > { %804 = shalt.err (!%p801_p12)
}
  0x55   : > { %s805_s29 = scalar_lea.vmem %s1050_s4, 512  ;;  %p813_p9 = scmp.lt.s32.totalorder %s1050_s4, %s1050_s4 }
  0x56   : > { %p806_p5 = scmp.ne.s32.totalorder %s1050_s4, %s805_s29  ;;  %p814_p1 = scmp.lt.s32.totalorder %s805_s29, %s805_s29 }
  0x58   : > { %p808_p2 = pnand %p806_p5, %p794_p3  ;;  %p815_p4 = por %p814_p1, %p813_p9 }
  0x5a   : > { %p809_p0 = pneg %p808_p2 }
  0x5c   : > { %p816_p10 = pnand %p815_p4, %p809_p0 }
  0x5e   : > { %819 = shalt.err (!%p816_p10)
}
  0x5f   : > { %s895_s30 = smov 128   ;;  %s896_s7 = smov 8  }
  0x60   : > { %665 = dma.hbm_to_vmem [thread:$0]  (!%p1198_p13), %s1183_s0, 512, %s1050_s4, [#allocation3], %s895_s30, %s895_s30, %s896_s7  }
  0x61   : > { %p1199_p7 = scmp.ne.s32.totalorder %s1196_s27, 0 }
  0x62   : > { %p1200_p3 = scmp.eq.s32.totalorder (!%p1199_p7), %s1010_s20, 0 }
  0x63   : > { %188 = sbr.rel (%p1199_p7) target bundleno = 588 (0x24c), region = 32 }
  0x6a   : > { %865 = dma.done.wait (%p1200_p3), [#allocation3], 512   ;;  %p1201_p6 = pmov %p1200_p3 }
  0x6b   : > { %s194_s6 = sand.u32 1, %s1010_s20   ;;  %s196_s8 = sand.u32 1, %s882_s13  }
  0x6c   : > { %867 = vsyncadd (%p1201_p6), [#allocation3], 4294966784  ;;  %s1109_s10 = sshll.u32 %s196_s8, 3  ;;  %s195_s4 = scalar_lea.sflag [#allocation6], %s194_s6 }
  0x6d   : > { %s198_s11 = scalar_lea.vmem [#allocation5], %s1109_s10  ;;  %p1202_p13 = scmp.ne.s32.totalorder %s1193_s24, 0 }
  0x6f   : > { %869 = dma.done.wait (%p1202_p13), %s195_s4, 256  }
  0x70   : > { %871 = vsyncadd (%p1202_p13), %s195_s4, 4294967040  ;;  %v897_v0 = vmov 0.0   ;;  %vm898_vm0 = vmmov 0   ;;  %v236_v1 = vld [vmem:[%s198_s11] sm:$0xff]  ;;  %vm247_vm1 = vcmask 1043456   ;;  %s899_s27 = smov 120  }
  0x71   : > { %628 = vmatprep.subr.bf16.mxu0 %v897_v0  ;;  %630 = vmatprep.mubr.msk.bf16.mxu0 %vm898_vm0, %v897_v0  ;;  %v237_v2 = vld [vmem:[#allocation2] sm:$0xff]  ;;  %v243_v3 = vpack.c.bf16 %v236_v1, %v236_v1  ;;  %s900_s23 = smov 104   ;;  %vm238_vm2 = vcmask 64512   ;;  %s901_s24 = smov 112   ;;  %v351_v6 = vld [vmem:[#allocation2 + $0x10] sm:$0xff]  ;;  %v294_v7 = vld [vmem:[#allocation2 + $0x8] sm:$0xff] }
  0x72   : > { %634 = vmatprep.subr.bf16.mxu1 %v897_v0  ;;  %636 = vmatprep.mubr.msk.bf16.mxu1 %vm898_vm0, %v897_v0  ;;  %v242_v5 = vpack.c.bf16 %v237_v2, %v237_v2  ;;  %v352_v8 = vsel %vm238_vm2, %v351_v6, 0.0  ;;  %v295_v9 = vsel %vm238_vm2, %v294_v7, 0.0  ;;  %v407_v10 = vld [vmem:[#allocation2 + $0x18] sm:$0xff]  ;;  %v239_v12 = vsel %vm238_vm2, %v237_v2, 0.0  ;;  %s902_s17 = smov 8   ;;  %s903_s18 = smov 16  }
  0x73   : > { %300 = vrot.lane.b32.xlu0 %v243_v3, %s899_s27  ;;  %412 = vrot.lane.b32.xlu1 %v243_v3, %s900_s23  ;;  %v249_v4 = vsel %vm247_vm1, %v243_v3, 0  ;;  %v408_v11 = vsel %vm238_vm2, %v407_v10, 0.0  ;;  %v298_v16 = vpack.c.bf16 %v294_v7, %v294_v7  ;;  %v355_v20 = vpack.c.bf16 %v351_v6, %v351_v6  ;;  %s904_s22 = smov 24   ;;  %s207_s21 = scalar_lea.vmem [#allocation7], %s1109_s10 }
  0x74   : > { %629 = vmatpush3.bf16.msra.mxu0 %v249_v4  ;;  %v411_v21 = vpack.c.bf16 %v407_v10, %v407_v10  ;;  %vm476_vm3 = vcmask 130048   ;;  %vm478_vm4 = vcmask 195584   ;;  %v462_v53 = vld [vmem:[%s207_s21] sm:$0xff]  ;;  %s617_s28 = sshll.u32 %s1010_s20, 7  ;;  %s234_s29 = scalar_lea.vmem [#allocation8], %s1109_s10  ;;  %vm481_vm5 = vcmask 261120  }
  0x75   : > { %640 = vmatprep.subr.bf16.mxu0 %v897_v0  ;;  %s497_s30 = sshll.u32 %s234_s29, 4  ;;  %s1139_s5 = scalar_lea.hbm %s1186_s3, %s617_s28  ;;  %s1141_s30 = int_to_ptr.vmem [resolvable:$true] %s497_s30 }
  0x76   : > { %s484_s20 = scalar_lea.sflag [#allocation4], %s196_s8  ;;  %s820_s6 = scalar_lea.vmem %s1141_s30, 128 }
  0x77   : > { %356 = vrot.lane.b32.xlu0 %v243_v3, %s901_s24  ;;  %631 = vmatmul.mubr.msk.bf16.vlgmr.msra.gmra.mrb[0].mxu0 %vm238_vm2, %v242_v5  ;;  %p821_p8 = scmp.ne.s32.totalorder %s1141_s30, %s820_s6  ;;  %p1203_p11 = scmp.ne.s32.totalorder %s1194_s25, 0 }
  0x78   : > { %642 = vmatprep.mubr.msk.bf16.mxu0 %vm898_vm0, %v897_v0  ;;  %s905_s10 = smov [#allocation8]  }
  0x79   : > { %p822_p12 = pnand %p821_p8, %p1203_p11  ;;  %s824_s4 = sshll.u32 %s905_s10, 4  ;;  %s825_s4 = int_to_ptr.vmem [resolvable:$false] %s824_s4 }
  0x7a   : > { %s826_s11 = scalar_lea.vmem %s825_s4, 256  ;;  %p827_p2 = scmp.lt.s32.totalorder %s1141_s30, %s825_s4 }
  0x7b   : > { %p823_p5 = pneg %p822_p12  ;;  %p828_p0 = scmp.lt.s32.totalorder %s826_s11, %s820_s6 }
  0x7d   : > { %p829_p9 = por %p828_p0, %p827_p2 }
  0x7f   : > { %p830_p1 = pnand %p829_p9, %p823_p5 }
  0x96   : > { %353 = vadd.xlane.f32.xlu0 %v352_v8 }
  0x97   : > { %296 = vadd.xlane.f32.xlu1 %v295_v9 }
  0x9a   : > { %409 = vadd.xlane.f32.xlu0 %v408_v11 }
  0x9b   : > { %240 = vadd.xlane.f32.xlu1 %v239_v12 }
  0xe5   : > { %v301_v13 = vpop.permute.xlu0 %300  ;;  %v413_v14 = vpop.permute.xlu1 %412 }
  0xe6   : > { %v306_v15 = vsel %vm247_vm1, %v301_v13, 0  ;;  %v418_v17 = vsel %vm247_vm1, %v413_v14, 0 }
  0xe7   : > { %635 = vmatpush3.bf16.msra.mxu1 %v306_v15 }
  0xe8   : > { %646 = vmatprep.subr.bf16.mxu1 %v897_v0 }
  0xe9   : > { %v357_v18 = vpop.permute.xlu0 %356 }
  0xea   : > { %v362_v19 = vsel %vm247_vm1, %v357_v18, 0  ;;  %637 = vmatmul.mubr.msk.bf16.vlgmr.msra.gmra.mrb[0].mxu1 %vm238_vm2, %v298_v16 }
  0xeb   : > { %641 = vmatpush3.bf16.msra.mxu0 %v362_v19  ;;  %647 = vmatpush3.bf16.msra.mxu1 %v418_v17 }
  0xec   : > { %648 = vmatprep.mubr.msk.bf16.mxu1 %vm898_vm0, %v897_v0 }
  0xee   : > { %643 = vmatmul.mubr.msk.bf16.vlgmr.msra.gmra.mrb[4].mxu0 %vm238_vm2, %v355_v20 }
  0xf2   : > { %649 = vmatmul.mubr.msk.bf16.vlgmr.msra.gmra.mrb[4].mxu1 %vm238_vm2, %v411_v21 }
 0x123   : > { %v354_v27 = vpop.xlane.xlu0 %353 }
 0x124   : > { %v297_v26 = vpop.xlane.xlu1 %296 }
 0x125   : > { %724 = vrcp.f32 %v297_v26 }
 0x126   : > { %726 = vrcp.f32 %v354_v27 }
 0x127   : > { %v410_v28 = vpop.xlane.xlu0 %409 }
 0x128   : > { %728 = vrcp.f32 %v410_v28  ;;  %v241_v47 = vpop.xlane.xlu1 %240 }
 0x129   : > { %730 = vrcp.f32 %v241_v47 }
 0x12f   : > { %v725_v29 = vpop.eup %724 }
 0x130   : > { %v727_v33 = vpop.eup %726 }
 0x132   : > { %v729_v39 = vpop.eup %728 }
 0x133   : > { %v731_v48 = vpop.eup %730 }
 0x14a   : > { %v285_v22 = vpop.f32.mrb[0].mxu0 }
 0x14b   : > { %v632_v23 = vpop.f32.mrb[1].mxu0  ;;  %v292_v51 = vmul.f32 %v731_v48, %v285_v22 }
 0x14c   : > { %v288_v24 = vpop.f32.mrb[2].mxu0 }
 0x14d   : > { %v633_v25 = vpop.f32.mrb[3].mxu0 }
 0x1bd   : > { %v342_v30 = vpop.f32.mrb[0].mxu1 }
 0x1be   : > { %v349_v31 = vmul.f32 %v725_v29, %v342_v30  ;;  %v638_v32 = vpop.f32.mrb[1].mxu1 }
 0x1bf   : > { %v345_v34 = vpop.f32.mrb[2].mxu1 }
 0x1c0   : > { %464 = vrot.lane.b32.xlu0 %v349_v31, %s902_s17  ;;  %v639_v35 = vpop.f32.mrb[3].mxu1 }
 0x1c1   : > { %v398_v36 = vpop.f32.mrb[4].mxu0 }
 0x1c2   : > { %v405_v37 = vmul.f32 %v727_v33, %v398_v36  ;;  %v644_v38 = vpop.f32.mrb[5].mxu0 }
 0x1c3   : > { %v401_v40 = vpop.f32.mrb[6].mxu0 }
 0x1c4   : > { %468 = vrot.lane.b32.xlu1 %v405_v37, %s903_s18  ;;  %v645_v41 = vpop.f32.mrb[7].mxu0 }
 0x1c5   : > { %v454_v42 = vpop.f32.mrb[4].mxu1 }
 0x1c6   : > { %v461_v43 = vmul.f32 %v729_v39, %v454_v42  ;;  %v650_v44 = vpop.f32.mrb[5].mxu1 }
 0x1c7   : > { %v457_v45 = vpop.f32.mrb[6].mxu1 }
 0x1c8   : > { %472 = vrot.lane.b32.xlu1 %v461_v43, %s904_s22  ;;  %v651_v46 = vpop.f32.mrb[7].mxu1 }
 0x232   : > { %v465_v49 = vpop.permute.xlu0 %464 }
 0x233   : > { %v475_v52 = vsel %vm238_vm2, %v292_v51, %v465_v49 }
 0x236   : > { %v469_v50 = vpop.permute.xlu1 %468 }
 0x237   : > { %v477_v54 = vsel %vm476_vm3, %v475_v52, %v469_v50 }
 0x23a   : > { %v473_v55 = vpop.permute.xlu1 %472 }
 0x23b   : > { %v479_v56 = vsel %vm478_vm4, %v477_v54, %v473_v55 }
 0x23c   : > { %v480_v57 = vadd.f32 %v479_v56, %v462_v53 }
 0x23e   : > { %482 = vst.msk [vmem:[%s234_s29] sm:$0xff] %vm481_vm5, %v480_v57 }
 0x23f   : > { %833 = shalt.err (!%p830_p1)
}
 0x240   : > { %s834_s8 = scalar_lea.hbm %s1139_s5, 128  ;;  %s838_s24 = scalar_lea.hbm %s1186_s3, 2048 }
 0x241   : > { %p835_p4 = scmp.ne.s32.totalorder %s1139_s5, %s834_s8  ;;  %p839_p3 = scmp.lt.u32.totalorder %s1139_s5, %s1186_s3 }
 0x242   : > { %p840_p6 = scmp.lt.u32.totalorder %s838_s24, %s834_s8  ;;  %p842_p8 = scmp.lt.u32.totalorder %s834_s8, %s1139_s5 }
 0x243   : > { %p836_p10 = pnand %p835_p4, %p1203_p11 }
 0x244   : > { %p841_p13 = por %p840_p6, %p839_p3 }
 0x245   : > { %p837_p7 = pneg %p836_p10 }
 0x246   : > { %p843_p12 = por %p842_p8, %p841_p13 }
 0x248   : > { %p844_p5 = pnand %p843_p12, %p837_p7 }
 0x24a   : > { %847 = shalt.err (!%p844_p5)
}
 0x24b   : > { %660 = dma.vmem_to_hbm [thread:$0]  (%p1203_p11), %s1141_s30, 128, %s1139_s5, %s484_s20  }
 0x24c PF: > { %p680_p2 = scmp.ge.s32.totalorder %s890_s15, 2  ;;  %s509_s22 = sand.u32 1, %s878_s12  }
 0x24d   : > { %p1204_p0 = scmp.ne.s32.totalorder %s1195_s26, 0  ;;  %s510_s21 = scalar_lea.sflag [#allocation4], %s509_s22 }
 0x24f   : > { %p674_p9 = pnand %p680_p2, %p1204_p0 }
 0x251   : > { %873 = dma.done.wait (!%p674_p9), %s510_s21, 128  }
 0x252   : > { %875 = vsyncadd (!%p674_p9), %s510_s21, 4294967168  ;;  %p17_p1 = scmp.ge.s32.totalorder %s947_s16, 18   ;;  %s1205_s12 = smov %s882_s13 }
 0x253   : > { %s1206_s13 = smov %s886_s14  ;;  %s1207_s14 = smov %s957_s19 }
 0x254   : > { %s1208_s15 = smov %s947_s16  ;;  %19 = sbr.rel (!%p17_p1) target bundleno = 6 (0x6), region = 96 }
 0x25b   :  { %515 = vsyncpa [#allocation3], 1 }
 0x25c   :  { %517 = vsyncpa [#allocation3 + $0x1], 1 }
 0x25d   :  { %518 = vsyncpa [#allocation6], 1 }
 0x25e   :  { %520 = vsyncpa [#allocation6 + $0x1], 1 }
 0x25f   :  { %521 = vsyncpa [#allocation4], 1 }
 0x260   :  { %523 = vsyncpa [#allocation4 + $0x1], 1 }

// kernel: model_forward.23
= control target key start
LH: loop header
LB: loop body
LE: loop exit
PB: predicated region body
PF: predicated region fallthrough
CT: control target
= control target key end

     0   :  { %s1389_s0 = inlined_call_operand.hbm [shape: f32[4,16,8,8], index: 0, kind: input, shape index: {}]   ;;  %s1390_s1 = inlined_call_operand.hbm [shape: f32[4,16,8,8], index: 1, kind: input, shape index: {}]   ;;  %s1391_s2 = inlined_call_operand.hbm [shape: bf16[32,8], index: 2, kind: input, shape index: {}]   ;;  %s1392_s3 = inlined_call_operand.hbm [shape: f32[4,8,8], index: 3, kind: output, shape index: {}]  }
   0x1   :  { %1403 = sst [smem:[#allocation21_spill]] %s1391_s2 }
   0x2   :  { %1404 = sst [smem:[#allocation22_spill]] %s1392_s3 }
   0x3   :  { %8 = vsyncpa [#allocation5], 0 }
   0x4   :  { %10 = vsyncpa [#allocation5 + $0x1], 0 }
   0x5   :  { %11 = vsyncpa [#allocation8], 0 }
   0x6   :  { %13 = vsyncpa [#allocation8 + $0x1], 0 }
   0x7   :  { %14 = vsyncpa [#allocation6], 0 }
   0x8   :  { %16 = vsyncpa [#allocation6 + $0x1], 0  ;;  %s1069_s12 = smov 0   ;;  %s1071_s13 = smov 0  }
   0x9   :  { %s1073_s14 = smov 0   ;;  %s1075_s15 = smov 0  }
   0xa   :  { %s1077_s16 = smov 0   ;;  %s1079_s17 = smov 0  }
   0xb   :  { %s1081_s18 = smov 0   ;;  %s1083_s19 = smov 0  }
   0xc   :  { %s1085_s20 = smov 0   ;;  %s1087_s21 = smov 0  }
   0xd   :  { %s1089_s22 = smov 0  }
   0xe LB: > { %1405 = sst [smem:[#allocation15_spill]] %s996_s12  ;;  %s1123_s23 = sadd.s32 4294967295, %s1036_s22   ;;  %s1036_s22 = sphi %s1089_s22, %s22_s22   ;;  %s1032_s21 = sphi %s1087_s21, %s1443_s21   ;;  %s1028_s20 = sphi %s1085_s20, %s1442_s20   ;;  %s1024_s19 = sphi %s1083_s19, %s1441_s19   ;;  %s1020_s18 = sphi %s1081_s18, %s1440_s18   ;;  %s1016_s17 = sphi %s1079_s17, %s1439_s17   ;;  %s1012_s16 = sphi %s1077_s16, %s1438_s16   ;;  %s1008_s15 = sphi %s1075_s15, %s1437_s15   ;;  %s1004_s14 = sphi %s1073_s14, %s1436_s14   ;;  %s1000_s13 = sphi %s1071_s13, %s1435_s13   ;;  %s996_s12 = sphi %s1069_s12, %s1434_s12  }
   0xf   : > { %1406 = sst [smem:[#allocation16_spill]] %s1020_s18  ;;  %s627_s24 = sadd.s32 4294967294, %s1036_s22  }
  0x10   : > { %1407 = sst [smem:[#allocation17_spill]] %s1024_s19  ;;  %p56_p0 = scmp.ne.s32.totalorder %s1012_s16, %s1008_s15 }
  0x11   : > { %p1393_p1 = scmp.eq.s32.totalorder %s1123_s23, 0  ;;  %p128_p2 = scmp.ne.s32.totalorder %s1004_s14, %s1000_s13 }
  0x12   : > { %p129_p3 = scmp.eq.s32.totalorder %s1123_s23, 63  ;;  %p134_p5 = scmp.ne.s32.totalorder %s1000_s13, %s996_s12 }
  0x13   : > { %p1133_p4 = por %p1393_p1, %p56_p0  ;;  %p135_p7 = scmp.eq.s32.totalorder %s627_s24, 63 }
  0x14   : > { %p1139_p6 = por %p129_p3, %p128_p2  ;;  %p628_p8 = scmp.ge.s32.totalorder %s1036_s22, 1 }
  0x15   : > { %s1408_s25 = scalar_select %p1133_p4, 1, 0 }
  0x16   : > { %s1409_s26 = scalar_select %p1139_p6, 1, 0 }
  0x17   : > { %p142_p9 = scmp.lt.s32.totalorder %s1036_s22, 65  ;;  %p1145_p10 = por %p135_p7, %p134_p5 }
  0x18   : > { %1410 = sst [smem:[#allocation18_spill]] %s1409_s26  ;;  %s1038_s29 = smov [#allocation9]  }
  0x19   : > { %s1411_s27 = scalar_select %p1145_p10, 1, 0 }
  0x1a   : > { %p1149_p11 = pnand %p628_p8, %p142_p9  ;;  %s154_s30 = sshll.u32 %s1038_s29, 4  ;;  %s155_s30 = int_to_ptr.vmem [resolvable:$true] %s154_s30 }
  0x1b   : > { %1412 = sst [smem:[#allocation19_spill]] %s1411_s27  ;;  %s1415_s2 = sld [smem:[#allocation21_spill]] }
  0x1c   : > { %s1413_s28 = scalar_select %p1149_p11, 1, 0 }
  0x1d   : > { %p695_p12 = pneg %p1149_p11 }
  0x1f   : > { %p1157_p13 = pnand %p695_p12, %p1393_p1 }
  0x21   : > { %s818_s7 = scalar_lea.hbm %s1415_s2, 256  ;;  %p820_p2 = pneg %p1157_p13 }
  0x22   : > { %p819_p0 = scmp.ne.s32.totalorder %s1415_s2, %s818_s7  ;;  %p825_p7 = scmp.lt.u32.totalorder %s818_s7, %s1415_s2 }
  0x24   : > { %p821_p3 = pnand %p820_p2, %p819_p0 }
  0x26   : > { %p822_p5 = pneg %p821_p3 }
  0x28   : > { %p827_p8 = pnand %p825_p7, %p822_p5 }
  0x2a   : > { %830 = shalt.err (!%p827_p8)
}
  0x2b   : > { %s831_s15 = scalar_lea.vmem %s155_s30, 256  ;;  %p839_p10 = scmp.lt.s32.totalorder %s155_s30, %s155_s30 }
  0x2c   : > { %p832_p9 = scmp.ne.s32.totalorder %s155_s30, %s831_s15  ;;  %p840_p6 = scmp.lt.s32.totalorder %s831_s15, %s831_s15 }
  0x2e   : > { %p834_p12 = pnand %p832_p9, %p820_p2  ;;  %p841_p4 = por %p840_p6, %p839_p10 }
  0x30   : > { %p835_p1 = pneg %p834_p12 }
  0x32   : > { %p842_p11 = pnand %p841_p4, %p835_p1 }
  0x34   : > { %845 = shalt.err (!%p842_p11)
}
  0x35   : > { %s1039_s24 = smov 64   ;;  %s1040_s29 = smov 4  }
  0x36   : > { %698 = dma.hbm_to_vmem [thread:$0]  (!%p1157_p13), %s1415_s2, 256, %s155_s30, [#allocation8], %s1039_s24, %s1039_s24, %s1040_s29  }
  0x37   : > { %s31_s7 = sadd.s32 1, %s1028_s20  ;;  %s34_s8 = sadd.s32 1, %s1032_s21 }
  0x38   : > { %p32_p1 = scmp.ge.s32.totalorder %s31_s7, 16  ;;  %s43_s9 = sadd.s32 1, %s1016_s17 }
  0x39   : > { %p50_p4 = scmp.ne.s32.totalorder %s1016_s17, %s1012_s16  ;;  %p51_p6 = scmp.eq.s32.totalorder %s1036_s22, 0 }
  0x3a   : > { %s1445_s7 = smov (%p32_p1, %s31_s7), 0  ;;  %s1447_s8 = smov (!%p32_p1, %s34_s8), %s1032_s21 }
  0x3b   : > { %1416 = sst [smem:[#allocation20_spill]] %s1445_s7  ;;  %s39_s4 = ssub.s32 %s1028_s20, %s1445_s7 }
  0x3c   : > { %p1188_p10 = por %p51_p6, %p50_p4  ;;  %p36_p11 = scmp.ge.s32.totalorder %s1447_s8, 4 }
  0x3d   : > { %s118_s30 = sadd.s32 1, %s1004_s14  ;;  %p711_p13 = scmp.lt.s32.totalorder %s1036_s22, 64 }
  0x3e   : > { %s168_s11 = sand.u32 1, %s1016_s17   ;;  %s1449_s8 = smov (%p36_p11, %s1447_s8), 0 }
  0x3f   : > { %s1197_s15 = sshll.u32 %s168_s11, 3  ;;  %s38_s24 = ssub.s32 %s1032_s21, %s1449_s8 }
  0x40   : > { %s40_s29 = sor.u32 %s39_s4, %s38_s24  ;;  %p116_p0 = scmp.eq.s32.totalorder %s38_s24, 0 }
  0x41   : > { %p41_p2 = scmp.eq.s32.totalorder %s40_s29, 0  ;;  %s632_s5 = sshll.u32 %s1032_s21, 4 }
  0x42   : > { %s1203_s6 = scalar_select %p116_p0, %s1004_s14, %s118_s30  }
  0x43   : > { %s1206_s2 = scalar_select %p41_p2, %s1016_s17, %s43_s9  }
  0x44   : > { %s177_s7 = sadd.s32 %s1028_s20, %s632_s5  ;;  %s172_s27 = scalar_lea.vmem [#allocation4], %s1197_s15 }
  0x45   : > { %s181_s12 = sshll.u32 %s172_s27, 4  ;;  %s633_s3 = sshll.u32 %s177_s7, 7  ;;  %s1210_s12 = int_to_ptr.vmem [resolvable:$true] %s181_s12 }
  0x46   : > { %s1215_s18 = scalar_lea.hbm %s1389_s0, %s633_s3  ;;  %p1221_p3 = pnand %p711_p13, %p1188_p10 }
  0x47   : > { %s1228_s7 = scalar_lea.hbm %s1390_s1, %s633_s3  ;;  %s188_s19 = sand.u32 1, %s1036_s22  }
  0x48   : > { %s169_s26 = scalar_lea.sflag [#allocation5], %s168_s11  ;;  %s846_s30 = scalar_lea.hbm %s1215_s18, 128 }
  0x49   : > { %p847_p5 = scmp.ne.s32.totalorder %s1215_s18, %s846_s30  ;;  %p848_p7 = pneg %p1221_p3 }
  0x4a   : > { %s851_s29 = scalar_lea.hbm %s1389_s0, 8192  ;;  %p852_p12 = scmp.lt.u32.totalorder %s1215_s18, %s1389_s0 }
  0x4b   : > { %p849_p8 = pnand %p848_p7, %p847_p5  ;;  %p853_p1 = scmp.lt.u32.totalorder %s851_s29, %s846_s30 }
  0x4c   : > { %p855_p6 = scmp.lt.u32.totalorder %s846_s30, %s1215_s18 }
  0x4d   : > { %p850_p9 = pneg %p849_p8  ;;  %p854_p4 = por %p853_p1, %p852_p12 }
  0x4f   : > { %p856_p10 = por %p855_p6, %p854_p4 }
  0x51   : > { %p857_p11 = pnand %p856_p10, %p850_p9 }
  0x53   : > { %860 = shalt.err (!%p857_p11)
}
  0x54   : > { %s861_s3 = scalar_lea.vmem %s1210_s12, 128  ;;  %s1041_s11 = smov [#allocation4]  }
  0x55   : > { %p862_p13 = scmp.ne.s32.totalorder %s1210_s12, %s861_s3  ;;  %s866_s27 = sshll.u32 %s1041_s11, 4  ;;  %s867_s27 = int_to_ptr.vmem [resolvable:$false] %s866_s27 }
  0x56   : > { %s868_s10 = scalar_lea.vmem %s867_s27, 256  ;;  %p869_p5 = scmp.lt.s32.totalorder %s1210_s12, %s867_s27 }
  0x57   : > { %p864_p0 = pnand %p862_p13, %p848_p7  ;;  %p870_p8 = scmp.lt.s32.totalorder %s868_s10, %s861_s3 }
  0x59   : > { %p865_p2 = pneg %p864_p0  ;;  %p871_p12 = por %p870_p8, %p869_p5 }
  0x5b   : > { %p872_p1 = pnand %p871_p12, %p865_p2 }
  0x5d   : > { %875 = shalt.err (!%p872_p1)
}
  0x5e   : > { %702 = dma.hbm_to_vmem [thread:$0]  (!%p1221_p3), %s1215_s18, 128, %s1210_s12, %s169_s26  }
  0x5f   : > { %s192_s30 = scalar_lea.vmem [#allocation7], %s1197_s15  ;;  %s189_s29 = scalar_lea.sflag [#allocation8], %s188_s19 }
  0x60   : > { %s201_s24 = sshll.u32 %s192_s30, 4  ;;  %s876_s5 = scalar_lea.hbm %s1228_s7, 128  ;;  %s202_s24 = int_to_ptr.vmem [resolvable:$true] %s201_s24 }
  0x61   : > { %p877_p9 = scmp.ne.s32.totalorder %s1228_s7, %s876_s5  ;;  %s881_s11 = scalar_lea.hbm %s1390_s1, 8192 }
  0x62   : > { %p882_p10 = scmp.lt.u32.totalorder %s1228_s7, %s1390_s1  ;;  %p883_p11 = scmp.lt.u32.totalorder %s881_s11, %s876_s5 }
  0x63   : > { %p879_p4 = pnand %p877_p9, %p848_p7  ;;  %p885_p0 = scmp.lt.u32.totalorder %s876_s5, %s1228_s7 }
  0x64   : > { %p884_p13 = por %p883_p11, %p882_p10 }
  0x65   : > { %p880_p6 = pneg %p879_p4 }
  0x66   : > { %p886_p2 = por %p885_p0, %p884_p13 }
  0x68   : > { %p887_p5 = pnand %p886_p2, %p880_p6 }
  0x6a   : > { %890 = shalt.err (!%p887_p5)
}
  0x6b   : > { %s891_s12 = scalar_lea.vmem %s202_s24, 128  ;;  %s1042_s18 = smov [#allocation7]  }
  0x6c   : > { %p892_p8 = scmp.ne.s32.totalorder %s202_s24, %s891_s12  ;;  %s896_s15 = sshll.u32 %s1042_s18, 4  ;;  %s897_s15 = int_to_ptr.vmem [resolvable:$false] %s896_s15 }
  0x6d   : > { %s898_s19 = scalar_lea.vmem %s897_s15, 256  ;;  %p899_p9 = scmp.lt.s32.totalorder %s202_s24, %s897_s15 }
  0x6e   : > { %p894_p12 = pnand %p892_p8, %p848_p7  ;;  %p900_p4 = scmp.lt.s32.totalorder %s898_s19, %s891_s12 }
  0x70   : > { %p895_p1 = pneg %p894_p12  ;;  %p901_p10 = por %p900_p4, %p899_p9 }
  0x72   : > { %p902_p11 = pnand %p901_p10, %p895_p1 }
  0x74   : > { %905 = shalt.err (!%p902_p11)
}
  0x75   : > { %705 = dma.hbm_to_vmem [thread:$0]  (!%p1221_p3), %s1228_s7, 128, %s202_s24, %s189_s29  }
  0x76   : > { %p1419_p6 = scmp.ne.s32.totalorder %s1413_s28, 0 }
  0x77   : > { %s212_s26 = sand.u32 (!%p1419_p6), 1, %s1012_s16   ;;  %p1420_p7 = scmp.ne.s32.totalorder (!%p1419_p6), %s1408_s25, 0 }
  0x78   : > { %210 = sbr.rel (%p1419_p6) target bundleno = 815 (0x32f), region = 32  ;;  %s1281_s30 = sshll.u32 (!%p1419_p6), %s212_s26, 3 }
  0x79   : > { %s213_s5 = scalar_lea.sflag (!%p1419_p6), [#allocation5], %s212_s26  ;;  %s216_s4 = scalar_lea.vmem (!%p1419_p6), [#allocation4], %s1281_s30 }
  0x7f   : > { %979 = dma.done.wait (%p1420_p7), %s213_s5, 128  }
  0x80   : > { %981 = vsyncadd (%p1420_p7), %s213_s5, 4294967168  ;;  %s221_s9 = sand.u32 1, %s1123_s23   ;;  %s225_s28 = scalar_lea.vmem [#allocation7], %s1281_s30 }
  0x81   : > { %s222_s7 = scalar_lea.sflag [#allocation8], %s221_s9 }
  0x82   : > { %983 = dma.done.wait (%p1420_p7), %s222_s7, 128  }
  0x83   : > { %985 = vsyncadd (%p1420_p7), %s222_s7, 4294967168  ;;  %p1421_p3 = scmp.eq.s32.totalorder %s1123_s23, 0 }
  0x85   : > { %987 = dma.done.wait (%p1421_p3), [#allocation8], 256   ;;  %p1422_p13 = pmov %p1421_p3 }
  0x86   : > { %s254_s24 = sand.u32 1, %s1000_s13   ;;  %s1423_s11 = sld [smem:[#allocation16_spill]] }
  0x87   : > { %989 = vsyncadd (%p1422_p13), [#allocation8], 4294967040  ;;  %s1301_s29 = sshll.u32 %s254_s24, 3 }
  0x88   : > { %s256_s3 = scalar_lea.vmem [#allocation10], %s1301_s29 }
  0x8c   : > { %p642_p0 = scmp.ne.s32.totalorder %s1423_s11, 0 }
  0x8d   : > { %vm262_vm0 = vcmask (!%p642_p0), 261120   ;;  %v1043_v0 = vmov (!%p642_p0), 0.0  }
  0x8e   : > { %261 = sbr.rel (%p642_p0) target bundleno = 149 (0x95), region = 48  ;;  %263 = vst.msk [vmem:[#allocation2] sm:$0xff] (!%p642_p0), %vm262_vm0, %v1043_v0  ;;  %264 = vst.msk [vmem:[#allocation3] sm:$0xff] (!%p642_p0), %vm262_vm0, %v1043_v0 }
  0x95 PF: > { %vm283_vm1 = vcmask 64512   ;;  %v1044_v1 = vmov 0.0   ;;  %v810_v2 = vld [vmem:[#allocation9] sm:$0xff]   ;;  %vm1045_vm2 = vmmov 0   ;;  %v351_v5 = vld [vmem:[%s225_s28] sm:$0xff]  ;;  %v812_v8 = vld [vmem:[#allocation9 + $0x8] sm:$0xff]  }
  0x96   : > { %671 = vmatprep.subr.bf16.mxu1 %v1044_v1  ;;  %663 = vmatprep.subr.bf16.mxu0 %v1044_v1  ;;  %v811_v3 = vld [vmem:[#allocation9] sm:$0xff]   ;;  %v372_v4 = vsel %vm283_vm1, %v810_v2, 0  ;;  %v417_v7 = vmul.f32 %v351_v5, %v351_v5  ;;  %v813_v9 = vld [vmem:[#allocation9 + $0x8] sm:$0xff]   ;;  %v375_v11 = vsel %vm283_vm1, %v812_v8, 0  ;;  %v356_v14 = vmul.f32 0.59460354, %v351_v5 }
  0x97   : > { %675 = vmatprep.mubr.msk.bf16.mxu1 %vm1045_vm2, %v1044_v1  ;;  %667 = vmatprep.mubr.msk.bf16.mxu0 %vm1045_vm2, %v1044_v1  ;;  %v288_v6 = vsel %vm283_vm1, %v811_v3, 0  ;;  %v266_v12 = vld [vmem:[%s216_s4] sm:$0xff]  ;;  %v291_v13 = vsel %vm283_vm1, %v813_v9, 0  ;;  %vm338_vm3 = vcmask 261120   ;;  %v265_v50 = vld [vmem:[#allocation2] sm:$0xff]  ;;  %v350_v55 = vld [vmem:[#allocation3] sm:$0xff] }
  0x98   : > { %672 = vmatpush3.bf16.xpose.msra.mxu1 %v372_v4  ;;  %664 = vmatpush3.bf16.xpose.msra.mxu0 %v288_v6  ;;  %v418_v10 = vsel %vm283_vm1, %v417_v7, 0.0  ;;  %v271_v15 = vmul.f32 0.59460354, %v266_v12  ;;  %v357_v16 = vpack.c.bf16 %v356_v14, %v356_v14  ;;  %v333_v18 = vmul.f32 %v266_v12, %v266_v12  ;;  %s1424_s23 = sld [smem:[#allocation16_spill]] }
  0x99   : > { %673 = vmatprep.subr.bf16.mxu1 %v1044_v1  ;;  %665 = vmatprep.subr.bf16.mxu0 %v1044_v1 }
  0x9a   : > { %419 = vadd.xlane.f32.xlu1 %v418_v10  ;;  %v272_v17 = vpack.c.bf16 %v271_v15, %v271_v15  ;;  %v334_v27 = vsel %vm283_vm1, %v333_v18, 0.0 }
  0x9e   : > { %p649_p2 = scmp.ne.s32.totalorder %s1424_s23, 15 }
  0x9f   : > { %v1046_v59 = vmov (!%p649_p2), 0.0   ;;  %vm1047_vm4 = vmmov (!%p649_p2), 0  }
  0xa0   : > { %674 = vmatpush3.bf16.xpose.msra.mxu1 %v375_v11  ;;  %666 = vmatpush3.bf16.xpose.msra.mxu0 %v291_v13 }
  0xa1   : > { %679 = vmatprep.subr.bf16.mxu0 (!%p649_p2), %v1046_v59 }
  0xa7   : > { %676 = vmatmul.mubr.msk.bf16.vlgmr.msra.gmra.mrb[0].mxu1 %vm283_vm1, %v357_v16  ;;  %668 = vmatmul.mubr.msk.bf16.vlgmr.msra.gmra.mrb[0].mxu0 %vm283_vm1, %v272_v17 }
  0xa8   : > { %681 = vmatprep.mubr.msk.bf16.mxu0 (!%p649_p2), %vm1047_vm4, %v1046_v59 }
 0x127   : > { %v420_v32 = vpop.xlane.xlu1 %419 }
 0x128   : > { %v421_v38 = vmul.f32 0.17677669, %v420_v32 }
 0x17a   : > { %v411_v19 = vpop.f32.mrb[0].mxu1  ;;  %v327_v22 = vpop.f32.mrb[0].mxu0 }
 0x17b   : > { %v677_v20 = vpop.f32.mrb[1].mxu1  ;;  %v422_v21 = vsel %vm338_vm3, %v411_v19, -inf  ;;  %v339_v24 = vsel %vm338_vm3, %v327_v22, -inf  ;;  %v669_v25 = vpop.f32.mrb[1].mxu0  ;;  %v431_v43 = vsub.f32 %v411_v19, %v421_v38 }
 0x17c   : > { %423 = vmax.xlane.f32.xlu0 %v422_v21  ;;  %v414_v23 = vpop.f32.mrb[2].mxu1  ;;  %340 = vmax.xlane.f32.xlu1 %v339_v24  ;;  %v330_v28 = vpop.f32.mrb[2].mxu0 }
 0x17d   : > { %v678_v26 = vpop.f32.mrb[3].mxu1  ;;  %v670_v29 = vpop.f32.mrb[3].mxu0 }
 0x180   : > { %335 = vadd.xlane.f32.xlu0 %v334_v27 }
 0x209   : > { %v424_v30 = vpop.xlane.xlu0 %423  ;;  %v341_v37 = vpop.xlane.xlu1 %340 }
 0x20a   : > { %v425_v31 = vrot.slane %v424_v30, 4 }
 0x20c   : > { %v426_v33 = vmax.f32 %v424_v30, %v425_v31 }
 0x20d   : > { %v336_v34 = vpop.xlane.xlu0 %335 }
 0x20e   : > { %v427_v35 = vrot.slane %v426_v33, 2  ;;  %v337_v36 = vmul.f32 0.17677669, %v336_v34 }
 0x210   : > { %v428_v39 = vmax.f32 %v426_v33, %v427_v35  ;;  %v342_v40 = vsub.f32 %v327_v22, %v337_v36 }
 0x212   : > { %v429_v41 = vrot.slane %v428_v39, 1  ;;  %v343_v42 = vsub.f32 %v342_v40, %v341_v37 }
 0x214   : > { %v430_v44 = vmax.f32 %v428_v39, %v429_v41  ;;  %v344_v45 = vmul.f32 1.442695, %v343_v42 }
 0x216   : > { %v432_v46 = vsub.f32 %v431_v43, %v430_v44  ;;  %814 = vpow2.f32 %v344_v45 }
 0x218   : > { %v433_v47 = vmul.f32 1.442695, %v432_v46 }
 0x21a   : > { %816 = vpow2.f32 %v433_v47 }
 0x220   : > { %v815_v48 = vpop.eup %814 }
 0x221   : > { %v346_v49 = vadd.f32 0.0001, %v815_v48 }
 0x223   : > { %v347_v51 = vmul.f32 0.17677669, %v346_v49 }
 0x224   : > { %v817_v52 = vpop.eup %816 }
 0x225   : > { %v435_v53 = vadd.f32 0.0001, %v817_v52  ;;  %v348_v54 = vadd.f32 %v347_v51, %v265_v50  ;;  %442 = sbr.rel (%p649_p2) target bundleno = 788 (0x314), region = 52 }
 0x227   : > { %v436_v56 = vmul.f32 0.17677669, %v435_v53  ;;  %349 = vst.msk [vmem:[#allocation2] sm:$0xff] %vm338_vm3, %v348_v54 }
 0x229   : > { %v437_v57 = vadd.f32 %v436_v56, %v350_v55 }
 0x22b   : > { %438 = vst.msk [vmem:[#allocation3] sm:$0xff] %vm338_vm3, %v437_v57 }
 0x22e   : > { %v443_v62 = vld [vmem:[#allocation2] sm:$0xff] }
 0x22f   : > { %v444_v63 = vpack.c.bf16 %v443_v62, %v443_v62 }
 0x232   : > { %v445_v58 = vld [vmem:[#allocation3] sm:$0xff] }
 0x233   : > { %v446_v60 = vpack.c.bf16 %v445_v58, %v445_v58 }
 0x235   : > { %v451_v61 = vsel %vm338_vm3, %v446_v60, 0 }
 0x236   : > { %680 = vmatpush3.bf16.xpose.msra.mxu0 %v451_v61 }
 0x23d   : > { %682 = vmatmul.mubr.msk.bf16.vlgmr.msra.gmra.mrb[0].mxu0 %vm338_vm3, %v444_v63 }
 0x310   : > { %v487_v0 = vpop.f32.mrb[0].mxu0 }
 0x311   : > { %v493_v1 = vmul.f32 0.00390625, %v487_v0  ;;  %v683_v2 = vpop.f32.mrb[1].mxu0 }
 0x312   : > { %v490_v3 = vpop.f32.mrb[2].mxu0 }
 0x313   : > { %494 = vst.msk [vmem:[%s256_s3] sm:$0xff] %vm283_vm1, %v493_v1  ;;  %v684_v4 = vpop.f32.mrb[3].mxu0 }
 0x314 PF: > { %s1425_s25 = sld [smem:[#allocation17_spill]]  ;;  %s1426_s27 = sld [smem:[#allocation18_spill]] }
 0x315   : > { %s1427_s15 = sld [smem:[#allocation22_spill]]  ;;  %s509_s30 = sshll.u32 %s256_s3, 4  ;;  %s510_s30 = int_to_ptr.vmem [resolvable:$true] %s509_s30 }
 0x316   : > { %s496_s5 = scalar_lea.sflag [#allocation6], %s254_s24  ;;  %s906_s4 = scalar_lea.vmem %s510_s30, 128 }
 0x317   : > { %p907_p5 = scmp.ne.s32.totalorder %s510_s30, %s906_s4  ;;  %s1048_s9 = smov [#allocation10]  }
 0x318   : > { %s910_s7 = sshll.u32 %s1048_s9, 4  ;;  %s911_s7 = int_to_ptr.vmem [resolvable:$false] %s910_s7 }
 0x319   : > { %s912_s28 = scalar_lea.vmem %s911_s7, 256  ;;  %p913_p9 = scmp.lt.s32.totalorder %s510_s30, %s911_s7 }
 0x31a   : > { %s652_s10 = sshll.u32 %s1425_s25, 7  ;;  %p1429_p8 = scmp.ne.s32.totalorder %s1426_s27, 0 }
 0x31b   : > { %s1428_s26 = smov %s1427_s15  ;;  %s1329_s19 = scalar_lea.hbm %s1427_s15, %s652_s10 }
 0x31c   : > { %p908_p12 = pnand %p907_p5, %p1429_p8  ;;  %p914_p4 = scmp.lt.s32.totalorder %s912_s28, %s906_s4 }
 0x31e   : > { %p909_p1 = pneg %p908_p12  ;;  %p915_p10 = por %p914_p4, %p913_p9 }
 0x320   : > { %p916_p11 = pnand %p915_p10, %p909_p1 }
 0x322   : > { %919 = shalt.err (!%p916_p11)
}
 0x323   : > { %s920_s24 = scalar_lea.hbm %s1329_s19, 128  ;;  %s924_s11 = scalar_lea.hbm %s1428_s26, 512 }
 0x324   : > { %p921_p6 = scmp.ne.s32.totalorder %s1329_s19, %s920_s24  ;;  %p925_p13 = scmp.lt.u32.totalorder %s1329_s19, %s1428_s26 }
 0x325   : > { %p926_p0 = scmp.lt.u32.totalorder %s924_s11, %s920_s24  ;;  %p928_p5 = scmp.lt.u32.totalorder %s920_s24, %s1329_s19 }
 0x326   : > { %p922_p7 = pnand %p921_p6, %p1429_p8 }
 0x327   : > { %p927_p2 = por %p926_p0, %p925_p13 }
 0x328   : > { %p923_p3 = pneg %p922_p7 }
 0x329   : > { %p929_p12 = por %p928_p5, %p927_p2 }
 0x32b   : > { %p930_p1 = pnand %p929_p12, %p923_p3 }
 0x32d   : > { %933 = shalt.err (!%p930_p1)
}
 0x32e   : > { %693 = dma.vmem_to_hbm [thread:$0]  (%p1429_p8), %s510_s30, 128, %s1329_s19, %s496_s5  }
 0x32f PF: > { %s1430_s10 = sld [smem:[#allocation15_spill]]  ;;  %s1431_s12 = sld [smem:[#allocation19_spill]] }
 0x330   : > { %p713_p9 = scmp.ge.s32.totalorder %s1036_s22, 2 }
 0x335   : > { %s521_s18 = sand.u32 1, %s1430_s10   ;;  %p1432_p4 = scmp.ne.s32.totalorder %s1431_s12, 0 }
 0x336   : > { %s522_s15 = scalar_lea.sflag [#allocation6], %s521_s18 }
 0x337   : > { %p707_p10 = pnand %p713_p9, %p1432_p4 }
 0x339   : > { %991 = dma.done.wait (!%p707_p10), %s522_s15, 128  }
 0x33a   : > { %993 = vsyncadd (!%p707_p10), %s522_s15, 4294967168  ;;  %s22_s22 = sadd.s32 1, %s1036_s22   ;;  %s1433_s27 = sld [smem:[#allocation20_spill]] }
 0x33b   : > { %p19_p11 = scmp.ge.s32.totalorder %s22_s22, 66   ;;  %s1434_s12 = smov %s1000_s13 }
 0x33c   : > { %s1435_s13 = smov %s1004_s14  ;;  %s1436_s14 = smov %s1203_s6 }
 0x33d   : > { %s1437_s15 = smov %s1012_s16  ;;  %s1438_s16 = smov %s1016_s17 }
 0x33e   : > { %s1439_s17 = smov %s1206_s2  ;;  %s1440_s18 = smov %s1028_s20 }
 0x33f   : > { %s1441_s19 = smov %s1032_s21  ;;  %s1443_s21 = smov %s1449_s8 }
 0x340   : > { %s1442_s20 = smov %s1433_s27  ;;  %21 = sbr.rel (!%p19_p11) target bundleno = 14 (0xe), region = 102 }
 0x347   :  { %527 = vsyncpa [#allocation5], 1 }
 0x348   :  { %529 = vsyncpa [#allocation5 + $0x1], 1 }
 0x349   :  { %530 = vsyncpa [#allocation8], 1 }
 0x34a   :  { %532 = vsyncpa [#allocation8 + $0x1], 1 }
 0x34b   :  { %533 = vsyncpa [#allocation6], 1 }
 0x34c   :  { %535 = vsyncpa [#allocation6 + $0x1], 1 }

// kernel: model_forward.25
= control target key start
LH: loop header
LB: loop body
LE: loop exit
PB: predicated region body
PF: predicated region fallthrough
CT: control target
= control target key end

     0   :  { %vm39_vm0 = vcmask 261120   ;;  %s1163_s0 = inlined_call_operand.vmem [shape: f32[128,32], index: 0, kind: input, shape index: {}]   ;;  %s1164_s3 = inlined_call_operand.vmem [shape: bf16[32,32], index: 3, kind: input, shape index: {}]   ;;  %s1165_s1 = inlined_call_operand.vmem [shape: f32[1,32], index: 1, kind: input, shape index: {}]   ;;  %s1166_s2 = inlined_call_operand.vmem [shape: f32[1,32], index: 2, kind: input, shape index: {}]   ;;  %s1167_s4 = inlined_call_operand.vmem [shape: f32[1,32], index: 4, kind: input, shape index: {}]   ;;  %s1168_s5 = inlined_call_operand.vmem [shape: f32[128,32], index: 5, kind: output, shape index: {}]  }
   0x1   :  { %v21_v0 = vld [vmem:[%s1163_s0] sm:$0xff]  ;;  %v22_v2 = vld [vmem:[%s1163_s0 + $0x8] sm:$0xff]  ;;  %v23_v8 = vld [vmem:[%s1163_s0 + $0x10] sm:$0xff] }
   0x2   :  { %v29_v1 = vld [vmem:[%s1163_s0 + $0x40] sm:$0xff]  ;;  %v40_v3 = vsel %vm39_vm0, %v21_v0, 0.0  ;;  %v30_v5 = vld [vmem:[%s1163_s0 + $0x48] sm:$0xff]  ;;  %v43_v6 = vsel %vm39_vm0, %v22_v2, 0.0  ;;  %v24_v9 = vld [vmem:[%s1163_s0 + $0x18] sm:$0xff]  ;;  %v46_v10 = vsel %vm39_vm0, %v23_v8, 0.0 }
   0x3   :  { %v64_v4 = vsel %vm39_vm0, %v29_v1, 0.0  ;;  %41 = vadd.xlane.f32.xlu0 %v40_v3  ;;  %v67_v7 = vsel %vm39_vm0, %v30_v5, 0.0  ;;  %v49_v11 = vsel %vm39_vm0, %v24_v9, 0.0  ;;  %v779_v12 = vld [vmem:[%s1163_s0 + $0x50] sm:$0xff]  ;;  %v784_v13 = vld [vmem:[%s1163_s0 + $0x58] sm:$0xff]  ;;  %v793_v16 = vld [vmem:[%s1163_s0 + $0x20] sm:$0xff] }
   0x4   :  { %65 = vadd.xlane.f32.xlu1 %v64_v4  ;;  %v70_v14 = vsel %vm39_vm0, %v779_v12, 0.0  ;;  %v73_v15 = vsel %vm39_vm0, %v784_v13, 0.0  ;;  %v798_v17 = vld [vmem:[%s1163_s0 + $0x28] sm:$0xff]  ;;  %v52_v18 = vsel %vm39_vm0, %v793_v16, 0.0  ;;  %v807_v20 = vld [vmem:[%s1163_s0 + $0x60] sm:$0xff]  ;;  %v821_v24 = vld [vmem:[%s1163_s0 + $0x30] sm:$0xff] }
   0x5   :  { %v55_v19 = vsel %vm39_vm0, %v798_v17, 0.0  ;;  %v812_v21 = vld [vmem:[%s1163_s0 + $0x68] sm:$0xff]  ;;  %v76_v22 = vsel %vm39_vm0, %v807_v20, 0.0  ;;  %v826_v25 = vld [vmem:[%s1163_s0 + $0x38] sm:$0xff]  ;;  %v58_v26 = vsel %vm39_vm0, %v821_v24, 0.0  ;;  %v835_v28 = vld [vmem:[%s1163_s0 + $0x70] sm:$0xff] }
   0x6   :  { %v79_v23 = vsel %vm39_vm0, %v812_v21, 0.0  ;;  %v61_v27 = vsel %vm39_vm0, %v826_v25, 0.0  ;;  %v840_v29 = vld [vmem:[%s1163_s0 + $0x78] sm:$0xff]  ;;  %v82_v30 = vsel %vm39_vm0, %v835_v28, 0.0 }
   0x7   :  { %44 = vadd.xlane.f32.xlu0 %v43_v6  ;;  %v85_v31 = vsel %vm39_vm0, %v840_v29, 0.0 }
   0x8   :  { %68 = vadd.xlane.f32.xlu1 %v67_v7 }
   0xb   :  { %47 = vadd.xlane.f32.xlu0 %v46_v10 }
   0xc   :  { %50 = vadd.xlane.f32.xlu1 %v49_v11 }
   0xf   :  { %71 = vadd.xlane.f32.xlu0 %v70_v14 }
  0x10   :  { %74 = vadd.xlane.f32.xlu1 %v73_v15 }
  0x13   :  { %53 = vadd.xlane.f32.xlu0 %v52_v18 }
  0x14   :  { %56 = vadd.xlane.f32.xlu1 %v55_v19 }
  0x17   :  { %77 = vadd.xlane.f32.xlu0 %v76_v22 }
  0x18   :  { %80 = vadd.xlane.f32.xlu1 %v79_v23 }
  0x1b   :  { %59 = vadd.xlane.f32.xlu0 %v58_v26 }
  0x1c   :  { %62 = vadd.xlane.f32.xlu1 %v61_v27 }
  0x1f   :  { %83 = vadd.xlane.f32.xlu0 %v82_v30 }
  0x20   :  { %86 = vadd.xlane.f32.xlu1 %v85_v31 }
  0x90   :  { %v42_v32 = vpop.xlane.xlu0 %41 }
  0x91   :  { %v66_v33 = vpop.xlane.xlu1 %65  ;;  %v89_v34 = vmul.f32 0.03125, %v42_v32 }
  0x92   :  { %v97_v35 = vmul.f32 0.03125, %v66_v33 }
  0x93   :  { %v846_v36 = vsub.f32 %v21_v0, %v89_v34 }
  0x94   :  { %v848_v37 = vsub.f32 %v29_v1, %v97_v35  ;;  %v45_v38 = vpop.xlane.xlu0 %44 }
  0x95   :  { %v69_v39 = vpop.xlane.xlu1 %68  ;;  %v90_v40 = vmul.f32 0.03125, %v45_v38  ;;  %v121_v42 = vmul.f32 %v846_v36, %v846_v36 }
  0x96   :  { %v98_v41 = vmul.f32 0.03125, %v69_v39  ;;  %v129_v43 = vmul.f32 %v848_v37, %v848_v37 }
  0x97   :  { %v854_v44 = vsub.f32 %v22_v2, %v90_v40  ;;  %v137_v46 = vsel %vm39_vm0, %v121_v42, 0.0 }
  0x98   :  { %v856_v45 = vsub.f32 %v30_v5, %v98_v41  ;;  %138 = vadd.xlane.f32.xlu0 %v137_v46  ;;  %v48_v47 = vpop.xlane.xlu0 %47  ;;  %v161_v49 = vsel %vm39_vm0, %v129_v43, 0.0 }
  0x99   :  { %v51_v48 = vpop.xlane.xlu1 %50  ;;  %v91_v50 = vmul.f32 0.03125, %v48_v47  ;;  %v122_v52 = vmul.f32 %v854_v44, %v854_v44 }
  0x9a   :  { %v92_v51 = vmul.f32 0.03125, %v51_v48  ;;  %v130_v53 = vmul.f32 %v856_v45, %v856_v45 }
  0x9b   :  { %v864_v54 = vsub.f32 %v23_v8, %v91_v50  ;;  %v140_v56 = vsel %vm39_vm0, %v122_v52, 0.0 }
  0x9c   :  { %v866_v55 = vsub.f32 %v24_v9, %v92_v51  ;;  %162 = vadd.xlane.f32.xlu0 %v161_v49  ;;  %141 = vadd.xlane.f32.xlu1 %v140_v56  ;;  %v72_v57 = vpop.xlane.xlu0 %71  ;;  %v164_v59 = vsel %vm39_vm0, %v130_v53, 0.0  ;;  %v657_v53 = vld [vmem:[%s1164_s3 + $0x8] sm:$0xff]  }
  0x9d   :  { %v75_v58 = vpop.xlane.xlu1 %74  ;;  %v99_v60 = vmul.f32 0.03125, %v72_v57  ;;  %v123_v62 = vmul.f32 %v864_v54, %v864_v54 }
  0x9e   :  { %v100_v61 = vmul.f32 0.03125, %v75_v58  ;;  %v124_v63 = vmul.f32 %v866_v55, %v866_v55 }
  0x9f   :  { %v875_v0 = vsub.f32 %v779_v12, %v99_v60  ;;  %v143_v2 = vsel %vm39_vm0, %v123_v62, 0.0 }
  0xa0   :  { %v878_v1 = vsub.f32 %v784_v13, %v100_v61  ;;  %165 = vadd.xlane.f32.xlu1 %v164_v59  ;;  %144 = vadd.xlane.f32.xlu0 %v143_v2  ;;  %v54_v3 = vpop.xlane.xlu0 %53  ;;  %v146_v5 = vsel %vm39_vm0, %v124_v63, 0.0 }
  0xa1   :  { %v57_v4 = vpop.xlane.xlu1 %56  ;;  %v93_v6 = vmul.f32 0.03125, %v54_v3  ;;  %v131_v8 = vmul.f32 %v875_v0, %v875_v0 }
  0xa2   :  { %v94_v7 = vmul.f32 0.03125, %v57_v4  ;;  %v132_v9 = vmul.f32 %v878_v1, %v878_v1 }
  0xa3   :  { %v887_v10 = vsub.f32 %v793_v16, %v93_v6  ;;  %v167_v12 = vsel %vm39_vm0, %v131_v8, 0.0 }
  0xa4   :  { %v890_v11 = vsub.f32 %v798_v17, %v94_v7  ;;  %147 = vadd.xlane.f32.xlu1 %v146_v5  ;;  %168 = vadd.xlane.f32.xlu0 %v167_v12  ;;  %v78_v13 = vpop.xlane.xlu0 %77  ;;  %v170_v15 = vsel %vm39_vm0, %v132_v9, 0.0 }
  0xa5   :  { %v81_v14 = vpop.xlane.xlu1 %80  ;;  %v101_v18 = vmul.f32 0.03125, %v78_v13  ;;  %v125_v22 = vmul.f32 %v887_v10, %v887_v10 }
  0xa6   :  { %v102_v19 = vmul.f32 0.03125, %v81_v14  ;;  %v126_v16 = vmul.f32 %v890_v11, %v890_v11 }
  0xa7   :  { %v899_v23 = vsub.f32 %v807_v20, %v101_v18  ;;  %v149_v26 = vsel %vm39_vm0, %v125_v22, 0.0 }
  0xa8   :  { %v902_v17 = vsub.f32 %v812_v21, %v102_v19  ;;  %171 = vadd.xlane.f32.xlu1 %v170_v15  ;;  %150 = vadd.xlane.f32.xlu0 %v149_v26  ;;  %v60_v27 = vpop.xlane.xlu0 %59  ;;  %v152_v31 = vsel %vm39_vm0, %v126_v16, 0.0 }
  0xa9   :  { %v63_v30 = vpop.xlane.xlu1 %62  ;;  %v95_v32 = vmul.f32 0.03125, %v60_v27  ;;  %v133_v34 = vmul.f32 %v899_v23, %v899_v23 }
  0xaa   :  { %v96_v33 = vmul.f32 0.03125, %v63_v30  ;;  %v134_v20 = vmul.f32 %v902_v17, %v902_v17 }
  0xab   :  { %v911_v35 = vsub.f32 %v821_v24, %v95_v32  ;;  %v173_v38 = vsel %vm39_vm0, %v133_v34, 0.0 }
  0xac   :  { %v914_v21 = vsub.f32 %v826_v25, %v96_v33  ;;  %153 = vadd.xlane.f32.xlu1 %v152_v31  ;;  %174 = vadd.xlane.f32.xlu0 %v173_v38  ;;  %v84_v39 = vpop.xlane.xlu0 %83  ;;  %v176_v41 = vsel %vm39_vm0, %v134_v20, 0.0  ;;  %v946_v31 = vld [vmem:[%s1165_s1] ss:$0 sm:$0xff] }
  0xad   :  { %v87_v40 = vpop.xlane.xlu1 %86  ;;  %v103_v42 = vmul.f32 0.03125, %v84_v39  ;;  %v127_v46 = vmul.f32 %v911_v35, %v911_v35 }
  0xae   :  { %v104_v43 = vmul.f32 0.03125, %v87_v40  ;;  %v128_v24 = vmul.f32 %v914_v21, %v914_v21 }
  0xaf   :  { %v923_v47 = vsub.f32 %v835_v28, %v103_v42  ;;  %v155_v48 = vsel %vm39_vm0, %v127_v46, 0.0 }
  0xb0   :  { %v926_v25 = vsub.f32 %v840_v29, %v104_v43  ;;  %177 = vadd.xlane.f32.xlu1 %v176_v41  ;;  %156 = vadd.xlane.f32.xlu0 %v155_v48  ;;  %v158_v49 = vsel %vm39_vm0, %v128_v24, 0.0  ;;  %v656_v29 = vld [vmem:[%s1164_s3] sm:$0xff]  }
  0xb1   :  { %v135_v50 = vmul.f32 %v923_v47, %v923_v47  ;;  %632 = vmatprep.subr.bf16.mxu0 %v656_v29  ;;  %652 = vmatprep.subr.bf16.mxu1 %v656_v29  ;;  %v953_v43 = vld [vmem:[%s1166_s2] ss:$0 sm:$0xff] }
  0xb2   :  { %v136_v51 = vmul.f32 %v926_v25, %v926_v25  ;;  %633 = vmatpush3.bf16.msra.mxu0 %v656_v29  ;;  %654 = vmatpush3.bf16.msra.mxu1 %v656_v29 }
  0xb3   :  { %v179_v52 = vsel %vm39_vm0, %v135_v50, 0.0  ;;  %634 = vmatprep.subr.bf16.mxu0 %v657_v53  ;;  %653 = vmatprep.subr.bf16.mxu1 %v657_v53 }
  0xb4   :  { %159 = vadd.xlane.f32.xlu1 %v158_v49  ;;  %180 = vadd.xlane.f32.xlu0 %v179_v52  ;;  %v182_v28 = vsel %vm39_vm0, %v136_v51, 0.0 }
  0xb6   :  { %635 = vmatpush3.bf16.msra.mxu0 %v657_v53  ;;  %655 = vmatpush3.bf16.msra.mxu1 %v657_v53 }
  0xb8   :  { %183 = vadd.xlane.f32.xlu1 %v182_v28 }
 0x125   :  { %v139_v56 = vpop.xlane.xlu0 %138 }
 0x126   :  { %v185_v57 = vmul.f32 0.03125, %v139_v56 }
 0x128   :  { %v201_v58 = vadd.f32 1e-12, %v185_v57 }
 0x129   :  { %v142_v59 = vpop.xlane.xlu1 %141  ;;  %v163_v60 = vpop.xlane.xlu0 %162 }
 0x12a   :  { %658 = vrsqrt.f32 %v201_v58  ;;  %v186_v61 = vmul.f32 0.03125, %v142_v59  ;;  %v193_v62 = vmul.f32 0.03125, %v163_v60 }
 0x12c   :  { %v202_v63 = vadd.f32 1e-12, %v186_v61  ;;  %v209_v2 = vadd.f32 1e-12, %v193_v62 }
 0x12d   :  { %v166_v3 = vpop.xlane.xlu1 %165  ;;  %v145_v4 = vpop.xlane.xlu0 %144 }
 0x12e   :  { %660 = vrsqrt.f32 %v202_v63  ;;  %v194_v5 = vmul.f32 0.03125, %v166_v3  ;;  %v187_v6 = vmul.f32 0.03125, %v145_v4 }
 0x12f   :  { %662 = vrsqrt.f32 %v209_v2 }
 0x130   :  { %v210_v7 = vadd.f32 1e-12, %v194_v5  ;;  %v203_v8 = vadd.f32 1e-12, %v187_v6 }
 0x131   :  { %v148_v9 = vpop.xlane.xlu1 %147  ;;  %v169_v12 = vpop.xlane.xlu0 %168 }
 0x132   :  { %664 = vrsqrt.f32 %v210_v7  ;;  %v188_v13 = vmul.f32 0.03125, %v148_v9  ;;  %v195_v14 = vmul.f32 0.03125, %v169_v12 }
 0x133   :  { %666 = vrsqrt.f32 %v203_v8 }
 0x134   :  { %v659_v15 = vpop.eup %658  ;;  %v204_v18 = vadd.f32 1e-12, %v188_v13  ;;  %v211_v19 = vadd.f32 1e-12, %v195_v14 }
 0x135   :  { %v172_v22 = vpop.xlane.xlu1 %171  ;;  %v151_v16 = vpop.xlane.xlu0 %150  ;;  %v233_v26 = vmul.f32 %v659_v15, %v846_v36 }
 0x136   :  { %668 = vrsqrt.f32 %v204_v18  ;;  %v196_v27 = vmul.f32 0.03125, %v172_v22  ;;  %v189_v30 = vmul.f32 0.03125, %v151_v16 }
 0x137   :  { %670 = vrsqrt.f32 %v211_v19  ;;  %v255_v41 = vmul.f32 %v946_v31, %v233_v26 }
 0x138   :  { %v661_v32 = vpop.eup %660  ;;  %v212_v33 = vadd.f32 1e-12, %v196_v27  ;;  %v205_v34 = vadd.f32 1e-12, %v189_v30 }
 0x139   :  { %v663_v20 = vpop.eup %662  ;;  %v154_v38 = vpop.xlane.xlu1 %153  ;;  %v234_v40 = vmul.f32 %v661_v32, %v854_v44  ;;  %v277_v28 = vadd.f32 %v953_v43, %v255_v41 }
 0x13a   :  { %v175_v39 = vpop.xlane.xlu0 %174  ;;  %672 = vrsqrt.f32 %v212_v33  ;;  %v190_v36 = vmul.f32 0.03125, %v154_v38  ;;  %v241_v46 = vmul.f32 %v663_v20, %v848_v37 }
 0x13b   :  { %v197_v42 = vmul.f32 0.03125, %v175_v39  ;;  %674 = vrsqrt.f32 %v205_v34  ;;  %v256_v24 = vmul.f32 %v946_v31, %v234_v40 }
 0x13c   :  { %v665_v48 = vpop.eup %664  ;;  %v206_v49 = vadd.f32 1e-12, %v190_v36  ;;  %v263_v56 = vmul.f32 %v946_v31, %v241_v46 }
 0x13d   :  { %v213_v50 = vadd.f32 1e-12, %v197_v42  ;;  %v667_v51 = vpop.eup %666  ;;  %v178_v44 = vpop.xlane.xlu1 %177  ;;  %v278_v29 = vadd.f32 %v953_v43, %v256_v24  ;;  %v242_v53 = vmul.f32 %v665_v48, %v856_v45 }
 0x13e   :  { %v157_v52 = vpop.xlane.xlu0 %156  ;;  %v235_v57 = vmul.f32 %v667_v51, %v864_v54  ;;  %676 = vrsqrt.f32 %v206_v49  ;;  %v198_v37 = vmul.f32 0.03125, %v178_v44  ;;  %v285_v5 = vadd.f32 %v953_v43, %v263_v56 }
 0x13f   :  { %v191_v58 = vmul.f32 0.03125, %v157_v52  ;;  %678 = vrsqrt.f32 %v213_v50  ;;  %v293_v59 = vpack.c.bf16 %v278_v29, %v277_v28  ;;  %v264_v60 = vmul.f32 %v946_v31, %v242_v53 }
 0x140   :  { %v669_v61 = vpop.eup %668  ;;  %v214_v62 = vadd.f32 1e-12, %v198_v37  ;;  %v257_v6 = vmul.f32 %v946_v31, %v235_v57 }
 0x141   :  { %v207_v63 = vadd.f32 1e-12, %v191_v58  ;;  %v671_v2 = vpop.eup %670  ;;  %v236_v3 = vmul.f32 %v669_v61, %v866_v55  ;;  %v160_v4 = vpop.xlane.xlu1 %159  ;;  %636 = vmatprep.mubr.msk.bf16.mxu0 %vm39_vm0, %v293_v59  ;;  %v286_v54 = vadd.f32 %v953_v43, %v264_v60 }
 0x142   :  { %v181_v45 = vpop.xlane.xlu0 %180  ;;  %v243_v7 = vmul.f32 %v671_v2, %v875_v0  ;;  %680 = vrsqrt.f32 %v214_v62  ;;  %v192_v8 = vmul.f32 0.03125, %v160_v4  ;;  %v279_v16 = vadd.f32 %v953_v43, %v257_v6 }
 0x143   :  { %v199_v9 = vmul.f32 0.03125, %v181_v45  ;;  %682 = vrsqrt.f32 %v207_v63  ;;  %v297_v12 = vpack.c.bf16 %v286_v54, %v285_v5  ;;  %v258_v13 = vmul.f32 %v946_v31, %v236_v3 }
 0x144   :  { %v673_v55 = vpop.eup %672  ;;  %v208_v14 = vadd.f32 1e-12, %v192_v8  ;;  %v265_v26 = vmul.f32 %v946_v31, %v243_v7 }
 0x145   :  { %v215_v15 = vadd.f32 1e-12, %v199_v9  ;;  %v675_v18 = vpop.eup %674  ;;  %v244_v19 = vmul.f32 %v673_v55, %v878_v1  ;;  %v184_v22 = vpop.xlane.xlu1 %183  ;;  %644 = vmatprep.mubr.msk.bf16.mxu1 %vm39_vm0, %v297_v12  ;;  %v280_v0 = vadd.f32 %v953_v43, %v258_v13 }
 0x146   :  { %v237_v27 = vmul.f32 %v675_v18, %v887_v10  ;;  %684 = vrsqrt.f32 %v208_v14  ;;  %v200_v30 = vmul.f32 0.03125, %v184_v22  ;;  %v287_v39 = vadd.f32 %v953_v43, %v265_v26 }
 0x147   :  { %686 = vrsqrt.f32 %v215_v15  ;;  %v294_v32 = vpack.c.bf16 %v280_v0, %v279_v16  ;;  %v266_v33 = vmul.f32 %v946_v31, %v244_v19 }
 0x148   :  { %v677_v34 = vpop.eup %676  ;;  %v216_v20 = vadd.f32 1e-12, %v200_v30  ;;  %v259_v41 = vmul.f32 %v946_v31, %v237_v27 }
 0x149   :  { %v679_v1 = vpop.eup %678  ;;  %v238_v38 = vmul.f32 %v677_v34, %v890_v11  ;;  %637 = vmatmul.mubr.msk.bf16.vlgmr.msra.gmra.mrb[0].mxu0 %vm39_vm0, %v294_v32  ;;  %v288_v40 = vadd.f32 %v953_v43, %v266_v33 }
 0x14a   :  { %v245_v10 = vmul.f32 %v679_v1, %v899_v23  ;;  %688 = vrsqrt.f32 %v216_v20  ;;  %v281_v11 = vadd.f32 %v953_v43, %v259_v41 }
 0x14b   :  { %v298_v36 = vpack.c.bf16 %v288_v40, %v287_v39  ;;  %v260_v42 = vmul.f32 %v946_v31, %v238_v38 }
 0x14c   :  { %v681_v46 = vpop.eup %680  ;;  %v267_v50 = vmul.f32 %v946_v31, %v245_v10 }
 0x14d   :  { %v683_v24 = vpop.eup %682  ;;  %v246_v48 = vmul.f32 %v681_v46, %v902_v17  ;;  %645 = vmatmul.mubr.msk.bf16.vlgmr.msra.gmra.mrb[0].mxu1 %vm39_vm0, %v298_v36  ;;  %v282_v49 = vadd.f32 %v953_v43, %v260_v42 }
 0x14e   :  { %v239_v51 = vmul.f32 %v683_v24, %v911_v35  ;;  %v289_v17 = vadd.f32 %v953_v43, %v267_v50 }
 0x14f   :  { %v295_v44 = vpack.c.bf16 %v282_v49, %v281_v11  ;;  %v268_v23 = vmul.f32 %v946_v31, %v246_v48 }
 0x150   :  { %v685_v52 = vpop.eup %684  ;;  %v261_v56 = vmul.f32 %v946_v31, %v239_v51 }
 0x151   :  { %v687_v28 = vpop.eup %686  ;;  %v240_v29 = vmul.f32 %v685_v52, %v914_v21  ;;  %640 = vmatprep.mubr.msk.bf16.mxu0 %vm39_vm0, %v295_v44  ;;  %v290_v53 = vadd.f32 %v953_v43, %v268_v23 }
 0x152   :  { %v247_v57 = vmul.f32 %v687_v28, %v923_v47  ;;  %v283_v21 = vadd.f32 %v953_v43, %v261_v56 }
 0x153   :  { %v299_v37 = vpack.c.bf16 %v290_v53, %v289_v17  ;;  %v262_v35 = vmul.f32 %v946_v31, %v240_v29 }
 0x154   :  { %v689_v58 = vpop.eup %688  ;;  %v269_v61 = vmul.f32 %v946_v31, %v247_v57 }
 0x155   :  { %v248_v59 = vmul.f32 %v689_v58, %v926_v25  ;;  %648 = vmatprep.mubr.msk.bf16.mxu1 %vm39_vm0, %v299_v37  ;;  %v284_v60 = vadd.f32 %v953_v43, %v262_v35  ;;  %v1011_v25 = vld [vmem:[%s1167_s4] ss:$0 sm:$0xff] }
 0x156   :  { %v291_v47 = vadd.f32 %v953_v43, %v269_v61 }
 0x157   :  { %v296_v62 = vpack.c.bf16 %v284_v60, %v283_v21  ;;  %v270_v63 = vmul.f32 %v946_v31, %v248_v59 }
 0x159   :  { %641 = vmatmul.mubr.msk.bf16.gmra.mrb[4].mxu0 %vm39_vm0, %v296_v62  ;;  %v292_v2 = vadd.f32 %v953_v43, %v270_v63 }
 0x15b   :  { %v300_v3 = vpack.c.bf16 %v292_v2, %v291_v47 }
 0x15d   :  { %649 = vmatmul.mubr.msk.bf16.gmra.mrb[4].mxu1 %vm39_vm0, %v300_v3 }
 0x21c   :  { %v638_v4 = vpop.f32.mrb[0].mxu0 }
 0x21d   :  { %v391_v45 = vadd.f32 %v638_v4, %v1011_v25  ;;  %v382_v5 = vpop.f32.mrb[1].mxu0 }
 0x21e   :  { %v383_v31 = vadd.f32 %v1011_v25, %v382_v5  ;;  %v639_v54 = vpop.f32.mrb[2].mxu0 }
 0x21f   :  { %v463_v6 = vmul.f32 0.044715, %v391_v45  ;;  %v394_v7 = vadd.f32 %v639_v54, %v1011_v25  ;;  %v385_v8 = vpop.f32.mrb[3].mxu0  ;;  %v447_v37 = vmul.f32 0.5, %v391_v45 }
 0x220   :  { %v461_v43 = vmul.f32 0.044715, %v383_v31  ;;  %v386_v9 = vadd.f32 %v1011_v25, %v385_v8  ;;  %v646_v12 = vpop.f32.mrb[0].mxu1  ;;  %v445_v21 = vmul.f32 0.5, %v383_v31 }
 0x221   :  { %v479_v13 = vmul.f32 %v463_v6, %v391_v45  ;;  %v464_v55 = vmul.f32 0.044715, %v394_v7  ;;  %v423_v14 = vadd.f32 %v646_v12, %v1011_v25  ;;  %v414_v15 = vpop.f32.mrb[1].mxu1  ;;  %v448_v63 = vmul.f32 0.5, %v394_v7 }
 0x222   :  { %v477_v18 = vmul.f32 %v461_v43, %v383_v31  ;;  %v462_v19 = vmul.f32 0.044715, %v386_v9  ;;  %v415_v22 = vadd.f32 %v1011_v25, %v414_v15  ;;  %v647_v16 = vpop.f32.mrb[2].mxu1 }
 0x223   :  { %v495_v0 = vmul.f32 %v479_v13, %v391_v45  ;;  %v480_v26 = vmul.f32 %v464_v55, %v394_v7  ;;  %v471_v27 = vmul.f32 0.044715, %v423_v14  ;;  %v417_v30 = vpop.f32.mrb[3].mxu1  ;;  %v1020_v39 = vadd.f32 %v647_v16, %v1011_v25 }
 0x224   :  { %v493_v32 = vmul.f32 %v477_v18, %v383_v31  ;;  %v478_v33 = vmul.f32 %v462_v19, %v386_v9  ;;  %v469_v34 = vmul.f32 0.044715, %v415_v22  ;;  %v1023_v24 = vadd.f32 %v1011_v25, %v417_v30 }
 0x225   :  { %v511_v20 = vadd.f32 %v495_v0, %v391_v45  ;;  %v496_v1 = vmul.f32 %v480_v26, %v394_v7  ;;  %v487_v38 = vmul.f32 %v471_v27, %v423_v14  ;;  %v472_v50 = vmul.f32 0.044715, %v1020_v39 }
 0x226   :  { %v509_v40 = vadd.f32 %v493_v32, %v383_v31  ;;  %v494_v41 = vmul.f32 %v478_v33, %v386_v9  ;;  %v485_v10 = vmul.f32 %v469_v34, %v415_v22  ;;  %v470_v17 = vmul.f32 0.044715, %v1023_v24 }
 0x227   :  { %v527_v36 = vmul.f32 0.7978846, %v511_v20  ;;  %v512_v42 = vadd.f32 %v496_v1, %v394_v7  ;;  %v503_v46 = vmul.f32 %v487_v38, %v423_v14  ;;  %v488_v28 = vmul.f32 %v472_v50, %v1020_v39 }
 0x228   :  { %v525_v48 = vmul.f32 0.7978846, %v509_v40  ;;  %v510_v11 = vadd.f32 %v494_v41, %v386_v9  ;;  %v501_v49 = vmul.f32 %v485_v10, %v415_v22  ;;  %v486_v35 = vmul.f32 %v470_v17, %v1023_v24 }
 0x229   :  { %690 = vtanh.f32 %v527_v36  ;;  %v528_v51 = vmul.f32 0.7978846, %v512_v42  ;;  %v519_v44 = vadd.f32 %v503_v46, %v423_v14  ;;  %v504_v56 = vmul.f32 %v488_v28, %v1020_v39 }
 0x22a   :  { %692 = vtanh.f32 %v525_v48  ;;  %v526_v23 = vmul.f32 0.7978846, %v510_v11  ;;  %v517_v52 = vadd.f32 %v501_v49, %v415_v22  ;;  %v502_v47 = vmul.f32 %v486_v35, %v1023_v24 }
 0x22b   :  { %694 = vtanh.f32 %v528_v51  ;;  %v535_v29 = vmul.f32 0.7978846, %v519_v44  ;;  %v520_v60 = vadd.f32 %v504_v56, %v1020_v39  ;;  %v446_v45 = vmul.f32 0.5, %v386_v9 }
 0x22c   :  { %696 = vtanh.f32 %v526_v23  ;;  %v533_v53 = vmul.f32 0.7978846, %v517_v52  ;;  %v642_v57 = vpop.f32.mrb[4].mxu0  ;;  %v455_v8 = vmul.f32 0.5, %v423_v14  ;;  %v518_v43 = vadd.f32 %v502_v47, %v1023_v24 }
 0x22d   :  { %698 = vtanh.f32 %v535_v29  ;;  %v1031_v58 = vadd.f32 %v642_v57, %v1011_v25  ;;  %v398_v59 = vpop.f32.mrb[5].mxu0  ;;  %v536_v5 = vmul.f32 0.7978846, %v520_v60  ;;  %v453_v55 = vmul.f32 0.5, %v415_v22 }
 0x22e   :  { %700 = vtanh.f32 %v533_v53  ;;  %v1035_v61 = vadd.f32 %v1011_v25, %v398_v59  ;;  %v643_v62 = vpop.f32.mrb[6].mxu0  ;;  %v534_v16 = vmul.f32 0.7978846, %v518_v43  ;;  %v456_v47 = vmul.f32 0.5, %v1020_v39 }
 0x22f   :  { %v467_v2 = vmul.f32 0.044715, %v1031_v58  ;;  %v1040_v3 = vadd.f32 %v643_v62, %v1011_v25  ;;  %v401_v4 = vpop.f32.mrb[7].mxu0  ;;  %702 = vtanh.f32 %v536_v5  ;;  %v454_v43 = vmul.f32 0.5, %v1023_v24 }
 0x230   :  { %v465_v31 = vmul.f32 0.044715, %v1035_v61  ;;  %v1044_v54 = vadd.f32 %v1011_v25, %v401_v4  ;;  %v650_v6 = vpop.f32.mrb[4].mxu1  ;;  %704 = vtanh.f32 %v534_v16 }
 0x231   :  { %v483_v7 = vmul.f32 %v467_v2, %v1031_v58  ;;  %v468_v12 = vmul.f32 0.044715, %v1040_v3  ;;  %v430_v13 = vpop.f32.mrb[5].mxu1  ;;  %v1054_v26 = vadd.f32 %v650_v6, %v1011_v25 }
 0x232   :  { %v481_v15 = vmul.f32 %v465_v31, %v1035_v61  ;;  %v466_v9 = vmul.f32 0.044715, %v1044_v54  ;;  %v651_v18 = vpop.f32.mrb[6].mxu1  ;;  %v1059_v34 = vadd.f32 %v1011_v25, %v430_v13 }
 0x233   :  { %v691_v19 = vpop.eup %690  ;;  %v499_v0 = vmul.f32 %v483_v7, %v1031_v58  ;;  %v484_v14 = vmul.f32 %v468_v12, %v1040_v3  ;;  %v433_v27 = vpop.f32.mrb[7].mxu1  ;;  %v475_v59 = vmul.f32 0.044715, %v1054_v26  ;;  %v1090_v62 = vadd.f32 %v651_v18, %v1011_v25 }
 0x234   :  { %v693_v30 = vpop.eup %692  ;;  %v559_v32 = vadd.f32 1.0, %v691_v19  ;;  %v497_v22 = vmul.f32 %v481_v15, %v1035_v61  ;;  %v482_v33 = vmul.f32 %v466_v9, %v1044_v54  ;;  %v473_v60 = vmul.f32 0.044715, %v1059_v34 }
 0x235   :  { %v695_v20 = vpop.eup %694  ;;  %v557_v1 = vadd.f32 1.0, %v693_v30  ;;  %v515_v38 = vadd.f32 %v499_v0, %v1031_v58  ;;  %v500_v40 = vmul.f32 %v484_v14, %v1040_v3  ;;  %v491_v4 = vmul.f32 %v475_v59, %v1054_v26 }
 0x236   :  { %v697_v41 = vpop.eup %696  ;;  %v575_v10 = vmul.f32 %v559_v32, %v447_v37  ;;  %v560_v36 = vadd.f32 1.0, %v695_v20  ;;  %v513_v42 = vadd.f32 %v497_v22, %v1035_v61  ;;  %v498_v46 = vmul.f32 %v482_v33, %v1044_v54 }
 0x237   :  { %v699_v48 = vpop.eup %698  ;;  %v573_v11 = vmul.f32 %v557_v1, %v445_v21  ;;  %v558_v49 = vadd.f32 1.0, %v697_v41  ;;  %v531_v50 = vmul.f32 0.7978846, %v515_v38  ;;  %v516_v51 = vadd.f32 %v500_v40, %v1040_v3 }
 0x238   :  { %v701_v44 = vpop.eup %700  ;;  %591 = vst.msk [vmem:[%s1168_s5 + $0x10] sm:$0xff] %vm39_vm0, %v575_v10  ;;  %v576_v23 = vmul.f32 %v560_v36, %v448_v63  ;;  %v567_v52 = vadd.f32 1.0, %v699_v48  ;;  %v529_v28 = vmul.f32 0.7978846, %v513_v42  ;;  %v514_v29 = vadd.f32 %v498_v46, %v1044_v54 }
 0x239   :  { %589 = vst.msk [vmem:[%s1168_s5] sm:$0xff] %vm39_vm0, %v573_v11  ;;  %v574_v17 = vmul.f32 %v558_v49, %v446_v45  ;;  %v565_v53 = vadd.f32 1.0, %v701_v44  ;;  %706 = vtanh.f32 %v531_v50  ;;  %v532_v56 = vmul.f32 0.7978846, %v516_v51  ;;  %v703_v21 = vpop.eup %702 }
 0x23a   :  { %592 = vst.msk [vmem:[%s1168_s5 + $0x18] sm:$0xff] %vm39_vm0, %v576_v23  ;;  %v583_v57 = vmul.f32 %v567_v52, %v455_v8  ;;  %708 = vtanh.f32 %v529_v28  ;;  %v530_v37 = vmul.f32 0.7978846, %v514_v29  ;;  %v1093_v63 = vadd.f32 %v1011_v25, %v433_v27  ;;  %v705_v31 = vpop.eup %704 }
 0x23b   :  { %590 = vst.msk [vmem:[%s1168_s5 + $0x8] sm:$0xff] %vm39_vm0, %v574_v17  ;;  %v581_v35 = vmul.f32 %v565_v53, %v453_v55  ;;  %710 = vtanh.f32 %v532_v56  ;;  %v568_v2 = vadd.f32 1.0, %v703_v21  ;;  %v489_v45 = vmul.f32 %v473_v60, %v1059_v34 }
 0x23c   :  { %599 = vst.msk [vmem:[%s1168_s5 + $0x50] sm:$0xff] %vm39_vm0, %v583_v57  ;;  %712 = vtanh.f32 %v530_v37  ;;  %v476_v5 = vmul.f32 0.044715, %v1090_v62  ;;  %v507_v8 = vmul.f32 %v491_v4, %v1054_v26  ;;  %v474_v25 = vmul.f32 0.044715, %v1093_v63 }
 0x23d   :  { %597 = vst.msk [vmem:[%s1168_s5 + $0x40] sm:$0xff] %vm39_vm0, %v581_v35  ;;  %v584_v6 = vmul.f32 %v568_v2, %v456_v47  ;;  %v566_v7 = vadd.f32 1.0, %v705_v31  ;;  %v505_v12 = vmul.f32 %v489_v45, %v1059_v34  ;;  %v451_v19 = vmul.f32 0.5, %v1031_v58 }
 0x23e   :  { %v492_v39 = vmul.f32 %v476_v5, %v1090_v62  ;;  %v523_v13 = vadd.f32 %v507_v8, %v1054_v26  ;;  %v490_v55 = vmul.f32 %v474_v25, %v1093_v63  ;;  %v449_v30 = vmul.f32 0.5, %v1035_v61 }
 0x23f   :  { %600 = vst.msk [vmem:[%s1168_s5 + $0x58] sm:$0xff] %vm39_vm0, %v584_v6  ;;  %v582_v15 = vmul.f32 %v566_v7, %v454_v43  ;;  %v521_v9 = vadd.f32 %v505_v12, %v1059_v34  ;;  %v452_v1 = vmul.f32 0.5, %v1040_v3  ;;  %v450_v42 = vmul.f32 0.5, %v1044_v54 }
 0x240   :  { %v508_v18 = vmul.f32 %v492_v39, %v1090_v62  ;;  %v539_v16 = vmul.f32 0.7978846, %v523_v13  ;;  %v506_v0 = vmul.f32 %v490_v55, %v1093_v63  ;;  %v459_v49 = vmul.f32 0.5, %v1054_v26 }
 0x241   :  { %598 = vst.msk [vmem:[%s1168_s5 + $0x48] sm:$0xff] %vm39_vm0, %v582_v15  ;;  %v537_v32 = vmul.f32 0.7978846, %v521_v9  ;;  %v457_v51 = vmul.f32 0.5, %v1059_v34  ;;  %v460_v17 = vmul.f32 0.5, %v1090_v62  ;;  %v458_v56 = vmul.f32 0.5, %v1093_v63 }
 0x242   :  { %v524_v22 = vadd.f32 %v508_v18, %v1090_v62  ;;  %714 = vtanh.f32 %v539_v16  ;;  %v522_v58 = vadd.f32 %v506_v0, %v1093_v63 }
 0x243   :  { %v707_v24 = vpop.eup %706  ;;  %716 = vtanh.f32 %v537_v32 }
 0x244   :  { %v709_v14 = vpop.eup %708  ;;  %v563_v27 = vadd.f32 1.0, %v707_v24  ;;  %v540_v10 = vmul.f32 0.7978846, %v524_v22  ;;  %v538_v61 = vmul.f32 0.7978846, %v522_v58 }
 0x245   :  { %v711_v33 = vpop.eup %710  ;;  %v561_v20 = vadd.f32 1.0, %v709_v14 }
 0x246   :  { %v713_v38 = vpop.eup %712  ;;  %v579_v40 = vmul.f32 %v563_v27, %v451_v19  ;;  %v564_v41 = vadd.f32 1.0, %v711_v33  ;;  %718 = vtanh.f32 %v540_v10 }
 0x247   :  { %v577_v36 = vmul.f32 %v561_v20, %v449_v30  ;;  %v562_v46 = vadd.f32 1.0, %v713_v38  ;;  %720 = vtanh.f32 %v538_v61 }
 0x248   :  { %595 = vst.msk [vmem:[%s1168_s5 + $0x30] sm:$0xff] %vm39_vm0, %v579_v40  ;;  %v580_v48 = vmul.f32 %v564_v41, %v452_v1 }
 0x249   :  { %593 = vst.msk [vmem:[%s1168_s5 + $0x20] sm:$0xff] %vm39_vm0, %v577_v36  ;;  %v578_v3 = vmul.f32 %v562_v46, %v450_v42 }
 0x24a   :  { %596 = vst.msk [vmem:[%s1168_s5 + $0x38] sm:$0xff] %vm39_vm0, %v580_v48 }
 0x24b   :  { %594 = vst.msk [vmem:[%s1168_s5 + $0x28] sm:$0xff] %vm39_vm0, %v578_v3 }
 0x24c   :  { %v715_v54 = vpop.eup %714 }
 0x24d   :  { %v717_v11 = vpop.eup %716  ;;  %v571_v50 = vadd.f32 1.0, %v715_v54 }
 0x24e   :  { %v569_v44 = vadd.f32 1.0, %v717_v11 }
 0x24f   :  { %v587_v52 = vmul.f32 %v571_v50, %v459_v49 }
 0x250   :  { %v719_v23 = vpop.eup %718  ;;  %v585_v29 = vmul.f32 %v569_v44, %v457_v51 }
 0x251   :  { %v721_v28 = vpop.eup %720  ;;  %v572_v53 = vadd.f32 1.0, %v719_v23  ;;  %603 = vst.msk [vmem:[%s1168_s5 + $0x70] sm:$0xff] %vm39_vm0, %v587_v52 }
 0x252   :  { %v570_v57 = vadd.f32 1.0, %v721_v28  ;;  %601 = vst.msk [vmem:[%s1168_s5 + $0x60] sm:$0xff] %vm39_vm0, %v585_v29 }
 0x253   :  { %v588_v26 = vmul.f32 %v572_v53, %v460_v17 }
 0x254   :  { %v586_v34 = vmul.f32 %v570_v57, %v458_v56 }
 0x255   :  { %604 = vst.msk [vmem:[%s1168_s5 + $0x78] sm:$0xff] %vm39_vm0, %v588_v26 }
 0x256   :  { %602 = vst.msk [vmem:[%s1168_s5 + $0x68] sm:$0xff] %vm39_vm0, %v586_v34 }

// kernel: model_forward.35
= control target key start
LH: loop header
LB: loop body
LE: loop exit
PB: predicated region body
PF: predicated region fallthrough
CT: control target
= control target key end

     0   :  { %vm47_vm0 = vcmask 261120   ;;  %vm749_vm1 = vcmask 7168   ;;  %s1411_s0 = inlined_call_operand.vmem [shape: f32[128,32], index: 0, kind: input, shape index: {}]   ;;  %s1412_s3 = inlined_call_operand.vmem [shape: bf16[32,32], index: 3, kind: input, shape index: {}]   ;;  %s1413_s1 = inlined_call_operand.vmem [shape: f32[1,32], index: 1, kind: input, shape index: {}]   ;;  %s1414_s2 = inlined_call_operand.vmem [shape: f32[1,32], index: 2, kind: input, shape index: {}]   ;;  %s1415_s5 = inlined_call_operand.vmem [shape: bf16[32,1], index: 5, kind: input, shape index: {}]   ;;  %s1416_s6 = inlined_call_operand.<no memory space> [shape: f32[1,1], index: 6, kind: input, shape index: {}]   ;;  %s1417_s4 = inlined_call_operand.vmem [shape: f32[1,32], index: 4, kind: input, shape index: {}]   ;;  %s1418_s7 = inlined_call_operand.vmem [shape: f32[128,1], index: 7, kind: output, shape index: {}]  }
   0x1   :  { %v29_v0 = vld [vmem:[%s1411_s0] sm:$0xff]  ;;  %v31_v1 = vld [vmem:[%s1411_s0 + $0x10] sm:$0xff]  ;;  %v30_v2 = vld [vmem:[%s1411_s0 + $0x8] sm:$0xff] }
   0x2   :  { %v48_v3 = vsel %vm47_vm0, %v29_v0, 0.0  ;;  %v54_v4 = vsel %vm47_vm0, %v31_v1, 0.0  ;;  %v32_v5 = vld [vmem:[%s1411_s0 + $0x18] sm:$0xff]  ;;  %v51_v6 = vsel %vm47_vm0, %v30_v2, 0.0  ;;  %v33_v8 = vld [vmem:[%s1411_s0 + $0x20] sm:$0xff]  ;;  %v34_v9 = vld [vmem:[%s1411_s0 + $0x28] sm:$0xff] }
   0x3   :  { %49 = vadd.xlane.f32.xlu0 %v48_v3  ;;  %55 = vadd.xlane.f32.xlu1 %v54_v4  ;;  %v57_v7 = vsel %vm47_vm0, %v32_v5, 0.0  ;;  %v60_v10 = vsel %vm47_vm0, %v33_v8, 0.0  ;;  %v63_v11 = vsel %vm47_vm0, %v34_v9, 0.0  ;;  %v989_v12 = vld [vmem:[%s1411_s0 + $0x30] sm:$0xff]  ;;  %v994_v13 = vld [vmem:[%s1411_s0 + $0x38] sm:$0xff]  ;;  %v1003_v16 = vld [vmem:[%s1411_s0 + $0x40] sm:$0xff] }
   0x4   :  { %v66_v14 = vsel %vm47_vm0, %v989_v12, 0.0  ;;  %v69_v15 = vsel %vm47_vm0, %v994_v13, 0.0  ;;  %v1008_v17 = vld [vmem:[%s1411_s0 + $0x48] sm:$0xff]  ;;  %v72_v18 = vsel %vm47_vm0, %v1003_v16, 0.0  ;;  %v1017_v20 = vld [vmem:[%s1411_s0 + $0x50] sm:$0xff]  ;;  %v1022_v21 = vld [vmem:[%s1411_s0 + $0x58] sm:$0xff] }
   0x5   :  { %v75_v19 = vsel %vm47_vm0, %v1008_v17, 0.0  ;;  %v78_v22 = vsel %vm47_vm0, %v1017_v20, 0.0  ;;  %v81_v23 = vsel %vm47_vm0, %v1022_v21, 0.0  ;;  %v1031_v24 = vld [vmem:[%s1411_s0 + $0x60] sm:$0xff]  ;;  %v1036_v25 = vld [vmem:[%s1411_s0 + $0x68] sm:$0xff]  ;;  %v1045_v28 = vld [vmem:[%s1411_s0 + $0x70] sm:$0xff] }
   0x6   :  { %v84_v26 = vsel %vm47_vm0, %v1031_v24, 0.0  ;;  %v87_v27 = vsel %vm47_vm0, %v1036_v25, 0.0  ;;  %v1050_v29 = vld [vmem:[%s1411_s0 + $0x78] sm:$0xff]  ;;  %v90_v30 = vsel %vm47_vm0, %v1045_v28, 0.0 }
   0x7   :  { %52 = vadd.xlane.f32.xlu0 %v51_v6  ;;  %58 = vadd.xlane.f32.xlu1 %v57_v7  ;;  %v93_v31 = vsel %vm47_vm0, %v1050_v29, 0.0 }
   0xb   :  { %61 = vadd.xlane.f32.xlu0 %v60_v10  ;;  %64 = vadd.xlane.f32.xlu1 %v63_v11 }
   0xf   :  { %67 = vadd.xlane.f32.xlu0 %v66_v14  ;;  %70 = vadd.xlane.f32.xlu1 %v69_v15 }
  0x13   :  { %73 = vadd.xlane.f32.xlu0 %v72_v18  ;;  %76 = vadd.xlane.f32.xlu1 %v75_v19 }
  0x17   :  { %79 = vadd.xlane.f32.xlu0 %v78_v22  ;;  %82 = vadd.xlane.f32.xlu1 %v81_v23 }
  0x1b   :  { %85 = vadd.xlane.f32.xlu0 %v84_v26  ;;  %88 = vadd.xlane.f32.xlu1 %v87_v27 }
  0x1f   :  { %91 = vadd.xlane.f32.xlu0 %v90_v30  ;;  %94 = vadd.xlane.f32.xlu1 %v93_v31 }
  0x90   :  { %v50_v32 = vpop.xlane.xlu0 %49  ;;  %v56_v33 = vpop.xlane.xlu1 %55 }
  0x91   :  { %v97_v34 = vmul.f32 0.03125, %v50_v32  ;;  %v99_v35 = vmul.f32 0.03125, %v56_v33 }
  0x93   :  { %v1056_v36 = vsub.f32 %v29_v0, %v97_v34  ;;  %v1058_v37 = vsub.f32 %v31_v1, %v99_v35 }
  0x94   :  { %v53_v38 = vpop.xlane.xlu0 %52  ;;  %v59_v39 = vpop.xlane.xlu1 %58 }
  0x95   :  { %v98_v40 = vmul.f32 0.03125, %v53_v38  ;;  %v100_v41 = vmul.f32 0.03125, %v59_v39  ;;  %v129_v42 = vmul.f32 %v1056_v36, %v1056_v36  ;;  %v131_v43 = vmul.f32 %v1058_v37, %v1058_v37 }
  0x97   :  { %v1064_v44 = vsub.f32 %v30_v2, %v98_v40  ;;  %v1066_v45 = vsub.f32 %v32_v5, %v100_v41  ;;  %v145_v46 = vsel %vm47_vm0, %v129_v42, 0.0  ;;  %v151_v49 = vsel %vm47_vm0, %v131_v43, 0.0 }
  0x98   :  { %146 = vadd.xlane.f32.xlu0 %v145_v46  ;;  %v62_v47 = vpop.xlane.xlu0 %61  ;;  %v65_v48 = vpop.xlane.xlu1 %64 }
  0x99   :  { %v101_v50 = vmul.f32 0.03125, %v62_v47  ;;  %v102_v51 = vmul.f32 0.03125, %v65_v48  ;;  %v130_v52 = vmul.f32 %v1064_v44, %v1064_v44  ;;  %v132_v53 = vmul.f32 %v1066_v45, %v1066_v45 }
  0x9b   :  { %v1074_v54 = vsub.f32 %v33_v8, %v101_v50  ;;  %v1076_v55 = vsub.f32 %v34_v9, %v102_v51  ;;  %v148_v56 = vsel %vm47_vm0, %v130_v52, 0.0  ;;  %v154_v59 = vsel %vm47_vm0, %v132_v53, 0.0  ;;  %v855_v53 = vld [vmem:[%s1412_s3 + $0x8] sm:$0xff]  }
  0x9c   :  { %152 = vadd.xlane.f32.xlu0 %v151_v49  ;;  %149 = vadd.xlane.f32.xlu1 %v148_v56  ;;  %v68_v57 = vpop.xlane.xlu0 %67  ;;  %v71_v58 = vpop.xlane.xlu1 %70 }
  0x9d   :  { %v103_v60 = vmul.f32 0.03125, %v68_v57  ;;  %v104_v61 = vmul.f32 0.03125, %v71_v58  ;;  %v133_v62 = vmul.f32 %v1074_v54, %v1074_v54  ;;  %v134_v63 = vmul.f32 %v1076_v55, %v1076_v55 }
  0x9f   :  { %v1085_v0 = vsub.f32 %v989_v12, %v103_v60  ;;  %v1088_v1 = vsub.f32 %v994_v13, %v104_v61  ;;  %v157_v2 = vsel %vm47_vm0, %v133_v62, 0.0  ;;  %v160_v5 = vsel %vm47_vm0, %v134_v63, 0.0 }
  0xa0   :  { %155 = vadd.xlane.f32.xlu1 %v154_v59  ;;  %158 = vadd.xlane.f32.xlu0 %v157_v2  ;;  %v74_v3 = vpop.xlane.xlu0 %73  ;;  %v77_v4 = vpop.xlane.xlu1 %76 }
  0xa1   :  { %v105_v6 = vmul.f32 0.03125, %v74_v3  ;;  %v106_v7 = vmul.f32 0.03125, %v77_v4  ;;  %v135_v8 = vmul.f32 %v1085_v0, %v1085_v0  ;;  %v136_v9 = vmul.f32 %v1088_v1, %v1088_v1 }
  0xa3   :  { %v1097_v10 = vsub.f32 %v1003_v16, %v105_v6  ;;  %v1100_v11 = vsub.f32 %v1008_v17, %v106_v7  ;;  %v163_v12 = vsel %vm47_vm0, %v135_v8, 0.0  ;;  %v166_v15 = vsel %vm47_vm0, %v136_v9, 0.0 }
  0xa4   :  { %161 = vadd.xlane.f32.xlu1 %v160_v5  ;;  %164 = vadd.xlane.f32.xlu0 %v163_v12  ;;  %v80_v13 = vpop.xlane.xlu0 %79  ;;  %v83_v14 = vpop.xlane.xlu1 %82 }
  0xa5   :  { %v107_v18 = vmul.f32 0.03125, %v80_v13  ;;  %v108_v19 = vmul.f32 0.03125, %v83_v14  ;;  %v137_v22 = vmul.f32 %v1097_v10, %v1097_v10  ;;  %v138_v16 = vmul.f32 %v1100_v11, %v1100_v11 }
  0xa7   :  { %v1109_v23 = vsub.f32 %v1017_v20, %v107_v18  ;;  %v1112_v17 = vsub.f32 %v1022_v21, %v108_v19  ;;  %v169_v26 = vsel %vm47_vm0, %v137_v22, 0.0  ;;  %v172_v31 = vsel %vm47_vm0, %v138_v16, 0.0 }
  0xa8   :  { %167 = vadd.xlane.f32.xlu1 %v166_v15  ;;  %170 = vadd.xlane.f32.xlu0 %v169_v26  ;;  %v86_v27 = vpop.xlane.xlu0 %85  ;;  %v89_v30 = vpop.xlane.xlu1 %88 }
  0xa9   :  { %v109_v32 = vmul.f32 0.03125, %v86_v27  ;;  %v110_v33 = vmul.f32 0.03125, %v89_v30  ;;  %v139_v34 = vmul.f32 %v1109_v23, %v1109_v23  ;;  %v140_v20 = vmul.f32 %v1112_v17, %v1112_v17 }
  0xab   :  { %v1121_v35 = vsub.f32 %v1031_v24, %v109_v32  ;;  %v1124_v21 = vsub.f32 %v1036_v25, %v110_v33  ;;  %v175_v38 = vsel %vm47_vm0, %v139_v34, 0.0  ;;  %v178_v41 = vsel %vm47_vm0, %v140_v20, 0.0 }
  0xac   :  { %173 = vadd.xlane.f32.xlu1 %v172_v31  ;;  %176 = vadd.xlane.f32.xlu0 %v175_v38  ;;  %v92_v39 = vpop.xlane.xlu0 %91  ;;  %v95_v40 = vpop.xlane.xlu1 %94  ;;  %v1156_v31 = vld [vmem:[%s1413_s1] ss:$0 sm:$0xff] }
  0xad   :  { %v111_v42 = vmul.f32 0.03125, %v92_v39  ;;  %v112_v43 = vmul.f32 0.03125, %v95_v40  ;;  %v141_v46 = vmul.f32 %v1121_v35, %v1121_v35  ;;  %v142_v24 = vmul.f32 %v1124_v21, %v1124_v21 }
  0xaf   :  { %v1133_v47 = vsub.f32 %v1045_v28, %v111_v42  ;;  %v1136_v25 = vsub.f32 %v1050_v29, %v112_v43  ;;  %v181_v48 = vsel %vm47_vm0, %v141_v46, 0.0  ;;  %v184_v49 = vsel %vm47_vm0, %v142_v24, 0.0  ;;  %v854_v29 = vld [vmem:[%s1412_s3] sm:$0xff]  }
  0xb0   :  { %179 = vadd.xlane.f32.xlu1 %v178_v41  ;;  %182 = vadd.xlane.f32.xlu0 %v181_v48  ;;  %v1164_v46 = vld [vmem:[%s1414_s2] ss:$0 sm:$0xff] }
  0xb1   :  { %v143_v50 = vmul.f32 %v1133_v47, %v1133_v47  ;;  %v144_v51 = vmul.f32 %v1136_v25, %v1136_v25  ;;  %814 = vmatprep.subr.bf16.mxu0 %v854_v29 }
  0xb2   :  { %815 = vmatpush3.bf16.msra.mxu0 %v854_v29 }
  0xb3   :  { %v187_v52 = vsel %vm47_vm0, %v143_v50, 0.0  ;;  %v190_v28 = vsel %vm47_vm0, %v144_v51, 0.0  ;;  %816 = vmatprep.subr.bf16.mxu0 %v855_v53 }
  0xb4   :  { %185 = vadd.xlane.f32.xlu1 %v184_v49  ;;  %188 = vadd.xlane.f32.xlu0 %v187_v52 }
  0xb6   :  { %817 = vmatpush3.bf16.msra.mxu0 %v855_v53 }
  0xb8   :  { %191 = vadd.xlane.f32.xlu1 %v190_v28 }
 0x125   :  { %v147_v56 = vpop.xlane.xlu0 %146 }
 0x126   :  { %v193_v57 = vmul.f32 0.03125, %v147_v56 }
 0x128   :  { %v209_v58 = vadd.f32 1e-12, %v193_v57 }
 0x129   :  { %v150_v59 = vpop.xlane.xlu1 %149  ;;  %v153_v60 = vpop.xlane.xlu0 %152 }
 0x12a   :  { %858 = vrsqrt.f32 %v209_v58  ;;  %v194_v61 = vmul.f32 0.03125, %v150_v59  ;;  %v195_v62 = vmul.f32 0.03125, %v153_v60 }
 0x12c   :  { %v210_v63 = vadd.f32 1e-12, %v194_v61  ;;  %v211_v2 = vadd.f32 1e-12, %v195_v62 }
 0x12d   :  { %v156_v3 = vpop.xlane.xlu1 %155  ;;  %v159_v4 = vpop.xlane.xlu0 %158 }
 0x12e   :  { %860 = vrsqrt.f32 %v210_v63  ;;  %v196_v5 = vmul.f32 0.03125, %v156_v3  ;;  %v197_v6 = vmul.f32 0.03125, %v159_v4 }
 0x12f   :  { %862 = vrsqrt.f32 %v211_v2 }
 0x130   :  { %v212_v7 = vadd.f32 1e-12, %v196_v5  ;;  %v213_v8 = vadd.f32 1e-12, %v197_v6 }
 0x131   :  { %v162_v9 = vpop.xlane.xlu1 %161  ;;  %v165_v12 = vpop.xlane.xlu0 %164 }
 0x132   :  { %864 = vrsqrt.f32 %v212_v7  ;;  %v198_v13 = vmul.f32 0.03125, %v162_v9  ;;  %v199_v14 = vmul.f32 0.03125, %v165_v12 }
 0x133   :  { %866 = vrsqrt.f32 %v213_v8 }
 0x134   :  { %v859_v15 = vpop.eup %858  ;;  %v214_v18 = vadd.f32 1e-12, %v198_v13  ;;  %v215_v19 = vadd.f32 1e-12, %v199_v14 }
 0x135   :  { %v168_v22 = vpop.xlane.xlu1 %167  ;;  %v171_v16 = vpop.xlane.xlu0 %170  ;;  %v241_v26 = vmul.f32 %v859_v15, %v1056_v36 }
 0x136   :  { %868 = vrsqrt.f32 %v214_v18  ;;  %v200_v27 = vmul.f32 0.03125, %v168_v22  ;;  %v201_v30 = vmul.f32 0.03125, %v171_v16 }
 0x137   :  { %870 = vrsqrt.f32 %v215_v19  ;;  %v263_v41 = vmul.f32 %v1156_v31, %v241_v26 }
 0x138   :  { %v861_v32 = vpop.eup %860  ;;  %v216_v33 = vadd.f32 1e-12, %v200_v27  ;;  %v217_v34 = vadd.f32 1e-12, %v201_v30 }
 0x139   :  { %v863_v20 = vpop.eup %862  ;;  %v174_v38 = vpop.xlane.xlu1 %173  ;;  %v242_v40 = vmul.f32 %v861_v32, %v1064_v44 }
 0x13a   :  { %v177_v39 = vpop.xlane.xlu0 %176  ;;  %v243_v36 = vmul.f32 %v863_v20, %v1058_v37  ;;  %872 = vrsqrt.f32 %v216_v33  ;;  %v202_v42 = vmul.f32 0.03125, %v174_v38  ;;  %v285_v37 = vadd.f32 %v1164_v46, %v263_v41 }
 0x13b   :  { %v203_v43 = vmul.f32 0.03125, %v177_v39  ;;  %874 = vrsqrt.f32 %v217_v34  ;;  %v264_v24 = vmul.f32 %v1156_v31, %v242_v40 }
 0x13c   :  { %v865_v48 = vpop.eup %864  ;;  %v218_v49 = vadd.f32 1e-12, %v202_v42  ;;  %v265_v53 = vmul.f32 %v1156_v31, %v243_v36 }
 0x13d   :  { %v219_v50 = vadd.f32 1e-12, %v203_v43  ;;  %v867_v51 = vpop.eup %866  ;;  %v244_v44 = vmul.f32 %v865_v48, %v1066_v45  ;;  %v180_v52 = vpop.xlane.xlu1 %179  ;;  %v286_v29 = vadd.f32 %v1164_v46, %v264_v24 }
 0x13e   :  { %v183_v28 = vpop.xlane.xlu0 %182  ;;  %v245_v56 = vmul.f32 %v867_v51, %v1074_v54  ;;  %876 = vrsqrt.f32 %v218_v49  ;;  %v204_v57 = vmul.f32 0.03125, %v180_v52  ;;  %v287_v5 = vadd.f32 %v1164_v46, %v265_v53 }
 0x13f   :  { %v205_v58 = vmul.f32 0.03125, %v183_v28  ;;  %878 = vrsqrt.f32 %v219_v50  ;;  %v301_v59 = vpack.c.bf16 %v286_v29, %v285_v37  ;;  %v266_v60 = vmul.f32 %v1156_v31, %v244_v44 }
 0x140   :  { %v869_v61 = vpop.eup %868  ;;  %v220_v62 = vadd.f32 1e-12, %v204_v57  ;;  %v267_v6 = vmul.f32 %v1156_v31, %v245_v56 }
 0x141   :  { %v221_v45 = vadd.f32 1e-12, %v205_v58  ;;  %v871_v63 = vpop.eup %870  ;;  %v246_v2 = vmul.f32 %v869_v61, %v1076_v55  ;;  %v186_v3 = vpop.xlane.xlu1 %185  ;;  %818 = vmatprep.mubr.msk.bf16.mxu0 %vm47_vm0, %v301_v59  ;;  %v288_v54 = vadd.f32 %v1164_v46, %v266_v60 }
 0x142   :  { %v189_v4 = vpop.xlane.xlu0 %188  ;;  %v247_v7 = vmul.f32 %v871_v63, %v1085_v0  ;;  %880 = vrsqrt.f32 %v220_v62  ;;  %v206_v8 = vmul.f32 0.03125, %v186_v3  ;;  %v289_v16 = vadd.f32 %v1164_v46, %v267_v6  ;;  %v857_v3 = vld [vmem:[%s1415_s5 + $0x8] sm:$0xff]  }
 0x143   :  { %v207_v9 = vmul.f32 0.03125, %v189_v4  ;;  %882 = vrsqrt.f32 %v221_v45  ;;  %v302_v12 = vpack.c.bf16 %v288_v54, %v287_v5  ;;  %v268_v13 = vmul.f32 %v1156_v31, %v246_v2 }
 0x144   :  { %v873_v55 = vpop.eup %872  ;;  %v222_v14 = vadd.f32 1e-12, %v206_v8  ;;  %v269_v26 = vmul.f32 %v1156_v31, %v247_v7 }
 0x145   :  { %v223_v15 = vadd.f32 1e-12, %v207_v9  ;;  %v875_v18 = vpop.eup %874  ;;  %v248_v19 = vmul.f32 %v873_v55, %v1088_v1  ;;  %v192_v22 = vpop.xlane.xlu1 %191  ;;  %819 = vmatmul.mubr.msk.bf16.vlgmr.msra.gmra.mrb[0].mxu0 %vm47_vm0, %v302_v12  ;;  %v290_v0 = vadd.f32 %v1164_v46, %v268_v13 }
 0x146   :  { %v249_v27 = vmul.f32 %v875_v18, %v1097_v10  ;;  %884 = vrsqrt.f32 %v222_v14  ;;  %v208_v30 = vmul.f32 0.03125, %v192_v22  ;;  %v291_v39 = vadd.f32 %v1164_v46, %v269_v26 }
 0x147   :  { %886 = vrsqrt.f32 %v223_v15  ;;  %v303_v32 = vpack.c.bf16 %v290_v0, %v289_v16  ;;  %v270_v33 = vmul.f32 %v1156_v31, %v248_v19 }
 0x148   :  { %v877_v34 = vpop.eup %876  ;;  %v224_v20 = vadd.f32 1e-12, %v208_v30  ;;  %v271_v41 = vmul.f32 %v1156_v31, %v249_v27 }
 0x149   :  { %v879_v1 = vpop.eup %878  ;;  %v250_v38 = vmul.f32 %v877_v34, %v1100_v11  ;;  %822 = vmatprep.mubr.msk.bf16.mxu0 %vm47_vm0, %v303_v32  ;;  %v292_v40 = vadd.f32 %v1164_v46, %v270_v33 }
 0x14a   :  { %v251_v10 = vmul.f32 %v879_v1, %v1109_v23  ;;  %888 = vrsqrt.f32 %v224_v20  ;;  %v293_v11 = vadd.f32 %v1164_v46, %v271_v41 }
 0x14b   :  { %v304_v36 = vpack.c.bf16 %v292_v40, %v291_v39  ;;  %v272_v42 = vmul.f32 %v1156_v31, %v250_v38 }
 0x14c   :  { %v881_v43 = vpop.eup %880  ;;  %v273_v50 = vmul.f32 %v1156_v31, %v251_v10 }
 0x14d   :  { %v883_v24 = vpop.eup %882  ;;  %v252_v48 = vmul.f32 %v881_v43, %v1112_v17  ;;  %823 = vmatmul.mubr.msk.bf16.gmra.mrb[4].mxu0 %vm47_vm0, %v304_v36  ;;  %v294_v49 = vadd.f32 %v1164_v46, %v272_v42 }
 0x14e   :  { %v253_v51 = vmul.f32 %v883_v24, %v1121_v35  ;;  %v295_v17 = vadd.f32 %v1164_v46, %v273_v50 }
 0x14f   :  { %v305_v44 = vpack.c.bf16 %v294_v49, %v293_v11  ;;  %v274_v23 = vmul.f32 %v1156_v31, %v252_v48 }
 0x150   :  { %v885_v52 = vpop.eup %884  ;;  %v275_v53 = vmul.f32 %v1156_v31, %v253_v51 }
 0x151   :  { %v887_v28 = vpop.eup %886  ;;  %v254_v37 = vmul.f32 %v885_v52, %v1124_v21  ;;  %826 = vmatprep.mubr.msk.bf16.mxu0 %vm47_vm0, %v305_v44  ;;  %v296_v29 = vadd.f32 %v1164_v46, %v274_v23 }
 0x152   :  { %v255_v56 = vmul.f32 %v887_v28, %v1133_v47  ;;  %v297_v21 = vadd.f32 %v1164_v46, %v275_v53 }
 0x153   :  { %v306_v57 = vpack.c.bf16 %v296_v29, %v295_v17  ;;  %v276_v35 = vmul.f32 %v1156_v31, %v254_v37 }
 0x154   :  { %v889_v58 = vpop.eup %888  ;;  %v277_v61 = vmul.f32 %v1156_v31, %v255_v56 }
 0x155   :  { %v256_v59 = vmul.f32 %v889_v58, %v1136_v25  ;;  %827 = vmatmul.mubr.msk.bf16.gmra.mrb[8].mxu0 %vm47_vm0, %v306_v57  ;;  %v298_v60 = vadd.f32 %v1164_v46, %v276_v35  ;;  %v856_v25 = vld [vmem:[%s1415_s5] sm:$0xff]  }
 0x156   :  { %v299_v47 = vadd.f32 %v1164_v46, %v277_v61  ;;  %834 = vmatprep.subr.bf16.mxu1 %v856_v25 }
 0x157   :  { %v307_v62 = vpack.c.bf16 %v298_v60, %v297_v21  ;;  %v278_v45 = vmul.f32 %v1156_v31, %v256_v59  ;;  %835 = vmatpush3.bf16.msra.mxu1 %v856_v25  ;;  %v12_v31 = vstv %s1416_s6 }
 0x158   :  { %836 = vmatprep.subr.bf16.mxu1 %v857_v3  ;;  %13 = vst [vmem:[#allocation2] sm:$0x1] %v12_v31 }
 0x159   :  { %830 = vmatprep.mubr.msk.bf16.mxu0 %vm47_vm0, %v307_v62  ;;  %v300_v63 = vadd.f32 %v1164_v46, %v278_v45  ;;  %v1230_v46 = vld [vmem:[%s1417_s4] ss:$0 sm:$0xff] }
 0x15b   :  { %v308_v2 = vpack.c.bf16 %v300_v63, %v299_v47  ;;  %837 = vmatpush3.bf16.msra.mxu1 %v857_v3 }
 0x15d   :  { %831 = vmatmul.mubr.msk.bf16.gmra.mrb[12].mxu0 %vm47_vm0, %v308_v2 }
 0x218   :  { %v820_v4 = vpop.f32.mrb[0].mxu0 }
 0x219   :  { %v399_v5 = vadd.f32 %v820_v4, %v1230_v46  ;;  %v390_v54 = vpop.f32.mrb[1].mxu0 }
 0x21a   :  { %v391_v6 = vadd.f32 %v1230_v46, %v390_v54  ;;  %v821_v7 = vpop.f32.mrb[2].mxu0 }
 0x21b   :  { %v471_v8 = vmul.f32 0.044715, %v399_v5  ;;  %v402_v9 = vadd.f32 %v821_v7, %v1230_v46  ;;  %v393_v12 = vpop.f32.mrb[3].mxu0  ;;  %v1239_v20 = vmul.f32 0.5, %v399_v5 }
 0x21c   :  { %v469_v13 = vmul.f32 0.044715, %v391_v6  ;;  %v394_v55 = vadd.f32 %v1230_v46, %v393_v12  ;;  %v1242_v39 = vmul.f32 0.5, %v391_v6 }
 0x21d   :  { %v487_v14 = vmul.f32 %v471_v8, %v399_v5  ;;  %v472_v15 = vmul.f32 0.044715, %v402_v9  ;;  %v1253_v53 = vmul.f32 0.5, %v402_v9 }
 0x21e   :  { %v485_v18 = vmul.f32 %v469_v13, %v391_v6  ;;  %v470_v19 = vmul.f32 0.044715, %v394_v55  ;;  %v1255_v58 = vmul.f32 0.5, %v394_v55 }
 0x21f   :  { %v503_v22 = vmul.f32 %v487_v14, %v399_v5  ;;  %v488_v16 = vmul.f32 %v472_v15, %v402_v9 }
 0x220   :  { %v486_v0 = vmul.f32 %v470_v19, %v394_v55  ;;  %v824_v26 = vpop.f32.mrb[4].mxu0  ;;  %v501_v27 = vmul.f32 %v485_v18, %v391_v6 }
 0x221   :  { %v519_v30 = vadd.f32 %v503_v22, %v399_v5  ;;  %v504_v32 = vmul.f32 %v488_v16, %v402_v9  ;;  %v1237_v33 = vadd.f32 %v824_v26, %v1230_v46  ;;  %v406_v34 = vpop.f32.mrb[5].mxu0 }
 0x222   :  { %v407_v1 = vadd.f32 %v1230_v46, %v406_v34  ;;  %v825_v38 = vpop.f32.mrb[6].mxu0  ;;  %v502_v40 = vmul.f32 %v486_v0, %v394_v55  ;;  %v517_v41 = vadd.f32 %v501_v27, %v391_v6 }
 0x223   :  { %v535_v10 = vmul.f32 0.7978846, %v519_v30  ;;  %v520_v36 = vadd.f32 %v504_v32, %v402_v9  ;;  %v475_v42 = vmul.f32 0.044715, %v1237_v33  ;;  %v1246_v43 = vadd.f32 %v825_v38, %v1230_v46  ;;  %v409_v24 = vpop.f32.mrb[7].mxu0 }
 0x224   :  { %v473_v48 = vmul.f32 0.044715, %v407_v1  ;;  %v410_v11 = vadd.f32 %v1230_v46, %v409_v24  ;;  %v518_v49 = vadd.f32 %v502_v40, %v394_v55  ;;  %v533_v50 = vmul.f32 0.7978846, %v517_v41 }
 0x225   :  { %890 = vtanh.f32 %v535_v10  ;;  %v536_v51 = vmul.f32 0.7978846, %v520_v36  ;;  %v491_v44 = vmul.f32 %v475_v42, %v1237_v33  ;;  %v476_v23 = vmul.f32 0.044715, %v1246_v43 }
 0x226   :  { %v489_v52 = vmul.f32 %v473_v48, %v407_v1  ;;  %v474_v28 = vmul.f32 0.044715, %v410_v11  ;;  %v534_v37 = vmul.f32 0.7978846, %v518_v49  ;;  %892 = vtanh.f32 %v533_v50 }
 0x227   :  { %894 = vtanh.f32 %v536_v51  ;;  %v507_v17 = vmul.f32 %v491_v44, %v1237_v33  ;;  %v492_v29 = vmul.f32 %v476_v23, %v1246_v43  ;;  %v1257_v59 = vmul.f32 0.5, %v407_v1 }
 0x228   :  { %v505_v56 = vmul.f32 %v489_v52, %v407_v1  ;;  %v490_v57 = vmul.f32 %v474_v28, %v410_v11  ;;  %v828_v35 = vpop.f32.mrb[8].mxu0  ;;  %896 = vtanh.f32 %v534_v37  ;;  %v1267_v25 = vmul.f32 0.5, %v410_v11 }
 0x229   :  { %v523_v21 = vadd.f32 %v507_v17, %v1237_v33  ;;  %v508_v60 = vmul.f32 %v492_v29, %v1246_v43  ;;  %v1262_v61 = vadd.f32 %v828_v35, %v1230_v46  ;;  %v422_v62 = vpop.f32.mrb[9].mxu0  ;;  %v1285_v0 = vmul.f32 0.5, %v1237_v33 }
 0x22a   :  { %v521_v45 = vadd.f32 %v505_v56, %v407_v1  ;;  %v506_v47 = vmul.f32 %v490_v57, %v410_v11  ;;  %v1265_v63 = vadd.f32 %v1230_v46, %v422_v62  ;;  %v829_v2 = vpop.f32.mrb[10].mxu0 }
 0x22b   :  { %v539_v3 = vmul.f32 0.7978846, %v523_v21  ;;  %v524_v31 = vadd.f32 %v508_v60, %v1246_v43  ;;  %v479_v4 = vmul.f32 0.044715, %v1262_v61  ;;  %v1272_v5 = vadd.f32 %v829_v2, %v1230_v46  ;;  %v425_v54 = vpop.f32.mrb[11].mxu0 }
 0x22c   :  { %v537_v6 = vmul.f32 0.7978846, %v521_v45  ;;  %v522_v7 = vadd.f32 %v506_v47, %v410_v11  ;;  %v477_v8 = vmul.f32 0.044715, %v1265_v63  ;;  %v1276_v9 = vadd.f32 %v1230_v46, %v425_v54 }
 0x22d   :  { %898 = vtanh.f32 %v539_v3  ;;  %v540_v12 = vmul.f32 0.7978846, %v524_v31  ;;  %v495_v13 = vmul.f32 %v479_v4, %v1262_v61  ;;  %v480_v55 = vmul.f32 0.044715, %v1272_v5 }
 0x22e   :  { %900 = vtanh.f32 %v537_v6  ;;  %v538_v14 = vmul.f32 0.7978846, %v522_v7  ;;  %v493_v15 = vmul.f32 %v477_v8, %v1265_v63  ;;  %v478_v18 = vmul.f32 0.044715, %v1276_v9 }
 0x22f   :  { %v891_v19 = vpop.eup %890  ;;  %902 = vtanh.f32 %v540_v12  ;;  %v511_v22 = vmul.f32 %v495_v13, %v1262_v61  ;;  %v496_v16 = vmul.f32 %v480_v55, %v1272_v5 }
 0x230   :  { %v893_v26 = vpop.eup %892  ;;  %904 = vtanh.f32 %v538_v14  ;;  %v509_v27 = vmul.f32 %v493_v15, %v1265_v63  ;;  %v494_v30 = vmul.f32 %v478_v18, %v1276_v9  ;;  %v832_v32 = vpop.f32.mrb[12].mxu0  ;;  %v567_v34 = vadd.f32 1.0, %v891_v19 }
 0x231   :  { %v895_v1 = vpop.eup %894  ;;  %v527_v38 = vadd.f32 %v511_v22, %v1262_v61  ;;  %v512_v40 = vmul.f32 %v496_v16, %v1272_v5  ;;  %v1292_v41 = vadd.f32 %v832_v32, %v1230_v46  ;;  %v438_v10 = vpop.f32.mrb[13].mxu0  ;;  %v565_v36 = vadd.f32 1.0, %v893_v26 }
 0x232   :  { %v525_v33 = vadd.f32 %v509_v27, %v1265_v63  ;;  %v510_v42 = vmul.f32 %v494_v30, %v1276_v9  ;;  %v1297_v24 = vadd.f32 %v1230_v46, %v438_v10  ;;  %v833_v48 = vpop.f32.mrb[14].mxu0  ;;  %v568_v11 = vadd.f32 1.0, %v895_v1  ;;  %v897_v49 = vpop.eup %896 }
 0x233   :  { %v543_v50 = vmul.f32 0.7978846, %v527_v38  ;;  %v528_v51 = vadd.f32 %v512_v40, %v1272_v5  ;;  %v483_v44 = vmul.f32 0.044715, %v1292_v41  ;;  %v1302_v23 = vadd.f32 %v833_v48, %v1230_v46  ;;  %v441_v52 = vpop.f32.mrb[15].mxu0 }
 0x234   :  { %v541_v28 = vmul.f32 0.7978846, %v525_v33  ;;  %v526_v37 = vadd.f32 %v510_v42, %v1276_v9  ;;  %v481_v17 = vmul.f32 0.044715, %v1297_v24  ;;  %v1307_v29 = vadd.f32 %v1230_v46, %v441_v52 }
 0x235   :  { %906 = vtanh.f32 %v543_v50  ;;  %v544_v56 = vmul.f32 0.7978846, %v528_v51  ;;  %v499_v57 = vmul.f32 %v483_v44, %v1292_v41  ;;  %v484_v35 = vmul.f32 0.044715, %v1302_v23 }
 0x236   :  { %908 = vtanh.f32 %v541_v28  ;;  %v542_v21 = vmul.f32 0.7978846, %v526_v37  ;;  %v497_v60 = vmul.f32 %v481_v17, %v1297_v24  ;;  %v482_v62 = vmul.f32 0.044715, %v1307_v29 }
 0x237   :  { %v899_v45 = vpop.eup %898  ;;  %910 = vtanh.f32 %v544_v56  ;;  %v515_v47 = vmul.f32 %v499_v57, %v1292_v41  ;;  %v500_v2 = vmul.f32 %v484_v35, %v1302_v23  ;;  %v566_v46 = vadd.f32 1.0, %v897_v49 }
 0x238   :  { %v901_v3 = vpop.eup %900  ;;  %912 = vtanh.f32 %v542_v21  ;;  %v513_v31 = vmul.f32 %v497_v60, %v1297_v24  ;;  %v498_v4 = vmul.f32 %v482_v62, %v1307_v29  ;;  %v581_v54 = vmul.f32 %v565_v36, %v1242_v39 }
 0x239   :  { %v903_v6 = vpop.eup %902  ;;  %v531_v7 = vadd.f32 %v515_v47, %v1292_v41  ;;  %v516_v8 = vmul.f32 %v500_v2, %v1302_v23  ;;  %v582_v12 = vmul.f32 %v566_v46, %v1255_v58  ;;  %v583_v13 = vmul.f32 %v567_v34, %v1239_v20 }
 0x23a   :  { %v905_v55 = vpop.eup %904  ;;  %v529_v14 = vadd.f32 %v513_v31, %v1297_v24  ;;  %v514_v15 = vmul.f32 %v498_v4, %v1307_v29  ;;  %v584_v18 = vmul.f32 %v568_v11, %v1253_v53  ;;  %v569_v19 = vadd.f32 1.0, %v901_v3 }
 0x23b   :  { %v547_v22 = vmul.f32 0.7978846, %v531_v7  ;;  %v532_v39 = vadd.f32 %v516_v8, %v1302_v23  ;;  %v597_v16 = vpack.c.bf16 %v582_v12, %v581_v54  ;;  %v570_v26 = vadd.f32 1.0, %v905_v55 }
 0x23c   :  { %v545_v27 = vmul.f32 0.7978846, %v529_v14  ;;  %v530_v30 = vadd.f32 %v514_v15, %v1307_v29  ;;  %v598_v32 = vpack.c.bf16 %v584_v18, %v583_v13  ;;  %v585_v58 = vmul.f32 %v569_v19, %v1257_v59 }
 0x23d   :  { %914 = vtanh.f32 %v547_v22  ;;  %v548_v20 = vmul.f32 0.7978846, %v532_v39  ;;  %838 = vmatprep.mubr.msk.bf16.mxu1 %vm47_vm0, %v597_v16  ;;  %v586_v34 = vmul.f32 %v570_v26, %v1267_v25  ;;  %v571_v1 = vadd.f32 1.0, %v899_v45 }
 0x23e   :  { %916 = vtanh.f32 %v545_v27  ;;  %v546_v53 = vmul.f32 0.7978846, %v530_v30  ;;  %839 = vmatmul.mubr.msk.bf16.vlgmr.msra.gmra.mrb[0].mxu1 %vm47_vm0, %v598_v32  ;;  %v460_v38 = vmul.f32 0.5, %v1246_v43  ;;  %v572_v40 = vadd.f32 1.0, %v903_v6 }
 0x23f   :  { %v907_v10 = vpop.eup %906  ;;  %918 = vtanh.f32 %v548_v20  ;;  %v599_v36 = vpack.c.bf16 %v586_v34, %v585_v58  ;;  %v587_v59 = vmul.f32 %v571_v1, %v1285_v0  ;;  %v463_v51 = vmul.f32 0.5, %v1262_v61 }
 0x240   :  { %v909_v33 = vpop.eup %908  ;;  %920 = vtanh.f32 %v546_v53  ;;  %v588_v42 = vmul.f32 %v572_v40, %v460_v38  ;;  %v575_v48 = vadd.f32 1.0, %v907_v10  ;;  %v464_v43 = vmul.f32 0.5, %v1272_v5 }
 0x241   :  { %v911_v11 = vpop.eup %910  ;;  %842 = vmatprep.mubr.msk.bf16.mxu1 %vm47_vm0, %v599_v36  ;;  %v573_v25 = vadd.f32 1.0, %v909_v33  ;;  %v461_v52 = vmul.f32 0.5, %v1265_v63  ;;  %v462_v28 = vmul.f32 0.5, %v1276_v9  ;;  %v467_v63 = vmul.f32 0.5, %v1292_v41  ;;  %v783_v41 = vld [vmem:[#allocation2] ss:$0 sm:$0xff] }
 0x242   :  { %v913_v49 = vpop.eup %912  ;;  %v600_v50 = vpack.c.bf16 %v588_v42, %v587_v59  ;;  %v576_v44 = vadd.f32 1.0, %v911_v11  ;;  %v591_v17 = vmul.f32 %v575_v48, %v463_v51  ;;  %v468_v9 = vmul.f32 0.5, %v1302_v23 }
 0x243   :  { %v574_v37 = vadd.f32 1.0, %v913_v49  ;;  %v589_v56 = vmul.f32 %v573_v25, %v461_v52  ;;  %v465_v46 = vmul.f32 0.5, %v1297_v24  ;;  %v466_v3 = vmul.f32 0.5, %v1307_v29 }
 0x244   :  { %v592_v0 = vmul.f32 %v576_v44, %v464_v43 }
 0x245   :  { %v590_v57 = vmul.f32 %v574_v37, %v462_v28 }
 0x246   :  { %843 = vmatmul.mubr.msk.bf16.gmra.mrb[4].mxu1 %vm47_vm0, %v600_v50  ;;  %v602_v35 = vpack.c.bf16 %v592_v0, %v591_v17 }
 0x247   :  { %v915_v21 = vpop.eup %914  ;;  %v601_v60 = vpack.c.bf16 %v590_v57, %v589_v56 }
 0x248   :  { %v917_v62 = vpop.eup %916  ;;  %v579_v45 = vadd.f32 1.0, %v915_v21 }
 0x249   :  { %v919_v61 = vpop.eup %918  ;;  %846 = vmatprep.mubr.msk.bf16.mxu1 %vm47_vm0, %v601_v60  ;;  %v577_v5 = vadd.f32 1.0, %v917_v62 }
 0x24a   :  { %v921_v47 = vpop.eup %920  ;;  %v580_v2 = vadd.f32 1.0, %v919_v61  ;;  %v595_v4 = vmul.f32 %v579_v45, %v467_v63 }
 0x24b   :  { %v578_v31 = vadd.f32 1.0, %v921_v47  ;;  %v593_v6 = vmul.f32 %v577_v5, %v465_v46 }
 0x24c   :  { %v596_v54 = vmul.f32 %v580_v2, %v468_v9 }
 0x24d   :  { %v594_v7 = vmul.f32 %v578_v31, %v466_v3 }
 0x24e   :  { %847 = vmatmul.mubr.msk.bf16.gmra.mrb[8].mxu1 %vm47_vm0, %v602_v35  ;;  %v604_v8 = vpack.c.bf16 %v596_v54, %v595_v4 }
 0x24f   :  { %v603_v12 = vpack.c.bf16 %v594_v7, %v593_v6 }
 0x251   :  { %850 = vmatprep.mubr.msk.bf16.mxu1 %vm47_vm0, %v603_v12 }
 0x256   :  { %851 = vmatmul.mubr.msk.bf16.gmra.mrb[12].mxu1 %vm47_vm0, %v604_v8 }
 0x311   :  { %v840_v23 = vpop.f32.mrb[0].mxu1 }
 0x312   :  { %v695_v13 = vadd.f32 %v840_v23, %v783_v41  ;;  %v686_v24 = vpop.f32.mrb[1].mxu1 }
 0x313   :  { %v687_v55 = vadd.f32 %v783_v41, %v686_v24  ;;  %v841_v29 = vpop.f32.mrb[2].mxu1 }
 0x314   :  { %752 = vst.msk [vmem:[%s1418_s7 + $0x10] sm:$0xff] %vm749_vm1, %v695_v13  ;;  %v698_v14 = vadd.f32 %v841_v29, %v783_v41  ;;  %v689_v15 = vpop.f32.mrb[3].mxu1 }
 0x315   :  { %750 = vst.msk [vmem:[%s1418_s7] sm:$0xff] %vm749_vm1, %v687_v55  ;;  %v690_v18 = vadd.f32 %v783_v41, %v689_v15 }
 0x316   :  { %753 = vst.msk [vmem:[%s1418_s7 + $0x18] sm:$0xff] %vm749_vm1, %v698_v14 }
 0x317   :  { %751 = vst.msk [vmem:[%s1418_s7 + $0x8] sm:$0xff] %vm749_vm1, %v690_v18 }
 0x319   :  { %v844_v19 = vpop.f32.mrb[4].mxu1 }
 0x31a   :  { %v711_v22 = vadd.f32 %v844_v19, %v783_v41  ;;  %v702_v39 = vpop.f32.mrb[5].mxu1 }
 0x31b   :  { %v703_v16 = vadd.f32 %v783_v41, %v702_v39  ;;  %v845_v26 = vpop.f32.mrb[6].mxu1 }
 0x31c   :  { %756 = vst.msk [vmem:[%s1418_s7 + $0x30] sm:$0xff] %vm749_vm1, %v711_v22  ;;  %v714_v27 = vadd.f32 %v845_v26, %v783_v41  ;;  %v705_v30 = vpop.f32.mrb[7].mxu1 }
 0x31d   :  { %754 = vst.msk [vmem:[%s1418_s7 + $0x20] sm:$0xff] %vm749_vm1, %v703_v16  ;;  %v706_v32 = vadd.f32 %v783_v41, %v705_v30 }
 0x31e   :  { %757 = vst.msk [vmem:[%s1418_s7 + $0x38] sm:$0xff] %vm749_vm1, %v714_v27 }
 0x31f   :  { %755 = vst.msk [vmem:[%s1418_s7 + $0x28] sm:$0xff] %vm749_vm1, %v706_v32 }
 0x321   :  { %v848_v58 = vpop.f32.mrb[8].mxu1 }
 0x322   :  { %v727_v20 = vadd.f32 %v848_v58, %v783_v41  ;;  %v718_v34 = vpop.f32.mrb[9].mxu1 }
 0x323   :  { %v719_v1 = vadd.f32 %v783_v41, %v718_v34  ;;  %v849_v53 = vpop.f32.mrb[10].mxu1 }
 0x324   :  { %760 = vst.msk [vmem:[%s1418_s7 + $0x50] sm:$0xff] %vm749_vm1, %v727_v20  ;;  %v730_v38 = vadd.f32 %v849_v53, %v783_v41  ;;  %v721_v40 = vpop.f32.mrb[11].mxu1 }
 0x325   :  { %758 = vst.msk [vmem:[%s1418_s7 + $0x40] sm:$0xff] %vm749_vm1, %v719_v1  ;;  %v722_v10 = vadd.f32 %v783_v41, %v721_v40 }
 0x326   :  { %761 = vst.msk [vmem:[%s1418_s7 + $0x58] sm:$0xff] %vm749_vm1, %v730_v38 }
 0x327   :  { %759 = vst.msk [vmem:[%s1418_s7 + $0x48] sm:$0xff] %vm749_vm1, %v722_v10 }
 0x329   :  { %v852_v36 = vpop.f32.mrb[12].mxu1 }
 0x32a   :  { %v743_v33 = vadd.f32 %v852_v36, %v783_v41  ;;  %v734_v59 = vpop.f32.mrb[13].mxu1 }
 0x32b   :  { %v735_v42 = vadd.f32 %v783_v41, %v734_v59  ;;  %v853_v48 = vpop.f32.mrb[14].mxu1 }
 0x32c   :  { %764 = vst.msk [vmem:[%s1418_s7 + $0x70] sm:$0xff] %vm749_vm1, %v743_v33  ;;  %v746_v11 = vadd.f32 %v853_v48, %v783_v41  ;;  %v737_v25 = vpop.f32.mrb[15].mxu1 }
 0x32d   :  { %762 = vst.msk [vmem:[%s1418_s7 + $0x60] sm:$0xff] %vm749_vm1, %v735_v42  ;;  %v738_v49 = vadd.f32 %v783_v41, %v737_v25 }
 0x32e   :  { %765 = vst.msk [vmem:[%s1418_s7 + $0x78] sm:$0xff] %vm749_vm1, %v746_v11 }
 0x32f   :  { %763 = vst.msk [vmem:[%s1418_s7 + $0x68] sm:$0xff] %vm749_vm1, %v738_v49 }

</bundles_post_ra>
